<compile_context>
chip_gen: v5e
topology: v5e:2x2
jax: 0.10.0
libtpu: 0.0.40
codegen_flags: <defaults>
</compile_context>

<pallas_src>
import jax
import jax.numpy as jnp
from jax.experimental import pallas as pl
from jax.experimental.pallas import tpu as pltpu

# logical (PyTorch) sizes
D_IN = 784
D_H = 400
D_Z = 20

# lane-padded sizes (multiples of 128)
D_IN_P = 896   # 7 * 128
D_H_P = 512    # 4 * 128
D_Z_P = 128    # mu and logvar each get one full lane tile in the fused head

TB_CAP = 512   # batch-tile cap (multiple of 16); ~9 MiB double-buffered VMEM


def _round_up(n, m):
    return ((n + m - 1) // m) * m


def _cdiv(a, b):
    return -(-a // b)


# --------------------------------------------------------------------------
# Kernel
# --------------------------------------------------------------------------
def vae_kernel(x_ref, eps_ref,
               w1_ref, b1_ref,
               wh_ref, bh_ref,
               w3_ref, b3_ref,
               w4_ref, b4_ref,
               recon_ref, head_ref):
    # ---- encode: fc1 + ReLU (bf16 MXU inputs, f32 accumulate / element-wise)
    x = x_ref[...]                                                  # [TB, 896] bf16
    h1 = jnp.dot(x, w1_ref[...], preferred_element_type=jnp.float32) + b1_ref[...]
    h1 = jnp.maximum(h1, 0.0)                                       # [TB, 512] f32

    # ---- fused fc21|fc22 head: cols [0,128) = mu, cols [128,256) = logvar
    head = jnp.dot(h1.astype(jnp.bfloat16), wh_ref[...],
                   preferred_element_type=jnp.float32) + bh_ref[...]
    mu = head[:, :D_Z_P]                                            # [TB, 128] f32
    logvar = head[:, D_Z_P:]                                        # [TB, 128] f32

    # ---- reparametrize: z = eps * exp(0.5*logvar) + mu
    # (padded lanes: eps = 0, mu = 0, logvar = 0 -> z = 0, contribute nothing)
    std = jnp.exp(0.5 * logvar)
    z = eps_ref[...] * std + mu                                     # [TB, 128] f32

    # ---- decode: fc3 + ReLU, fc4 + sigmoid
    h3 = jnp.dot(z.astype(jnp.bfloat16), w3_ref[...],
                 preferred_element_type=jnp.float32) + b3_ref[...]
    h3 = jnp.maximum(h3, 0.0)                                       # [TB, 512] f32

    logits = jnp.dot(h3.astype(jnp.bfloat16), w4_ref[...],
                     preferred_element_type=jnp.float32) + b4_ref[...]
    # sigmoid in f32, store bf16 (halves the largest output stream)
    recon_ref[...] = jax.nn.sigmoid(logits).astype(recon_ref.dtype)  # [TB, 896] bf16
    head_ref[...] = head                                             # [TB, 256] f32


# --------------------------------------------------------------------------
# Parameter packing (pad feature dims, fuse fc21|fc22, cast weights to bf16)
# --------------------------------------------------------------------------
def _pad2(a, shape, dtype):
    out = jnp.zeros(shape, dtype)
    return out.at[:a.shape[0], :a.shape[1]].set(a.astype(dtype))


def pack_params(params):
    (w1, b1, w21, b21, w22, b22, w3, b3, w4, b4) = params
    wh = jnp.zeros((D_H_P, 2 * D_Z_P), jnp.float32)
    wh = wh.at[:D_H, :D_Z].set(w21).at[:D_H, D_Z_P:D_Z_P + D_Z].set(w22)
    bh = jnp.zeros((1, 2 * D_Z_P), jnp.float32)
    bh = bh.at[:, :D_Z].set(b21).at[:, D_Z_P:D_Z_P + D_Z].set(b22)
    return (
        _pad2(w1, (D_IN_P, D_H_P), jnp.bfloat16),
        _pad2(b1, (1, D_H_P), jnp.float32),
        wh.astype(jnp.bfloat16),
        bh,                                                   # f32 bias
        _pad2(w3, (D_Z_P, D_H_P), jnp.bfloat16),
        _pad2(b3, (1, D_H_P), jnp.float32),
        _pad2(w4, (D_H_P, D_IN_P), jnp.bfloat16),
        _pad2(b4, (1, D_IN_P), jnp.float32),
    )


# --------------------------------------------------------------------------
# Batch tiling / input padding (done ONCE, outside the per-step hot path)
# --------------------------------------------------------------------------
def choose_padding(B):
    """Return (TB, B_pad): batch tile (mult. of 16) and padded batch (TB*ntiles).

    For B_pad > TB_CAP the grid has >= 2 steps so v7x can shard the batch axis
    across both TensorCores; tiny batches stay single-tile (one weight DMA)."""
    B16 = _round_up(max(B, 1), 16)
    if B16 <= TB_CAP:
        return B16, B16
    n_tiles = max(2, _cdiv(B16, TB_CAP))
    tb = _round_up(_cdiv(B16, n_tiles), 16)
    return tb, tb * n_tiles


def pad_inputs(x, eps, B_pad):
    """Pad/cast once (ideally in the data pipeline, not per training step)."""
    B = x.shape[0]
    x_p = jnp.zeros((B_pad, D_IN_P), jnp.bfloat16)
    x_p = x_p.at[:B, :D_IN].set(x.astype(jnp.bfloat16))
    eps_p = jnp.zeros((B_pad, D_Z_P), jnp.float32)
    eps_p = eps_p.at[:B, :D_Z].set(eps.astype(jnp.float32))
    return x_p, eps_p


def unpack_outputs(recon_p, head_p, B):
    """Test/convenience only -- in training, mask padding in the loss instead."""
    recon = recon_p[:B, :D_IN].astype(jnp.float32)
    mu = head_p[:B, :D_Z]
    logvar = head_p[:B, D_Z_P:D_Z_P + D_Z]
    return recon, mu, logvar


# --------------------------------------------------------------------------
# pallas_call wrapper
# --------------------------------------------------------------------------
def _cost_estimate(B_pad):
    mxu = D_IN_P * D_H_P + D_H_P * 2 * D_Z_P + D_Z_P * D_H_P + D_H_P * D_IN_P
    weight_bytes = 2 * mxu                                   # bf16 weights
    bias_bytes = 4 * (2 * D_H_P + 2 * D_Z_P + D_IN_P)
    io_bytes = B_pad * (2 * D_IN_P + 4 * D_Z_P              # x bf16, eps f32
                        + 2 * D_IN_P + 4 * 2 * D_Z_P)       # recon bf16, head f32
    return pl.CostEstimate(
        flops=2 * B_pad * mxu,
        transcendentals=B_pad * (D_Z_P + D_IN_P),            # exp + sigmoid
        bytes_accessed=weight_bytes + bias_bytes + io_bytes)


def _vae_forward_impl(x_p, eps_p, packed, *, tb, buffered_weights):
    (w1p, b1p, whp, bhp, w3p, b3p, w4p, b4p) = packed
    B_pad = x_p.shape[0]
    assert B_pad % tb == 0
    grid = (B_pad // tb,)

    def batch_spec(cols):
        return pl.BlockSpec((tb, cols), lambda i: (i, 0))

    def resident_spec(shape):
        # constant block index -> fetched once, stays in VMEM across the grid.
        if buffered_weights:
            # grid-invariant: one buffer is enough, save ~2 MiB of VMEM.
            return pl.BlockSpec(shape, lambda i: (0, 0),
                                pipeline_mode=pl.Buffered(1))
        return pl.BlockSpec(shape, lambda i: (0, 0))

    in_specs = [
        batch_spec(D_IN_P),                       # x
        batch_spec(D_Z_P),                        # eps
        resident_spec(w1p.shape), resident_spec(b1p.shape),
        resident_spec(whp.shape), resident_spec(bhp.shape),
        resident_spec(w3p.shape), resident_spec(b3p.shape),
        resident_spec(w4p.shape), resident_spec(b4p.shape),
    ]
    out_specs = (batch_spec(D_IN_P), batch_spec(2 * D_Z_P))
    out_shape = (
        jax.ShapeDtypeStruct((B_pad, D_IN_P), jnp.bfloat16),     # reconstruction
        jax.ShapeDtypeStruct((B_pad, 2 * D_Z_P), jnp.float32),   # mu | logvar
    )

    return pl.pallas_call(
        vae_kernel,
        grid=grid,
        in_specs=in_specs,
        out_specs=out_specs,
        out_shape=out_shape,
        compiler_params=pltpu.CompilerParams(
            dimension_semantics=("parallel",)),   # v7x: shard batch over 2 TCs
        cost_estimate=_cost_estimate(B_pad),
    )(x_p, eps_p, w1p, b1p, whp, bhp, w3p, b3p, w4p, b4p)


_impl_jit = jax.jit(_vae_forward_impl, static_argnames=("tb", "buffered_weights"))
_BUFFERED_OK = None  # lazily probed: does this jax honor pl.Buffered(1)?


def vae_forward_padded(x_p, eps_p, packed, tb):
    """Hot-path API: pre-padded bf16 x [B_pad,896], f32 eps [B_pad,128] ->
    padded (recon bf16 [B_pad,896], head f32 [B_pad,256] = mu|logvar)."""
    global _BUFFERED_OK
    if _BUFFERED_OK is None or _BUFFERED_OK:
        try:
            out = _impl_jit(x_p, eps_p, packed, tb=tb, buffered_weights=True)
            _BUFFERED_OK = True
            return out
        except Exception:
            # pipeline_mode=pl.Buffered(1) not supported here; fall back to the
            # default double-buffered resident weights (plenty of VMEM anyway).
            _BUFFERED_OK = False
    return _impl_jit(x_p, eps_p, packed, tb=tb, buffered_weights=False)


# --------------------------------------------------------------------------
# Init + pure-JAX reference
# --------------------------------------------------------------------------
def init_params(key):
    """Deterministic init mimicking nn.Linear (uniform +-1/sqrt(fan_in)).
    Weights stored as [in_features, out_features] (pre-transposed)."""
    def linear(key, fan_in, fan_out):
        kw, kb = jax.random.split(key)
        bound = 1.0 / jnp.sqrt(fan_in)
        w = jax.random.uniform(kw, (fan_in, fan_out), jnp.float32, -bound, bound)
        b = jax.random.uniform(kb, (1, fan_out), jnp.float32, -bound, bound)
        return w, b

    k1, k21, k22, k3, k4 = jax.random.split(key, 5)
    w1, b1 = linear(k1, D_IN, D_H)
    w21, b21 = linear(k21, D_H, D_Z)
    w22, b22 = linear(k22, D_H, D_Z)
    w3, b3 = linear(k3, D_Z, D_H)
    w4, b4 = linear(k4, D_H, D_IN)
    return (w1, b1, w21, b21, w22, b22, w3, b3, w4, b4)


def reference_forward(x, eps, params, weight_dtype=jnp.float32):
    """Pure-JAX reference.  weight_dtype=bf16 mimics the kernel's numerics
    (bf16 MXU inputs, f32 accumulation, f32 element-wise)."""
    (w1, b1, w21, b21, w22, b22, w3, b3, w4, b4) = params

    def mm(a, w):
        return jnp.dot(a.astype(weight_dtype), w.astype(weight_dtype),
                       preferred_element_type=jnp.float32)

    h1 = jnp.maximum(mm(x, w1) + b1, 0.0)
    mu = mm(h1, w21) + b21
    logvar = mm(h1, w22) + b22
    z = eps * jnp.exp(0.5 * logvar) + mu
    h3 = jnp.maximum(mm(z, w3) + b3, 0.0)
    recon = jax.nn.sigmoid(mm(h3, w4) + b4)
    return recon, mu, logvar


if __name__ == "__main__":
    key = jax.random.PRNGKey(0)
    kp, kx, ke = jax.random.split(key, 3)

    B = 8
    params = init_params(kp)
    packed = pack_params(params)
    x = jax.random.uniform(kx, (B, D_IN), jnp.float32)      # pixel-like input
    eps = jax.random.normal(ke, (B, D_Z), jnp.float32)      # reparam noise

    # pad once (outside the per-step path) and run the fused kernel
    TB, B_pad = choose_padding(B)
    x_p, eps_p = pad_inputs(x, eps, B_pad)
    recon_p, head_p = jax.block_until_ready(
        vae_forward_padded(x_p, eps_p, packed, TB))

    # test-only unpacking of the padded outputs
    recon, mu, logvar = unpack_outputs(recon_p, head_p, B)

    # strict check vs. a reference mimicking the kernel's bf16-weight numerics
    # (recon tolerance loosened: it is stored as bf16)
    r_b, m_b, l_b = reference_forward(x, eps, params, weight_dtype=jnp.bfloat16)
    assert jnp.allclose(recon, r_b, atol=1e-2, rtol=1e-2)
    assert jnp.allclose(mu, m_b, atol=2e-3, rtol=2e-3)
    assert jnp.allclose(logvar, l_b, atol=2e-3, rtol=2e-3)

    # sanity check vs. the true f32 module semantics (bf16 weights/outputs)
    r_f, m_f, l_f = reference_forward(x, eps, params)
    assert jnp.allclose(recon, r_f, atol=3e-2, rtol=3e-2)
    assert jnp.allclose(mu, m_f, atol=3e-2, rtol=3e-2)
    assert jnp.allclose(logvar, l_f, atol=3e-2, rtol=3e-2)

    print("KERNEL_OK")
</pallas_src>

<mosaic_0001>
module attributes {stable_mosaic.version = 11 : i64} {
  func.func @vae_kernel(%arg0: i32, %arg1: memref<16x896xbf16, #tpu.memory_space<vmem>>, %arg2: memref<16x128xf32, #tpu.memory_space<vmem>>, %arg3: memref<896x512xbf16, #tpu.memory_space<vmem>>, %arg4: memref<1x512xf32, #tpu.memory_space<vmem>>, %arg5: memref<512x256xbf16, #tpu.memory_space<vmem>>, %arg6: memref<1x256xf32, #tpu.memory_space<vmem>>, %arg7: memref<128x512xbf16, #tpu.memory_space<vmem>>, %arg8: memref<1x512xf32, #tpu.memory_space<vmem>>, %arg9: memref<512x896xbf16, #tpu.memory_space<vmem>>, %arg10: memref<1x896xf32, #tpu.memory_space<vmem>>, %arg11: memref<16x896xbf16, #tpu.memory_space<vmem>>, %arg12: memref<16x256xf32, #tpu.memory_space<vmem>>) attributes {dimension_semantics = [#tpu.dimension_semantics<parallel>], iteration_bounds = array<i64: 1>, scalar_prefetch = 0 : i64, scratch_operands = 0 : i64, tpu.core_type = #tpu.core_type<tc>, window_params = [{transform_indices = @transform_0, window_bounds = array<i64: 16, 896>}, {transform_indices = @transform_1, window_bounds = array<i64: 16, 128>}, {pipeline_mode = #tpu.pipeline_mode<synchronous>, transform_indices = @transform_2, window_bounds = array<i64: 896, 512>}, {pipeline_mode = #tpu.pipeline_mode<synchronous>, transform_indices = @transform_3, window_bounds = array<i64: 1, 512>}, {pipeline_mode = #tpu.pipeline_mode<synchronous>, transform_indices = @transform_4, window_bounds = array<i64: 512, 256>}, {pipeline_mode = #tpu.pipeline_mode<synchronous>, transform_indices = @transform_5, window_bounds = array<i64: 1, 256>}, {pipeline_mode = #tpu.pipeline_mode<synchronous>, transform_indices = @transform_6, window_bounds = array<i64: 128, 512>}, {pipeline_mode = #tpu.pipeline_mode<synchronous>, transform_indices = @transform_7, window_bounds = array<i64: 1, 512>}, {pipeline_mode = #tpu.pipeline_mode<synchronous>, transform_indices = @transform_8, window_bounds = array<i64: 512, 896>}, {pipeline_mode = #tpu.pipeline_mode<synchronous>, transform_indices = @transform_9, window_bounds = array<i64: 1, 896>}, {transform_indices = @transform_10, window_bounds = array<i64: 16, 896>}, {transform_indices = @transform_11, window_bounds = array<i64: 16, 256>}]} {
    %c0 = arith.constant 0 : index
    %c0_0 = arith.constant 0 : index
    %0 = vector.load %arg1[%c0, %c0_0] : memref<16x896xbf16, #tpu.memory_space<vmem>>, vector<16x896xbf16>
    %c0_1 = arith.constant 0 : index
    %c0_2 = arith.constant 0 : index
    %1 = vector.load %arg3[%c0_1, %c0_2] : memref<896x512xbf16, #tpu.memory_space<vmem>>, vector<896x512xbf16>
    %cst = arith.constant dense<0.000000e+00> : vector<16x512xf32>
    %2 = tpu.matmul %0, %1, %cst {dimension_numbers = #tpu.dot_dimension_numbers<[1], [0], [0], [1], [0, 0, 1, 1], [], []>} : vector<16x896xbf16>, vector<896x512xbf16>, vector<16x512xf32> -> vector<16x512xf32>
    %c0_3 = arith.constant 0 : index
    %c0_4 = arith.constant 0 : index
    %3 = vector.load %arg4[%c0_3, %c0_4] : memref<1x512xf32, #tpu.memory_space<vmem>>, vector<1x512xf32>
    %4 = vector.broadcast %3 : vector<1x512xf32> to vector<16x512xf32>
    %5 = arith.addf %2, %4 : vector<16x512xf32>
    %cst_5 = arith.constant 0.000000e+00 : f32
    %6 = vector.broadcast %cst_5 : f32 to vector<16x512xf32>
    %7 = arith.maximumf %5, %6 : vector<16x512xf32>
    %8 = arith.truncf %7 : vector<16x512xf32> to vector<16x512xbf16>
    %c0_6 = arith.constant 0 : index
    %c0_7 = arith.constant 0 : index
    %9 = vector.load %arg5[%c0_6, %c0_7] : memref<512x256xbf16, #tpu.memory_space<vmem>>, vector<512x256xbf16>
    %cst_8 = arith.constant dense<0.000000e+00> : vector<16x256xf32>
    %10 = tpu.matmul %8, %9, %cst_8 {dimension_numbers = #tpu.dot_dimension_numbers<[1], [0], [0], [1], [0, 0, 1, 1], [], []>} : vector<16x512xbf16>, vector<512x256xbf16>, vector<16x256xf32> -> vector<16x256xf32>
    %c0_9 = arith.constant 0 : index
    %c0_10 = arith.constant 0 : index
    %11 = vector.load %arg6[%c0_9, %c0_10] : memref<1x256xf32, #tpu.memory_space<vmem>>, vector<1x256xf32>
    %12 = vector.broadcast %11 : vector<1x256xf32> to vector<16x256xf32>
    %13 = arith.addf %10, %12 : vector<16x256xf32>
    %14 = vector.extract_strided_slice %13 {offsets = [0, 0], sizes = [16, 128], strides = [1, 1]} : vector<16x256xf32> to vector<16x128xf32>
    %15 = vector.extract_strided_slice %13 {offsets = [0, 128], sizes = [16, 128], strides = [1, 1]} : vector<16x256xf32> to vector<16x128xf32>
    %cst_11 = arith.constant 5.000000e-01 : f32
    %16 = vector.broadcast %cst_11 : f32 to vector<16x128xf32>
    %17 = arith.mulf %16, %15 : vector<16x128xf32>
    %18 = math.exp %17 : vector<16x128xf32>
    %c0_12 = arith.constant 0 : index
    %c0_13 = arith.constant 0 : index
    %19 = vector.load %arg2[%c0_12, %c0_13] : memref<16x128xf32, #tpu.memory_space<vmem>>, vector<16x128xf32>
    %20 = arith.mulf %19, %18 : vector<16x128xf32>
    %21 = arith.addf %20, %14 : vector<16x128xf32>
    %22 = arith.truncf %21 : vector<16x128xf32> to vector<16x128xbf16>
    %c0_14 = arith.constant 0 : index
    %c0_15 = arith.constant 0 : index
    %23 = vector.load %arg7[%c0_14, %c0_15] : memref<128x512xbf16, #tpu.memory_space<vmem>>, vector<128x512xbf16>
    %cst_16 = arith.constant dense<0.000000e+00> : vector<16x512xf32>
    %24 = tpu.matmul %22, %23, %cst_16 {dimension_numbers = #tpu.dot_dimension_numbers<[1], [0], [0], [1], [0, 0, 1, 1], [], []>} : vector<16x128xbf16>, vector<128x512xbf16>, vector<16x512xf32> -> vector<16x512xf32>
    %c0_17 = arith.constant 0 : index
    %c0_18 = arith.constant 0 : index
    %25 = vector.load %arg8[%c0_17, %c0_18] : memref<1x512xf32, #tpu.memory_space<vmem>>, vector<1x512xf32>
    %26 = vector.broadcast %25 : vector<1x512xf32> to vector<16x512xf32>
    %27 = arith.addf %24, %26 : vector<16x512xf32>
    %cst_19 = arith.constant 0.000000e+00 : f32
    %28 = vector.broadcast %cst_19 : f32 to vector<16x512xf32>
    %29 = arith.maximumf %27, %28 : vector<16x512xf32>
    %30 = arith.truncf %29 : vector<16x512xf32> to vector<16x512xbf16>
    %c0_20 = arith.constant 0 : index
    %c0_21 = arith.constant 0 : index
    %31 = vector.load %arg9[%c0_20, %c0_21] : memref<512x896xbf16, #tpu.memory_space<vmem>>, vector<512x896xbf16>
    %cst_22 = arith.constant dense<0.000000e+00> : vector<16x896xf32>
    %32 = tpu.matmul %30, %31, %cst_22 {dimension_numbers = #tpu.dot_dimension_numbers<[1], [0], [0], [1], [0, 0, 1, 1], [], []>} : vector<16x512xbf16>, vector<512x896xbf16>, vector<16x896xf32> -> vector<16x896xf32>
    %c0_23 = arith.constant 0 : index
    %c0_24 = arith.constant 0 : index
    %33 = vector.load %arg10[%c0_23, %c0_24] : memref<1x896xf32, #tpu.memory_space<vmem>>, vector<1x896xf32>
    %34 = vector.broadcast %33 : vector<1x896xf32> to vector<16x896xf32>
    %35 = arith.addf %32, %34 : vector<16x896xf32>
    %36 = arith.negf %35 : vector<16x896xf32>
    %37 = math.exp %36 : vector<16x896xf32>
    %cst_25 = arith.constant 1.000000e+00 : f32
    %38 = vector.broadcast %cst_25 : f32 to vector<16x896xf32>
    %39 = arith.addf %38, %37 : vector<16x896xf32>
    %40 = arith.divf %38, %39 : vector<16x896xf32>
    %41 = arith.truncf %40 : vector<16x896xf32> to vector<16x896xbf16>
    %c0_26 = arith.constant 0 : index
    %c0_27 = arith.constant 0 : index
    %42 = vector.load %arg11[%c0_26, %c0_27] : memref<16x896xbf16, #tpu.memory_space<vmem>>, vector<16x896xbf16>
    tpu.vector_store %arg11[%c0_26, %c0_27], %41 {strides = array<i32>} : memref<16x896xbf16, #tpu.memory_space<vmem>>, vector<16x896xbf16>,
    %c0_28 = arith.constant 0 : index
    %c0_29 = arith.constant 0 : index
    %43 = vector.load %arg12[%c0_28, %c0_29] : memref<16x256xf32, #tpu.memory_space<vmem>>, vector<16x256xf32>
    tpu.vector_store %arg12[%c0_28, %c0_29], %13 {strides = array<i32>} : memref<16x256xf32, #tpu.memory_space<vmem>>, vector<16x256xf32>,
    return
  }
  func.func @transform_0(%arg0: i32) -> (i32, i32) {
    %c0_i32 = arith.constant 0 : i32
    %c0_i32_0 = arith.constant 0 : i32
    return %arg0, %c0_i32 : i32, i32
  }
  func.func @transform_1(%arg0: i32) -> (i32, i32) {
    %c0_i32 = arith.constant 0 : i32
    %c0_i32_0 = arith.constant 0 : i32
    return %arg0, %c0_i32 : i32, i32
  }
  func.func @transform_2(%arg0: i32) -> (i32, i32) {
    %c0_i32 = arith.constant 0 : i32
    %c0_i32_0 = arith.constant 0 : i32
    %c0_i32_1 = arith.constant 0 : i32
    return %c0_i32, %c0_i32_0 : i32, i32
  }
  func.func @transform_3(%arg0: i32) -> (i32, i32) {
    %c0_i32 = arith.constant 0 : i32
    %c0_i32_0 = arith.constant 0 : i32
    %c0_i32_1 = arith.constant 0 : i32
    return %c0_i32, %c0_i32_0 : i32, i32
  }
  func.func @transform_4(%arg0: i32) -> (i32, i32) {
    %c0_i32 = arith.constant 0 : i32
    %c0_i32_0 = arith.constant 0 : i32
    %c0_i32_1 = arith.constant 0 : i32
    return %c0_i32, %c0_i32_0 : i32, i32
  }
  func.func @transform_5(%arg0: i32) -> (i32, i32) {
    %c0_i32 = arith.constant 0 : i32
    %c0_i32_0 = arith.constant 0 : i32
    %c0_i32_1 = arith.constant 0 : i32
    return %c0_i32, %c0_i32_0 : i32, i32
  }
  func.func @transform_6(%arg0: i32) -> (i32, i32) {
    %c0_i32 = arith.constant 0 : i32
    %c0_i32_0 = arith.constant 0 : i32
    %c0_i32_1 = arith.constant 0 : i32
    return %c0_i32, %c0_i32_0 : i32, i32
  }
  func.func @transform_7(%arg0: i32) -> (i32, i32) {
    %c0_i32 = arith.constant 0 : i32
    %c0_i32_0 = arith.constant 0 : i32
    %c0_i32_1 = arith.constant 0 : i32
    return %c0_i32, %c0_i32_0 : i32, i32
  }
  func.func @transform_8(%arg0: i32) -> (i32, i32) {
    %c0_i32 = arith.constant 0 : i32
    %c0_i32_0 = arith.constant 0 : i32
    %c0_i32_1 = arith.constant 0 : i32
    return %c0_i32, %c0_i32_0 : i32, i32
  }
  func.func @transform_9(%arg0: i32) -> (i32, i32) {
    %c0_i32 = arith.constant 0 : i32
    %c0_i32_0 = arith.constant 0 : i32
    %c0_i32_1 = arith.constant 0 : i32
    return %c0_i32, %c0_i32_0 : i32, i32
  }
  func.func @transform_10(%arg0: i32) -> (i32, i32) {
    %c0_i32 = arith.constant 0 : i32
    %c0_i32_0 = arith.constant 0 : i32
    return %arg0, %c0_i32 : i32, i32
  }
  func.func @transform_11(%arg0: i32) -> (i32, i32) {
    %c0_i32 = arith.constant 0 : i32
    %c0_i32_0 = arith.constant 0 : i32
    return %arg0, %c0_i32 : i32, i32
  }
}

module attributes {stable_mosaic.version = 11 : i64} {
  func.func @vae_kernel(%arg0: i32, %arg1: memref<16x896xbf16, #tpu.memory_space<vmem>>, %arg2: memref<16x128xf32, #tpu.memory_space<vmem>>, %arg3: memref<896x512xbf16, #tpu.memory_space<vmem>>, %arg4: memref<1x512xf32, #tpu.memory_space<vmem>>, %arg5: memref<512x256xbf16, #tpu.memory_space<vmem>>, %arg6: memref<1x256xf32, #tpu.memory_space<vmem>>, %arg7: memref<128x512xbf16, #tpu.memory_space<vmem>>, %arg8: memref<1x512xf32, #tpu.memory_space<vmem>>, %arg9: memref<512x896xbf16, #tpu.memory_space<vmem>>, %arg10: memref<1x896xf32, #tpu.memory_space<vmem>>, %arg11: memref<16x896xbf16, #tpu.memory_space<vmem>>, %arg12: memref<16x256xf32, #tpu.memory_space<vmem>>) attributes {dimension_semantics = [#tpu.dimension_semantics<parallel>], iteration_bounds = array<i64: 1>, scalar_prefetch = 0 : i64, scratch_operands = 0 : i64, tpu.core_type = #tpu.core_type<tc>, window_params = [{transform_indices = @transform_0, window_bounds = array<i64: 16, 896>}, {transform_indices = @transform_1, window_bounds = array<i64: 16, 128>}, {pipeline_mode = #tpu.pipeline_mode<synchronous>, transform_indices = @transform_2, window_bounds = array<i64: 896, 512>}, {pipeline_mode = #tpu.pipeline_mode<synchronous>, transform_indices = @transform_3, window_bounds = array<i64: 1, 512>}, {pipeline_mode = #tpu.pipeline_mode<synchronous>, transform_indices = @transform_4, window_bounds = array<i64: 512, 256>}, {pipeline_mode = #tpu.pipeline_mode<synchronous>, transform_indices = @transform_5, window_bounds = array<i64: 1, 256>}, {pipeline_mode = #tpu.pipeline_mode<synchronous>, transform_indices = @transform_6, window_bounds = array<i64: 128, 512>}, {pipeline_mode = #tpu.pipeline_mode<synchronous>, transform_indices = @transform_7, window_bounds = array<i64: 1, 512>}, {pipeline_mode = #tpu.pipeline_mode<synchronous>, transform_indices = @transform_8, window_bounds = array<i64: 512, 896>}, {pipeline_mode = #tpu.pipeline_mode<synchronous>, transform_indices = @transform_9, window_bounds = array<i64: 1, 896>}, {transform_indices = @transform_10, window_bounds = array<i64: 16, 896>}, {transform_indices = @transform_11, window_bounds = array<i64: 16, 256>}]} {
    %c0 = arith.constant 0 : index
    %c0_0 = arith.constant 0 : index
    %0 = vector.load %arg1[%c0, %c0_0] : memref<16x896xbf16, #tpu.memory_space<vmem>>, vector<16x896xbf16>
    %c0_1 = arith.constant 0 : index
    %c0_2 = arith.constant 0 : index
    %1 = vector.load %arg3[%c0_1, %c0_2] : memref<896x512xbf16, #tpu.memory_space<vmem>>, vector<896x512xbf16>
    %cst = arith.constant dense<0.000000e+00> : vector<16x512xf32>
    %2 = tpu.matmul %0, %1, %cst {dimension_numbers = #tpu.dot_dimension_numbers<[1], [0], [0], [1], [0, 0, 1, 1], [], []>} : vector<16x896xbf16>, vector<896x512xbf16>, vector<16x512xf32> -> vector<16x512xf32>
    %c0_3 = arith.constant 0 : index
    %c0_4 = arith.constant 0 : index
    %3 = vector.load %arg4[%c0_3, %c0_4] : memref<1x512xf32, #tpu.memory_space<vmem>>, vector<1x512xf32>
    %4 = vector.broadcast %3 : vector<1x512xf32> to vector<16x512xf32>
    %5 = arith.addf %2, %4 : vector<16x512xf32>
    %cst_5 = arith.constant 0.000000e+00 : f32
    %6 = vector.broadcast %cst_5 : f32 to vector<16x512xf32>
    %7 = arith.maximumf %5, %6 : vector<16x512xf32>
    %8 = arith.truncf %7 : vector<16x512xf32> to vector<16x512xbf16>
    %c0_6 = arith.constant 0 : index
    %c0_7 = arith.constant 0 : index
    %9 = vector.load %arg5[%c0_6, %c0_7] : memref<512x256xbf16, #tpu.memory_space<vmem>>, vector<512x256xbf16>
    %cst_8 = arith.constant dense<0.000000e+00> : vector<16x256xf32>
    %10 = tpu.matmul %8, %9, %cst_8 {dimension_numbers = #tpu.dot_dimension_numbers<[1], [0], [0], [1], [0, 0, 1, 1], [], []>} : vector<16x512xbf16>, vector<512x256xbf16>, vector<16x256xf32> -> vector<16x256xf32>
    %c0_9 = arith.constant 0 : index
    %c0_10 = arith.constant 0 : index
    %11 = vector.load %arg6[%c0_9, %c0_10] : memref<1x256xf32, #tpu.memory_space<vmem>>, vector<1x256xf32>
    %12 = vector.broadcast %11 : vector<1x256xf32> to vector<16x256xf32>
    %13 = arith.addf %10, %12 : vector<16x256xf32>
    %14 = vector.extract_strided_slice %13 {offsets = [0, 0], sizes = [16, 128], strides = [1, 1]} : vector<16x256xf32> to vector<16x128xf32>
    %15 = vector.extract_strided_slice %13 {offsets = [0, 128], sizes = [16, 128], strides = [1, 1]} : vector<16x256xf32> to vector<16x128xf32>
    %cst_11 = arith.constant 5.000000e-01 : f32
    %16 = vector.broadcast %cst_11 : f32 to vector<16x128xf32>
    %17 = arith.mulf %16, %15 : vector<16x128xf32>
    %18 = math.exp %17 : vector<16x128xf32>
    %c0_12 = arith.constant 0 : index
    %c0_13 = arith.constant 0 : index
    %19 = vector.load %arg2[%c0_12, %c0_13] : memref<16x128xf32, #tpu.memory_space<vmem>>, vector<16x128xf32>
    %20 = arith.mulf %19, %18 : vector<16x128xf32>
    %21 = arith.addf %20, %14 : vector<16x128xf32>
    %22 = arith.truncf %21 : vector<16x128xf32> to vector<16x128xbf16>
    %c0_14 = arith.constant 0 : index
    %c0_15 = arith.constant 0 : index
    %23 = vector.load %arg7[%c0_14, %c0_15] : memref<128x512xbf16, #tpu.memory_space<vmem>>, vector<128x512xbf16>
    %cst_16 = arith.constant dense<0.000000e+00> : vector<16x512xf32>
    %24 = tpu.matmul %22, %23, %cst_16 {dimension_numbers = #tpu.dot_dimension_numbers<[1], [0], [0], [1], [0, 0, 1, 1], [], []>} : vector<16x128xbf16>, vector<128x512xbf16>, vector<16x512xf32> -> vector<16x512xf32>
    %c0_17 = arith.constant 0 : index
    %c0_18 = arith.constant 0 : index
    %25 = vector.load %arg8[%c0_17, %c0_18] : memref<1x512xf32, #tpu.memory_space<vmem>>, vector<1x512xf32>
    %26 = vector.broadcast %25 : vector<1x512xf32> to vector<16x512xf32>
    %27 = arith.addf %24, %26 : vector<16x512xf32>
    %cst_19 = arith.constant 0.000000e+00 : f32
    %28 = vector.broadcast %cst_19 : f32 to vector<16x512xf32>
    %29 = arith.maximumf %27, %28 : vector<16x512xf32>
    %30 = arith.truncf %29 : vector<16x512xf32> to vector<16x512xbf16>
    %c0_20 = arith.constant 0 : index
    %c0_21 = arith.constant 0 : index
    %31 = vector.load %arg9[%c0_20, %c0_21] : memref<512x896xbf16, #tpu.memory_space<vmem>>, vector<512x896xbf16>
    %cst_22 = arith.constant dense<0.000000e+00> : vector<16x896xf32>
    %32 = tpu.matmul %30, %31, %cst_22 {dimension_numbers = #tpu.dot_dimension_numbers<[1], [0], [0], [1], [0, 0, 1, 1], [], []>} : vector<16x512xbf16>, vector<512x896xbf16>, vector<16x896xf32> -> vector<16x896xf32>
    %c0_23 = arith.constant 0 : index
    %c0_24 = arith.constant 0 : index
    %33 = vector.load %arg10[%c0_23, %c0_24] : memref<1x896xf32, #tpu.memory_space<vmem>>, vector<1x896xf32>
    %34 = vector.broadcast %33 : vector<1x896xf32> to vector<16x896xf32>
    %35 = arith.addf %32, %34 : vector<16x896xf32>
    %36 = arith.negf %35 : vector<16x896xf32>
    %37 = math.exp %36 : vector<16x896xf32>
    %cst_25 = arith.constant 1.000000e+00 : f32
    %38 = vector.broadcast %cst_25 : f32 to vector<16x896xf32>
    %39 = arith.addf %38, %37 : vector<16x896xf32>
    %40 = arith.divf %38, %39 : vector<16x896xf32>
    %41 = arith.truncf %40 : vector<16x896xf32> to vector<16x896xbf16>
    %c0_26 = arith.constant 0 : index
    %c0_27 = arith.constant 0 : index
    %42 = vector.load %arg11[%c0_26, %c0_27] : memref<16x896xbf16, #tpu.memory_space<vmem>>, vector<16x896xbf16>
    tpu.vector_store %arg11[%c0_26, %c0_27], %41 {strides = array<i32>} : memref<16x896xbf16, #tpu.memory_space<vmem>>, vector<16x896xbf16>,
    %c0_28 = arith.constant 0 : index
    %c0_29 = arith.constant 0 : index
    %43 = vector.load %arg12[%c0_28, %c0_29] : memref<16x256xf32, #tpu.memory_space<vmem>>, vector<16x256xf32>
    tpu.vector_store %arg12[%c0_28, %c0_29], %13 {strides = array<i32>} : memref<16x256xf32, #tpu.memory_space<vmem>>, vector<16x256xf32>,
    return
  }
  func.func @transform_0(%arg0: i32) -> (i32, i32) {
    %c0_i32 = arith.constant 0 : i32
    %c0_i32_0 = arith.constant 0 : i32
    return %arg0, %c0_i32 : i32, i32
  }
  func.func @transform_1(%arg0: i32) -> (i32, i32) {
    %c0_i32 = arith.constant 0 : i32
    %c0_i32_0 = arith.constant 0 : i32
    return %arg0, %c0_i32 : i32, i32
  }
  func.func @transform_2(%arg0: i32) -> (i32, i32) {
    %c0_i32 = arith.constant 0 : i32
    %c0_i32_0 = arith.constant 0 : i32
    %c0_i32_1 = arith.constant 0 : i32
    return %c0_i32, %c0_i32_0 : i32, i32
  }
  func.func @transform_3(%arg0: i32) -> (i32, i32) {
    %c0_i32 = arith.constant 0 : i32
    %c0_i32_0 = arith.constant 0 : i32
    %c0_i32_1 = arith.constant 0 : i32
    return %c0_i32, %c0_i32_0 : i32, i32
  }
  func.func @transform_4(%arg0: i32) -> (i32, i32) {
    %c0_i32 = arith.constant 0 : i32
    %c0_i32_0 = arith.constant 0 : i32
    %c0_i32_1 = arith.constant 0 : i32
    return %c0_i32, %c0_i32_0 : i32, i32
  }
  func.func @transform_5(%arg0: i32) -> (i32, i32) {
    %c0_i32 = arith.constant 0 : i32
    %c0_i32_0 = arith.constant 0 : i32
    %c0_i32_1 = arith.constant 0 : i32
    return %c0_i32, %c0_i32_0 : i32, i32
  }
  func.func @transform_6(%arg0: i32) -> (i32, i32) {
    %c0_i32 = arith.constant 0 : i32
    %c0_i32_0 = arith.constant 0 : i32
    %c0_i32_1 = arith.constant 0 : i32
    return %c0_i32, %c0_i32_0 : i32, i32
  }
  func.func @transform_7(%arg0: i32) -> (i32, i32) {
    %c0_i32 = arith.constant 0 : i32
    %c0_i32_0 = arith.constant 0 : i32
    %c0_i32_1 = arith.constant 0 : i32
    return %c0_i32, %c0_i32_0 : i32, i32
  }
  func.func @transform_8(%arg0: i32) -> (i32, i32) {
    %c0_i32 = arith.constant 0 : i32
    %c0_i32_0 = arith.constant 0 : i32
    %c0_i32_1 = arith.constant 0 : i32
    return %c0_i32, %c0_i32_0 : i32, i32
  }
  func.func @transform_9(%arg0: i32) -> (i32, i32) {
    %c0_i32 = arith.constant 0 : i32
    %c0_i32_0 = arith.constant 0 : i32
    %c0_i32_1 = arith.constant 0 : i32
    return %c0_i32, %c0_i32_0 : i32, i32
  }
  func.func @transform_10(%arg0: i32) -> (i32, i32) {
    %c0_i32 = arith.constant 0 : i32
    %c0_i32_0 = arith.constant 0 : i32
    return %arg0, %c0_i32 : i32, i32
  }
  func.func @transform_11(%arg0: i32) -> (i32, i32) {
    %c0_i32 = arith.constant 0 : i32
    %c0_i32_0 = arith.constant 0 : i32
    return %arg0, %c0_i32 : i32, i32
  }
}

</mosaic_0001>

<bundles_post_ra>
// kernel: _vae_forward_impl.1
= control target key start
LH: loop header
LB: loop body
LE: loop exit
PB: predicated region body
PF: predicated region fallthrough
CT: control target
= control target key end

     0   :  { %17 = vsyncpa [#allocation3], 0  ;;  %s8385_s0 = inlined_call_operand.hbm [shape: bf16[16,896], index: 0, kind: input, shape index: {}]   ;;  %s8386_s1 = inlined_call_operand.hbm [shape: f32[16,128], index: 1, kind: input, shape index: {}]   ;;  %s8387_s2 = inlined_call_operand.hbm [shape: bf16[896,512], index: 2, kind: input, shape index: {}]   ;;  %s8388_s3 = inlined_call_operand.hbm [shape: f32[1,512], index: 3, kind: input, shape index: {}]   ;;  %s8389_s4 = inlined_call_operand.hbm [shape: bf16[512,256], index: 4, kind: input, shape index: {}]   ;;  %s8390_s5 = inlined_call_operand.hbm [shape: f32[1,256], index: 5, kind: input, shape index: {}]   ;;  %s8391_s6 = inlined_call_operand.hbm [shape: bf16[128,512], index: 6, kind: input, shape index: {}]   ;;  %s8392_s7 = inlined_call_operand.hbm [shape: f32[1,512], index: 7, kind: input, shape index: {}]   ;;  %s8393_s8 = inlined_call_operand.hbm [shape: bf16[512,896], index: 8, kind: input, shape index: {}]   ;;  %s8394_s9 = inlined_call_operand.vmem [shape: f32[1,896], index: 9, kind: input, shape index: {}]   ;;  %s8395_s10 = inlined_call_operand.hbm [shape: bf16[16,896], index: 10, kind: output, shape index: {0}]   ;;  %s8396_s11 = inlined_call_operand.hbm [shape: f32[16,256], index: 11, kind: output, shape index: {1}]  }
   0x1   :  { %18 = vsyncpa [#allocation6], 0 }
   0x2   :  { %19 = vsyncpa [#allocation9], 0 }
   0x3   :  { %20 = vsyncpa [#allocation12], 0 }
   0x4   :  { %21 = vsyncpa [#allocation15], 0 }
   0x5   :  { %22 = vsyncpa [#allocation4], 0  ;;  %s41_s19 = sshll.u32 %s8386_s1, 4  ;;  %s42_s19 = int_to_ptr.hbm [resolvable:$true] %s41_s19 }
   0x6   :  { %23 = vsyncpa [#allocation19], 0  ;;  %s8027_s20 = smov [#allocation5]   ;;  %s68_s24 = sshll.u32 %s8388_s3, 4  ;;  %s69_s24 = int_to_ptr.hbm [resolvable:$true] %s68_s24 }
   0x7   :  { %s43_s21 = sshll.u32 %s8027_s20, 4  ;;  %s8028_s25 = smov 128   ;;  %s44_s21 = int_to_ptr.vmem [resolvable:$true] %s43_s21 }
   0x8   :  { %s8029_s26 = smov 8   ;;  %s8030_s27 = smov [#allocation8]  }
   0x9   :  { %49 = dma.hbm_to_vmem [thread:$0]  %s42_s19, 256, %s44_s21, [#allocation6], %s8028_s25, %s8028_s25, %s8029_s26  }
   0xa   :  { %s70_s28 = sshll.u32 %s8030_s27, 4  ;;  %s92_s30 = sshll.u32 %s8390_s5, 4  ;;  %s71_s28 = int_to_ptr.vmem [resolvable:$true] %s70_s28  ;;  %s93_s30 = int_to_ptr.hbm [resolvable:$true] %s92_s30 }
   0xb   :  { %73 = dma.hbm_to_vmem [thread:$0]  %s69_s24, 64, %s71_s28, [#allocation9]  }
   0xc   :  { %s116_s3 = sshll.u32 %s8392_s7, 4  ;;  %s8031_s14 = smov [#allocation11]   ;;  %s117_s3 = int_to_ptr.hbm [resolvable:$true] %s116_s3 }
   0xd   :  { %s94_s15 = sshll.u32 %s8031_s14, 4  ;;  %s8032_s16 = smov [#allocation14]   ;;  %s95_s15 = int_to_ptr.vmem [resolvable:$true] %s94_s15 }
   0xe   :  { %97 = dma.hbm_to_vmem [thread:$0]  %s93_s30, 32, %s95_s15, [#allocation12]  }
   0xf   :  { %s118_s17 = sshll.u32 %s8032_s16, 4  ;;  %s28_s20 = sshll.u32 %s8385_s0, 4  ;;  %s119_s17 = int_to_ptr.vmem [resolvable:$true] %s118_s17  ;;  %s29_s20 = int_to_ptr.hbm [resolvable:$true] %s28_s20 }
  0x10   :  { %121 = dma.hbm_to_vmem [thread:$0]  %s117_s3, 64, %s119_s17, [#allocation15]  }
  0x11   :  { %s8033_s5 = smov [#allocation2]   ;;  %s54_s7 = sshll.u32 %s8387_s2, 4  ;;  %s55_s7 = int_to_ptr.hbm [resolvable:$true] %s54_s7 }
  0x12   :  { %s30_s21 = sshll.u32 %s8033_s5, 4  ;;  %s8034_s24 = smov 448   ;;  %s31_s21 = int_to_ptr.vmem [resolvable:$true] %s30_s21 }
  0x13   :  { %s8035_s27 = smov 28   ;;  %s8036_s28 = smov [#allocation7]  }
  0x14   :  { %36 = dma.hbm_to_vmem [thread:$0]  %s29_s20, 896, %s31_s21, [#allocation3], %s8034_s24, %s8034_s24, %s8035_s27  }
  0x15   :  { %s56_s29 = sshll.u32 %s8036_s28, 4  ;;  %s8037_s0 = smov 256   ;;  %s57_s29 = int_to_ptr.vmem [resolvable:$true] %s56_s29 }
  0x16   :  { %s8038_s1 = smov 16   ;;  %s78_s2 = sshll.u32 %s8389_s4, 4  ;;  %s79_s2 = int_to_ptr.hbm [resolvable:$true] %s78_s2 }
  0x17   :  { %62 = dma.hbm_to_vmem [thread:$0]  %s55_s7, 28672, %s57_s29, [#allocation6], %s8037_s0, %s8037_s0, %s8038_s1  }
  0x18   :  { %s8039_s13 = smov [#allocation10]   ;;  %s102_s16 = sshll.u32 %s8391_s6, 4  ;;  %s103_s16 = int_to_ptr.hbm [resolvable:$true] %s102_s16 }
  0x19   :  { %s80_s3 = sshll.u32 %s8039_s13, 4  ;;  %s8040_s17 = smov [#allocation13]   ;;  %s81_s3 = int_to_ptr.vmem [resolvable:$true] %s80_s3 }
  0x1a   :  { %86 = dma.hbm_to_vmem [thread:$0]  %s79_s2, 8192, %s81_s3, [#allocation9], %s8028_s25, %s8028_s25, %s8029_s26  }
  0x1b   :  { %s104_s18 = sshll.u32 %s8040_s17, 4  ;;  %s126_s5 = sshll.u32 %s8393_s8, 4  ;;  %s105_s18 = int_to_ptr.vmem [resolvable:$true] %s104_s18  ;;  %s127_s5 = int_to_ptr.hbm [resolvable:$true] %s126_s5 }
  0x1c   :  { %110 = dma.hbm_to_vmem [thread:$0]  %s103_s16, 4096, %s105_s18, [#allocation12], %s8037_s0, %s8037_s0, %s8038_s1  }
  0x1d   :  { %s8041_s4 = smov [#allocation16]  }
  0x1e   :  { %s128_s21 = sshll.u32 %s8041_s4, 4  ;;  %s129_s21 = int_to_ptr.vmem [resolvable:$true] %s128_s21 }
  0x1f   :  { %134 = dma.hbm_to_vmem [thread:$0]  %s127_s5, 28672, %s129_s21, [#allocation15], %s8034_s24, %s8034_s24, %s8035_s27  }
  0x20   :  { %8013 = dma.done.wait [#allocation3], 896  }
  0x21   :  { %8014 = vsyncadd [#allocation3], 4294966400 }
  0x22   :  { %8015 = dma.done.wait [#allocation6], 28928  }
  0x23   :  { %8016 = vsyncadd [#allocation6], 4294938368 }
  0x24   :  { %8017 = dma.done.wait [#allocation9], 8256  }
  0x25   :  { %8018 = vsyncadd [#allocation9], 4294959040 }
  0x26   :  { %8019 = dma.done.wait [#allocation12], 4128  }
  0x27   :  { %8020 = vsyncadd [#allocation12], 4294963168 }
  0x28   :  { %8021 = dma.done.wait [#allocation15], 28736  }
  0x29   :  { %8022 = vsyncadd [#allocation15], 4294938560  ;;  %v5045_v0 = vld [vmem:[#allocation7 + $0xe0] sm:$0xf]  ;;  %v7158_v1 = vld [vmem:[#allocation7 + $0xec] sm:$0xf0] }
  0x2a   :  { %v5173_v2 = vld [vmem:[#allocation7 + $0x1e0] sm:$0xf]  ;;  %v5046_v3 = vor.u32 %v7158_v1, %v5045_v0  ;;  %v7190_v4 = vld [vmem:[#allocation7 + $0x1ec] sm:$0xf0]  ;;  %s4881_s23 = sshll.u32 %s8396_s11, 4  ;;  %s8043_s11 = smov [#allocation17]   ;;  %s4882_s23 = int_to_ptr.hbm [resolvable:$true] %s4881_s23 }
  0x2b   :  { %v5301_v5 = vld [vmem:[#allocation7 + $0x2e0] sm:$0xf]  ;;  %v7222_v6 = vld [vmem:[#allocation7 + $0x2ec] sm:$0xf0]  ;;  %v5174_v7 = vor.u32 %v7190_v4, %v5173_v2  ;;  %s4866_s7 = sshll.u32 %s8043_s11, 4  ;;  %s4867_s7 = int_to_ptr.vmem [resolvable:$true] %s4866_s7 }
  0x2c   :  { %v5302_v8 = vor.u32 %v7222_v6, %v5301_v5  ;;  %v5429_v9 = vld [vmem:[#allocation7 + $0x3e0] sm:$0xf]  ;;  %v7254_v10 = vld [vmem:[#allocation7 + $0x3ec] sm:$0xf0]  ;;  %1571 = vmatpush.bf16.msra.mxu0 %v5046_v3 }
  0x2d   :  { %v5029_v11 = vld [vmem:[#allocation7 + $0xc0] sm:$0xf]  ;;  %v5430_v12 = vor.u32 %v7254_v10, %v5429_v9  ;;  %v7154_v13 = vld [vmem:[#allocation7 + $0xcc] sm:$0xf0]  ;;  %1585 = vmatpush.bf16.msra.mxu1 %v5174_v7 }
  0x2e   :  { %v5157_v14 = vld [vmem:[#allocation7 + $0x1c0] sm:$0xf]  ;;  %v7186_v15 = vld [vmem:[#allocation7 + $0x1cc] sm:$0xf0]  ;;  %1599 = vmatpush.bf16.msra.mxu2 %v5302_v8  ;;  %v5030_v16 = vor.u32 %v7154_v13, %v5029_v11 }
  0x2f   :  { %v5158_v17 = vor.u32 %v7186_v15, %v5157_v14  ;;  %v5285_v18 = vld [vmem:[#allocation7 + $0x2c0] sm:$0xf]  ;;  %v7218_v19 = vld [vmem:[#allocation7 + $0x2cc] sm:$0xf0]  ;;  %1613 = vmatpush.bf16.msra.mxu3 %v5430_v12 }
  0x30   :  { %v5413_v20 = vld [vmem:[#allocation7 + $0x3c0] sm:$0xf]  ;;  %v5286_v21 = vor.u32 %v7218_v19, %v5285_v18  ;;  %v7250_v22 = vld [vmem:[#allocation7 + $0x3cc] sm:$0xf0]  ;;  %1572 = vmatpush.bf16.msra.mxu0 %v5030_v16 }
  0x31   :  { %v5013_v23 = vld [vmem:[#allocation7 + $0xa0] sm:$0xf]  ;;  %v7150_v24 = vld [vmem:[#allocation7 + $0xac] sm:$0xf0]  ;;  %v5414_v25 = vor.u32 %v7250_v22, %v5413_v20  ;;  %1586 = vmatpush.bf16.msra.mxu1 %v5158_v17 }
  0x32   :  { %v5141_v26 = vld [vmem:[#allocation7 + $0x1a0] sm:$0xf]  ;;  %v7182_v27 = vld [vmem:[#allocation7 + $0x1ac] sm:$0xf0]  ;;  %v5014_v29 = vor.u32 %v7150_v24, %v5013_v23  ;;  %1600 = vmatpush.bf16.msra.mxu2 %v5286_v21 }
  0x33   :  { %v5269_v28 = vld [vmem:[#allocation7 + $0x2a0] sm:$0xf]  ;;  %v7214_v30 = vld [vmem:[#allocation7 + $0x2ac] sm:$0xf0]  ;;  %v5142_v33 = vor.u32 %v7182_v27, %v5141_v26  ;;  %1614 = vmatpush.bf16.msra.mxu3 %v5414_v25 }
  0x34   :  { %v5397_v31 = vld [vmem:[#allocation7 + $0x3a0] sm:$0xf]  ;;  %v7246_v32 = vld [vmem:[#allocation7 + $0x3ac] sm:$0xf0]  ;;  %v5270_v34 = vor.u32 %v7214_v30, %v5269_v28  ;;  %1573 = vmatpush.bf16.msra.mxu0 %v5014_v29 }
  0x35   :  { %v4997_v35 = vld [vmem:[#allocation7 + $0x80] sm:$0xf]  ;;  %v7146_v36 = vld [vmem:[#allocation7 + $0x8c] sm:$0xf0]  ;;  %v5398_v38 = vor.u32 %v7246_v32, %v5397_v31  ;;  %1587 = vmatpush.bf16.msra.mxu1 %v5142_v33 }
  0x36   :  { %v5125_v37 = vld [vmem:[#allocation7 + $0x180] sm:$0xf]  ;;  %v7178_v39 = vld [vmem:[#allocation7 + $0x18c] sm:$0xf0]  ;;  %v4998_v44 = vor.u32 %v7146_v36, %v4997_v35  ;;  %1601 = vmatpush.bf16.msra.mxu2 %v5270_v34 }
  0x37   :  { %v5253_v40 = vld [vmem:[#allocation7 + $0x280] sm:$0xf]  ;;  %v7210_v41 = vld [vmem:[#allocation7 + $0x28c] sm:$0xf0]  ;;  %v5126_v45 = vor.u32 %v7178_v39, %v5125_v37  ;;  %1615 = vmatpush.bf16.msra.mxu3 %v5398_v38  ;;  %v7156_v37 = vld [vmem:[#allocation7 + $0xe4] sm:$0xf] }
  0x38   :  { %v5381_v42 = vld [vmem:[#allocation7 + $0x380] sm:$0xf]  ;;  %v7242_v43 = vld [vmem:[#allocation7 + $0x38c] sm:$0xf0]  ;;  %v5254_v46 = vor.u32 %v7210_v41, %v5253_v40  ;;  %1574 = vmatpush.bf16.msra.mxu0 %v4998_v44  ;;  %v5047_v38 = vld [vmem:[#allocation7 + $0xf0] sm:$0xf0] }
  0x39   :  { %v4981_v47 = vld [vmem:[#allocation7 + $0x60] sm:$0xf]  ;;  %v7142_v48 = vld [vmem:[#allocation7 + $0x6c] sm:$0xf0]  ;;  %v5382_v50 = vor.u32 %v7242_v43, %v5381_v42  ;;  %1588 = vmatpush.bf16.msra.mxu1 %v5126_v45 }
  0x3a   :  { %v5109_v49 = vld [vmem:[#allocation7 + $0x160] sm:$0xf]  ;;  %v7174_v51 = vld [vmem:[#allocation7 + $0x16c] sm:$0xf0]  ;;  %v4982_v56 = vor.u32 %v7142_v48, %v4981_v47  ;;  %1602 = vmatpush.bf16.msra.mxu2 %v5254_v46  ;;  %v5050_v48 = vor.u32 %v7156_v37, %v5047_v38 }
  0x3b   :  { %v5237_v52 = vld [vmem:[#allocation7 + $0x260] sm:$0xf]  ;;  %v7206_v53 = vld [vmem:[#allocation7 + $0x26c] sm:$0xf0]  ;;  %v5110_v57 = vor.u32 %v7174_v51, %v5109_v49  ;;  %1616 = vmatpush.bf16.msra.mxu3 %v5382_v50  ;;  %v7152_v50 = vld [vmem:[#allocation7 + $0xc4] sm:$0xf] }
  0x3c   :  { %v5365_v54 = vld [vmem:[#allocation7 + $0x360] sm:$0xf]  ;;  %v7238_v55 = vld [vmem:[#allocation7 + $0x36c] sm:$0xf0]  ;;  %v5238_v58 = vor.u32 %v7206_v53, %v5237_v52  ;;  %1575 = vmatpush.bf16.msra.mxu0 %v4982_v56  ;;  %v5031_v51 = vld [vmem:[#allocation7 + $0xd0] sm:$0xf0] }
  0x3d   :  { %v4965_v59 = vld [vmem:[#allocation7 + $0x40] sm:$0xf]  ;;  %v7138_v60 = vld [vmem:[#allocation7 + $0x4c] sm:$0xf0]  ;;  %v5366_v62 = vor.u32 %v7238_v55, %v5365_v54  ;;  %1589 = vmatpush.bf16.msra.mxu1 %v5110_v57  ;;  %v4905_v52 = vld [vmem:[#allocation2] sm:$0xf] }
  0x3e   :  { %v5093_v61 = vld [vmem:[#allocation7 + $0x140] sm:$0xf]  ;;  %v7170_v63 = vld [vmem:[#allocation7 + $0x14c] sm:$0xf0]  ;;  %v4966_v4 = vor.u32 %v7138_v60, %v4965_v59  ;;  %1603 = vmatpush.bf16.msra.mxu2 %v5238_v58  ;;  %v7124_v53 = vld [vmem:[#allocation2 + $0x18] sm:$0xf0] }
  0x3f   :  { %v5221_v0 = vld [vmem:[#allocation7 + $0x240] sm:$0xf]  ;;  %v7202_v1 = vld [vmem:[#allocation7 + $0x24c] sm:$0xf0]  ;;  %v5094_v5 = vor.u32 %v7170_v63, %v5093_v61  ;;  %1617 = vmatpush.bf16.msra.mxu3 %v5366_v62  ;;  %v8149_v57 = vor.u32 %v7124_v53, %v4905_v52  ;;  %v7125_v58 = vld [vmem:[#allocation2 + $0x20] sm:$0xf0] }
  0x40   :  { %v5349_v2 = vld [vmem:[#allocation7 + $0x340] sm:$0xf]  ;;  %v7234_v3 = vld [vmem:[#allocation7 + $0x34c] sm:$0xf0]  ;;  %v5222_v6 = vor.u32 %v7202_v1, %v5221_v0  ;;  %1576 = vmatpush.bf16.msra.mxu0 %v4966_v4  ;;  %v5034_v1 = vor.u32 %v7152_v50, %v5031_v51  ;;  %v7148_v4 = vld [vmem:[#allocation7 + $0xa4] sm:$0xf] }
  0x41   :  { %v4949_v7 = vld [vmem:[#allocation7 + $0x20] sm:$0xf]  ;;  %v7134_v8 = vld [vmem:[#allocation7 + $0x2c] sm:$0xf0]  ;;  %v5350_v10 = vor.u32 %v7234_v3, %v5349_v2  ;;  %1590 = vmatpush.bf16.msra.mxu1 %v5094_v5  ;;  %v5015_v5 = vld [vmem:[#allocation7 + $0xb0] sm:$0xf0] }
  0x42   :  { %v5077_v9 = vld [vmem:[#allocation7 + $0x120] sm:$0xf]  ;;  %v7166_v11 = vld [vmem:[#allocation7 + $0x12c] sm:$0xf0]  ;;  %v4950_v16 = vor.u32 %v7134_v8, %v4949_v7  ;;  %1604 = vmatpush.bf16.msra.mxu2 %v5222_v6  ;;  %v7121_v6 = vld [vmem:[#allocation2 + $0x4] sm:$0xf] }
  0x43   :  { %v5205_v12 = vld [vmem:[#allocation7 + $0x220] sm:$0xf]  ;;  %v7198_v13 = vld [vmem:[#allocation7 + $0x22c] sm:$0xf0]  ;;  %v5078_v19 = vor.u32 %v7166_v11, %v5077_v9  ;;  %1618 = vmatpush.bf16.msra.mxu3 %v5350_v10  ;;  %v4907_v7 = vld [vmem:[#allocation2 + $0x1c] sm:$0xf0] }
  0x44   :  { %v5333_v14 = vld [vmem:[#allocation7 + $0x320] sm:$0xf]  ;;  %v7230_v15 = vld [vmem:[#allocation7 + $0x32c] sm:$0xf0]  ;;  %v5206_v20 = vor.u32 %v7198_v13, %v5205_v12  ;;  %1577 = vmatpush.bf16.msra.mxu0 %v4950_v16  ;;  %v8155_v11 = vor.u32 %v7121_v6, %v4907_v7  ;;  %v7128_v7 = vld [vmem:[#allocation7 + $0x4] sm:$0xf] }
  0x45   :  { %v4933_v17 = vld [vmem:[#allocation7] sm:$0xf]  ;;  %v7130_v18 = vld [vmem:[#allocation7 + $0xc] sm:$0xf0]  ;;  %v5334_v24 = vor.u32 %v7230_v15, %v5333_v14  ;;  %1591 = vmatpush.bf16.msra.mxu1 %v5078_v19  ;;  %v7122_v19 = vld [vmem:[#allocation2 + $0xc] sm:$0xf] }
  0x46   :  { %v5061_v21 = vld [vmem:[#allocation7 + $0x100] sm:$0xf]  ;;  %v7162_v22 = vld [vmem:[#allocation7 + $0x10c] sm:$0xf0]  ;;  %v4934_v31 = vor.u32 %v7130_v18, %v4933_v17  ;;  %1605 = vmatpush.bf16.msra.mxu2 %v5206_v20  ;;  %v5018_v17 = vor.u32 %v7148_v4, %v5015_v5 }
  0x47   :  { %v5189_v23 = vld [vmem:[#allocation7 + $0x200] sm:$0xf]  ;;  %v7194_v25 = vld [vmem:[#allocation7 + $0x20c] sm:$0xf0]  ;;  %v5062_v35 = vor.u32 %v7162_v22, %v5061_v21  ;;  %1619 = vmatpush.bf16.msra.mxu3 %v5334_v24  ;;  %v7144_v21 = vld [vmem:[#allocation7 + $0x84] sm:$0xf] }
  0x48   :  { %v5317_v26 = vld [vmem:[#allocation7 + $0x300] sm:$0xf]  ;;  %v7226_v27 = vld [vmem:[#allocation7 + $0x30c] sm:$0xf0]  ;;  %v5190_v36 = vor.u32 %v7194_v25, %v5189_v23  ;;  %1578 = vmatpush.bf16.msra.mxu0 %v4934_v31  ;;  %v4999_v22 = vld [vmem:[#allocation7 + $0x90] sm:$0xf0] }
  0x49   :  { %v5557_v28 = vld [vmem:[#allocation7 + $0x4e0] sm:$0xf]  ;;  %v7286_v29 = vld [vmem:[#allocation7 + $0x4ec] sm:$0xf0]  ;;  %v5318_v39 = vor.u32 %v7226_v27, %v5317_v26  ;;  %1592 = vmatpush.bf16.msra.mxu1 %v5062_v35  ;;  %v4983_v35 = vld [vmem:[#allocation7 + $0x70] sm:$0xf0] }
  0x4a   :  { %v5685_v30 = vld [vmem:[#allocation7 + $0x5e0] sm:$0xf]  ;;  %v7318_v32 = vld [vmem:[#allocation7 + $0x5ec] sm:$0xf0]  ;;  %v5558_v40 = vor.u32 %v7286_v29, %v5557_v28  ;;  %1606 = vmatpush.bf16.msra.mxu2 %v5190_v36 }
  0x4b   :  { %v5813_v33 = vld [vmem:[#allocation7 + $0x6e0] sm:$0xf]  ;;  %v7350_v34 = vld [vmem:[#allocation7 + $0x6ec] sm:$0xf0]  ;;  %v5686_v43 = vor.u32 %v7318_v32, %v5685_v30  ;;  %1620 = vmatpush.bf16.msra.mxu3 %v5318_v39  ;;  %1579 = vmatmul.bf16.vlgmr.msra.gmra.mxu0 %v8149_v57  ;;  %v5002_v30 = vor.u32 %v7144_v21, %v4999_v22  ;;  %v4921_v22 = vld [vmem:[#allocation2 + $0x10] sm:$0xf] }
  0x4c   :  { %v5541_v41 = vld [vmem:[#allocation7 + $0x4c0] sm:$0xf]  ;;  %v7282_v42 = vld [vmem:[#allocation7 + $0x4cc] sm:$0xf0]  ;;  %v5814_v44 = vor.u32 %v7350_v34, %v5813_v33  ;;  %1627 = vmatpush.bf16.msrb.mxu0 %v5558_v40  ;;  %1593 = vmatmul.bf16.vlgmr.msra.gmra.mxu1 %v8155_v11  ;;  %v7140_v34 = vld [vmem:[#allocation7 + $0x64] sm:$0xf] }
  0x4d   :  { %v5669_v45 = vld [vmem:[#allocation7 + $0x5c0] sm:$0xf]  ;;  %v7314_v46 = vld [vmem:[#allocation7 + $0x5cc] sm:$0xf0]  ;;  %v5542_v55 = vor.u32 %v7282_v42, %v5541_v41  ;;  %1641 = vmatpush.bf16.msrb.mxu1 %v5686_v43  ;;  %v4986_v42 = vor.u32 %v7140_v34, %v4983_v35  ;;  %v5159_v34 = vld [vmem:[#allocation7 + $0x1d0] sm:$0xf0] }
  0x4e   :  { %v5797_v47 = vld [vmem:[#allocation7 + $0x6c0] sm:$0xf]  ;;  %v7346_v49 = vld [vmem:[#allocation7 + $0x6cc] sm:$0xf0]  ;;  %1655 = vmatpush.bf16.msrb.mxu2 %v5814_v44  ;;  %v5670_v59 = vor.u32 %v7314_v46, %v5669_v45  ;;  %v7136_v46 = vld [vmem:[#allocation7 + $0x44] sm:$0xf] }
  0x4f   :  { %v4913_v54 = vld [vmem:[#allocation2 + $0x8] sm:$0xf]  ;;  %v5798_v60 = vor.u32 %v7346_v49, %v5797_v47  ;;  %v7278_v61 = vld [vmem:[#allocation7 + $0x4ac] sm:$0xf0]  ;;  %1669 = vmatpush.bf16.msrb.mxu3 %v5050_v48  ;;  %v4967_v47 = vld [vmem:[#allocation7 + $0x50] sm:$0xf0] }
  0x50   :  { %v5525_v56 = vld [vmem:[#allocation7 + $0x4a0] sm:$0xf]  ;;  %v7310_v63 = vld [vmem:[#allocation7 + $0x5ac] sm:$0xf0]  ;;  %v8151_v0 = vor.u32 %v7125_v58, %v4913_v54  ;;  %1628 = vmatpush.bf16.msrb.mxu0 %v5542_v55  ;;  %v4970_v54 = vor.u32 %v7136_v46, %v4967_v47  ;;  %v7216_v35 = vld [vmem:[#allocation7 + $0x2c4] sm:$0xf] }
  0x51   :  { %v5653_v62 = vld [vmem:[#allocation7 + $0x5a0] sm:$0xf]  ;;  %v7342_v3 = vld [vmem:[#allocation7 + $0x6ac] sm:$0xf0]  ;;  %v5526_v8 = vor.u32 %v7278_v61, %v5525_v56  ;;  %1642 = vmatpush.bf16.msrb.mxu1 %v5670_v59  ;;  %v7132_v59 = vld [vmem:[#allocation7 + $0x24] sm:$0xf] }
  0x52   :  { %v5781_v2 = vld [vmem:[#allocation7 + $0x6a0] sm:$0xf]  ;;  %1607 = vmatmul.bf16.vlgmr.msra.gmra.mxu2 %v8151_v0  ;;  %v7274_v10 = vld [vmem:[#allocation7 + $0x48c] sm:$0xf0]  ;;  %v5654_v12 = vor.u32 %v7310_v63, %v5653_v62 }
  0x53   :  { %v5509_v9 = vld [vmem:[#allocation7 + $0x480] sm:$0xf]  ;;  %1656 = vmatpush.bf16.msrb.mxu2 %v5798_v60  ;;  %v5782_v13 = vor.u32 %v7342_v3, %v5781_v2  ;;  %v7306_v15 = vld [vmem:[#allocation7 + $0x58c] sm:$0xf0]  ;;  %1670 = vmatpush.bf16.msrb.mxu3 %v5034_v1  ;;  %v4951_v60 = vld [vmem:[#allocation7 + $0x30] sm:$0xf0] }
  0x54   :  { %v5637_v14 = vld [vmem:[#allocation7 + $0x580] sm:$0xf]  ;;  %v7338_v18 = vld [vmem:[#allocation7 + $0x68c] sm:$0xf0]  ;;  %1629 = vmatpush.bf16.msrb.mxu0 %v5526_v8  ;;  %v5510_v24 = vor.u32 %v7274_v10, %v5509_v9  ;;  %v4954_v8 = vor.u32 %v7132_v59, %v4951_v60  ;;  %v4935_v9 = vld [vmem:[#allocation7 + $0x10] sm:$0xf0] }
  0x55   :  { %v5765_v16 = vld [vmem:[#allocation7 + $0x680] sm:$0xf]  ;;  %1643 = vmatpush.bf16.msrb.mxu1 %v5654_v12  ;;  %v5638_v25 = vor.u32 %v7306_v15, %v5637_v14  ;;  %v7270_v28 = vld [vmem:[#allocation7 + $0x46c] sm:$0xf0]  ;;  %v7188_v10 = vld [vmem:[#allocation7 + $0x1e4] sm:$0xf] }
  0x56   :  { %v4915_v20 = vld [vmem:[#allocation2 + $0x24] sm:$0xf0]  ;;  %v5766_v26 = vor.u32 %v7338_v18, %v5765_v16  ;;  %v7302_v31 = vld [vmem:[#allocation7 + $0x56c] sm:$0xf0]  ;;  %v5175_v12 = vld [vmem:[#allocation7 + $0x1f0] sm:$0xf0] }
  0x57   :  { %v8158_v23 = vor.u32 %v7122_v19, %v4915_v20  ;;  %1657 = vmatpush.bf16.msrb.mxu2 %v5782_v13  ;;  %v5493_v27 = vld [vmem:[#allocation7 + $0x460] sm:$0xf]  ;;  %1671 = vmatpush.bf16.msrb.mxu3 %v5018_v17  ;;  %v7334_v33 = vld [vmem:[#allocation7 + $0x66c] sm:$0xf0]  ;;  %v7220_v13 = vld [vmem:[#allocation7 + $0x2e4] sm:$0xf] }
  0x58   :  { %v5621_v29 = vld [vmem:[#allocation7 + $0x560] sm:$0xf]  ;;  %1630 = vmatpush.bf16.msrb.mxu0 %v5510_v24  ;;  %v5494_v36 = vor.u32 %v7270_v28, %v5493_v27  ;;  %v7266_v40 = vld [vmem:[#allocation7 + $0x44c] sm:$0xf0]  ;;  %v5303_v14 = vld [vmem:[#allocation7 + $0x2f0] sm:$0xf0]  ;;  %v5178_v27 = vor.u32 %v7188_v10, %v5175_v12 }
  0x59   :  { %v5749_v32 = vld [vmem:[#allocation7 + $0x660] sm:$0xf]  ;;  %1621 = vmatmul.bf16.vlgmr.msra.gmra.mxu3 %v8158_v23  ;;  %1644 = vmatpush.bf16.msrb.mxu1 %v5638_v25  ;;  %v5622_v37 = vor.u32 %v7302_v31, %v5621_v29  ;;  %v7298_v43 = vld [vmem:[#allocation7 + $0x54c] sm:$0xf0]  ;;  %v7252_v15 = vld [vmem:[#allocation7 + $0x3e4] sm:$0xf]  ;;  %v5306_v31 = vor.u32 %v7220_v13, %v5303_v14 }
  0x5a   :  { %v5750_v38 = vor.u32 %v7334_v33, %v5749_v32  ;;  %v5477_v39 = vld [vmem:[#allocation7 + $0x440] sm:$0xf]  ;;  %v7330_v45 = vld [vmem:[#allocation7 + $0x64c] sm:$0xf0]  ;;  %v5431_v17 = vld [vmem:[#allocation7 + $0x3f0] sm:$0xf0] }
  0x5b   :  { %1658 = vmatpush.bf16.msrb.mxu2 %v5766_v26  ;;  %v5605_v41 = vld [vmem:[#allocation7 + $0x540] sm:$0xf]  ;;  %1672 = vmatpush.bf16.msrb.mxu3 %v5002_v30  ;;  %v5478_v48 = vor.u32 %v7266_v40, %v5477_v39  ;;  %v7262_v52 = vld [vmem:[#allocation7 + $0x42c] sm:$0xf0]  ;;  %v7284_v18 = vld [vmem:[#allocation7 + $0x4e4] sm:$0xf]  ;;  %v4938_v26 = vor.u32 %v7128_v7, %v4935_v9  ;;  %v5434_v32 = vor.u32 %v7252_v15, %v5431_v17 }
  0x5c   :  { %v5733_v44 = vld [vmem:[#allocation7 + $0x640] sm:$0xf]  ;;  %1631 = vmatpush.bf16.msrb.mxu0 %v5494_v36  ;;  %v5606_v49 = vor.u32 %v7298_v43, %v5605_v41  ;;  %v7294_v55 = vld [vmem:[#allocation7 + $0x52c] sm:$0xf0]  ;;  %v5559_v19 = vld [vmem:[#allocation7 + $0x4f0] sm:$0xf0] }
  0x5d   :  { %1645 = vmatpush.bf16.msrb.mxu1 %v5622_v37  ;;  %v5734_v50 = vor.u32 %v7330_v45, %v5733_v44  ;;  %v5461_v51 = vld [vmem:[#allocation7 + $0x420] sm:$0xf]  ;;  %v7326_v58 = vld [vmem:[#allocation7 + $0x62c] sm:$0xf0]  ;;  %v7126_v24 = vld [vmem:[#allocation2 + $0x28] sm:$0xf0]  ;;  %v5562_v36 = vor.u32 %v7284_v18, %v5559_v19 }
  0x5e   :  { %v5589_v53 = vld [vmem:[#allocation7 + $0x520] sm:$0xf]  ;;  %v5462_v62 = vor.u32 %v7262_v52, %v5461_v51  ;;  %v7258_v63 = vld [vmem:[#allocation7 + $0x40c] sm:$0xf0]  ;;  %v7127_v28 = vld [vmem:[#allocation2 + $0x30] sm:$0xf0]  ;;  %v8161_v37 = vor.u32 %v7126_v24, %v4921_v22 }
  0x5f   :  { %1659 = vmatpush.bf16.msrb.mxu2 %v5750_v38  ;;  %1673 = vmatpush.bf16.msrb.mxu3 %v4986_v42  ;;  %v5717_v56 = vld [vmem:[#allocation7 + $0x620] sm:$0xf]  ;;  %v7290_v2 = vld [vmem:[#allocation7 + $0x50c] sm:$0xf0]  ;;  %v5590_v3 = vor.u32 %v7294_v55, %v5589_v53  ;;  %v7123_v29 = vld [vmem:[#allocation2 + $0x14] sm:$0xf] }
  0x60   :  { %v5445_v61 = vld [vmem:[#allocation7 + $0x400] sm:$0xf]  ;;  %1632 = vmatpush.bf16.msrb.mxu0 %v5478_v48  ;;  %v5718_v4 = vor.u32 %v7326_v58, %v5717_v56  ;;  %v7322_v6 = vld [vmem:[#allocation7 + $0x60c] sm:$0xf0]  ;;  %v4923_v30 = vld [vmem:[#allocation2 + $0x2c] sm:$0xf0] }
  0x61   :  { %v5573_v1 = vld [vmem:[#allocation7 + $0x500] sm:$0xf]  ;;  %1646 = vmatpush.bf16.msrb.mxu1 %v5606_v49  ;;  %v5446_v16 = vor.u32 %v7258_v63, %v5445_v61  ;;  %v4929_v25 = vld [vmem:[#allocation2 + $0x18] sm:$0xf]  ;;  %v7184_v33 = vld [vmem:[#allocation7 + $0x1c4] sm:$0xf]  ;;  %v8165_v42 = vor.u32 %v7123_v29, %v4923_v30 }
  0x62   :  { %v5701_v5 = vld [vmem:[#allocation7 + $0x600] sm:$0xf]  ;;  %v5574_v20 = vor.u32 %v7290_v2, %v5573_v1  ;;  %v5287_v38 = vld [vmem:[#allocation7 + $0x2d0] sm:$0xf0]  ;;  %v7248_v39 = vld [vmem:[#allocation7 + $0x3c4] sm:$0xf]  ;;  %v8163_v41 = vor.u32 %v7127_v28, %v4929_v25  ;;  %v5162_v45 = vor.u32 %v7184_v33, %v5159_v34 }
  0x63   :  { %1660 = vmatpush.bf16.msrb.mxu2 %v5734_v50  ;;  %1674 = vmatpush.bf16.msrb.mxu3 %v4970_v54  ;;  %v5702_v21 = vor.u32 %v7322_v6, %v5701_v5  ;;  %v5415_v40 = vld [vmem:[#allocation7 + $0x3d0] sm:$0xf0]  ;;  %v7280_v43 = vld [vmem:[#allocation7 + $0x4c4] sm:$0xf]  ;;  %v5290_v46 = vor.u32 %v7216_v35, %v5287_v38 }
  0x64   :  { %1633 = vmatpush.bf16.msrb.mxu0 %v5462_v62  ;;  %v5543_v44 = vld [vmem:[#allocation7 + $0x4d0] sm:$0xf0]  ;;  %v5418_v47 = vor.u32 %v7248_v39, %v5415_v40  ;;  %v7180_v48 = vld [vmem:[#allocation7 + $0x1a4] sm:$0xf] }
  0x65   :  { %1647 = vmatpush.bf16.msrb.mxu1 %v5590_v3  ;;  %v5143_v49 = vld [vmem:[#allocation7 + $0x1b0] sm:$0xf0]  ;;  %v7212_v50 = vld [vmem:[#allocation7 + $0x2a4] sm:$0xf]  ;;  %v5546_v51 = vor.u32 %v7280_v43, %v5543_v44 }
  0x66   :  { %v5271_v52 = vld [vmem:[#allocation7 + $0x2b0] sm:$0xf0]  ;;  %v7244_v53 = vld [vmem:[#allocation7 + $0x3a4] sm:$0xf]  ;;  %v5146_v58 = vor.u32 %v7180_v48, %v5143_v49 }
  0x67   :  { %1661 = vmatpush.bf16.msrb.mxu2 %v5718_v4  ;;  %1675 = vmatpush.bf16.msrb.mxu3 %v4954_v8  ;;  %v5399_v54 = vld [vmem:[#allocation7 + $0x3b0] sm:$0xf0]  ;;  %v7276_v55 = vld [vmem:[#allocation7 + $0x4a4] sm:$0xf]  ;;  %v5274_v59 = vor.u32 %v7212_v50, %v5271_v52 }
  0x68   :  { %1634 = vmatpush.bf16.msrb.mxu0 %v5446_v16  ;;  %v5527_v56 = vld [vmem:[#allocation7 + $0x4b0] sm:$0xf0]  ;;  %v5402_v60 = vor.u32 %v7244_v53, %v5399_v54  ;;  %v7176_v61 = vld [vmem:[#allocation7 + $0x184] sm:$0xf] }
  0x69   :  { %1648 = vmatpush.bf16.msrb.mxu1 %v5574_v20  ;;  %v5127_v62 = vld [vmem:[#allocation7 + $0x190] sm:$0xf0]  ;;  %v7208_v63 = vld [vmem:[#allocation7 + $0x284] sm:$0xf]  ;;  %v5530_v1 = vor.u32 %v7276_v55, %v5527_v56 }
  0x6a   :  { %v5255_v2 = vld [vmem:[#allocation7 + $0x290] sm:$0xf0]  ;;  %v7240_v3 = vld [vmem:[#allocation7 + $0x384] sm:$0xf]  ;;  %v5130_v7 = vor.u32 %v7176_v61, %v5127_v62 }
  0x6b   :  { %1662 = vmatpush.bf16.msrb.mxu2 %v5702_v21  ;;  %1676 = vmatpush.bf16.msrb.mxu3 %v4938_v26  ;;  %v5383_v4 = vld [vmem:[#allocation7 + $0x390] sm:$0xf0]  ;;  %v7272_v5 = vld [vmem:[#allocation7 + $0x484] sm:$0xf]  ;;  %v5258_v8 = vor.u32 %v7208_v63, %v5255_v2 }
  0x6c   :  { %1683 = vmatpush.bf16.msra.mxu0 %v5178_v27  ;;  %1649 = vmatmul.bf16.vlgmr.msrb.gmra.mxu1 %v8165_v42  ;;  %v5511_v6 = vld [vmem:[#allocation7 + $0x490] sm:$0xf0]  ;;  %v5386_v9 = vor.u32 %v7240_v3, %v5383_v4  ;;  %v7172_v10 = vld [vmem:[#allocation7 + $0x164] sm:$0xf]  ;;  %v5053_v3 = vld [vmem:[#allocation7 + $0xe8] sm:$0xf] }
  0x6d   :  { %1697 = vmatpush.bf16.msra.mxu1 %v5306_v31  ;;  %1635 = vmatmul.bf16.vlgmr.msrb.gmra.mxu0 %v8161_v37  ;;  %v5111_v12 = vld [vmem:[#allocation7 + $0x170] sm:$0xf0]  ;;  %v7204_v13 = vld [vmem:[#allocation7 + $0x264] sm:$0xf]  ;;  %v5514_v14 = vor.u32 %v7272_v5, %v5511_v6  ;;  %v7159_v4 = vld [vmem:[#allocation7 + $0xf4] sm:$0xf0] }
  0x6e   :  { %1663 = vmatmul.bf16.vlgmr.msrb.gmra.mxu2 %v8163_v41  ;;  %1677 = vmatmul.bf16.vlgmr.msrb.gmra.mxu3 %v8149_v57  ;;  %v5239_v15 = vld [vmem:[#allocation7 + $0x270] sm:$0xf0]  ;;  %v7236_v16 = vld [vmem:[#allocation7 + $0x364] sm:$0xf]  ;;  %v5114_v20 = vor.u32 %v7172_v10, %v5111_v12 }
  0x6f   :  { %1711 = vmatpush.bf16.msra.mxu2 %v5434_v32  ;;  %1725 = vmatpush.bf16.msra.mxu3 %v5562_v36  ;;  %v5367_v17 = vld [vmem:[#allocation7 + $0x370] sm:$0xf0]  ;;  %v7268_v18 = vld [vmem:[#allocation7 + $0x464] sm:$0xf]  ;;  %v5242_v21 = vor.u32 %v7204_v13, %v5239_v15  ;;  %v5054_v13 = vor.u32 %v7159_v4, %v5053_v3 }
  0x70   :  { %1684 = vmatpush.bf16.msra.mxu0 %v5162_v45  ;;  %v5495_v19 = vld [vmem:[#allocation7 + $0x470] sm:$0xf0]  ;;  %v5370_v22 = vor.u32 %v7236_v16, %v5367_v17  ;;  %v7168_v24 = vld [vmem:[#allocation7 + $0x144] sm:$0xf] }
  0x71   :  { %1698 = vmatpush.bf16.msra.mxu1 %v5290_v46  ;;  %v5095_v25 = vld [vmem:[#allocation7 + $0x150] sm:$0xf0]  ;;  %v7200_v26 = vld [vmem:[#allocation7 + $0x244] sm:$0xf]  ;;  %v5498_v27 = vor.u32 %v7268_v18, %v5495_v19  ;;  %v5037_v19 = vld [vmem:[#allocation7 + $0xc8] sm:$0xf] }
  0x72   :  { %v5223_v28 = vld [vmem:[#allocation7 + $0x250] sm:$0xf0]  ;;  %v7232_v29 = vld [vmem:[#allocation7 + $0x344] sm:$0xf]  ;;  %v5098_v33 = vor.u32 %v7168_v24, %v5095_v25 }
  0x73   :  { %1712 = vmatpush.bf16.msra.mxu2 %v5418_v47  ;;  %1726 = vmatpush.bf16.msra.mxu3 %v5546_v51  ;;  %v5351_v30 = vld [vmem:[#allocation7 + $0x350] sm:$0xf0]  ;;  %v7264_v31 = vld [vmem:[#allocation7 + $0x444] sm:$0xf]  ;;  %v5226_v34 = vor.u32 %v7200_v26, %v5223_v28 }
  0x74   :  { %1685 = vmatpush.bf16.msra.mxu0 %v5146_v58  ;;  %v5479_v32 = vld [vmem:[#allocation7 + $0x450] sm:$0xf0]  ;;  %v5354_v35 = vor.u32 %v7232_v29, %v5351_v30  ;;  %v7164_v36 = vld [vmem:[#allocation7 + $0x124] sm:$0xf] }
  0x75   :  { %1699 = vmatpush.bf16.msra.mxu1 %v5274_v59  ;;  %v5079_v38 = vld [vmem:[#allocation7 + $0x130] sm:$0xf0]  ;;  %v7196_v39 = vld [vmem:[#allocation7 + $0x224] sm:$0xf]  ;;  %v5482_v40 = vor.u32 %v7264_v31, %v5479_v32  ;;  %v5021_v32 = vld [vmem:[#allocation7 + $0xa8] sm:$0xf] }
  0x76   :  { %v5207_v43 = vld [vmem:[#allocation7 + $0x230] sm:$0xf0]  ;;  %v7228_v44 = vld [vmem:[#allocation7 + $0x324] sm:$0xf]  ;;  %v5082_v48 = vor.u32 %v7164_v36, %v5079_v38 }
  0x77   :  { %1713 = vmatpush.bf16.msra.mxu2 %v5402_v60  ;;  %1727 = vmatpush.bf16.msra.mxu3 %v5530_v1  ;;  %v5335_v45 = vld [vmem:[#allocation7 + $0x330] sm:$0xf0]  ;;  %v7260_v46 = vld [vmem:[#allocation7 + $0x424] sm:$0xf]  ;;  %v5210_v51 = vor.u32 %v7196_v39, %v5207_v43 }
  0x78   :  { %1686 = vmatpush.bf16.msra.mxu0 %v5130_v7  ;;  %v5463_v47 = vld [vmem:[#allocation7 + $0x430] sm:$0xf0]  ;;  %v7160_v49 = vld [vmem:[#allocation7 + $0x104] sm:$0xf]  ;;  %v5338_v52 = vor.u32 %v7228_v44, %v5335_v45  ;;  %v5181_v7 = vld [vmem:[#allocation7 + $0x1e8] sm:$0xf] }
  0x79   :  { %1700 = vmatpush.bf16.msra.mxu1 %v5258_v8  ;;  %v5063_v50 = vld [vmem:[#allocation7 + $0x110] sm:$0xf0]  ;;  %v7192_v53 = vld [vmem:[#allocation7 + $0x204] sm:$0xf]  ;;  %v5466_v56 = vor.u32 %v7260_v46, %v5463_v47  ;;  %v7191_v8 = vld [vmem:[#allocation7 + $0x1f4] sm:$0xf0] }
  0x7a   :  { %v5191_v54 = vld [vmem:[#allocation7 + $0x210] sm:$0xf0]  ;;  %v7224_v55 = vld [vmem:[#allocation7 + $0x304] sm:$0xf]  ;;  %v5066_v1 = vor.u32 %v7160_v49, %v5063_v50  ;;  %v5182_v17 = vor.u32 %v7191_v8, %v5181_v7  ;;  %v5005_v47 = vld [vmem:[#allocation7 + $0x88] sm:$0xf] }
  0x7b   :  { %1714 = vmatpush.bf16.msra.mxu2 %v5386_v9  ;;  %1728 = vmatpush.bf16.msra.mxu3 %v5514_v14  ;;  %v5319_v58 = vld [vmem:[#allocation7 + $0x310] sm:$0xf0]  ;;  %v7256_v59 = vld [vmem:[#allocation7 + $0x404] sm:$0xf]  ;;  %v5194_v5 = vor.u32 %v7192_v53, %v5191_v54  ;;  %v5133_v49 = vld [vmem:[#allocation7 + $0x188] sm:$0xf] }
  0x7c   :  { %1687 = vmatpush.bf16.msra.mxu0 %v5114_v20  ;;  %v5447_v60 = vld [vmem:[#allocation7 + $0x410] sm:$0xf0]  ;;  %v7316_v61 = vld [vmem:[#allocation7 + $0x5e4] sm:$0xf]  ;;  %v5322_v6 = vor.u32 %v7224_v55, %v5319_v58  ;;  %v7155_v20 = vld [vmem:[#allocation7 + $0xd4] sm:$0xf0] }
  0x7d   :  { %1701 = vmatpush.bf16.msra.mxu1 %v5242_v21  ;;  %v5687_v62 = vld [vmem:[#allocation7 + $0x5f0] sm:$0xf0]  ;;  %v7348_v63 = vld [vmem:[#allocation7 + $0x6e4] sm:$0xf]  ;;  %v5450_v9 = vor.u32 %v7256_v59, %v5447_v60  ;;  %v5165_v21 = vld [vmem:[#allocation7 + $0x1c8] sm:$0xf]  ;;  %v5038_v26 = vor.u32 %v7155_v20, %v5037_v19 }
  0x7e   :  { %v5815_v2 = vld [vmem:[#allocation7 + $0x6f0] sm:$0xf0]  ;;  %v5690_v10 = vor.u32 %v7316_v61, %v5687_v62  ;;  %v7312_v14 = vld [vmem:[#allocation7 + $0x5c4] sm:$0xf]  ;;  %v7179_v50 = vld [vmem:[#allocation7 + $0x194] sm:$0xf0] }
  0x7f   :  { %1715 = vmatpush.bf16.msra.mxu2 %v5370_v22  ;;  %1729 = vmatpush.bf16.msra.mxu3 %v5498_v27  ;;  %v5818_v12 = vor.u32 %v7348_v63, %v5815_v2  ;;  %v5671_v15 = vld [vmem:[#allocation7 + $0x5d0] sm:$0xf0]  ;;  %v7344_v16 = vld [vmem:[#allocation7 + $0x6c4] sm:$0xf]  ;;  %v7187_v22 = vld [vmem:[#allocation7 + $0x1d4] sm:$0xf0]  ;;  %v5134_v58 = vor.u32 %v7179_v50, %v5133_v49 }
  0x80   :  { %1688 = vmatpush.bf16.msra.mxu0 %v5098_v33  ;;  %v5799_v18 = vld [vmem:[#allocation7 + $0x6d0] sm:$0xf0]  ;;  %v5674_v24 = vor.u32 %v7312_v14, %v5671_v15  ;;  %v7308_v27 = vld [vmem:[#allocation7 + $0x5a4] sm:$0xf]  ;;  %v5166_v30 = vor.u32 %v7187_v22, %v5165_v21  ;;  %v7151_v33 = vld [vmem:[#allocation7 + $0xb4] sm:$0xf0] }
  0x81   :  { %1702 = vmatpush.bf16.msra.mxu1 %v5226_v34  ;;  %v5802_v25 = vor.u32 %v7344_v16, %v5799_v18  ;;  %v5655_v28 = vld [vmem:[#allocation7 + $0x5b0] sm:$0xf0]  ;;  %v7340_v29 = vld [vmem:[#allocation7 + $0x6a4] sm:$0xf]  ;;  %v5149_v34 = vld [vmem:[#allocation7 + $0x1a8] sm:$0xf]  ;;  %v5022_v39 = vor.u32 %v7151_v33, %v5021_v32 }
  0x82   :  { %v5783_v31 = vld [vmem:[#allocation7 + $0x6b0] sm:$0xf0]  ;;  %v5658_v36 = vor.u32 %v7308_v27, %v5655_v28  ;;  %v7336_v44 = vld [vmem:[#allocation7 + $0x684] sm:$0xf]  ;;  %v4989_v60 = vld [vmem:[#allocation7 + $0x68] sm:$0xf] }
  0x83   :  { %1716 = vmatpush.bf16.msra.mxu2 %v5354_v35  ;;  %1730 = vmatpush.bf16.msra.mxu3 %v5482_v40  ;;  %v7183_v35 = vld [vmem:[#allocation7 + $0x1b4] sm:$0xf0]  ;;  %v5786_v38 = vor.u32 %v7340_v29, %v5783_v31  ;;  %v7304_v40 = vld [vmem:[#allocation7 + $0x584] sm:$0xf]  ;;  %v5639_v43 = vld [vmem:[#allocation7 + $0x590] sm:$0xf0] }
  0x84   :  { %1689 = vmatpush.bf16.msra.mxu0 %v5082_v48  ;;  %v5150_v45 = vor.u32 %v7183_v35, %v5149_v34  ;;  %v5767_v46 = vld [vmem:[#allocation7 + $0x690] sm:$0xf0]  ;;  %v7147_v48 = vld [vmem:[#allocation7 + $0x94] sm:$0xf0]  ;;  %v7300_v54 = vld [vmem:[#allocation7 + $0x564] sm:$0xf] }
  0x85   :  { %1703 = vmatpush.bf16.msra.mxu1 %v5210_v51  ;;  %v5642_v51 = vor.u32 %v7304_v40, %v5639_v43  ;;  %v5006_v53 = vor.u32 %v7147_v48, %v5005_v47  ;;  %v5623_v55 = vld [vmem:[#allocation7 + $0x570] sm:$0xf0]  ;;  %v7143_v61 = vld [vmem:[#allocation7 + $0x74] sm:$0xf0]  ;;  %v5117_v62 = vld [vmem:[#allocation7 + $0x168] sm:$0xf] }
  0x86   :  { %v5751_v59 = vld [vmem:[#allocation7 + $0x670] sm:$0xf0]  ;;  %v7175_v63 = vld [vmem:[#allocation7 + $0x174] sm:$0xf0]  ;;  %v4990_v3 = vor.u32 %v7143_v61, %v4989_v60  ;;  %v7296_v4 = vld [vmem:[#allocation7 + $0x544] sm:$0xf] }
  0x87   :  { %1717 = vmatpush.bf16.msra.mxu2 %v5338_v52  ;;  %1731 = vmatpush.bf16.msra.mxu3 %v5466_v56  ;;  %v5770_v52 = vor.u32 %v7336_v44, %v5767_v46  ;;  %v7332_v56 = vld [vmem:[#allocation7 + $0x664] sm:$0xf]  ;;  %v5118_v7 = vor.u32 %v7175_v63, %v5117_v62  ;;  %v5735_v8 = vld [vmem:[#allocation7 + $0x650] sm:$0xf0]  ;;  %v4957_v22 = vld [vmem:[#allocation7 + $0x28] sm:$0xf] }
  0x88   :  { %1690 = vmatpush.bf16.msra.mxu0 %v5066_v1  ;;  %v5626_v1 = vor.u32 %v7300_v54, %v5623_v55  ;;  %v5754_v2 = vor.u32 %v7332_v56, %v5751_v59  ;;  %v5591_v18 = vld [vmem:[#allocation7 + $0x530] sm:$0xf0]  ;;  %v7324_v19 = vld [vmem:[#allocation7 + $0x624] sm:$0xf]  ;;  %v4941_v34 = vld [vmem:[#allocation7 + $0x8] sm:$0xf] }
  0x89   :  { %1704 = vmatpush.bf16.msra.mxu1 %v5194_v5  ;;  %v5607_v5 = vld [vmem:[#allocation7 + $0x550] sm:$0xf0]  ;;  %v7288_v28 = vld [vmem:[#allocation7 + $0x504] sm:$0xf]  ;;  %v5309_v40 = vld [vmem:[#allocation7 + $0x2e8] sm:$0xf] }
  0x8a   :  { %v5610_v14 = vor.u32 %v7296_v4, %v5607_v5  ;;  %v5719_v21 = vld [vmem:[#allocation7 + $0x630] sm:$0xf0]  ;;  %v7320_v32 = vld [vmem:[#allocation7 + $0x604] sm:$0xf]  ;;  %v7223_v43 = vld [vmem:[#allocation7 + $0x2f4] sm:$0xf0] }
  0x8b   :  { %1718 = vmatpush.bf16.msra.mxu2 %v5322_v6  ;;  %1732 = vmatpush.bf16.msra.mxu3 %v5450_v9  ;;  %v7328_v6 = vld [vmem:[#allocation7 + $0x644] sm:$0xf]  ;;  %v4973_v9 = vld [vmem:[#allocation7 + $0x48] sm:$0xf]  ;;  %v5575_v29 = vld [vmem:[#allocation7 + $0x510] sm:$0xf0]  ;;  %v5310_v54 = vor.u32 %v7223_v43, %v5309_v40 }
  0x8c   :  { %1739 = vmatpush.bf16.msrb.mxu0 %v5690_v10  ;;  %1705 = vmatmul.bf16.vlgmr.msra.gmra.mxu1 %v8151_v0  ;;  %v7139_v10 = vld [vmem:[#allocation7 + $0x54] sm:$0xf0]  ;;  %v5738_v15 = vor.u32 %v7328_v6, %v5735_v8  ;;  %v5703_v33 = vld [vmem:[#allocation7 + $0x610] sm:$0xf0]  ;;  %v5437_v44 = vld [vmem:[#allocation7 + $0x3e8] sm:$0xf] }
  0x8d   :  { %1753 = vmatpush.bf16.msrb.mxu1 %v5818_v12  ;;  %1691 = vmatmul.bf16.vlgmr.msra.gmra.mxu0 %v8155_v11  ;;  %v5101_v12 = vld [vmem:[#allocation7 + $0x148] sm:$0xf]  ;;  %v4974_v16 = vor.u32 %v7139_v10, %v4973_v9  ;;  %v7255_v46 = vld [vmem:[#allocation7 + $0x3f4] sm:$0xf0]  ;;  %v5706_v49 = vor.u32 %v7320_v32, %v5703_v33 }
  0x8e   :  { %1719 = vmatmul.bf16.vlgmr.msra.gmra.mxu2 %v8158_v23  ;;  %1733 = vmatmul.bf16.vlgmr.msra.gmra.mxu3 %v8161_v37  ;;  %v5565_v47 = vld [vmem:[#allocation7 + $0x4e8] sm:$0xf]  ;;  %v7287_v48 = vld [vmem:[#allocation7 + $0x4f4] sm:$0xf0]  ;;  %v5438_v55 = vor.u32 %v7255_v46, %v5437_v44 }
  0x8f   :  { %1767 = vmatpush.bf16.msrb.mxu2 %v5054_v13  ;;  %1781 = vmatpush.bf16.msrb.mxu3 %v5182_v17  ;;  %v7171_v13 = vld [vmem:[#allocation7 + $0x154] sm:$0xf0]  ;;  %v7292_v17 = vld [vmem:[#allocation7 + $0x524] sm:$0xf]  ;;  %v5566_v56 = vor.u32 %v7287_v48, %v5565_v47  ;;  %v5421_v60 = vld [vmem:[#allocation7 + $0x3c8] sm:$0xf] }
  0x90   :  { %1740 = vmatpush.bf16.msrb.mxu0 %v5674_v24  ;;  %v5102_v20 = vor.u32 %v7171_v13, %v5101_v12  ;;  %v7135_v24 = vld [vmem:[#allocation7 + $0x34] sm:$0xf0]  ;;  %v5594_v27 = vor.u32 %v7292_v17, %v5591_v18  ;;  %v5549_v63 = vld [vmem:[#allocation7 + $0x4c8] sm:$0xf] }
  0x91   :  { %1754 = vmatpush.bf16.msrb.mxu1 %v5802_v25  ;;  %v5085_v25 = vld [vmem:[#allocation7 + $0x128] sm:$0xf]  ;;  %v4958_v31 = vor.u32 %v7135_v24, %v4957_v22  ;;  %v7219_v59 = vld [vmem:[#allocation7 + $0x2d4] sm:$0xf0] }
  0x92   :  { %v7251_v62 = vld [vmem:[#allocation7 + $0x3d4] sm:$0xf0]  ;;  %v5405_v9 = vld [vmem:[#allocation7 + $0x3a8] sm:$0xf] }
  0x93   :  { %1768 = vmatpush.bf16.msrb.mxu2 %v5038_v26  ;;  %1782 = vmatpush.bf16.msrb.mxu3 %v5166_v30  ;;  %v7167_v26 = vld [vmem:[#allocation7 + $0x134] sm:$0xf0]  ;;  %v5722_v30 = vor.u32 %v7324_v19, %v5719_v21  ;;  %v5422_v5 = vor.u32 %v7251_v62, %v5421_v60  ;;  %v5533_v13 = vld [vmem:[#allocation7 + $0x4a8] sm:$0xf] }
  0x94   :  { %1741 = vmatpush.bf16.msrb.mxu0 %v5658_v36  ;;  %v5086_v35 = vor.u32 %v7167_v26, %v5085_v25  ;;  %v7131_v36 = vld [vmem:[#allocation7 + $0x14] sm:$0xf0]  ;;  %v5389_v22 = vld [vmem:[#allocation7 + $0x388] sm:$0xf] }
  0x95   :  { %1755 = vmatpush.bf16.msrb.mxu1 %v5786_v38  ;;  %v5069_v38 = vld [vmem:[#allocation7 + $0x108] sm:$0xf]  ;;  %v4942_v50 = vor.u32 %v7131_v36, %v4941_v34  ;;  %v7215_v8 = vld [vmem:[#allocation7 + $0x2b4] sm:$0xf0] }
  0x96   :  { %v7247_v12 = vld [vmem:[#allocation7 + $0x3b4] sm:$0xf0]  ;;  %v5517_v26 = vld [vmem:[#allocation7 + $0x488] sm:$0xf] }
  0x97   :  { %1769 = vmatpush.bf16.msrb.mxu2 %v5022_v39  ;;  %1783 = vmatpush.bf16.msrb.mxu3 %v5150_v45  ;;  %v7163_v39 = vld [vmem:[#allocation7 + $0x114] sm:$0xf0]  ;;  %v5578_v45 = vor.u32 %v7288_v28, %v5575_v29  ;;  %v5406_v18 = vor.u32 %v7247_v12, %v5405_v9  ;;  %v5645_v28 = vld [vmem:[#allocation7 + $0x588] sm:$0xf] }
  0x98   :  { %1742 = vmatpush.bf16.msrb.mxu0 %v5642_v51  ;;  %v5693_v51 = vld [vmem:[#allocation7 + $0x5e8] sm:$0xf]  ;;  %v7211_v21 = vld [vmem:[#allocation7 + $0x294] sm:$0xf0] }
  0x99   :  { %1756 = vmatpush.bf16.msrb.mxu1 %v5770_v52  ;;  %v7319_v52 = vld [vmem:[#allocation7 + $0x5f4] sm:$0xf0]  ;;  %v5245_v33 = vld [vmem:[#allocation7 + $0x268] sm:$0xf] }
  0x9a   :  { %v5694_v61 = vor.u32 %v7319_v52, %v5693_v51  ;;  %v7243_v25 = vld [vmem:[#allocation7 + $0x394] sm:$0xf0]  ;;  %v5629_v43 = vld [vmem:[#allocation7 + $0x568] sm:$0xf] }
  0x9b   :  { %1770 = vmatpush.bf16.msrb.mxu2 %v5006_v53  ;;  %1784 = vmatpush.bf16.msrb.mxu3 %v5134_v58  ;;  %v5070_v53 = vor.u32 %v7163_v39, %v5069_v38  ;;  %v5293_v58 = vld [vmem:[#allocation7 + $0x2c8] sm:$0xf]  ;;  %v7307_v29 = vld [vmem:[#allocation7 + $0x594] sm:$0xf0] }
  0x9c   :  { %1743 = vmatpush.bf16.msrb.mxu0 %v5626_v1  ;;  %v7283_v1 = vld [vmem:[#allocation7 + $0x4d4] sm:$0xf0]  ;;  %v5294_v4 = vor.u32 %v7219_v59, %v5293_v58  ;;  %v5646_v36 = vor.u32 %v7307_v29, %v5645_v28  ;;  %v5501_v39 = vld [vmem:[#allocation7 + $0x468] sm:$0xf] }
  0x9d   :  { %1757 = vmatpush.bf16.msrb.mxu1 %v5754_v2  ;;  %v5677_v2 = vld [vmem:[#allocation7 + $0x5c8] sm:$0xf]  ;;  %v5550_v6 = vor.u32 %v7283_v1, %v5549_v63  ;;  %v7207_v34 = vld [vmem:[#allocation7 + $0x274] sm:$0xf0] }
  0x9e   :  { %v7239_v38 = vld [vmem:[#allocation7 + $0x374] sm:$0xf0]  ;;  %v5229_v48 = vld [vmem:[#allocation7 + $0x248] sm:$0xf] }
  0x9f   :  { %1771 = vmatpush.bf16.msrb.mxu2 %v4990_v3  ;;  %1785 = vmatpush.bf16.msrb.mxu3 %v5118_v7  ;;  %v7315_v3 = vld [vmem:[#allocation7 + $0x5d4] sm:$0xf0]  ;;  %v5277_v7 = vld [vmem:[#allocation7 + $0x2a8] sm:$0xf] }
  0xa0   :  { %1744 = vmatpush.bf16.msrb.mxu0 %v5610_v14  ;;  %v5678_v10 = vor.u32 %v7315_v3, %v5677_v2  ;;  %v7279_v14 = vld [vmem:[#allocation7 + $0x4b4] sm:$0xf0]  ;;  %v5278_v17 = vor.u32 %v7215_v8, %v5277_v7  ;;  %v5341_v63 = vld [vmem:[#allocation7 + $0x328] sm:$0xf] }
  0xa1   :  { %1758 = vmatpush.bf16.msrb.mxu1 %v5738_v15  ;;  %v5661_v15 = vld [vmem:[#allocation7 + $0x5a8] sm:$0xf]  ;;  %v5534_v19 = vor.u32 %v7279_v14, %v5533_v13  ;;  %v7271_v40 = vld [vmem:[#allocation7 + $0x474] sm:$0xf0] }
  0xa2   :  { %v7303_v44 = vld [vmem:[#allocation7 + $0x574] sm:$0xf0]  ;;  %v5502_v47 = vor.u32 %v7271_v40, %v5501_v39  ;;  %v5469_v3 = vld [vmem:[#allocation7 + $0x428] sm:$0xf]  ;;  %v7153_v39 = vld [vmem:[#allocation7 + $0xcc] sm:$0xf] }
  0xa3   :  { %1772 = vmatpush.bf16.msrb.mxu2 %v4974_v16  ;;  %1786 = vmatpush.bf16.msrb.mxu3 %v5102_v20  ;;  %v7311_v16 = vld [vmem:[#allocation7 + $0x5b4] sm:$0xf0]  ;;  %v5261_v20 = vld [vmem:[#allocation7 + $0x288] sm:$0xf]  ;;  %v5630_v51 = vor.u32 %v7303_v44, %v5629_v43  ;;  %v5039_v43 = vld [vmem:[#allocation7 + $0xd8] sm:$0xf0] }
  0xa4   :  { %1745 = vmatpush.bf16.msrb.mxu0 %v5594_v27  ;;  %v5662_v24 = vor.u32 %v7311_v16, %v5661_v15  ;;  %v7275_v27 = vld [vmem:[#allocation7 + $0x494] sm:$0xf0]  ;;  %v5197_v8 = vld [vmem:[#allocation7 + $0x208] sm:$0xf]  ;;  %v7185_v44 = vld [vmem:[#allocation7 + $0x1cc] sm:$0xf] }
  0xa5   :  { %1759 = vmatpush.bf16.msrb.mxu1 %v5722_v30  ;;  %v5262_v30 = vor.u32 %v7211_v21, %v5261_v20  ;;  %v5518_v32 = vor.u32 %v7275_v27, %v5517_v26  ;;  %v7235_v52 = vld [vmem:[#allocation7 + $0x354] sm:$0xf0]  ;;  %v5325_v13 = vld [vmem:[#allocation7 + $0x308] sm:$0xf]  ;;  %v7189_v26 = vld [vmem:[#allocation7 + $0x1ec] sm:$0xf] }
  0xa6   :  { %v7199_v62 = vld [vmem:[#allocation7 + $0x234] sm:$0xf0]  ;;  %v5453_v15 = vld [vmem:[#allocation7 + $0x408] sm:$0xf]  ;;  %v5183_v27 = vld [vmem:[#allocation7 + $0x1f8] sm:$0xf0] }
  0xa7   :  { %1773 = vmatpush.bf16.msrb.mxu2 %v4958_v31  ;;  %1787 = vmatpush.bf16.msrb.mxu3 %v5086_v35  ;;  %v5390_v31 = vor.u32 %v7243_v25, %v5389_v22  ;;  %v5373_v35 = vld [vmem:[#allocation7 + $0x368] sm:$0xf]  ;;  %v7231_v2 = vld [vmem:[#allocation7 + $0x334] sm:$0xf0]  ;;  %v7157_v22 = vld [vmem:[#allocation7 + $0xec] sm:$0xf] }
  0xa8   :  { %1746 = vmatpush.bf16.msrb.mxu0 %v5578_v45  ;;  %v5246_v45 = vor.u32 %v7207_v34, %v5245_v33  ;;  %v5374_v46 = vor.u32 %v7239_v38, %v5373_v35  ;;  %v7195_v9 = vld [vmem:[#allocation7 + $0x214] sm:$0xf0]  ;;  %v5821_v20 = vld [vmem:[#allocation7 + $0x6e8] sm:$0xf]  ;;  %v5055_v25 = vld [vmem:[#allocation7 + $0xf8] sm:$0xf0]  ;;  %v5186_v35 = vor.u32 %v7189_v26, %v5183_v27 }
  0xa9   :  { %1760 = vmatpush.bf16.msrb.mxu1 %v5706_v49  ;;  %v7203_v49 = vld [vmem:[#allocation7 + $0x254] sm:$0xf0]  ;;  %v5058_v34 = vor.u32 %v7157_v22, %v5055_v25  ;;  %v5247_v22 = vld [vmem:[#allocation7 + $0x278] sm:$0xf0]  ;;  %v5741_v27 = vld [vmem:[#allocation7 + $0x648] sm:$0xf] }
  0xaa   :  { %v5230_v58 = vor.u32 %v7203_v49, %v5229_v48  ;;  %v7227_v14 = vld [vmem:[#allocation7 + $0x314] sm:$0xf0]  ;;  %v5042_v49 = vor.u32 %v7153_v39, %v5039_v43 }
  0xab   :  { %1774 = vmatpush.bf16.msrb.mxu2 %v4942_v50  ;;  %1788 = vmatpush.bf16.msrb.mxu3 %v5070_v53  ;;  %v5357_v50 = vld [vmem:[#allocation7 + $0x348] sm:$0xf]  ;;  %v7351_v21 = vld [vmem:[#allocation7 + $0x6f4] sm:$0xf0]  ;;  %v5326_v28 = vor.u32 %v7227_v14, %v5325_v13 }
  0xac   :  { %1795 = vmatpush.bf16.msra.mxu0 %v5310_v54  ;;  %1761 = vmatmul.bf16.vlgmr.msrb.gmra.mxu1 %v8163_v41  ;;  %v5485_v53 = vld [vmem:[#allocation7 + $0x448] sm:$0xf]  ;;  %v7267_v54 = vld [vmem:[#allocation7 + $0x454] sm:$0xf0]  ;;  %v5358_v59 = vor.u32 %v7235_v52, %v5357_v50  ;;  %v5822_v33 = vor.u32 %v7351_v21, %v5821_v20  ;;  %v5119_v20 = vld [vmem:[#allocation7 + $0x178] sm:$0xf0] }
  0xad   :  { %1809 = vmatpush.bf16.msra.mxu1 %v5438_v55  ;;  %1747 = vmatmul.bf16.vlgmr.msrb.gmra.mxu0 %v8165_v42  ;;  %v5613_v55 = vld [vmem:[#allocation7 + $0x548] sm:$0xf]  ;;  %v5486_v60 = vor.u32 %v7267_v54, %v5485_v53  ;;  %v7347_v38 = vld [vmem:[#allocation7 + $0x6d4] sm:$0xf0]  ;;  %v7149_v53 = vld [vmem:[#allocation7 + $0xac] sm:$0xf] }
  0xae   :  { %1775 = vmatmul.bf16.vlgmr.msrb.gmra.mxu2 %v8149_v57  ;;  %1789 = vmatmul.bf16.vlgmr.msrb.gmra.mxu3 %v8155_v11  ;;  %v7343_v52 = vld [vmem:[#allocation7 + $0x6b4] sm:$0xf0]  ;;  %v5757_v14 = vld [vmem:[#allocation7 + $0x668] sm:$0xf]  ;;  %v7205_v21 = vld [vmem:[#allocation7 + $0x26c] sm:$0xf] }
  0xaf   :  { %1823 = vmatpush.bf16.msra.mxu2 %v5566_v56  ;;  %1837 = vmatpush.bf16.msra.mxu3 %v5694_v61  ;;  %v7299_v56 = vld [vmem:[#allocation7 + $0x554] sm:$0xf0]  ;;  %v5213_v61 = vld [vmem:[#allocation7 + $0x228] sm:$0xf] }
  0xb0   :  { %1796 = vmatpush.bf16.msra.mxu0 %v5294_v4  ;;  %v5614_v1 = vor.u32 %v7299_v56, %v5613_v55  ;;  %v7263_v4 = vld [vmem:[#allocation7 + $0x434] sm:$0xf0]  ;;  %v5214_v7 = vor.u32 %v7199_v62, %v5213_v61  ;;  %v5023_v55 = vld [vmem:[#allocation7 + $0xb8] sm:$0xf0]  ;;  %v7181_v56 = vld [vmem:[#allocation7 + $0x1ac] sm:$0xf] }
  0xb1   :  { %1810 = vmatpush.bf16.msra.mxu1 %v5422_v5  ;;  %v5597_v5 = vld [vmem:[#allocation7 + $0x528] sm:$0xf]  ;;  %v5470_v12 = vor.u32 %v7263_v4, %v5469_v3  ;;  %v5026_v62 = vor.u32 %v7149_v53, %v5023_v55  ;;  %v7145_v3 = vld [vmem:[#allocation7 + $0x8c] sm:$0xf]  ;;  %v7327_v43 = vld [vmem:[#allocation7 + $0x634] sm:$0xf0] }
  0xb2   :  { %v7323_v53 = vld [vmem:[#allocation7 + $0x614] sm:$0xf0] }
  0xb3   :  { %1824 = vmatpush.bf16.msra.mxu2 %v5550_v6  ;;  %1838 = vmatpush.bf16.msra.mxu3 %v5678_v10  ;;  %v7295_v6 = vld [vmem:[#allocation7 + $0x534] sm:$0xf0]  ;;  %v5342_v10 = vor.u32 %v7231_v2, %v5341_v63 }
  0xb4   :  { %1797 = vmatpush.bf16.msra.mxu0 %v5278_v17  ;;  %v5598_v16 = vor.u32 %v7295_v6, %v5597_v5  ;;  %v7259_v17 = vld [vmem:[#allocation7 + $0x414] sm:$0xf0]  ;;  %v5007_v5 = vld [vmem:[#allocation7 + $0x98] sm:$0xf0]  ;;  %v7177_v6 = vld [vmem:[#allocation7 + $0x18c] sm:$0xf] }
  0xb5   :  { %1811 = vmatpush.bf16.msra.mxu1 %v5406_v18  ;;  %v5581_v18 = vld [vmem:[#allocation7 + $0x508] sm:$0xf]  ;;  %v5454_v29 = vor.u32 %v7259_v17, %v5453_v15  ;;  %v7339_v2 = vld [vmem:[#allocation7 + $0x694] sm:$0xf0] }
  0xb6   :  { %v7335_v15 = vld [vmem:[#allocation7 + $0x674] sm:$0xf0] }
  0xb7   :  { %1825 = vmatpush.bf16.msra.mxu2 %v5534_v19  ;;  %1839 = vmatpush.bf16.msra.mxu3 %v5662_v24  ;;  %v7291_v19 = vld [vmem:[#allocation7 + $0x514] sm:$0xf0]  ;;  %v5198_v24 = vor.u32 %v7195_v9, %v5197_v8  ;;  %v7209_v8 = vld [vmem:[#allocation7 + $0x28c] sm:$0xf]  ;;  %v5263_v9 = vld [vmem:[#allocation7 + $0x298] sm:$0xf0] }
  0xb8   :  { %1798 = vmatpush.bf16.msra.mxu0 %v5262_v30  ;;  %v7221_v30 = vld [vmem:[#allocation7 + $0x2ec] sm:$0xf]  ;;  %v5266_v17 = vor.u32 %v7209_v8, %v5263_v9 }
  0xb9   :  { %1812 = vmatpush.bf16.msra.mxu1 %v5390_v31  ;;  %v5311_v31 = vld [vmem:[#allocation7 + $0x2f8] sm:$0xf0] }
  0xba   :  { %v5314_v40 = vor.u32 %v7221_v30, %v5311_v31  ;;  %v5250_v30 = vor.u32 %v7205_v21, %v5247_v22  ;;  %v4975_v31 = vld [vmem:[#allocation7 + $0x58] sm:$0xf0]  ;;  %v7313_v22 = vld [vmem:[#allocation7 + $0x5cc] sm:$0xf] }
  0xbb   :  { %1826 = vmatpush.bf16.msra.mxu2 %v5518_v32  ;;  %1840 = vmatpush.bf16.msra.mxu3 %v5646_v36  ;;  %v5582_v32 = vor.u32 %v7291_v19, %v5581_v18  ;;  %v5805_v36 = vld [vmem:[#allocation7 + $0x6c8] sm:$0xf]  ;;  %v4991_v18 = vld [vmem:[#allocation7 + $0x78] sm:$0xf0]  ;;  %v7173_v19 = vld [vmem:[#allocation7 + $0x16c] sm:$0xf] }
  0xbc   :  { %1799 = vmatpush.bf16.msra.mxu0 %v5246_v45  ;;  %v5167_v45 = vld [vmem:[#allocation7 + $0x1d8] sm:$0xf0]  ;;  %v5806_v48 = vor.u32 %v7347_v38, %v5805_v36  ;;  %v5122_v26 = vor.u32 %v7173_v19, %v5119_v20  ;;  %v7281_v19 = vld [vmem:[#allocation7 + $0x4cc] sm:$0xf] }
  0xbd   :  { %1813 = vmatpush.bf16.msra.mxu1 %v5374_v46  ;;  %v7217_v46 = vld [vmem:[#allocation7 + $0x2cc] sm:$0xf]  ;;  %v5170_v50 = vor.u32 %v7185_v44, %v5167_v45  ;;  %v5551_v21 = vld [vmem:[#allocation7 + $0x4d8] sm:$0xf0] }
  0xbe   :  { %v7133_v44 = vld [vmem:[#allocation7 + $0x2c] sm:$0xf] }
  0xbf   :  { %1827 = vmatpush.bf16.msra.mxu2 %v5502_v47  ;;  %1841 = vmatpush.bf16.msra.mxu3 %v5630_v51  ;;  %v5295_v47 = vld [vmem:[#allocation7 + $0x2d8] sm:$0xf0]  ;;  %v5789_v51 = vld [vmem:[#allocation7 + $0x6a8] sm:$0xf] }
  0xc0   :  { %1800 = vmatpush.bf16.msra.mxu0 %v5230_v58  ;;  %v5298_v54 = vor.u32 %v7217_v46, %v5295_v47  ;;  %v5151_v58 = vld [vmem:[#allocation7 + $0x1b8] sm:$0xf0]  ;;  %v5790_v61 = vor.u32 %v7343_v52, %v5789_v51  ;;  %v7165_v47 = vld [vmem:[#allocation7 + $0x12c] sm:$0xf]  ;;  %v5709_v52 = vld [vmem:[#allocation7 + $0x608] sm:$0xf] }
  0xc1   :  { %1814 = vmatpush.bf16.msra.mxu1 %v5358_v59  ;;  %v7213_v59 = vld [vmem:[#allocation7 + $0x2ac] sm:$0xf]  ;;  %v5154_v63 = vor.u32 %v7181_v56, %v5151_v58  ;;  %v4959_v46 = vld [vmem:[#allocation7 + $0x38] sm:$0xf0] }
  0xc2   :  { %v7129_v56 = vld [vmem:[#allocation7 + $0xc] sm:$0xf]  ;;  %v4943_v58 = vld [vmem:[#allocation7 + $0x18] sm:$0xf0] }
  0xc3   :  { %1828 = vmatpush.bf16.msra.mxu2 %v5486_v60  ;;  %1842 = vmatpush.bf16.msra.mxu3 %v5614_v1  ;;  %v5279_v60 = vld [vmem:[#allocation7 + $0x2b8] sm:$0xf0]  ;;  %v5773_v1 = vld [vmem:[#allocation7 + $0x688] sm:$0xf]  ;;  %v4946_v8 = vor.u32 %v7129_v56, %v4943_v58  ;;  %v7269_v56 = vld [vmem:[#allocation7 + $0x46c] sm:$0xf] }
  0xc4   :  { %1801 = vmatpush.bf16.msra.mxu0 %v5214_v7  ;;  %v5282_v4 = vor.u32 %v7213_v59, %v5279_v60  ;;  %v5135_v7 = vld [vmem:[#allocation7 + $0x198] sm:$0xf0]  ;;  %v7161_v59 = vld [vmem:[#allocation7 + $0x10c] sm:$0xf] }
  0xc5   :  { %1815 = vmatpush.bf16.msra.mxu1 %v5342_v10  ;;  %v5774_v10 = vor.u32 %v7339_v2, %v5773_v1  ;;  %v5138_v13 = vor.u32 %v7177_v6, %v5135_v7  ;;  %v7253_v1 = vld [vmem:[#allocation7 + $0x3ec] sm:$0xf]  ;;  %v5439_v2 = vld [vmem:[#allocation7 + $0x3f8] sm:$0xf0] }
  0xc6   :  { %v7317_v6 = vld [vmem:[#allocation7 + $0x5ec] sm:$0xf]  ;;  %v5695_v7 = vld [vmem:[#allocation7 + $0x5f8] sm:$0xf0] }
  0xc7   :  { %1829 = vmatpush.bf16.msra.mxu2 %v5470_v12  ;;  %1843 = vmatpush.bf16.msra.mxu3 %v5598_v16  ;;  %v5010_v12 = vor.u32 %v7145_v3, %v5007_v5  ;;  %v7141_v16 = vld [vmem:[#allocation7 + $0x6c] sm:$0xf]  ;;  %v5567_v5 = vld [vmem:[#allocation7 + $0x4f8] sm:$0xf0] }
  0xc8   :  { %1802 = vmatpush.bf16.msra.mxu0 %v5198_v24  ;;  %v5758_v24 = vor.u32 %v7335_v15, %v5757_v14  ;;  %v4994_v25 = vor.u32 %v7141_v16, %v4991_v18  ;;  %v7285_v3 = vld [vmem:[#allocation7 + $0x4ec] sm:$0xf]  ;;  %v5442_v14 = vor.u32 %v7253_v1, %v5439_v2  ;;  %v5698_v16 = vor.u32 %v7317_v6, %v5695_v7  ;;  %v5423_v18 = vld [vmem:[#allocation7 + $0x3d8] sm:$0xf0] }
  0xc9   :  { %1816 = vmatpush.bf16.msra.mxu1 %v5326_v28  ;;  %v7331_v28 = vld [vmem:[#allocation7 + $0x654] sm:$0xf0]  ;;  %v5570_v15 = vor.u32 %v7285_v3, %v5567_v5  ;;  %v5759_v1 = vld [vmem:[#allocation7 + $0x678] sm:$0xf0]  ;;  %v8189_v2 = vpop.f32.mrf.mxu1  ;;  %v7233_v6 = vld [vmem:[#allocation7 + $0x34c] sm:$0xf] }
  0xca   :  { %v5742_v36 = vor.u32 %v7331_v28, %v5741_v27  ;;  %v5554_v28 = vor.u32 %v7281_v19, %v5551_v21  ;;  %v5359_v7 = vld [vmem:[#allocation7 + $0x358] sm:$0xf0]  ;;  %v7229_v19 = vld [vmem:[#allocation7 + $0x32c] sm:$0xf] }
  0xcb   :  { %1830 = vmatpush.bf16.msra.mxu2 %v5454_v29  ;;  %1844 = vmatpush.bf16.msra.mxu3 %v5582_v32  ;;  %v7137_v29 = vld [vmem:[#allocation7 + $0x4c] sm:$0xf] }
  0xcc   :  { %1851 = vmatpush.bf16.msrb.mxu0 %v5822_v33  ;;  %1817 = vmatmul.bf16.vlgmr.msra.gmra.mxu1 %v8158_v23  ;;  %v7169_v32 = vld [vmem:[#allocation7 + $0x14c] sm:$0xf]  ;;  %v5103_v33 = vld [vmem:[#allocation7 + $0x158] sm:$0xf0]  ;;  %v4978_v38 = vor.u32 %v7137_v29, %v4975_v31 }
  0xcd   :  { %1865 = vmatpush.bf16.msrb.mxu1 %v5058_v34  ;;  %1803 = vmatmul.bf16.vlgmr.msra.gmra.mxu0 %v8151_v0  ;;  %v7201_v34 = vld [vmem:[#allocation7 + $0x24c] sm:$0xf]  ;;  %v5106_v39 = vor.u32 %v7169_v32, %v5103_v33  ;;  %v5407_v31 = vld [vmem:[#allocation7 + $0x3b8] sm:$0xf0] }
  0xce   :  { %1831 = vmatmul.bf16.vlgmr.msra.gmra.mxu2 %v8161_v37  ;;  %1845 = vmatmul.bf16.vlgmr.msra.gmra.mxu3 %v8165_v42  ;;  %v7277_v32 = vld [vmem:[#allocation7 + $0x4ac] sm:$0xf] }
  0xcf   :  { %1879 = vmatpush.bf16.msrb.mxu2 %v5186_v35  ;;  %1893 = vmatpush.bf16.msrb.mxu3 %v5314_v40  ;;  %v5231_v35 = vld [vmem:[#allocation7 + $0x258] sm:$0xf0]  ;;  %v5725_v40 = vld [vmem:[#allocation7 + $0x628] sm:$0xf]  ;;  %v7261_v21 = vld [vmem:[#allocation7 + $0x42c] sm:$0xf] }
  0xd0   :  { %1852 = vmatpush.bf16.msrb.mxu0 %v5806_v48  ;;  %v5234_v45 = vor.u32 %v7201_v34, %v5231_v35  ;;  %v5087_v48 = vld [vmem:[#allocation7 + $0x138] sm:$0xf0]  ;;  %v5726_v51 = vor.u32 %v7327_v43, %v5725_v40  ;;  %v7309_v35 = vld [vmem:[#allocation7 + $0x5ac] sm:$0xf] }
  0xd1   :  { %1866 = vmatpush.bf16.msrb.mxu1 %v5042_v49  ;;  %v7197_v49 = vld [vmem:[#allocation7 + $0x22c] sm:$0xf]  ;;  %v5090_v55 = vor.u32 %v7165_v47, %v5087_v48  ;;  %v5535_v34 = vld [vmem:[#allocation7 + $0x4b8] sm:$0xf0] }
  0xd2   :  { %v5538_v43 = vor.u32 %v7277_v32, %v5535_v34  ;;  %v7273_v47 = vld [vmem:[#allocation7 + $0x48c] sm:$0xf] }
  0xd3   :  { %1880 = vmatpush.bf16.msrb.mxu2 %v5170_v50  ;;  %1894 = vmatpush.bf16.msrb.mxu3 %v5298_v54  ;;  %v5215_v50 = vld [vmem:[#allocation7 + $0x238] sm:$0xf0]  ;;  %v4962_v54 = vor.u32 %v7133_v44, %v4959_v46  ;;  %v7225_v32 = vld [vmem:[#allocation7 + $0x30c] sm:$0xf] }
  0xd4   :  { %1853 = vmatpush.bf16.msrb.mxu0 %v5790_v61  ;;  %v5218_v60 = vor.u32 %v7197_v49, %v5215_v50  ;;  %v5071_v61 = vld [vmem:[#allocation7 + $0x118] sm:$0xf0]  ;;  %v7305_v50 = vld [vmem:[#allocation7 + $0x58c] sm:$0xf] }
  0xd5   :  { %1867 = vmatpush.bf16.msrb.mxu1 %v5026_v62  ;;  %v7193_v62 = vld [vmem:[#allocation7 + $0x20c] sm:$0xf]  ;;  %v5074_v9 = vor.u32 %v7161_v59, %v5071_v61  ;;  %v5391_v46 = vld [vmem:[#allocation7 + $0x398] sm:$0xf0] }
  0xd6   :  { %v5519_v49 = vld [vmem:[#allocation7 + $0x498] sm:$0xf0] }
  0xd7   :  { %1881 = vmatpush.bf16.msrb.mxu2 %v5154_v63  ;;  %1895 = vmatpush.bf16.msrb.mxu3 %v5282_v4  ;;  %v5199_v63 = vld [vmem:[#allocation7 + $0x218] sm:$0xf0]  ;;  %v5710_v4 = vor.u32 %v7323_v53, %v5709_v52  ;;  %v5522_v53 = vor.u32 %v7273_v47, %v5519_v49  ;;  %v5885_v49 = vld [vmem:[#allocation10 + $0x70] sm:$0xf] }
  0xd8   :  { %1854 = vmatpush.bf16.msrb.mxu0 %v5774_v10  ;;  %v7349_v10 = vld [vmem:[#allocation7 + $0x6ec] sm:$0xf]  ;;  %v5775_v52 = vld [vmem:[#allocation7 + $0x698] sm:$0xf0] }
  0xd9   :  { %1868 = vmatpush.bf16.msrb.mxu1 %v5010_v12  ;;  %v5823_v12 = vld [vmem:[#allocation7 + $0x6f8] sm:$0xf0] }
  0xda   :  { %v5826_v20 = vor.u32 %v7349_v10, %v5823_v12  ;;  %v5503_v59 = vld [vmem:[#allocation7 + $0x478] sm:$0xf0]  ;;  %v7297_v12 = vld [vmem:[#allocation7 + $0x54c] sm:$0xf] }
  0xdb   :  { %1882 = vmatpush.bf16.msrb.mxu2 %v5138_v13  ;;  %1896 = vmatpush.bf16.msrb.mxu3 %v5266_v17  ;;  %v5202_v13 = vor.u32 %v7193_v62, %v5199_v63  ;;  %v7249_v17 = vld [vmem:[#allocation7 + $0x3cc] sm:$0xf]  ;;  %v5631_v61 = vld [vmem:[#allocation7 + $0x578] sm:$0xf0]  ;;  %v8187_v62 = vpop.f32.mrf.mxu0 }
  0xdc   :  { %1855 = vmatpush.bf16.msrb.mxu0 %v5758_v24  ;;  %v5679_v24 = vld [vmem:[#allocation7 + $0x5d8] sm:$0xf0]  ;;  %v5426_v27 = vor.u32 %v7249_v17, %v5423_v18  ;;  %v7333_v63 = vld [vmem:[#allocation7 + $0x66c] sm:$0xf]  ;;  %v8195_v47 = vpop.f32.mrf.mxu3 }
  0xdd   :  { %1869 = vmatpush.bf16.msrb.mxu1 %v4994_v25  ;;  %v7345_v25 = vld [vmem:[#allocation7 + $0x6cc] sm:$0xf]  ;;  %v5682_v29 = vor.u32 %v7313_v22, %v5679_v24  ;;  %v5487_v10 = vld [vmem:[#allocation7 + $0x458] sm:$0xf0]  ;;  %v8191_v22 = vpop.f32.mrf.mxu2 }
  0xdf   :  { %1883 = vmatpush.bf16.msrb.mxu2 %v5122_v26  ;;  %1897 = vmatpush.bf16.msrb.mxu3 %v5250_v30  ;;  %v5807_v26 = vld [vmem:[#allocation7 + $0x6d8] sm:$0xf0]  ;;  %v7245_v30 = vld [vmem:[#allocation7 + $0x3ac] sm:$0xf] }
  0xe0   :  { %1856 = vmatpush.bf16.msrb.mxu0 %v5742_v36  ;;  %v5810_v33 = vor.u32 %v7345_v25, %v5807_v26  ;;  %v5663_v36 = vld [vmem:[#allocation7 + $0x5b8] sm:$0xf0]  ;;  %v5410_v40 = vor.u32 %v7245_v30, %v5407_v31  ;;  %v7293_v26 = vld [vmem:[#allocation7 + $0x52c] sm:$0xf]  ;;  %v8193_v30 = vld [vmem:[#allocation8] sm:$0xf] }
  0xe1   :  { %1870 = vmatpush.bf16.msrb.mxu1 %v4978_v38  ;;  %v7341_v38 = vld [vmem:[#allocation7 + $0x6ac] sm:$0xf]  ;;  %v5666_v44 = vor.u32 %v7309_v35, %v5663_v36  ;;  %v5471_v25 = vld [vmem:[#allocation7 + $0x438] sm:$0xf0] }
  0xe2   :  { %v5474_v34 = vor.u32 %v7261_v21, %v5471_v25  ;;  %v5327_v36 = vld [vmem:[#allocation7 + $0x318] sm:$0xf0] }
  0xe3   :  { %1884 = vmatpush.bf16.msrb.mxu2 %v5106_v39  ;;  %1898 = vmatpush.bf16.msrb.mxu3 %v5234_v45  ;;  %v5791_v39 = vld [vmem:[#allocation7 + $0x6b8] sm:$0xf0]  ;;  %v7241_v45 = vld [vmem:[#allocation7 + $0x38c] sm:$0xf] }
  0xe4   :  { %1857 = vmatpush.bf16.msrb.mxu0 %v5726_v51  ;;  %v5794_v48 = vor.u32 %v7341_v38, %v5791_v39  ;;  %v7337_v51 = vld [vmem:[#allocation7 + $0x68c] sm:$0xf]  ;;  %v5455_v39 = vld [vmem:[#allocation7 + $0x418] sm:$0xf0] }
  0xe5   :  { %1871 = vmatpush.bf16.msrb.mxu1 %v4962_v54  ;;  %v7237_v54 = vld [vmem:[#allocation7 + $0x36c] sm:$0xf]  ;;  %v5778_v58 = vor.u32 %v7337_v51, %v5775_v52  ;;  %v5949_v51 = vld [vmem:[#allocation10 + $0xf0] sm:$0xf]  ;;  %v7383_v52 = vld [vmem:[#allocation10 + $0xf4] sm:$0xf0] }
  0xe6   :  { %v7257_v38 = vld [vmem:[#allocation7 + $0x40c] sm:$0xf] }
  0xe7   :  { %1885 = vmatpush.bf16.msrb.mxu2 %v5090_v55  ;;  %1899 = vmatpush.bf16.msrb.mxu3 %v5218_v60  ;;  %v5375_v55 = vld [vmem:[#allocation7 + $0x378] sm:$0xf0]  ;;  %v7301_v60 = vld [vmem:[#allocation7 + $0x56c] sm:$0xf] }
  0xe8   :  { %1858 = vmatpush.bf16.msrb.mxu0 %v5710_v4  ;;  %v5378_v3 = vor.u32 %v7237_v54, %v5375_v55  ;;  %v5506_v4 = vor.u32 %v7269_v56, %v5503_v59  ;;  %v5634_v5 = vor.u32 %v7301_v60, %v5631_v61  ;;  %v5877_v56 = vld [vmem:[#allocation10 + $0x60] sm:$0xf]  ;;  %v5950_v59 = vor.u32 %v7383_v52, %v5949_v51  ;;  %v1610_v60 = vpop.f32.mrf.mxu2 }
  0xe9   :  { %1872 = vmatpush.bf16.msrb.mxu1 %v4946_v8  ;;  %v7265_v8 = vld [vmem:[#allocation7 + $0x44c] sm:$0xf]  ;;  %v5941_v61 = vld [vmem:[#allocation10 + $0xe0] sm:$0xf]  ;;  %v408_v52 = vperm.slane %v8193_v30, 1 }
  0xea   :  { %v5490_v17 = vor.u32 %v7265_v8, %v5487_v10  ;;  %v5933_v10 = vld [vmem:[#allocation10 + $0xd0] sm:$0xf] }
  0xeb   :  { %1886 = vmatpush.bf16.msrb.mxu2 %v5074_v9  ;;  %1900 = vmatpush.bf16.msrb.mxu3 %v5202_v13  ;;  %v5762_v9 = vor.u32 %v7333_v63, %v5759_v1  ;;  %v5615_v13 = vld [vmem:[#allocation7 + $0x558] sm:$0xf0]  ;;  %v7381_v63 = vld [vmem:[#allocation10 + $0xe4] sm:$0xf0] }
  0xec   :  { %1907 = vmatpush.bf16.msra.mxu0 %v5442_v14  ;;  %1873 = vmatmul.bf16.vlgmr.msrb.gmra.mxu1 %v8149_v57  ;;  %v7329_v14 = vld [vmem:[#allocation7 + $0x64c] sm:$0xf]  ;;  %v5618_v18 = vor.u32 %v7297_v12, %v5615_v13  ;;  %v5942_v8 = vor.u32 %v7381_v63, %v5941_v61  ;;  %v5893_v61 = vld [vmem:[#allocation10 + $0x80] sm:$0xf] }
  0xed   :  { %1921 = vmatpush.bf16.msra.mxu1 %v5570_v15  ;;  %1859 = vmatmul.bf16.vlgmr.msrb.gmra.mxu0 %v8163_v41  ;;  %v5743_v15 = vld [vmem:[#allocation7 + $0x658] sm:$0xf0]  ;;  %v7369_v63 = vld [vmem:[#allocation10 + $0x84] sm:$0xf0] }
  0xee   :  { %1887 = vmatmul.bf16.vlgmr.msrb.gmra.mxu2 %v8155_v11  ;;  %1901 = vmatmul.bf16.vlgmr.msrb.gmra.mxu3 %v8151_v0  ;;  %v5647_v11 = vld [vmem:[#allocation7 + $0x598] sm:$0xf0]  ;;  %v5394_v0 = vor.u32 %v7241_v45, %v5391_v46  ;;  %v5746_v24 = vor.u32 %v7329_v14, %v5743_v15  ;;  %v7321_v46 = vld [vmem:[#allocation7 + $0x60c] sm:$0xf]  ;;  %v1624_v14 = vpop.f32.mrf.mxu3 }
  0xef   :  { %1935 = vmatpush.bf16.msra.mxu2 %v5698_v16  ;;  %1949 = vmatpush.bf16.msra.mxu3 %v5826_v20  ;;  %v5650_v57 = vor.u32 %v7305_v50, %v5647_v11  ;;  %v5362_v16 = vor.u32 %v7233_v6, %v5359_v7  ;;  %v5343_v20 = vld [vmem:[#allocation7 + $0x338] sm:$0xf0]  ;;  %v5330_v11 = vor.u32 %v7225_v32, %v5327_v36  ;;  %v5869_v6 = vld [vmem:[#allocation10 + $0x50] sm:$0xf]  ;;  %v5909_v36 = vld [vmem:[#allocation10 + $0xa0] sm:$0xf] }
  0xf0   :  { %1908 = vmatpush.bf16.msra.mxu0 %v5426_v27  ;;  %v5599_v27 = vld [vmem:[#allocation7 + $0x538] sm:$0xf0]  ;;  %v5346_v31 = vor.u32 %v7229_v19, %v5343_v20  ;;  %v7377_v19 = vld [vmem:[#allocation10 + $0xc4] sm:$0xf0] }
  0xf1   :  { %1922 = vmatpush.bf16.msra.mxu1 %v5554_v28  ;;  %v7325_v28 = vld [vmem:[#allocation7 + $0x62c] sm:$0xf]  ;;  %v5602_v35 = vor.u32 %v7293_v26, %v5599_v27  ;;  %v5583_v45 = vld [vmem:[#allocation7 + $0x518] sm:$0xf0]  ;;  %v5917_v26 = vld [vmem:[#allocation10 + $0xb0] sm:$0xf] }
  0xf2   :  { %v7367_v50 = vld [vmem:[#allocation10 + $0x74] sm:$0xf0] }
  0xf3   :  { %1936 = vmatpush.bf16.msra.mxu2 %v5682_v29  ;;  %1950 = vmatpush.bf16.msra.mxu3 %v5810_v33  ;;  %v5727_v29 = vld [vmem:[#allocation7 + $0x638] sm:$0xf0]  ;;  %v1582_v33 = vpop.f32.mrf.mxu0  ;;  %v5886_v55 = vor.u32 %v7367_v50, %v5885_v49 }
  0xf4   :  { %1909 = vmatpush.bf16.msra.mxu0 %v5410_v40  ;;  %v1596_v40 = vpop.f32.mrf.mxu1  ;;  %v7363_v7 = vld [vmem:[#allocation10 + $0x54] sm:$0xf0] }
  0xf5   :  { %1923 = vmatpush.bf16.msra.mxu1 %v5538_v43  ;;  %v5730_v43 = vor.u32 %v7325_v28, %v5727_v29  ;;  %v5870_v15 = vor.u32 %v7363_v7, %v5869_v6  ;;  %v7371_v49 = vld [vmem:[#allocation10 + $0x94] sm:$0xf0] }
  0xf7   :  { %1937 = vmatpush.bf16.msra.mxu2 %v5666_v44  ;;  %1951 = vmatpush.bf16.msra.mxu3 %v5794_v48  ;;  %v7289_v44 = vld [vmem:[#allocation7 + $0x50c] sm:$0xf]  ;;  %v5711_v48 = vld [vmem:[#allocation7 + $0x618] sm:$0xf0] }
  0xf8   :  { %1910 = vmatpush.bf16.msra.mxu0 %v5394_v0  ;;  %v407_v0 = vperm.slane %v8193_v30, 0  ;;  %v5714_v54 = vor.u32 %v7321_v46, %v5711_v48  ;;  %v5901_v48 = vld [vmem:[#allocation10 + $0x90] sm:$0xf] }
  0xf9   :  { %1924 = vmatpush.bf16.msra.mxu1 %v5522_v53  ;;  %v5458_v53 = vor.u32 %v7257_v38, %v5455_v39  ;;  %v7373_v38 = vld [vmem:[#allocation10 + $0xa4] sm:$0xf0] }
  0xfa   :  { %v1581_v1 = vadd.f32 %v8187_v62, %v407_v0  ;;  %v7379_v62 = vld [vmem:[#allocation10 + $0xd4] sm:$0xf0]  ;;  %v5910_v46 = vor.u32 %v7373_v38, %v5909_v36 }
  0xfb   :  { %1938 = vmatpush.bf16.msra.mxu2 %v5650_v57  ;;  %1952 = vmatpush.bf16.msra.mxu3 %v5778_v58  ;;  %v5586_v57 = vor.u32 %v7289_v44, %v5583_v45  ;;  %v7365_v58 = vld [vmem:[#allocation10 + $0x64] sm:$0xf0]  ;;  %v5837_v44 = vld [vmem:[#allocation10 + $0x10] sm:$0xf]  ;;  %v7355_v45 = vld [vmem:[#allocation10 + $0x14] sm:$0xf0] }
  0xfc   :  { %1911 = vmatpush.bf16.msra.mxu0 %v5378_v3  ;;  %v1583_v3 = vadd.f32 %v1582_v33, %v407_v0  ;;  %v1595_v12 = vadd.f32 %v8189_v2, %v1581_v1  ;;  %v7359_v2 = vld [vmem:[#allocation10 + $0x34] sm:$0xf0] }
  0xfd   :  { %1925 = vmatpush.bf16.msra.mxu1 %v5506_v4  ;;  %v5878_v4 = vor.u32 %v7365_v58, %v5877_v56  ;;  %v7353_v56 = vld [vmem:[#allocation10 + $0x4] sm:$0xf0]  ;;  %v7366_v58 = vld [vmem:[#allocation10 + $0x74] sm:$0xf] }
  0xfe   :  { %v1597_v13 = vadd.f32 %v1596_v40, %v1583_v3  ;;  %v7382_v3 = vld [vmem:[#allocation10 + $0xf4] sm:$0xf] }
  0xff   :  { %1939 = vmatpush.bf16.msra.mxu2 %v5634_v5  ;;  %1953 = vmatpush.bf16.msra.mxu3 %v5762_v9  ;;  %v1636_v5 = vpop.f32.mrf.mxu0  ;;  %v1650_v9 = vpop.f32.mrf.mxu1 }
 0x100   :  { %1912 = vmatpush.bf16.msra.mxu0 %v5362_v16  ;;  %v7361_v16 = vld [vmem:[#allocation10 + $0x44] sm:$0xf0]  ;;  %v1611_v20 = vadd.f32 %v1610_v60, %v1597_v13  ;;  %v5887_v60 = vld [vmem:[#allocation10 + $0x78] sm:$0xf0] }
 0x101   :  { %1926 = vmatpush.bf16.msra.mxu1 %v5490_v17  ;;  %v5934_v17 = vor.u32 %v7379_v62, %v5933_v10  ;;  %v7364_v10 = vld [vmem:[#allocation10 + $0x64] sm:$0xf]  ;;  %v5879_v62 = vld [vmem:[#allocation10 + $0x68] sm:$0xf0] }
 0x102   :  { %v1625_v28 = vadd.f32 %v1624_v14, %v1611_v20 }
 0x103   :  { %1940 = vmatpush.bf16.msra.mxu2 %v5618_v18  ;;  %1954 = vmatpush.bf16.msra.mxu3 %v5746_v24  ;;  %v5925_v18 = vld [vmem:[#allocation10 + $0xc0] sm:$0xf]  ;;  %v5853_v24 = vld [vmem:[#allocation10 + $0x30] sm:$0xf] }
 0x104   :  { %1913 = vmatpush.bf16.msra.mxu0 %v5346_v31  ;;  %v5926_v25 = vor.u32 %v7377_v19, %v5925_v18  ;;  %v1678_v31 = vpop.f32.mrf.mxu3  ;;  %v5854_v33 = vor.u32 %v7359_v2, %v5853_v24  ;;  %v5882_v19 = vor.u32 %v7364_v10, %v5879_v62  ;;  %v5839_v62 = vld [vmem:[#allocation10 + $0x18] sm:$0xf0] }
 0x105   :  { %1927 = vmatpush.bf16.msra.mxu1 %v5474_v34  ;;  %v5845_v34 = vld [vmem:[#allocation10 + $0x20] sm:$0xf] }
 0x107   :  { %1941 = vmatpush.bf16.msra.mxu2 %v5602_v35  ;;  %1955 = vmatpush.bf16.msra.mxu3 %v5730_v43  ;;  %v1638_v29 = vpop.f32.mrf.mxu0  ;;  %v1652_v32 = vpop.f32.mrf.mxu1 }
 0x108   :  { %1914 = vmatpush.bf16.msra.mxu0 %v5330_v11  ;;  %v1639_v40 = vadd.f32 %v1638_v29, %v1625_v28  ;;  %v7360_v29 = vld [vmem:[#allocation10 + $0x44] sm:$0xf] }
 0x109   :  { %1928 = vmatpush.bf16.msra.mxu1 %v5458_v53  ;;  %v5838_v53 = vor.u32 %v7355_v45, %v5837_v44  ;;  %v7358_v44 = vld [vmem:[#allocation10 + $0x34] sm:$0xf] }
 0x10a   :  { %v1653_v11 = vadd.f32 %v1652_v32, %v1639_v40 }
 0x10b   :  { %1942 = vmatpush.bf16.msra.mxu2 %v5586_v57  ;;  %1956 = vmatpush.bf16.msra.mxu3 %v5714_v54 }
 0x10c   :  { %2365 = vmatpush.bf16.msrb.mxu0 %v5886_v55  ;;  %1929 = vmatmul.bf16.vlgmr.msra.gmra.mxu1 %v8161_v37  ;;  %v1609_v37 = vadd.f32 %v8191_v22, %v1595_v12  ;;  %v7357_v22 = vld [vmem:[#allocation10 + $0x24] sm:$0xf0]  ;;  %v1680_v54 = vpop.f32.mrf.mxu3  ;;  %v5829_v55 = vld [vmem:[#allocation10] sm:$0xf] }
 0x10d   :  { %1915 = vmatmul.bf16.vlgmr.msra.gmra.mxu0 %v8158_v23  ;;  %2379 = vmatpush.bf16.msrb.mxu1 %v5950_v59  ;;  %v5861_v23 = vld [vmem:[#allocation10 + $0x40] sm:$0xf]  ;;  %v5846_v43 = vor.u32 %v7357_v22, %v5845_v34  ;;  %v5902_v59 = vor.u32 %v7371_v49, %v5901_v48  ;;  %v5830_v6 = vor.u32 %v7353_v56, %v5829_v55  ;;  %v5927_v34 = vld [vmem:[#allocation10 + $0xc8] sm:$0xf0]  ;;  %v6013_v22 = vld [vmem:[#allocation10 + $0x170] sm:$0xf] }
 0x10e   :  { %1943 = vmatmul.bf16.vlgmr.msra.gmra.mxu2 %v8165_v42  ;;  %1957 = vmatmul.bf16.vlgmr.msra.gmra.mxu3 %v8163_v41  ;;  %v1664_v42 = vpop.f32.mrf.mxu2  ;;  %v5862_v21 = vor.u32 %v7361_v16, %v5861_v23  ;;  %v7375_v41 = vld [vmem:[#allocation10 + $0xb4] sm:$0xf0]  ;;  %v1623_v27 = vadd.f32 %v8195_v47, %v1609_v37  ;;  %v5943_v23 = vld [vmem:[#allocation10 + $0xe8] sm:$0xf0]  ;;  %v1681_v37 = vadd.f32 %v1680_v54, %v408_v52  ;;  %v6005_v49 = vld [vmem:[#allocation10 + $0x160] sm:$0xf] }
 0x10f   :  { %v5918_v35 = vor.u32 %v7375_v41, %v5917_v26  ;;  %v1692_v51 = vpop.f32.mrf.mxu0  ;;  %v1706_v0 = vpop.f32.mrf.mxu1  ;;  %v5935_v26 = vld [vmem:[#allocation10 + $0xd8] sm:$0xf0]  ;;  %v7356_v56 = vld [vmem:[#allocation10 + $0x24] sm:$0xf] }
 0x110   :  { %2366 = vmatpush.bf16.msrb.mxu0 %v5878_v4  ;;  %v1637_v39 = vadd.f32 %v1636_v5, %v1623_v27  ;;  %v5951_v4 = vld [vmem:[#allocation10 + $0xf8] sm:$0xf0]  ;;  %v1679_v5 = vadd.f32 %v1678_v31, %v408_v52  ;;  %v5863_v31 = vld [vmem:[#allocation10 + $0x48] sm:$0xf0] }
 0x111   :  { %2380 = vmatpush.bf16.msrb.mxu1 %v5942_v8  ;;  %v5890_v8 = vor.u32 %v7366_v58, %v5887_v60  ;;  %v5954_v12 = vor.u32 %v7382_v3, %v5951_v4  ;;  %v5847_v58 = vld [vmem:[#allocation10 + $0x28] sm:$0xf0]  ;;  %v7372_v60 = vld [vmem:[#allocation10 + $0xa4] sm:$0xf] }
 0x112   :  { %v1651_v50 = vadd.f32 %v1650_v9, %v1637_v39  ;;  %v5894_v9 = vor.u32 %v7369_v63, %v5893_v61  ;;  %v1693_v16 = vadd.f32 %v1692_v51, %v1679_v5  ;;  %v5919_v51 = vld [vmem:[#allocation10 + $0xb8] sm:$0xf0]  ;;  %v5911_v61 = vld [vmem:[#allocation10 + $0xa8] sm:$0xf0]  ;;  %v5997_v63 = vld [vmem:[#allocation10 + $0x150] sm:$0xf] }
 0x114   :  { %2367 = vmatpush.bf16.msrb.mxu0 %v5870_v15  ;;  %v1665_v1 = vadd.f32 %v1664_v42, %v1651_v50  ;;  %v7380_v15 = vld [vmem:[#allocation10 + $0xe4] sm:$0xf]  ;;  %v7362_v42 = vld [vmem:[#allocation10 + $0x54] sm:$0xf]  ;;  %v1734_v2 = vpop.f32.mrf.mxu3  ;;  %v1707_v41 = vadd.f32 %v1706_v0, %v1693_v16  ;;  %v7397_v50 = vld [vmem:[#allocation10 + $0x164] sm:$0xf0] }
 0x115   :  { %2381 = vmatpush.bf16.msrb.mxu1 %v5934_v17  ;;  %v5946_v24 = vor.u32 %v7380_v15, %v5943_v23  ;;  %v6006_v52 = vor.u32 %v7397_v50, %v6005_v49  ;;  %v7370_v16 = vld [vmem:[#allocation10 + $0x94] sm:$0xf] }
 0x116   :  { %v1666_v47 = vpop.f32.mrf.mxu2  ;;  %v1963_v13 = vmax.f32 %v1665_v1, 0.0  ;;  %v7395_v1 = vld [vmem:[#allocation10 + $0x154] sm:$0xf0] }
 0x117   :  { %v1667_v57 = vadd.f32 %v1666_v47, %v1653_v11  ;;  %v1694_v18 = vpop.f32.mrf.mxu0  ;;  %v1708_v20 = vpop.f32.mrf.mxu1  ;;  %v5855_v47 = vld [vmem:[#allocation10 + $0x38] sm:$0xf0]  ;;  %v7374_v11 = vld [vmem:[#allocation10 + $0xb4] sm:$0xf]  ;;  %v5998_v4 = vor.u32 %v7395_v1, %v5997_v63  ;;  %v6061_v1 = vld [vmem:[#allocation10 + $0x1d0] sm:$0xf] }
 0x118   :  { %2368 = vmatpush.bf16.msrb.mxu0 %v5862_v21  ;;  %v5871_v21 = vld [vmem:[#allocation10 + $0x58] sm:$0xf0]  ;;  %v1695_v28 = vadd.f32 %v1694_v18, %v1681_v37  ;;  %v5858_v54 = vor.u32 %v7358_v44, %v5855_v47  ;;  %v7396_v47 = vld [vmem:[#allocation10 + $0x164] sm:$0xf] }
 0x119   :  { %2382 = vmatpush.bf16.msrb.mxu1 %v5926_v25  ;;  %v1967_v7 = vmax.f32 %v1667_v57, 0.0  ;;  %v7378_v25 = vld [vmem:[#allocation10 + $0xd4] sm:$0xf]  ;;  %v5874_v27 = vor.u32 %v7362_v42, %v5871_v21  ;;  %v5903_v18 = vld [vmem:[#allocation10 + $0x98] sm:$0xf0] }
 0x11a   :  { %v5938_v32 = vor.u32 %v7378_v25, %v5935_v26  ;;  %v1709_v45 = vadd.f32 %v1708_v20, %v1695_v28  ;;  %v7352_v42 = vld [vmem:[#allocation10 + $0x4] sm:$0xf]  ;;  %v5831_v21 = vld [vmem:[#allocation10 + $0x8] sm:$0xf0]  ;;  %v7391_v25 = vld [vmem:[#allocation10 + $0x134] sm:$0xf0] }
 0x11b   :  { %v8207_v17 = vpack.c.bf16 %v1967_v7, %v1963_v13  ;;  %v7354_v7 = vld [vmem:[#allocation10 + $0x14] sm:$0xf]  ;;  %v5989_v13 = vld [vmem:[#allocation10 + $0x140] sm:$0xf]  ;;  %v6015_v44 = vld [vmem:[#allocation10 + $0x178] sm:$0xf0] }
 0x11c   :  { %2369 = vmatpush.bf16.msrb.mxu0 %v5854_v33  ;;  %v7376_v33 = vld [vmem:[#allocation10 + $0xc4] sm:$0xf]  ;;  %v1736_v57 = vpop.f32.mrf.mxu3 }
 0x11d   :  { %2383 = vmatpush.bf16.msrb.mxu1 %v5918_v35  ;;  %v7399_v35 = vld [vmem:[#allocation10 + $0x174] sm:$0xf0]  ;;  %v5930_v48 = vor.u32 %v7376_v33, %v5927_v34 }
 0x11e   :  { %v1720_v14 = vpop.f32.mrf.mxu2  ;;  %v6014_v38 = vor.u32 %v7399_v35, %v6013_v22  ;;  %v5965_v22 = vld [vmem:[#allocation10 + $0x110] sm:$0xf]  ;;  %v7387_v35 = vld [vmem:[#allocation10 + $0x114] sm:$0xf0] }
 0x11f   :  { %v1721_v36 = vadd.f32 %v1720_v14, %v1707_v41  ;;  %v7393_v14 = vld [vmem:[#allocation10 + $0x144] sm:$0xf0]  ;;  %v7368_v41 = vld [vmem:[#allocation10 + $0x84] sm:$0xf] }
 0x120   :  { %2370 = vmatpush.bf16.msrb.mxu0 %v5846_v43  ;;  %v5866_v43 = vor.u32 %v7360_v29, %v5863_v31  ;;  %2393 = vmatpush.bf16.msrb.mxu2 %v6014_v38  ;;  %v5990_v15 = vor.u32 %v7393_v14, %v5989_v13  ;;  %v5834_v29 = vor.u32 %v7352_v42, %v5831_v21  ;;  %v5973_v31 = vld [vmem:[#allocation10 + $0x120] sm:$0xf]  ;;  %v5975_v13 = vld [vmem:[#allocation10 + $0x128] sm:$0xf0] }
 0x121   :  { %2384 = vmatpush.bf16.msrb.mxu1 %v5910_v46  ;;  %v1735_v0 = vadd.f32 %v1734_v2, %v1721_v36  ;;  %v5981_v2 = vld [vmem:[#allocation10 + $0x130] sm:$0xf]  ;;  %v5966_v36 = vor.u32 %v7387_v35, %v5965_v22  ;;  %v5957_v38 = vld [vmem:[#allocation10 + $0x100] sm:$0xf] }
 0x122   :  { %v5982_v28 = vor.u32 %v7391_v25, %v5981_v2  ;;  %v6037_v25 = vld [vmem:[#allocation10 + $0x1a0] sm:$0xf] }
 0x124   :  { %2371 = vmatpush.bf16.msrb.mxu0 %v5838_v53  ;;  %2394 = vmatpush.bf16.msrb.mxu2 %v6006_v52  ;;  %v7394_v52 = vld [vmem:[#allocation10 + $0x154] sm:$0xf] }
 0x125   :  { %2385 = vmatpush.bf16.msrb.mxu1 %v5902_v59  ;;  %v5922_v59 = vor.u32 %v7374_v11, %v5919_v51  ;;  %v6077_v11 = vld [vmem:[#allocation10 + $0x1f0] sm:$0xf]  ;;  %v7415_v51 = vld [vmem:[#allocation10 + $0x1f4] sm:$0xf0] }
 0x126   :  { %v1722_v39 = vpop.f32.mrf.mxu2 }
 0x127   :  { %v1723_v53 = vadd.f32 %v1722_v39, %v1709_v45  ;;  %v7385_v39 = vld [vmem:[#allocation10 + $0x104] sm:$0xf0] }
 0x128   :  { %2372 = vmatpush.bf16.msrb.mxu0 %v5830_v6  ;;  %v5850_v6 = vor.u32 %v7356_v56, %v5847_v58  ;;  %2395 = vmatpush.bf16.msrb.mxu2 %v5998_v4  ;;  %v7390_v4 = vld [vmem:[#allocation10 + $0x134] sm:$0xf] }
 0x129   :  { %2386 = vmatpush.bf16.msrb.mxu1 %v5894_v9  ;;  %v1762_v46 = vpop.f32.mrf.mxu1  ;;  %v1737_v3 = vadd.f32 %v1736_v57, %v1723_v53  ;;  %v5999_v53 = vld [vmem:[#allocation10 + $0x158] sm:$0xf0]  ;;  %v6069_v57 = vld [vmem:[#allocation10 + $0x1e0] sm:$0xf] }
 0x12a   :  { %v1748_v40 = vpop.f32.mrf.mxu0 }
 0x12b   :  { %2373 = vmatmul.bf16.vlgmr.msrb.gmra.mxu0 %v8207_v17  ;;  %v1749_v55 = vadd.f32 %v1748_v40, %v1735_v0  ;;  %v5958_v40 = vor.u32 %v7385_v39, %v5957_v38  ;;  %v6078_v0 = vor.u32 %v7415_v51, %v6077_v11  ;;  %v6029_v38 = vld [vmem:[#allocation10 + $0x190] sm:$0xf]  ;;  %v7403_v39 = vld [vmem:[#allocation10 + $0x194] sm:$0xf0]  ;;  %v7414_v51 = vld [vmem:[#allocation10 + $0x1f4] sm:$0xf] }
 0x12c   :  { %2421 = vmatpush.bf16.msra.mxu0 %v5890_v8  ;;  %2396 = vmatpush.bf16.msrb.mxu2 %v5990_v15 }
 0x12d   :  { %2435 = vmatpush.bf16.msra.mxu1 %v5954_v12  ;;  %v1763_v8 = vadd.f32 %v1762_v46, %v1749_v55  ;;  %v5914_v12 = vor.u32 %v7372_v60, %v5911_v61  ;;  %2407 = vmatpush.bf16.msrb.mxu3 %v6078_v0  ;;  %v7392_v55 = vld [vmem:[#allocation10 + $0x144] sm:$0xf]  ;;  %v409_v60 = vperm.slane %v8193_v30, 2 }
 0x12f   :  { %v1964_v37 = vmax.f32 %v1763_v8, 0.0  ;;  %v6053_v8 = vld [vmem:[#allocation10 + $0x1c0] sm:$0xf] }
 0x130   :  { %2422 = vmatpush.bf16.msra.mxu0 %v5882_v19  ;;  %v5842_v19 = vor.u32 %v7354_v7, %v5839_v62  ;;  %2397 = vmatpush.bf16.msrb.mxu2 %v5982_v28  ;;  %v5983_v7 = vld [vmem:[#allocation10 + $0x138] sm:$0xf0]  ;;  %v5959_v28 = vld [vmem:[#allocation10 + $0x108] sm:$0xf0] }
 0x131   :  { %2436 = vmatpush.bf16.msra.mxu1 %v5946_v24  ;;  %v1764_v10 = vpop.f32.mrf.mxu1  ;;  %v5906_v24 = vor.u32 %v7370_v16, %v5903_v18  ;;  %v1776_v46 = vpop.f32.mrf.mxu2  ;;  %v5986_v62 = vor.u32 %v7390_v4, %v5983_v7  ;;  %v7407_v16 = vld [vmem:[#allocation10 + $0x1b4] sm:$0xf0]  ;;  %v6055_v7 = vld [vmem:[#allocation10 + $0x1c8] sm:$0xf0] }
 0x132   :  { %v1750_v5 = vpop.f32.mrf.mxu0  ;;  %v1790_v50 = vpop.f32.mrf.mxu3 }
 0x133   :  { %v1751_v9 = vadd.f32 %v1750_v5, %v1737_v3  ;;  %v7411_v3 = vld [vmem:[#allocation10 + $0x1d4] sm:$0xf0] }
 0x134   :  { %2423 = vmatpush.bf16.msra.mxu0 %v5874_v27  ;;  %v5895_v27 = vld [vmem:[#allocation10 + $0x88] sm:$0xf0] }
 0x135   :  { %2437 = vmatpush.bf16.msra.mxu1 %v5938_v32  ;;  %v1765_v23 = vadd.f32 %v1764_v10, %v1751_v9  ;;  %v7389_v32 = vld [vmem:[#allocation10 + $0x124] sm:$0xf0]  ;;  %v5898_v34 = vor.u32 %v7368_v41, %v5895_v27  ;;  %v1777_v10 = vadd.f32 %v1776_v46, %v409_v60  ;;  %v7384_v27 = vld [vmem:[#allocation10 + $0x104] sm:$0xf] }
 0x136   :  { %v5974_v33 = vor.u32 %v7389_v32, %v5973_v31  ;;  %v7409_v9 = vld [vmem:[#allocation10 + $0x1c4] sm:$0xf0] }
 0x137   :  { %v1968_v20 = vmax.f32 %v1765_v23, 0.0  ;;  %v6054_v14 = vor.u32 %v7409_v9, %v6053_v8  ;;  %v6045_v23 = vld [vmem:[#allocation10 + $0x1b0] sm:$0xf] }
 0x138   :  { %2424 = vmatpush.bf16.msra.mxu0 %v5866_v43  ;;  %2398 = vmatpush.bf16.msrb.mxu2 %v5974_v33  ;;  %v7398_v43 = vld [vmem:[#allocation10 + $0x174] sm:$0xf] }
 0x139   :  { %2438 = vmatpush.bf16.msra.mxu1 %v5930_v48  ;;  %v1972_v26 = vpack.c.bf16 %v1968_v20, %v1964_v37  ;;  %v6018_v45 = vor.u32 %v7398_v43, %v6015_v44  ;;  %v6007_v48 = vld [vmem:[#allocation10 + $0x168] sm:$0xf0]  ;;  %v1778_v56 = vpop.f32.mrf.mxu2  ;;  %v5967_v37 = vld [vmem:[#allocation10 + $0x118] sm:$0xf0]  ;;  %v1791_v20 = vadd.f32 %v1790_v50, %v1777_v10  ;;  %v6030_v44 = vor.u32 %v7403_v39, %v6029_v38 }
 0x13a   :  { %v6010_v49 = vor.u32 %v7396_v47, %v6007_v48  ;;  %v1792_v5 = vpop.f32.mrf.mxu3  ;;  %v1779_v42 = vadd.f32 %v1778_v56, %v409_v60  ;;  %v6021_v48 = vld [vmem:[#allocation10 + $0x180] sm:$0xf]  ;;  %v6071_v56 = vld [vmem:[#allocation10 + $0x1e8] sm:$0xf0] }
 0x13b   :  { %2387 = vmatmul.bf16.vlgmr.msrb.gmra.mxu1 %v1972_v26 }
 0x13c   :  { %2425 = vmatpush.bf16.msra.mxu0 %v5858_v54  ;;  %2399 = vmatpush.bf16.msrb.mxu2 %v5966_v36  ;;  %v7413_v54 = vld [vmem:[#allocation10 + $0x1e4] sm:$0xf0] }
 0x13d   :  { %2439 = vmatpush.bf16.msra.mxu1 %v5922_v59  ;;  %v6070_v58 = vor.u32 %v7413_v54, %v6069_v57  ;;  %v5991_v59 = vld [vmem:[#allocation10 + $0x148] sm:$0xf0] }
 0x13e   :  { %v5994_v61 = vor.u32 %v7392_v55, %v5991_v59  ;;  %v7412_v55 = vld [vmem:[#allocation10 + $0x1e4] sm:$0xf] }
 0x13f   :  { %2408 = vmatpush.bf16.msrb.mxu3 %v6070_v58  ;;  %v6074_v59 = vor.u32 %v7412_v55, %v6071_v56 }
 0x140   :  { %2426 = vmatpush.bf16.msra.mxu0 %v5850_v6  ;;  %2400 = vmatpush.bf16.msrb.mxu2 %v5958_v40  ;;  %v6062_v6 = vor.u32 %v7411_v3, %v6061_v1  ;;  %v6063_v1 = vld [vmem:[#allocation10 + $0x1d8] sm:$0xf0] }
 0x141   :  { %2440 = vmatpush.bf16.msra.mxu1 %v5914_v12  ;;  %v7388_v12 = vld [vmem:[#allocation10 + $0x124] sm:$0xf] }
 0x142   :  { %v5978_v15 = vor.u32 %v7388_v12, %v5975_v13  ;;  %v6047_v12 = vld [vmem:[#allocation10 + $0x1b8] sm:$0xf0]  ;;  %v410_v13 = vperm.slane %v8193_v30, 3 }
 0x143   :  { %2409 = vmatpush.bf16.msrb.mxu3 %v6062_v6  ;;  %v7408_v6 = vld [vmem:[#allocation10 + $0x1c4] sm:$0xf] }
 0x144   :  { %2427 = vmatpush.bf16.msra.mxu0 %v5842_v19  ;;  %2449 = vmatpush.bf16.msra.mxu2 %v6018_v45  ;;  %v7386_v19 = vld [vmem:[#allocation10 + $0x114] sm:$0xf]  ;;  %v6058_v8 = vor.u32 %v7408_v6, %v6055_v7  ;;  %v7443_v6 = vld [vmem:[#allocation13 + $0xd4] sm:$0xf0] }
 0x145   :  { %2441 = vmatpush.bf16.msra.mxu1 %v5906_v24  ;;  %v6046_v24 = vor.u32 %v7407_v16, %v6045_v23  ;;  %v5970_v2 = vor.u32 %v7386_v19, %v5967_v37  ;;  %v6039_v23 = vld [vmem:[#allocation10 + $0x1a8] sm:$0xf0] }
 0x147   :  { %2410 = vmatpush.bf16.msrb.mxu3 %v6054_v14 }
 0x148   :  { %2428 = vmatpush.bf16.msra.mxu0 %v5834_v29  ;;  %2450 = vmatpush.bf16.msra.mxu2 %v6010_v49  ;;  %v1793_v29 = vadd.f32 %v1792_v5, %v1779_v42  ;;  %v7401_v49 = vld [vmem:[#allocation10 + $0x184] sm:$0xf0]  ;;  %v6031_v42 = vld [vmem:[#allocation10 + $0x198] sm:$0xf0] }
 0x149   :  { %2442 = vmatpush.bf16.msra.mxu1 %v5898_v34  ;;  %v1818_v18 = vpop.f32.mrf.mxu1  ;;  %v5962_v34 = vor.u32 %v7384_v27, %v5959_v28  ;;  %v6022_v11 = vor.u32 %v7401_v49, %v6021_v48  ;;  %v6023_v27 = vld [vmem:[#allocation10 + $0x188] sm:$0xf0] }
 0x14a   :  { %v1804_v63 = vpop.f32.mrf.mxu0 }
 0x14b   :  { %2429 = vmatmul.bf16.vlgmr.msra.gmra.mxu0 %v8207_v17  ;;  %v6002_v17 = vor.u32 %v7394_v52, %v5999_v53  ;;  %v1805_v31 = vadd.f32 %v1804_v63, %v1791_v20  ;;  %2411 = vmatpush.bf16.msrb.mxu3 %v6046_v24  ;;  %v6079_v52 = vld [vmem:[#allocation10 + $0x1f8] sm:$0xf0]  ;;  %v7410_v63 = vld [vmem:[#allocation10 + $0x1d4] sm:$0xf] }
 0x14c   :  { %2443 = vmatmul.bf16.vlgmr.msra.gmra.mxu1 %v1972_v26  ;;  %v7405_v26 = vld [vmem:[#allocation10 + $0x1a4] sm:$0xf0]  ;;  %v6082_v53 = vor.u32 %v7414_v51, %v6079_v52  ;;  %v6066_v4 = vor.u32 %v7410_v63, %v6063_v1  ;;  %v7402_v20 = vld [vmem:[#allocation10 + $0x194] sm:$0xf]  ;;  %v6197_v51 = vld [vmem:[#allocation13 + $0xe0] sm:$0xf] }
 0x14d   :  { %2451 = vmatpush.bf16.msra.mxu2 %v6002_v17  ;;  %v6038_v33 = vor.u32 %v7405_v26, %v6037_v25  ;;  %v1819_v22 = vadd.f32 %v1818_v18, %v1805_v31  ;;  %v7446_v52 = vld [vmem:[#allocation13 + $0xec] sm:$0xf0]  ;;  %v7440_v1 = vld [vmem:[#allocation13 + $0xc4] sm:$0xf] }
 0x14e   :  { %v7442_v63 = vld [vmem:[#allocation13 + $0xcc] sm:$0xf0] }
 0x14f   :  { %2412 = vmatpush.bf16.msrb.mxu3 %v6038_v33 }
 0x151   :  { %2452 = vmatpush.bf16.msra.mxu2 %v5994_v61  ;;  %v1832_v21 = vpop.f32.mrf.mxu2  ;;  %v1846_v32 = vpop.f32.mrf.mxu3 }
 0x152   :  { %v1806_v41 = vpop.f32.mrf.mxu0  ;;  %v1820_v36 = vpop.f32.mrf.mxu1  ;;  %v1833_v45 = vadd.f32 %v1832_v21, %v1819_v22  ;;  %v7400_v21 = vld [vmem:[#allocation10 + $0x184] sm:$0xf] }
 0x153   :  { %v1807_v35 = vadd.f32 %v1806_v41, %v1793_v29  ;;  %2413 = vmatpush.bf16.msrb.mxu3 %v6030_v44  ;;  %v6034_v41 = vor.u32 %v7402_v20, %v6031_v42  ;;  %v6026_v30 = vor.u32 %v7400_v21, %v6023_v27  ;;  %v7439_v20 = vld [vmem:[#allocation13 + $0xb4] sm:$0xf0]  ;;  %v6149_v27 = vld [vmem:[#allocation13 + $0x80] sm:$0xf] }
 0x154   :  { %v1847_v0 = vadd.f32 %v1846_v32, %v1833_v45 }
 0x155   :  { %2453 = vmatpush.bf16.msra.mxu2 %v5986_v62  ;;  %v1821_v46 = vadd.f32 %v1820_v36, %v1807_v35  ;;  %v7406_v62 = vld [vmem:[#allocation10 + $0x1b4] sm:$0xf] }
 0x156   :  { %v6050_v14 = vor.u32 %v7406_v62, %v6047_v12  ;;  %v8213_v62 = vld [vmem:[#allocation11] sm:$0x3] }
 0x157   :  { %2414 = vmatpush.bf16.msrb.mxu3 %v6022_v11 }
 0x159   :  { %2454 = vmatpush.bf16.msra.mxu2 %v5978_v15  ;;  %v1834_v40 = vpop.f32.mrf.mxu2  ;;  %v1848_v50 = vpop.f32.mrf.mxu3  ;;  %v7404_v15 = vld [vmem:[#allocation10 + $0x1a4] sm:$0xf] }
 0x15a   :  { %v1835_v47 = vadd.f32 %v1834_v40, %v1821_v46  ;;  %v6042_v16 = vor.u32 %v7404_v15, %v6039_v23  ;;  %v7436_v15 = vld [vmem:[#allocation13 + $0xa4] sm:$0xf] }
 0x15b   :  { %2463 = vmatpush.bf16.msra.mxu3 %v6082_v53  ;;  %v6198_v53 = vor.u32 %v7446_v52, %v6197_v51  ;;  %v7429_v51 = vld [vmem:[#allocation13 + $0x6c] sm:$0xf]  ;;  %v6143_v52 = vld [vmem:[#allocation13 + $0x78] sm:$0xf0] }
 0x15c   :  { %v1849_v17 = vadd.f32 %v1848_v50, %v1835_v47 }
 0x15d   :  { %2455 = vmatpush.bf16.msra.mxu2 %v5970_v2  ;;  %2692 = vmatpush.bf16.msrb.mxu0 %v6198_v53 }
 0x15f   :  { %2464 = vmatpush.bf16.msra.mxu3 %v6074_v59  ;;  %v6207_v59 = vld [vmem:[#allocation13 + $0xf8] sm:$0xf0] }
 0x161   :  { %2456 = vmatpush.bf16.msra.mxu2 %v5962_v34 }
 0x163   :  { %2465 = vmatpush.bf16.msra.mxu3 %v6066_v4  ;;  %v6183_v4 = vld [vmem:[#allocation13 + $0xd0] sm:$0xf0] }
 0x164   :  { %v6186_v7 = vor.u32 %v7440_v1, %v6183_v4  ;;  %v7427_v4 = vld [vmem:[#allocation13 + $0x54] sm:$0xf0] }
 0x167   :  { %2466 = vmatpush.bf16.msra.mxu3 %v6058_v8 }
 0x169   :  { %v1874_v5 = vpop.f32.mrf.mxu1 }
 0x16a   :  { %v1860_v43 = vpop.f32.mrf.mxu0  ;;  %v1875_v19 = vadd.f32 %v1874_v5, %v410_v13  ;;  %v6189_v5 = vld [vmem:[#allocation13 + $0xc8] sm:$0xf] }
 0x16b   :  { %v1861_v57 = vadd.f32 %v1860_v43, %v1847_v0  ;;  %2467 = vmatpush.bf16.msra.mxu3 %v6050_v14  ;;  %v7444_v0 = vld [vmem:[#allocation13 + $0xe4] sm:$0xf]  ;;  %v6190_v8 = vor.u32 %v7443_v6, %v6189_v5  ;;  %v7438_v14 = vld [vmem:[#allocation13 + $0xac] sm:$0xf0]  ;;  %v7425_v5 = vld [vmem:[#allocation13 + $0x4c] sm:$0xf] }
 0x16c   :  { %v6127_v6 = vld [vmem:[#allocation13 + $0x58] sm:$0xf0] }
 0x16d   :  { %v1965_v60 = vmax.f32 %v1861_v57, 0.0  ;;  %v6205_v57 = vld [vmem:[#allocation13 + $0xe8] sm:$0xf] }
 0x16f   :  { %2468 = vmatpush.bf16.msra.mxu3 %v6042_v16 }
 0x171   :  { %v1888_v9 = vpop.f32.mrf.mxu2  ;;  %v1902_v10 = vpop.f32.mrf.mxu3 }
 0x172   :  { %v1862_v54 = vpop.f32.mrf.mxu0  ;;  %v1876_v18 = vpop.f32.mrf.mxu1  ;;  %v1889_v24 = vadd.f32 %v1888_v9, %v1875_v19  ;;  %v7441_v9 = vld [vmem:[#allocation13 + $0xcc] sm:$0xf]  ;;  %v6167_v19 = vld [vmem:[#allocation13 + $0xb0] sm:$0xf0] }
 0x173   :  { %v1863_v58 = vadd.f32 %v1862_v54, %v1849_v17  ;;  %v1877_v2 = vadd.f32 %v1876_v18, %v410_v13  ;;  %2469 = vmatpush.bf16.msra.mxu3 %v6034_v41  ;;  %v6199_v17 = vld [vmem:[#allocation13 + $0xf0] sm:$0xf0]  ;;  %v7447_v54 = vld [vmem:[#allocation13 + $0xf4] sm:$0xf0]  ;;  %v6165_v13 = vld [vmem:[#allocation13 + $0xa0] sm:$0xf]  ;;  %v6170_v42 = vor.u32 %v7436_v15, %v6167_v19 }
 0x174   :  { %v1903_v29 = vadd.f32 %v1902_v10, %v1889_v24  ;;  %v6202_v55 = vor.u32 %v7444_v0, %v6199_v17  ;;  %v6206_v56 = vor.u32 %v7447_v54, %v6205_v57  ;;  %v6191_v10 = vld [vmem:[#allocation13 + $0xd8] sm:$0xf0]  ;;  %v6166_v18 = vor.u32 %v7438_v14, %v6165_v13  ;;  %v7437_v24 = vld [vmem:[#allocation13 + $0xac] sm:$0xf]  ;;  %v6117_v54 = vld [vmem:[#allocation13 + $0x40] sm:$0xf] }
 0x175   :  { %v1969_v61 = vmax.f32 %v1863_v58, 0.0  ;;  %v7445_v58 = vld [vmem:[#allocation13 + $0xec] sm:$0xf]  ;;  %v6194_v12 = vor.u32 %v7441_v9, %v6191_v10  ;;  %v2041_v41 = vperm.slane %v8213_v62, 0  ;;  %v6146_v17 = vor.u32 %v7429_v51, %v6143_v52  ;;  %v7422_v13 = vld [vmem:[#allocation13 + $0x2c] sm:$0xf0] }
 0x176   :  { %2706 = vmatpush.bf16.msrb.mxu1 %v6202_v55  ;;  %v7426_v55 = vld [vmem:[#allocation13 + $0x4c] sm:$0xf0]  ;;  %v2042_v10 = vperm.slane %v8213_v62, 1  ;;  %v7420_v15 = vld [vmem:[#allocation13 + $0x24] sm:$0xf] }
 0x177   :  { %v1973_v3 = vpack.c.bf16 %v1969_v61, %v1965_v60  ;;  %2470 = vmatpush.bf16.msra.mxu3 %v6026_v30  ;;  %v6210_v60 = vor.u32 %v7445_v58, %v6207_v59  ;;  %v6181_v61 = vld [vmem:[#allocation13 + $0xc0] sm:$0xf]  ;;  %v7434_v30 = vld [vmem:[#allocation13 + $0x8c] sm:$0xf0]  ;;  %v6118_v59 = vor.u32 %v7426_v55, %v6117_v54  ;;  %v6801_v62 = vld [vmem:[#allocation16 + $0x498] sm:$0xf] }
 0x179   :  { %2401 = vmatmul.bf16.vlgmr.msrb.gmra.mxu2 %v1973_v3  ;;  %v1890_v37 = vpop.f32.mrf.mxu2  ;;  %v1904_v25 = vpop.f32.mrf.mxu3 }
 0x17a   :  { %v1891_v31 = vadd.f32 %v1890_v37, %v1877_v2  ;;  %2720 = vmatpush.bf16.msrb.mxu2 %v6206_v56  ;;  %2707 = vmatpush.bf16.msrb.mxu1 %v6186_v7  ;;  %v6173_v37 = vld [vmem:[#allocation13 + $0xa8] sm:$0xf]  ;;  %v6175_v2 = vld [vmem:[#allocation13 + $0xb8] sm:$0xf0] }
 0x17b   :  { %v6174_v21 = vor.u32 %v7439_v20, %v6173_v37  ;;  %v7423_v37 = vld [vmem:[#allocation13 + $0x34] sm:$0xf0]  ;;  %v7421_v20 = vld [vmem:[#allocation13 + $0x2c] sm:$0xf] }
 0x17c   :  { %v1905_v34 = vadd.f32 %v1904_v25, %v1891_v31  ;;  %v6151_v31 = vld [vmem:[#allocation13 + $0x90] sm:$0xf0] }
 0x17e   :  { %2721 = vmatpush.bf16.msrb.mxu2 %v6190_v8  ;;  %2708 = vmatpush.bf16.msrb.mxu1 %v6170_v42  ;;  %v6130_v8 = vor.u32 %v7425_v5, %v6127_v6  ;;  %v6111_v42 = vld [vmem:[#allocation13 + $0x38] sm:$0xf0]  ;;  %v7486_v5 = vld [vmem:[#allocation16 + $0x130] sm:$0xf0] }
 0x17f   :  { %v6577_v6 = vld [vmem:[#allocation16 + $0x2d8] sm:$0xf] }
 0x182   :  { %2722 = vmatpush.bf16.msrb.mxu2 %v6174_v21 }
 0x189   :  { %2457 = vmatmul.bf16.vlgmr.msra.gmra.mxu2 %v1973_v3  ;;  %v1930_v28 = vpop.f32.mrf.mxu1  ;;  %v6182_v3 = vor.u32 %v7442_v63, %v6181_v61  ;;  %v6119_v61 = vld [vmem:[#allocation13 + $0x50] sm:$0xf0]  ;;  %v6125_v63 = vld [vmem:[#allocation13 + $0x48] sm:$0xf] }
 0x18a   :  { %v1916_v26 = vpop.f32.mrf.mxu0  ;;  %v6126_v7 = vor.u32 %v7427_v4, %v6125_v63  ;;  %v6353_v4 = vld [vmem:[#allocation16 + $0x118] sm:$0xf] }
 0x18b   :  { %v1917_v32 = vadd.f32 %v1916_v26, %v1903_v29  ;;  %2693 = vmatpush.bf16.msrb.mxu0 %v6182_v3  ;;  %v6178_v26 = vor.u32 %v7437_v24, %v6175_v2  ;;  %v7432_v29 = vld [vmem:[#allocation13 + $0x84] sm:$0xf]  ;;  %v6114_v2 = vor.u32 %v7421_v20, %v6111_v42  ;;  %v7479_v42 = vld [vmem:[#allocation16 + $0xf8] sm:$0xf0] }
 0x18c   :  { %v6325_v20 = vld [vmem:[#allocation16 + $0xe0] sm:$0xf] }
 0x18d   :  { %v1931_v36 = vadd.f32 %v1930_v28, %v1917_v32  ;;  %v6150_v28 = vor.u32 %v7434_v30, %v6149_v27  ;;  %v6157_v32 = vld [vmem:[#allocation13 + $0x88] sm:$0xf] }
 0x18f   :  { %2694 = vmatpush.bf16.msrb.mxu0 %v6166_v18 }
 0x191   :  { %v1944_v33 = vpop.f32.mrf.mxu2  ;;  %v1958_v22 = vpop.f32.mrf.mxu3 }
 0x192   :  { %v1918_v35 = vpop.f32.mrf.mxu0  ;;  %v1945_v39 = vadd.f32 %v1944_v33, %v1931_v36  ;;  %v1932_v40 = vpop.f32.mrf.mxu1  ;;  %v6154_v33 = vor.u32 %v7432_v29, %v6151_v31  ;;  %v6093_v29 = vld [vmem:[#allocation13 + $0x8] sm:$0xf]  ;;  %v7419_v31 = vld [vmem:[#allocation13 + $0x14] sm:$0xf0] }
 0x193   :  { %v1919_v38 = vadd.f32 %v1918_v35, %v1905_v34  ;;  %v7435_v34 = vld [vmem:[#allocation13 + $0x94] sm:$0xf0]  ;;  %v6159_v35 = vld [vmem:[#allocation13 + $0x98] sm:$0xf0]  ;;  %2695 = vmatpush.bf16.msrb.mxu0 %v6150_v28  ;;  %v6087_v28 = vld [vmem:[#allocation13 + $0x10] sm:$0xf0] }
 0x194   :  { %v1959_v45 = vadd.f32 %v1958_v22, %v1945_v39  ;;  %v7433_v22 = vld [vmem:[#allocation13 + $0x8c] sm:$0xf]  ;;  %v6158_v36 = vor.u32 %v7435_v34, %v6157_v32  ;;  %2709 = vmatpush.bf16.msrb.mxu1 %v6154_v33 }
 0x195   :  { %v1933_v43 = vadd.f32 %v1932_v40, %v1919_v38  ;;  %v6162_v38 = vor.u32 %v7433_v22, %v6159_v35  ;;  %v6133_v40 = vld [vmem:[#allocation13 + $0x60] sm:$0xf]  ;;  %v6094_v22 = vor.u32 %v7419_v31, %v6093_v29  ;;  %v7417_v35 = vld [vmem:[#allocation13 + $0xc] sm:$0xf] }
 0x196   :  { %v1966_v49 = vmax.f32 %v1959_v45, 0.0  ;;  %2723 = vmatpush.bf16.msrb.mxu2 %v6158_v36  ;;  %v6095_v36 = vld [vmem:[#allocation13 + $0x18] sm:$0xf0] }
 0x199   :  { %v1946_v44 = vpop.f32.mrf.mxu2  ;;  %v1960_v47 = vpop.f32.mrf.mxu3 }
 0x19a   :  { %v1947_v46 = vadd.f32 %v1946_v44, %v1933_v43  ;;  %v7430_v43 = vld [vmem:[#allocation13 + $0x6c] sm:$0xf0]  ;;  %v7428_v44 = vld [vmem:[#allocation13 + $0x64] sm:$0xf] }
 0x19b   :  { %v6134_v45 = vor.u32 %v7430_v43, %v6133_v40 }
 0x19c   :  { %v1961_v48 = vadd.f32 %v1960_v47, %v1947_v46  ;;  %v6135_v46 = vld [vmem:[#allocation13 + $0x70] sm:$0xf0]  ;;  %v6141_v47 = vld [vmem:[#allocation13 + $0x68] sm:$0xf] }
 0x19d   :  { %2696 = vmatpush.bf16.msrb.mxu0 %v6134_v45  ;;  %v6409_v45 = vld [vmem:[#allocation16 + $0x188] sm:$0xf] }
 0x19e   :  { %v1970_v50 = vmax.f32 %v1961_v48, 0.0  ;;  %v7431_v48 = vld [vmem:[#allocation13 + $0x74] sm:$0xf0] }
 0x1a0   :  { %v1974_v11 = vpack.c.bf16 %v1970_v50, %v1966_v49  ;;  %v6138_v50 = vor.u32 %v7428_v44, %v6135_v46  ;;  %v7500_v46 = vld [vmem:[#allocation16 + $0x1a0] sm:$0xf0] }
 0x1a1   :  { %2697 = vmatpush.bf16.msrb.mxu0 %v6118_v59  ;;  %v7668_v59 = vld [vmem:[#allocation16 + $0x6e0] sm:$0xf0] }
 0x1a2   :  { %2415 = vmatmul.bf16.vlgmr.msrb.gmra.mxu3 %v1974_v11  ;;  %2710 = vmatpush.bf16.msrb.mxu1 %v6138_v50  ;;  %v6381_v50 = vld [vmem:[#allocation16 + $0x150] sm:$0xf] }
 0x1a3   :  { %2734 = vmatpush.bf16.msrb.mxu3 %v6210_v60  ;;  %v7424_v60 = vld [vmem:[#allocation13 + $0x44] sm:$0xf] }
 0x1a4   :  { %v6122_v3 = vor.u32 %v7424_v60, %v6119_v61 }
 0x1a6   :  { %2711 = vmatpush.bf16.msrb.mxu1 %v6122_v3 }
 0x1a7   :  { %2735 = vmatpush.bf16.msrb.mxu3 %v6194_v12  ;;  %v6101_v12 = vld [vmem:[#allocation13 + $0x20] sm:$0xf] }
 0x1a8   :  { %v2374_v23 = vpop.f32.mrf.mxu0  ;;  %v6102_v14 = vor.u32 %v7422_v13, %v6101_v12  ;;  %v7605_v12 = vld [vmem:[#allocation16 + $0x4e8] sm:$0xf0] }
 0x1a9   :  { %v2375_v39 = vadd.f32 %v2374_v23, %v2041_v41  ;;  %v6103_v23 = vld [vmem:[#allocation13 + $0x30] sm:$0xf0] }
 0x1aa   :  { %v6106_v19 = vor.u32 %v7420_v15, %v6103_v23  ;;  %2698 = vmatpush.bf16.msrb.mxu0 %v6102_v14  ;;  %v7053_v23 = vld [vmem:[#allocation16 + $0x690] sm:$0xf] }
 0x1ab   :  { %2736 = vmatpush.bf16.msrb.mxu3 %v6178_v26  ;;  %v7418_v26 = vld [vmem:[#allocation13 + $0xc] sm:$0xf0] }
 0x1ac   :  { %2712 = vmatpush.bf16.msrb.mxu1 %v6106_v19  ;;  %v6354_v19 = vor.u32 %v7486_v5, %v6353_v4  ;;  %v2483_v5 = vld [vmem:[#allocation5] sm:$0xff] }
 0x1af   :  { %2737 = vmatpush.bf16.msrb.mxu3 %v6162_v38 }
 0x1b0   :  { %v2376_v0 = vpop.f32.mrf.mxu0 }
 0x1b1   :  { %v2377_v9 = vadd.f32 %v2376_v0, %v2041_v41  ;;  %v7416_v41 = vld [vmem:[#allocation13 + $0x4] sm:$0xf]  ;;  %v6605_v0 = vld [vmem:[#allocation16 + $0x310] sm:$0xf] }
 0x1b2   :  { %2471 = vmatmul.bf16.vlgmr.msra.gmra.mxu3 %v1974_v11  ;;  %v6142_v11 = vor.u32 %v7431_v48, %v6141_v47  ;;  %v6090_v34 = vor.u32 %v7416_v41, %v6087_v28  ;;  %v6633_v47 = vld [vmem:[#allocation16 + $0x348] sm:$0xf]  ;;  %v6410_v48 = vor.u32 %v7500_v46, %v6409_v45  ;;  %v7654_v41 = vld [vmem:[#allocation16 + $0x670] sm:$0xf0]  ;;  %v7528_v45 = vld [vmem:[#allocation16 + $0x280] sm:$0xf0] }
 0x1b3   :  { %2738 = vmatpush.bf16.msrb.mxu3 %v6146_v17  ;;  %v6857_v17 = vld [vmem:[#allocation16 + $0x508] sm:$0xf] }
 0x1b4   :  { %2724 = vmatpush.bf16.msrb.mxu2 %v6142_v11  ;;  %2713 = vmatpush.bf16.msrb.mxu1 %v6090_v34  ;;  %v7493_v11 = vld [vmem:[#allocation16 + $0x168] sm:$0xf0]  ;;  %v6773_v34 = vld [vmem:[#allocation16 + $0x460] sm:$0xf] }
 0x1b5   :  { %v6382_v55 = vor.u32 %v7493_v11, %v6381_v50  ;;  %v7584_v11 = vld [vmem:[#allocation16 + $0x440] sm:$0xf0] }
 0x1b7   :  { %2739 = vmatpush.bf16.msrb.mxu3 %v6130_v8  ;;  %v7542_v8 = vld [vmem:[#allocation16 + $0x2f0] sm:$0xf0] }
 0x1b8   :  { %v2388_v16 = vpop.f32.mrf.mxu1  ;;  %2725 = vmatpush.bf16.msrb.mxu2 %v6126_v7 }
 0x1b9   :  { %v2389_v49 = vadd.f32 %v2388_v16, %v2375_v39  ;;  %v6109_v16 = vld [vmem:[#allocation13 + $0x28] sm:$0xf]  ;;  %v6098_v39 = vor.u32 %v7417_v35, %v6095_v36 }
 0x1ba   :  { %v6110_v24 = vor.u32 %v7423_v37, %v6109_v16  ;;  %v7661_v16 = vld [vmem:[#allocation16 + $0x6a8] sm:$0xf0] }
 0x1bb   :  { %2740 = vmatpush.bf16.msrb.mxu3 %v6114_v2  ;;  %v7054_v37 = vor.u32 %v7661_v16, %v7053_v23  ;;  %v6549_v2 = vld [vmem:[#allocation16 + $0x2a0] sm:$0xf]  ;;  %v6689_v23 = vld [vmem:[#allocation16 + $0x3b8] sm:$0xf] }
 0x1bc   :  { %2726 = vmatpush.bf16.msrb.mxu2 %v6110_v24  ;;  %v6578_v24 = vor.u32 %v7542_v8, %v6577_v6  ;;  %v7458_v8 = vld [vmem:[#allocation16 + $0x50] sm:$0xf0] }
 0x1bf   :  { %2741 = vmatpush.bf16.msrb.mxu3 %v6098_v39  ;;  %v7472_v39 = vld [vmem:[#allocation16 + $0xc0] sm:$0xf0] }
 0x1c0   :  { %v2390_v53 = vpop.f32.mrf.mxu1  ;;  %2727 = vmatpush.bf16.msrb.mxu2 %v6094_v22  ;;  %v7591_v22 = vld [vmem:[#allocation16 + $0x478] sm:$0xf0] }
 0x1c1   :  { %v2391_v18 = vadd.f32 %v2390_v53, %v2377_v9  ;;  %v7549_v53 = vld [vmem:[#allocation16 + $0x328] sm:$0xf0]  ;;  %v6829_v9 = vld [vmem:[#allocation16 + $0x4d0] sm:$0xf] }
 0x1c2   :  { %v6606_v61 = vor.u32 %v7549_v53, %v6605_v0  ;;  %v6830_v15 = vor.u32 %v7605_v12, %v6829_v9  ;;  %v6465_v9 = vld [vmem:[#allocation16 + $0x1f8] sm:$0xf]  ;;  %v7514_v12 = vld [vmem:[#allocation16 + $0x210] sm:$0xf0] }
 0x1c8   :  { %v2430_v21 = vpop.f32.mrf.mxu0 }
 0x1c9   :  { %v2444_v32 = vpop.f32.mrf.mxu1  ;;  %v2431_v43 = vadd.f32 %v2430_v21, %v2042_v10 }
 0x1cb   :  { %v2445_v44 = vadd.f32 %v2444_v32, %v2431_v43  ;;  %v6326_v32 = vor.u32 %v7479_v42, %v6325_v20  ;;  %v7647_v43 = vld [vmem:[#allocation16 + $0x638] sm:$0xf0]  ;;  %v7626_v20 = vld [vmem:[#allocation16 + $0x590] sm:$0xf0] }
 0x1d1   :  { %v2446_v7 = vpop.f32.mrf.mxu1 }
 0x1fc   :  { %v2402_v25 = vpop.f32.mrf.mxu2 }
 0x1fd   :  { %v2403_v57 = vadd.f32 %v2402_v25, %v2389_v49  ;;  %v6085_v25 = vld [vmem:[#allocation13] sm:$0xf]  ;;  %v7556_v49 = vld [vmem:[#allocation16 + $0x360] sm:$0xf0] }
 0x1fe   :  { %v6086_v30 = vor.u32 %v7418_v26, %v6085_v25  ;;  %v6634_v52 = vor.u32 %v7556_v49, %v6633_v47  ;;  %v7535_v25 = vld [vmem:[#allocation16 + $0x2b8] sm:$0xf0]  ;;  %v7025_v26 = vld [vmem:[#allocation16 + $0x658] sm:$0xf]  ;;  %v6774_v47 = vor.u32 %v7591_v22, %v6773_v34  ;;  %v6745_v49 = vld [vmem:[#allocation16 + $0x428] sm:$0xf] }
 0x1ff   :  { %v7026_v29 = vor.u32 %v7654_v41, %v7025_v26  ;;  %v6550_v36 = vor.u32 %v7535_v25, %v6549_v2  ;;  %v7451_v25 = vld [vmem:[#allocation16 + $0x18] sm:$0xf0]  ;;  %v7497_v26 = vld [vmem:[#allocation16 + $0x18c] sm:$0xf]  ;;  %v6411_v41 = vld [vmem:[#allocation16 + $0x1a4] sm:$0xf0] }
 0x200   :  { %2699 = vmatpush.bf16.msrb.mxu0 %v6086_v30  ;;  %4198 = vmatpush.bf16.msra.mxu1 %v6634_v52  ;;  %v7640_v52 = vld [vmem:[#allocation16 + $0x600] sm:$0xf0]  ;;  %v7563_v34 = vld [vmem:[#allocation16 + $0x398] sm:$0xf0]  ;;  %v6885_v22 = vld [vmem:[#allocation16 + $0x540] sm:$0xf] }
 0x204   :  { %v2404_v56 = vpop.f32.mrf.mxu2  ;;  %4184 = vmatpush.bf16.msra.mxu0 %v6410_v48  ;;  %4199 = vmatpush.bf16.msra.mxu1 %v6606_v61  ;;  %v7577_v61 = vld [vmem:[#allocation16 + $0x408] sm:$0xf0] }
 0x205   :  { %v2405_v27 = vadd.f32 %v2404_v56, %v2391_v18  ;;  %v7612_v56 = vld [vmem:[#allocation16 + $0x520] sm:$0xf0] }
 0x206   :  { %v6858_v63 = vor.u32 %v7612_v56, %v6857_v17  ;;  %v6269_v17 = vld [vmem:[#allocation16 + $0x70] sm:$0xf]  ;;  %v6746_v56 = vor.u32 %v7584_v11, %v6745_v49  ;;  %v7546_v49 = vld [vmem:[#allocation16 + $0x314] sm:$0xf] }
 0x208   :  { %4212 = vmatpush.bf16.msra.mxu2 %v6858_v63  ;;  %4185 = vmatpush.bf16.msra.mxu0 %v6382_v55  ;;  %v7521_v55 = vld [vmem:[#allocation16 + $0x248] sm:$0xf0]  ;;  %v6941_v63 = vld [vmem:[#allocation16 + $0x5b0] sm:$0xf] }
 0x209   :  { %4200 = vmatpush.bf16.msra.mxu1 %v6578_v24  ;;  %v6213_v24 = vld [vmem:[#allocation16] sm:$0xf] }
 0x20c   :  { %v2458_v40 = vpop.f32.mrf.mxu2  ;;  %4213 = vmatpush.bf16.msra.mxu2 %v6830_v15  ;;  %4186 = vmatpush.bf16.msra.mxu0 %v6354_v19  ;;  %v7570_v19 = vld [vmem:[#allocation16 + $0x3d0] sm:$0xf0] }
 0x20d   :  { %v2459_v51 = vadd.f32 %v2458_v40, %v2445_v44  ;;  %v6997_v40 = vld [vmem:[#allocation16 + $0x620] sm:$0xf]  ;;  %v6521_v44 = vld [vmem:[#allocation16 + $0x268] sm:$0xf]  ;;  %4201 = vmatpush.bf16.msra.mxu1 %v6550_v36  ;;  %v7609_v36 = vld [vmem:[#allocation16 + $0x50c] sm:$0xf] }
 0x20e   :  { %v6998_v48 = vor.u32 %v7647_v43, %v6997_v40  ;;  %v6522_v53 = vor.u32 %v7528_v45, %v6521_v44  ;;  %v6214_v40 = vor.u32 %v7451_v25, %v6213_v24  ;;  %v6859_v44 = vld [vmem:[#allocation16 + $0x524] sm:$0xf0]  ;;  %v7665_v45 = vld [vmem:[#allocation16 + $0x6cc] sm:$0xf]  ;;  %v7588_v25 = vld [vmem:[#allocation16 + $0x464] sm:$0xf] }
 0x20f   :  { %v6523_v24 = vld [vmem:[#allocation16 + $0x284] sm:$0xf0] }
 0x210   :  { %4187 = vmatpush.bf16.msra.mxu0 %v6326_v32  ;;  %v6635_v32 = vld [vmem:[#allocation16 + $0x364] sm:$0xf0] }
 0x211   :  { %4202 = vmatpush.bf16.msra.mxu1 %v6522_v53  ;;  %v7602_v53 = vld [vmem:[#allocation16 + $0x4d4] sm:$0xf] }
 0x214   :  { %v2460_v18 = vpop.f32.mrf.mxu2 }
 0x225   :  { %v2416_v58 = vpop.f32.mrf.mxu3 }
 0x226   :  { %v8216_v1 = vadd.f32 %v2416_v58, %v2403_v57  ;;  %v2432_v57 = vpop.f32.mrf.mxu0  ;;  %v7081_v58 = vld [vmem:[#allocation16 + $0x6c8] sm:$0xf] }
 0x227   :  { %v7082_v3 = vor.u32 %v7668_v59, %v7081_v58  ;;  %v2433_v13 = vadd.f32 %v2432_v57, %v2042_v10  ;;  %v7598_v10 = vld [vmem:[#allocation16 + $0x4b0] sm:$0xf0]  ;;  %v7465_v57 = vld [vmem:[#allocation16 + $0x88] sm:$0xf0]  ;;  %v6717_v59 = vld [vmem:[#allocation16 + $0x3f0] sm:$0xf] }
 0x228   :  { %4858 = vst [vmem:[#allocation18] sm:$0xff] %v8216_v1  ;;  %v6802_v28 = vor.u32 %v7598_v10, %v6801_v62  ;;  %v6437_v62 = vld [vmem:[#allocation16 + $0x1c0] sm:$0xf]  ;;  %v7507_v10 = vld [vmem:[#allocation16 + $0x1d8] sm:$0xf0] }
 0x229   :  { %4226 = vmatpush.bf16.msra.mxu3 %v7082_v3  ;;  %v2447_v21 = vadd.f32 %v2446_v7, %v2433_v13  ;;  %v7633_v3 = vld [vmem:[#allocation16 + $0x5c8] sm:$0xf0]  ;;  %v6241_v7 = vld [vmem:[#allocation16 + $0x38] sm:$0xf]  ;;  %v6438_v43 = vor.u32 %v7507_v10, %v6437_v62  ;;  %v6775_v62 = vld [vmem:[#allocation16 + $0x47c] sm:$0xf0] }
 0x22a   :  { %4214 = vmatpush.bf16.msra.mxu2 %v6802_v28  ;;  %v2484_v13 = vld [vmem:[#allocation5 + $0x8] sm:$0xff]  ;;  %v6942_v15 = vor.u32 %v7633_v3, %v6941_v63  ;;  %v7644_v10 = vld [vmem:[#allocation16 + $0x624] sm:$0xf] }
 0x22d   :  { %v2418_v33 = vpop.f32.mrf.mxu3  ;;  %4227 = vmatpush.bf16.msra.mxu3 %v7054_v37  ;;  %v6913_v37 = vld [vmem:[#allocation16 + $0x578] sm:$0xf] }
 0x22e   :  { %v8220_v38 = vadd.f32 %v2418_v33, %v2405_v27  ;;  %v2461_v27 = vadd.f32 %v2460_v18, %v2447_v21  ;;  %v6297_v33 = vld [vmem:[#allocation16 + $0xa8] sm:$0xf]  ;;  %4215 = vmatpush.bf16.msra.mxu2 %v6774_v47  ;;  %v6242_v18 = vor.u32 %v7458_v8, %v6241_v7  ;;  %v6466_v21 = vor.u32 %v7514_v12, %v6465_v9  ;;  %v6327_v7 = vld [vmem:[#allocation16 + $0xfc] sm:$0xf0]  ;;  %v7532_v8 = vld [vmem:[#allocation16 + $0x2a4] sm:$0xf] }
 0x22f   :  { %v6298_v50 = vor.u32 %v7472_v39, %v6297_v33  ;;  %v6914_v28 = vor.u32 %v7626_v20, %v6913_v37  ;;  %v6661_v33 = vld [vmem:[#allocation16 + $0x380] sm:$0xf]  ;;  %v6414_v47 = vor.u32 %v7497_v26, %v6411_v41  ;;  %v7469_v37 = vld [vmem:[#allocation16 + $0xac] sm:$0xf]  ;;  %v6299_v20 = vld [vmem:[#allocation16 + $0xc4] sm:$0xf0]  ;;  %v6778_v26 = vor.u32 %v7588_v25, %v6775_v62 }
 0x230   :  { %4860 = vst [vmem:[#allocation18 + $0x10] sm:$0xff] %v8220_v38  ;;  %v6662_v11 = vor.u32 %v7563_v34, %v6661_v33  ;;  %v6551_v9 = vld [vmem:[#allocation16 + $0x2bc] sm:$0xf0]  ;;  %v7581_v34 = vld [vmem:[#allocation16 + $0x42c] sm:$0xf] }
 0x231   :  { %4228 = vmatpush.bf16.msra.mxu3 %v7026_v29  ;;  %4188 = vmatpush.bf16.msra.mxu0 %v6298_v50  ;;  %v6607_v50 = vld [vmem:[#allocation16 + $0x32c] sm:$0xf0]  ;;  %v6999_v41 = vld [vmem:[#allocation16 + $0x63c] sm:$0xf0]  ;;  %v7557_v25 = vld [vmem:[#allocation16 + $0x368] sm:$0xf0] }
 0x232   :  { %4216 = vmatpush.bf16.msra.mxu2 %v6746_v56  ;;  %v6610_v56 = vor.u32 %v7546_v49, %v6607_v50  ;;  %v7630_v49 = vld [vmem:[#allocation16 + $0x5b4] sm:$0xf] }
 0x235   :  { %v2472_v54 = vpop.f32.mrf.mxu3  ;;  %4229 = vmatpush.bf16.msra.mxu3 %v6998_v48 }
 0x236   :  { %v2473_v60 = vadd.f32 %v2472_v54, %v2459_v51  ;;  %v6969_v51 = vld [vmem:[#allocation16 + $0x5e8] sm:$0xf]  ;;  %v6493_v54 = vld [vmem:[#allocation16 + $0x230] sm:$0xf] }
 0x237   :  { %v6970_v58 = vor.u32 %v7640_v52, %v6969_v51  ;;  %v6494_v6 = vor.u32 %v7521_v55, %v6493_v54  ;;  %v6862_v52 = vor.u32 %v7609_v36, %v6859_v44  ;;  %v7055_v54 = vld [vmem:[#allocation16 + $0x6ac] sm:$0xf0]  ;;  %v7637_v36 = vld [vmem:[#allocation16 + $0x5ec] sm:$0xf]  ;;  %v6243_v44 = vld [vmem:[#allocation16 + $0x54] sm:$0xf0] }
 0x238   :  { %v2477_v14 = vmul.f32 0.5, %v2473_v60  ;;  %4859 = vst [vmem:[#allocation18 + $0x8] sm:$0xff] %v2473_v60  ;;  %v6270_v60 = vor.u32 %v7465_v57, %v6269_v17  ;;  %v6831_v17 = vld [vmem:[#allocation16 + $0x4ec] sm:$0xf0]  ;;  %v7658_v57 = vld [vmem:[#allocation16 + $0x694] sm:$0xf] }
 0x239   :  { %4230 = vmatpush.bf16.msra.mxu3 %v6970_v58  ;;  %4203 = vmatpush.bf16.msra.mxu1 %v6494_v6  ;;  %v7483_v58 = vld [vmem:[#allocation16 + $0x11c] sm:$0xf]  ;;  %v6834_v63 = vor.u32 %v7602_v53, %v6831_v17  ;;  %v7058_v3 = vor.u32 %v7658_v57, %v7055_v54  ;;  %v7476_v6 = vld [vmem:[#allocation16 + $0xe4] sm:$0xf]  ;;  %v6439_v57 = vld [vmem:[#allocation16 + $0x1dc] sm:$0xf0] }
 0x23a   :  { %v2479_v30 = vmul.f32 1.442695, %v2477_v14  ;;  %v6718_v14 = vor.u32 %v7577_v61, %v6717_v59  ;;  %4189 = vmatpush.bf16.msra.mxu0 %v6270_v60  ;;  %v6355_v59 = vld [vmem:[#allocation16 + $0x134] sm:$0xf0]  ;;  %v7539_v60 = vld [vmem:[#allocation16 + $0x2dc] sm:$0xf]  ;;  %v6330_v12 = vor.u32 %v7476_v6, %v6327_v7 }
 0x23b   :  { %v6579_v61 = vld [vmem:[#allocation16 + $0x2f4] sm:$0xf0]  ;;  %v7504_v53 = vld [vmem:[#allocation16 + $0x1c4] sm:$0xf]  ;;  %v6887_v6 = vld [vmem:[#allocation16 + $0x55c] sm:$0xf0] }
 0x23c   :  { %7689 = vpow2.f32 %v2479_v30  ;;  %4217 = vmatpush.bf16.msra.mxu2 %v6718_v14  ;;  %v6690_v30 = vor.u32 %v7570_v19, %v6689_v23  ;;  %v7595_v14 = vld [vmem:[#allocation16 + $0x49c] sm:$0xf]  ;;  %v6442_v54 = vor.u32 %v7504_v53, %v6439_v57 }
 0x23d   :  { %v2474_v31 = vpop.f32.mrf.mxu3  ;;  %4231 = vmatpush.bf16.msra.mxu3 %v6942_v15  ;;  %4204 = vmatpush.bf16.msra.mxu1 %v6466_v21  ;;  %v6803_v15 = vld [vmem:[#allocation16 + $0x4b4] sm:$0xf0]  ;;  %v7651_v23 = vld [vmem:[#allocation16 + $0x65c] sm:$0xf]  ;;  %v7525_v21 = vld [vmem:[#allocation16 + $0x26c] sm:$0xf] }
 0x23e   :  { %v2475_v35 = vadd.f32 %v2474_v31, %v2461_v27  ;;  %v7553_v27 = vld [vmem:[#allocation16 + $0x34c] sm:$0xf]  ;;  %4190 = vmatpush.bf16.msra.mxu0 %v6242_v18  ;;  %v7027_v18 = vld [vmem:[#allocation16 + $0x674] sm:$0xf0] }
 0x23f   :  { %v6638_v48 = vor.u32 %v7553_v27, %v6635_v32  ;;  %v7030_v19 = vor.u32 %v7651_v23, %v7027_v18  ;;  %v7002_v27 = vor.u32 %v7644_v10, %v6999_v41  ;;  %v6495_v32 = vld [vmem:[#allocation16 + $0x24c] sm:$0xf0] }
 0x240   :  { %v2478_v46 = vmul.f32 0.5, %v2475_v35  ;;  %4861 = vst [vmem:[#allocation18 + $0x18] sm:$0xff] %v2475_v35  ;;  %v7619_v35 = vld [vmem:[#allocation16 + $0x558] sm:$0xf0]  ;;  %4218 = vmatpush.bf16.msra.mxu2 %v6690_v30  ;;  %v7462_v30 = vld [vmem:[#allocation16 + $0x74] sm:$0xf] }
 0x241   :  { %4232 = vmatpush.bf16.msra.mxu3 %v6914_v28  ;;  %v6886_v51 = vor.u32 %v7619_v35, %v6885_v22  ;;  %4205 = vmatpush.bf16.msra.mxu1 %v6438_v43  ;;  %v6271_v28 = vld [vmem:[#allocation16 + $0x8c] sm:$0xf0]  ;;  %v6747_v22 = vld [vmem:[#allocation16 + $0x444] sm:$0xf0]  ;;  %v7455_v43 = vld [vmem:[#allocation16 + $0x3c] sm:$0xf] }
 0x242   :  { %v2481_v0 = vmul.f32 1.442695, %v2478_v46  ;;  %v7690_v4 = vpop.eup %7689  ;;  %v7083_v46 = vld [vmem:[#allocation16 + $0x6e4] sm:$0xf0]  ;;  %4191 = vmatpush.bf16.msra.mxu0 %v6214_v40  ;;  %v6750_v35 = vor.u32 %v7581_v34, %v6747_v22  ;;  %v6613_v22 = vld [vmem:[#allocation16 + $0x318] sm:$0xf] }
 0x243   :  { %v2485_v16 = vmul.f32 %v7690_v4, %v2483_v5  ;;  %v6358_v4 = vor.u32 %v7483_v58, %v6355_v59  ;;  %v6582_v5 = vor.u32 %v7539_v60, %v6579_v61  ;;  %v7623_v58 = vld [vmem:[#allocation16 + $0x57c] sm:$0xf]  ;;  %v6915_v59 = vld [vmem:[#allocation16 + $0x594] sm:$0xf0] }
 0x244   :  { %7691 = vpow2.f32 %v2481_v0  ;;  %v7086_v0 = vor.u32 %v7665_v45, %v7083_v46  ;;  %4219 = vmatpush.bf16.msra.mxu2 %v6662_v11  ;;  %v7511_v45 = vld [vmem:[#allocation16 + $0x1fc] sm:$0xf]  ;;  %v6246_v46 = vor.u32 %v7455_v43, %v6243_v44  ;;  %v6943_v11 = vld [vmem:[#allocation16 + $0x5cc] sm:$0xf0]  ;;  %v6918_v61 = vor.u32 %v7623_v58, %v6915_v59  ;;  %v6837_v58 = vld [vmem:[#allocation16 + $0x4d8] sm:$0xf] }
 0x245   :  { %v2487_v29 = vadd.f32 %v2485_v16, %v8216_v1  ;;  %v7490_v1 = vld [vmem:[#allocation16 + $0x154] sm:$0xf]  ;;  %4233 = vmatpush.bf16.msra.mxu3 %v6886_v51  ;;  %v6806_v16 = vor.u32 %v7595_v14, %v6803_v15  ;;  %v6946_v51 = vor.u32 %v7630_v49, %v6943_v11  ;;  %v7669_v49 = vld [vmem:[#allocation16 + $0x6e8] sm:$0xf0]  ;;  %v7487_v11 = vld [vmem:[#allocation16 + $0x138] sm:$0xf0] }
 0x246   :  { %v7606_v59 = vld [vmem:[#allocation16 + $0x4f0] sm:$0xf0] }
 0x24a   :  { %v7692_v42 = vpop.eup %7691 }
 0x24b   :  { %v2486_v2 = vmul.f32 %v7692_v42, %v2484_v13  ;;  %v6554_v13 = vor.u32 %v7532_v8, %v6551_v9  ;;  %v6302_v42 = vor.u32 %v7469_v37, %v6299_v20  ;;  %v2522_v8 = vld [vmem:[#allocation14] sm:$0xf]  ;;  %v6417_v20 = vld [vmem:[#allocation16 + $0x190] sm:$0xf] }
 0x24c   :  { %v2525_v14 = vperm.slane %v2522_v8, 1  ;;  %v2526_v62 = vperm.slane %v2522_v8, 2  ;;  %v2527_v10 = vperm.slane %v2522_v8, 3 }
 0x24d   :  { %v2488_v31 = vadd.f32 %v2486_v2, %v8220_v38  ;;  %v6383_v38 = vld [vmem:[#allocation16 + $0x16c] sm:$0xf0]  ;;  %v6526_v2 = vor.u32 %v7525_v21, %v6523_v24  ;;  %v7501_v24 = vld [vmem:[#allocation16 + $0x1a8] sm:$0xf0] }
 0x24e   :  { %v6386_v55 = vor.u32 %v7490_v1, %v6383_v38  ;;  %v7574_v1 = vld [vmem:[#allocation16 + $0x3f4] sm:$0xf]  ;;  %v6719_v38 = vld [vmem:[#allocation16 + $0x40c] sm:$0xf0] }
 0x24f   :  { %v2489_v39 = vpack.c.bf16 %v2488_v31, %v2487_v29  ;;  %v7518_v29 = vld [vmem:[#allocation16 + $0x234] sm:$0xf]  ;;  %v6274_v31 = vor.u32 %v7462_v30, %v6271_v28  ;;  %v6722_v50 = vor.u32 %v7574_v1, %v6719_v38  ;;  %v6418_v28 = vor.u32 %v7501_v24, %v6417_v20  ;;  %v6529_v20 = vld [vmem:[#allocation16 + $0x270] sm:$0xf] }
 0x250   :  { %v6498_v33 = vor.u32 %v7518_v29, %v6495_v32  ;;  %v7494_v32 = vld [vmem:[#allocation16 + $0x170] sm:$0xf0] }
 0x251   :  { %2700 = vmatmul.bf16.vlgmr.msrb.gmra.mxu0 %v2489_v39  ;;  %2714 = vmatmul.bf16.vlgmr.msrb.gmra.mxu1 %v2489_v39 }
 0x252   :  { %2728 = vmatmul.bf16.vlgmr.msrb.gmra.mxu2 %v2489_v39  ;;  %2742 = vmatmul.bf16.vlgmr.msrb.gmra.mxu3 %v2489_v39  ;;  %v6971_v39 = vld [vmem:[#allocation16 + $0x604] sm:$0xf0] }
 0x253   :  { %4240 = vmatpush.bf16.msrb.mxu0 %v6414_v47  ;;  %4254 = vmatpush.bf16.msrb.mxu1 %v6638_v48  ;;  %v6974_v40 = vor.u32 %v7637_v36, %v6971_v39  ;;  %v6467_v47 = vld [vmem:[#allocation16 + $0x214] sm:$0xf0] }
 0x254   :  { %4268 = vmatpush.bf16.msrb.mxu2 %v6862_v52  ;;  %4282 = vmatpush.bf16.msrb.mxu3 %v7086_v0  ;;  %v6470_v48 = vor.u32 %v7511_v45, %v6467_v47  ;;  %v7448_v52 = vld [vmem:[#allocation16 + $0x4] sm:$0xf]  ;;  %v6215_v0 = vld [vmem:[#allocation16 + $0x1c] sm:$0xf0]  ;;  %v6865_v45 = vld [vmem:[#allocation16 + $0x510] sm:$0xf] }
 0x255   :  { %v6218_v17 = vor.u32 %v7448_v52, %v6215_v0  ;;  %v7089_v47 = vld [vmem:[#allocation16 + $0x6d0] sm:$0xf]  ;;  %v7543_v52 = vld [vmem:[#allocation16 + $0x2f8] sm:$0xf0] }
 0x257   :  { %4241 = vmatpush.bf16.msrb.mxu0 %v6386_v55  ;;  %4255 = vmatpush.bf16.msrb.mxu1 %v6610_v56  ;;  %v7567_v55 = vld [vmem:[#allocation16 + $0x3bc] sm:$0xf]  ;;  %v6691_v56 = vld [vmem:[#allocation16 + $0x3d4] sm:$0xf0] }
 0x258   :  { %4269 = vmatpush.bf16.msrb.mxu2 %v6834_v63  ;;  %4283 = vmatpush.bf16.msrb.mxu3 %v7058_v3  ;;  %v6694_v60 = vor.u32 %v7567_v55, %v6691_v56  ;;  %v7560_v63 = vld [vmem:[#allocation16 + $0x384] sm:$0xf]  ;;  %v6663_v3 = vld [vmem:[#allocation16 + $0x39c] sm:$0xf0]  ;;  %v7090_v55 = vor.u32 %v7669_v49, %v7089_v47  ;;  %v7515_v47 = vld [vmem:[#allocation16 + $0x218] sm:$0xf0] }
 0x259   :  { %v7578_v49 = vld [vmem:[#allocation16 + $0x410] sm:$0xf0] }
 0x25b   :  { %4242 = vmatpush.bf16.msrb.mxu0 %v6358_v4  ;;  %4256 = vmatpush.bf16.msrb.mxu1 %v6582_v5  ;;  %v6666_v4 = vor.u32 %v7560_v63, %v6663_v3  ;;  %v7616_v5 = vld [vmem:[#allocation16 + $0x544] sm:$0xf]  ;;  %v7061_v3 = vld [vmem:[#allocation16 + $0x698] sm:$0xf] }
 0x25c   :  { %4270 = vmatpush.bf16.msrb.mxu2 %v6806_v16  ;;  %4284 = vmatpush.bf16.msrb.mxu3 %v7030_v19  ;;  %v6890_v7 = vor.u32 %v7616_v5, %v6887_v6  ;;  %v6333_v5 = vld [vmem:[#allocation16 + $0xe8] sm:$0xf]  ;;  %v7480_v6 = vld [vmem:[#allocation16 + $0x100] sm:$0xf0] }
 0x25f   :  { %4243 = vmatpush.bf16.msrb.mxu0 %v6330_v12  ;;  %4257 = vmatpush.bf16.msrb.mxu1 %v6554_v13  ;;  %v2524_v13 = vperm.slane %v2522_v8, 0  ;;  %v7536_v8 = vld [vmem:[#allocation16 + $0x2c0] sm:$0xf0] }
 0x260   :  { %4271 = vmatpush.bf16.msrb.mxu2 %v6778_v26  ;;  %4285 = vmatpush.bf16.msrb.mxu3 %v7002_v27 }
 0x263   :  { %4244 = vmatpush.bf16.msrb.mxu0 %v6302_v42  ;;  %4258 = vmatpush.bf16.msrb.mxu1 %v6526_v2  ;;  %v6641_v2 = vld [vmem:[#allocation16 + $0x350] sm:$0xf] }
 0x264   :  { %4272 = vmatpush.bf16.msrb.mxu2 %v6750_v35  ;;  %4286 = vmatpush.bf16.msrb.mxu3 %v6974_v40  ;;  %v6642_v29 = vor.u32 %v7557_v25, %v6641_v2  ;;  %v7550_v35 = vld [vmem:[#allocation16 + $0x330] sm:$0xf0]  ;;  %v6781_v2 = vld [vmem:[#allocation16 + $0x468] sm:$0xf]  ;;  %v7592_v25 = vld [vmem:[#allocation16 + $0x480] sm:$0xf0] }
 0x265   :  { %v6614_v38 = vor.u32 %v7550_v35, %v6613_v22  ;;  %v6753_v22 = vld [vmem:[#allocation16 + $0x430] sm:$0xf]  ;;  %v7585_v35 = vld [vmem:[#allocation16 + $0x448] sm:$0xf0] }
 0x267   :  { %4245 = vmatpush.bf16.msrb.mxu0 %v6274_v31  ;;  %4259 = vmatpush.bf16.msrb.mxu1 %v6498_v33  ;;  %v6389_v31 = vld [vmem:[#allocation16 + $0x158] sm:$0xf] }
 0x268   :  { %4273 = vmatpush.bf16.msrb.mxu2 %v6722_v50  ;;  %4287 = vmatpush.bf16.msrb.mxu3 %v6946_v51  ;;  %v6390_v44 = vor.u32 %v7494_v32, %v6389_v31  ;;  %v6361_v50 = vld [vmem:[#allocation16 + $0x120] sm:$0xf]  ;;  %v6782_v31 = vor.u32 %v7592_v25, %v6781_v2  ;;  %v7666_v2 = vld [vmem:[#allocation16 + $0x6d4] sm:$0xf]  ;;  %v7091_v25 = vld [vmem:[#allocation16 + $0x6ec] sm:$0xf0] }
 0x269   :  { %v6585_v51 = vld [vmem:[#allocation16 + $0x2e0] sm:$0xf]  ;;  %v6362_v56 = vor.u32 %v7487_v11, %v6361_v50  ;;  %v6949_v50 = vld [vmem:[#allocation16 + $0x5b8] sm:$0xf]  ;;  %v7634_v11 = vld [vmem:[#allocation16 + $0x5d0] sm:$0xf0] }
 0x26a   :  { %v6586_v63 = vor.u32 %v7543_v52, %v6585_v51 }
 0x26b   :  { %4246 = vmatpush.bf16.msrb.mxu0 %v6246_v46  ;;  %4260 = vmatpush.bf16.msrb.mxu1 %v6470_v48  ;;  %v7613_v46 = vld [vmem:[#allocation16 + $0x528] sm:$0xf0] }
 0x26c   :  { %4274 = vmatpush.bf16.msrb.mxu2 %v6694_v60  ;;  %4288 = vmatpush.bf16.msrb.mxu3 %v6918_v61 }
 0x26f   :  { %4247 = vmatpush.bf16.msrb.mxu0 %v6218_v17  ;;  %4261 = vmatpush.bf16.msrb.mxu1 %v6442_v54  ;;  %v6866_v54 = vor.u32 %v7613_v46, %v6865_v45  ;;  %v7459_v45 = vld [vmem:[#allocation16 + $0x58] sm:$0xf0]  ;;  %v6473_v46 = vld [vmem:[#allocation16 + $0x200] sm:$0xf] }
 0x270   :  { %4275 = vmatpush.bf16.msrb.mxu2 %v6666_v4  ;;  %4289 = vmatpush.bf16.msrb.mxu3 %v6890_v7  ;;  %v7662_v4 = vld [vmem:[#allocation16 + $0x6b0] sm:$0xf0]  ;;  %v6557_v7 = vld [vmem:[#allocation16 + $0x2a8] sm:$0xf]  ;;  %v6474_v52 = vor.u32 %v7515_v47, %v6473_v46  ;;  %v7533_v46 = vld [vmem:[#allocation16 + $0x2ac] sm:$0xf] }
 0x271   :  { %v6559_v47 = vld [vmem:[#allocation16 + $0x2c4] sm:$0xf0] }
 0x2ce   :  { %v2701_v9 = vpop.f32.mrf.mxu0  ;;  %v2715_v12 = vpop.f32.mrf.mxu1 }
 0x2cf   :  { %v2702_v15 = vadd.f32 %v2701_v9, %v2524_v13  ;;  %v2716_v23 = vadd.f32 %v2715_v12, %v2525_v14  ;;  %v6838_v9 = vor.u32 %v7606_v59, %v6837_v58  ;;  %v7062_v12 = vor.u32 %v7662_v4, %v7061_v3  ;;  %v7554_v59 = vld [vmem:[#allocation16 + $0x354] sm:$0xf]  ;;  %v6697_v3 = vld [vmem:[#allocation16 + $0x3c0] sm:$0xf]  ;;  %v7571_v4 = vld [vmem:[#allocation16 + $0x3d8] sm:$0xf0] }
 0x2d0   :  { %v6950_v58 = vor.u32 %v7634_v11, %v6949_v50  ;;  %v7652_v50 = vld [vmem:[#allocation16 + $0x664] sm:$0xf]  ;;  %v7035_v11 = vld [vmem:[#allocation16 + $0x67c] sm:$0xf0] }
 0x2d1   :  { %v2748_v26 = vmax.f32 %v2702_v15, 0.0  ;;  %v2749_v41 = vmax.f32 %v2716_v23, 0.0  ;;  %v6558_v15 = vor.u32 %v7536_v8, %v6557_v7  ;;  %v7599_v23 = vld [vmem:[#allocation16 + $0x4b8] sm:$0xf0] }
 0x2d5   :  { %v2729_v16 = vpop.f32.mrf.mxu2  ;;  %v2743_v18 = vpop.f32.mrf.mxu3 }
 0x2d6   :  { %v2703_v19 = vpop.f32.mrf.mxu0  ;;  %v2717_v37 = vpop.f32.mrf.mxu1  ;;  %v2730_v36 = vadd.f32 %v2729_v16, %v2526_v62  ;;  %v2744_v39 = vadd.f32 %v2743_v18, %v2527_v10  ;;  %v7033_v16 = vld [vmem:[#allocation16 + $0x660] sm:$0xf]  ;;  %v7655_v18 = vld [vmem:[#allocation16 + $0x678] sm:$0xf0] }
 0x2d7   :  { %v2704_v42 = vadd.f32 %v2703_v19, %v2524_v13  ;;  %v2718_v21 = vadd.f32 %v2717_v37, %v2525_v14  ;;  %v6809_v13 = vld [vmem:[#allocation16 + $0x4a0] sm:$0xf]  ;;  %v6334_v14 = vor.u32 %v7480_v6, %v6333_v5  ;;  %v6305_v19 = vld [vmem:[#allocation16 + $0xb0] sm:$0xf]  ;;  %v7473_v37 = vld [vmem:[#allocation16 + $0xc8] sm:$0xf0]  ;;  %v7034_v24 = vor.u32 %v7655_v18, %v7033_v16 }
 0x2d8   :  { %v2750_v0 = vmax.f32 %v2730_v36, 0.0  ;;  %v2751_v53 = vmax.f32 %v2744_v39, 0.0  ;;  %v6977_v36 = vld [vmem:[#allocation16 + $0x5f0] sm:$0xf]  ;;  %v7641_v39 = vld [vmem:[#allocation16 + $0x608] sm:$0xf0] }
 0x2d9   :  { %v2752_v27 = vmax.f32 %v2704_v42, 0.0  ;;  %v2753_v30 = vmax.f32 %v2718_v21, 0.0  ;;  %v7529_v42 = vld [vmem:[#allocation16 + $0x288] sm:$0xf0]  ;;  %v6810_v21 = vor.u32 %v7599_v23, %v6809_v13  ;;  %v6921_v5 = vld [vmem:[#allocation16 + $0x580] sm:$0xf]  ;;  %v6698_v23 = vor.u32 %v7571_v4, %v6697_v3 }
 0x2da   :  { %v7627_v6 = vld [vmem:[#allocation16 + $0x598] sm:$0xf0]  ;;  %v6615_v18 = vld [vmem:[#allocation16 + $0x334] sm:$0xf0] }
 0x2db   :  { %v8229_v33 = vpack.c.bf16 %v2752_v27, %v2748_v26  ;;  %v8231_v34 = vpack.c.bf16 %v2753_v30, %v2749_v41  ;;  %v6306_v26 = vor.u32 %v7473_v37, %v6305_v19  ;;  %v6530_v41 = vor.u32 %v7529_v42, %v6529_v20  ;;  %v6277_v27 = vld [vmem:[#allocation16 + $0x78] sm:$0xf]  ;;  %v7466_v30 = vld [vmem:[#allocation16 + $0x90] sm:$0xf0]  ;;  %v7491_v13 = vld [vmem:[#allocation16 + $0x15c] sm:$0xf] }
 0x2dc   :  { %v6922_v16 = vor.u32 %v7627_v6, %v6921_v5  ;;  %v6669_v19 = vld [vmem:[#allocation16 + $0x388] sm:$0xf]  ;;  %v7564_v37 = vld [vmem:[#allocation16 + $0x3a0] sm:$0xf0]  ;;  %v7463_v5 = vld [vmem:[#allocation16 + $0x7c] sm:$0xf] }
 0x2dd   :  { %v2731_v40 = vpop.f32.mrf.mxu2  ;;  %v2745_v43 = vpop.f32.mrf.mxu3  ;;  %4192 = vmatmul.bf16.vlgmr.msra.gmra.mxu0 %v8229_v33  ;;  %4206 = vmatmul.bf16.vlgmr.msra.gmra.mxu1 %v8231_v34  ;;  %v6893_v20 = vld [vmem:[#allocation16 + $0x548] sm:$0xf]  ;;  %v7620_v42 = vld [vmem:[#allocation16 + $0x560] sm:$0xf0]  ;;  %v6279_v6 = vld [vmem:[#allocation16 + $0x94] sm:$0xf0] }
 0x2de   :  { %v2732_v48 = vadd.f32 %v2731_v40, %v2526_v62  ;;  %v2746_v1 = vadd.f32 %v2745_v43, %v2527_v10  ;;  %4296 = vmatpush.bf16.msra.mxu0 %v6418_v28  ;;  %4310 = vmatpush.bf16.msra.mxu1 %v6642_v29  ;;  %v7005_v62 = vld [vmem:[#allocation16 + $0x628] sm:$0xf]  ;;  %v7648_v10 = vld [vmem:[#allocation16 + $0x640] sm:$0xf0]  ;;  %v6501_v28 = vld [vmem:[#allocation16 + $0x238] sm:$0xf]  ;;  %v6278_v40 = vor.u32 %v7466_v30, %v6277_v27 }
 0x2df   :  { %v7522_v29 = vld [vmem:[#allocation16 + $0x250] sm:$0xf0]  ;;  %v7006_v32 = vor.u32 %v7648_v10, %v7005_v62  ;;  %v6894_v27 = vor.u32 %v7620_v42, %v6893_v20  ;;  %v6363_v30 = vld [vmem:[#allocation16 + $0x13c] sm:$0xf0]  ;;  %v7512_v20 = vld [vmem:[#allocation16 + $0x204] sm:$0xf] }
 0x2e0   :  { %v2754_v17 = vmax.f32 %v2732_v48, 0.0  ;;  %v2755_v57 = vmax.f32 %v2746_v1, 0.0  ;;  %v6502_v43 = vor.u32 %v7522_v29, %v6501_v28  ;;  %v6754_v48 = vor.u32 %v7585_v35, %v6753_v22  ;;  %v7540_v28 = vld [vmem:[#allocation16 + $0x2e4] sm:$0xf]  ;;  %v6587_v29 = vld [vmem:[#allocation16 + $0x2fc] sm:$0xf0] }
 0x2e1   :  { %v6978_v1 = vor.u32 %v7641_v39, %v6977_v36  ;;  %v7603_v22 = vld [vmem:[#allocation16 + $0x4dc] sm:$0xf]  ;;  %v6839_v35 = vld [vmem:[#allocation16 + $0x4f4] sm:$0xf0]  ;;  %v6475_v42 = vld [vmem:[#allocation16 + $0x21c] sm:$0xf0] }
 0x2e2   :  { %v8235_v60 = vpack.c.bf16 %v2754_v17, %v2750_v0  ;;  %v8237_v61 = vpack.c.bf16 %v2755_v57, %v2751_v53  ;;  %4297 = vmatpush.bf16.msra.mxu0 %v6390_v44  ;;  %4311 = vmatpush.bf16.msra.mxu1 %v6614_v38  ;;  %v6249_v44 = vld [vmem:[#allocation16 + $0x40] sm:$0xf]  ;;  %v6725_v38 = vld [vmem:[#allocation16 + $0x3f8] sm:$0xf]  ;;  %v6221_v0 = vld [vmem:[#allocation16 + $0x8] sm:$0xf] }
 0x2e3   :  { %v6250_v51 = vor.u32 %v7459_v45, %v6249_v44  ;;  %v7452_v53 = vld [vmem:[#allocation16 + $0x20] sm:$0xf0]  ;;  %v6445_v17 = vld [vmem:[#allocation16 + $0x1c8] sm:$0xf]  ;;  %v7659_v36 = vld [vmem:[#allocation16 + $0x69c] sm:$0xf] }
 0x2e4   :  { %4220 = vmatmul.bf16.vlgmr.msra.gmra.mxu2 %v8235_v60  ;;  %4234 = vmatmul.bf16.vlgmr.msra.gmra.mxu3 %v8237_v61  ;;  %v7508_v57 = vld [vmem:[#allocation16 + $0x1e0] sm:$0xf0]  ;;  %v6222_v7 = vor.u32 %v7452_v53, %v6221_v0  ;;  %v7063_v39 = vld [vmem:[#allocation16 + $0x6b4] sm:$0xf0]  ;;  %v7477_v44 = vld [vmem:[#allocation16 + $0xec] sm:$0xf] }
 0x2e5   :  { %4324 = vmatpush.bf16.msra.mxu2 %v6866_v54  ;;  %4338 = vmatpush.bf16.msra.mxu3 %v7090_v55  ;;  %v7498_v54 = vld [vmem:[#allocation16 + $0x194] sm:$0xf]  ;;  %v6419_v55 = vld [vmem:[#allocation16 + $0x1ac] sm:$0xf0]  ;;  %v6446_v8 = vor.u32 %v7508_v57, %v6445_v17  ;;  %v6335_v45 = vld [vmem:[#allocation16 + $0x104] sm:$0xf0] }
 0x2e6   :  { %4298 = vmatpush.bf16.msra.mxu0 %v6362_v56  ;;  %4312 = vmatpush.bf16.msra.mxu1 %v6586_v63  ;;  %v6726_v56 = vor.u32 %v7578_v49, %v6725_v38  ;;  %v6643_v63 = vld [vmem:[#allocation16 + $0x36c] sm:$0xf0]  ;;  %v7596_v38 = vld [vmem:[#allocation16 + $0x4a4] sm:$0xf]  ;;  %v6811_v49 = vld [vmem:[#allocation16 + $0x4bc] sm:$0xf0] }
 0x2e7   :  { %v7470_v0 = vld [vmem:[#allocation16 + $0xb4] sm:$0xf]  ;;  %v6307_v53 = vld [vmem:[#allocation16 + $0xcc] sm:$0xf0] }
 0x2e8   :  { %v7526_v17 = vld [vmem:[#allocation16 + $0x274] sm:$0xf]  ;;  %v6531_v57 = vld [vmem:[#allocation16 + $0x28c] sm:$0xf0]  ;;  %v6310_v3 = vor.u32 %v7470_v0, %v6307_v53  ;;  %v7561_v0 = vld [vmem:[#allocation16 + $0x38c] sm:$0xf] }
 0x2e9   :  { %4325 = vmatpush.bf16.msra.mxu2 %v6838_v9  ;;  %4339 = vmatpush.bf16.msra.mxu3 %v7062_v12  ;;  %v6422_v9 = vor.u32 %v7498_v54, %v6419_v55  ;;  %v6646_v12 = vor.u32 %v7554_v59, %v6643_v63  ;;  %v6814_v54 = vor.u32 %v7596_v38, %v6811_v49  ;;  %v7645_v59 = vld [vmem:[#allocation16 + $0x62c] sm:$0xf]  ;;  %v7007_v63 = vld [vmem:[#allocation16 + $0x644] sm:$0xf0]  ;;  %v6397_v38 = vld [vmem:[#allocation16 + $0x160] sm:$0xf] }
 0x2ea   :  { %4299 = vmatpush.bf16.msra.mxu0 %v6334_v14  ;;  %4313 = vmatpush.bf16.msra.mxu1 %v6558_v15  ;;  %v6391_v14 = vld [vmem:[#allocation16 + $0x174] sm:$0xf0]  ;;  %v7547_v15 = vld [vmem:[#allocation16 + $0x31c] sm:$0xf]  ;;  %v7038_v55 = vor.u32 %v7652_v50, %v7035_v11  ;;  %v6534_v4 = vor.u32 %v7526_v17, %v6531_v57  ;;  %v6621_v50 = vld [vmem:[#allocation16 + $0x320] sm:$0xf] }
 0x2eb   :  { %v6394_v62 = vor.u32 %v7491_v13, %v6391_v14  ;;  %v6618_v10 = vor.u32 %v7547_v15, %v6615_v18  ;;  %v7582_v13 = vld [vmem:[#allocation16 + $0x434] sm:$0xf]  ;;  %v6755_v14 = vld [vmem:[#allocation16 + $0x44c] sm:$0xf0]  ;;  %v7495_v49 = vld [vmem:[#allocation16 + $0x178] sm:$0xf0] }
 0x2ec   :  { %v7638_v15 = vld [vmem:[#allocation16 + $0x5f4] sm:$0xf]  ;;  %v6671_v53 = vld [vmem:[#allocation16 + $0x3a4] sm:$0xf0]  ;;  %v7617_v17 = vld [vmem:[#allocation16 + $0x54c] sm:$0xf] }
 0x2ed   :  { %4326 = vmatpush.bf16.msra.mxu2 %v6810_v21  ;;  %4340 = vmatpush.bf16.msra.mxu3 %v7034_v24  ;;  %v7610_v21 = vld [vmem:[#allocation16 + $0x514] sm:$0xf]  ;;  %v6867_v24 = vld [vmem:[#allocation16 + $0x52c] sm:$0xf0]  ;;  %v6895_v57 = vld [vmem:[#allocation16 + $0x564] sm:$0xf0] }
 0x2ee   :  { %4248 = vmatmul.bf16.vlgmr.msrb.gmra.mxu0 %v8229_v33  ;;  %4262 = vmatmul.bf16.vlgmr.msrb.gmra.mxu1 %v8231_v34 }
 0x2ef   :  { %4300 = vmatpush.bf16.msra.mxu0 %v6306_v26  ;;  %4314 = vmatpush.bf16.msra.mxu1 %v6530_v41  ;;  %v7484_v26 = vld [vmem:[#allocation16 + $0x124] sm:$0xf]  ;;  %v6670_v41 = vor.u32 %v7564_v37, %v6669_v19  ;;  %v6251_v37 = vld [vmem:[#allocation16 + $0x5c] sm:$0xf0] }
 0x2f0   :  { %v7456_v19 = vld [vmem:[#allocation16 + $0x44] sm:$0xf] }
 0x2f1   :  { %4327 = vmatpush.bf16.msra.mxu2 %v6782_v31  ;;  %4341 = vmatpush.bf16.msra.mxu3 %v7006_v32  ;;  %v6870_v31 = vor.u32 %v7610_v21, %v6867_v24  ;;  %v7094_v32 = vor.u32 %v7666_v2, %v7091_v25  ;;  %v6758_v21 = vor.u32 %v7582_v13, %v6755_v14  ;;  %v7575_v2 = vld [vmem:[#allocation16 + $0x3fc] sm:$0xf]  ;;  %v6727_v25 = vld [vmem:[#allocation16 + $0x414] sm:$0xf0]  ;;  %v6845_v13 = vld [vmem:[#allocation16 + $0x4e0] sm:$0xf] }
 0x2f2   :  { %v7607_v14 = vld [vmem:[#allocation16 + $0x4f8] sm:$0xf0] }
 0x2f3   :  { %4301 = vmatpush.bf16.msra.mxu0 %v6278_v40  ;;  %4315 = vmatpush.bf16.msra.mxu1 %v6502_v43  ;;  %v6366_v40 = vor.u32 %v7484_v26, %v6363_v30  ;;  %v6590_v43 = vor.u32 %v7540_v28, %v6587_v29  ;;  %v6254_v26 = vor.u32 %v7456_v19, %v6251_v37  ;;  %v6223_v30 = vld [vmem:[#allocation16 + $0x24] sm:$0xf0]  ;;  %v7505_v28 = vld [vmem:[#allocation16 + $0x1cc] sm:$0xf]  ;;  %v6341_v19 = vld [vmem:[#allocation16 + $0xf0] sm:$0xf] }
 0x2f4   :  { %4276 = vmatmul.bf16.vlgmr.msrb.gmra.mxu2 %v8235_v60  ;;  %4290 = vmatmul.bf16.vlgmr.msrb.gmra.mxu3 %v8237_v61  ;;  %v6447_v29 = vld [vmem:[#allocation16 + $0x1e4] sm:$0xf0]  ;;  %v7481_v37 = vld [vmem:[#allocation16 + $0x108] sm:$0xf0] }
 0x2f5   :  { %4328 = vmatpush.bf16.msra.mxu2 %v6754_v48  ;;  %4342 = vmatpush.bf16.msra.mxu3 %v6978_v1  ;;  %v6842_v48 = vor.u32 %v7603_v22, %v6839_v35  ;;  %v7066_v1 = vor.u32 %v7659_v36, %v7063_v39  ;;  %v6730_v22 = vor.u32 %v7575_v2, %v6727_v25  ;;  %v6649_v36 = vld [vmem:[#allocation16 + $0x358] sm:$0xf]  ;;  %v7558_v39 = vld [vmem:[#allocation16 + $0x370] sm:$0xf0]  ;;  %v6817_v2 = vld [vmem:[#allocation16 + $0x4a8] sm:$0xf] }
 0x2f6   :  { %v7600_v25 = vld [vmem:[#allocation16 + $0x4c0] sm:$0xf0] }
 0x2f7   :  { %4302 = vmatpush.bf16.msra.mxu0 %v6250_v51  ;;  %4316 = vmatpush.bf16.msra.mxu1 %v6474_v52  ;;  %v6338_v51 = vor.u32 %v7477_v44, %v6335_v45  ;;  %v6562_v52 = vor.u32 %v7533_v46, %v6559_v47  ;;  %v7624_v44 = vld [vmem:[#allocation16 + $0x584] sm:$0xf]  ;;  %v6923_v45 = vld [vmem:[#allocation16 + $0x59c] sm:$0xf0]  ;;  %v6450_v47 = vor.u32 %v7505_v28, %v6447_v29 }
 0x2f8   :  { %v6818_v28 = vor.u32 %v7600_v25, %v6817_v2  ;;  %v7492_v2 = vld [vmem:[#allocation16 + $0x164] sm:$0xf]  ;;  %v6399_v25 = vld [vmem:[#allocation16 + $0x17c] sm:$0xf0] }
 0x2f9   :  { %4329 = vmatpush.bf16.msra.mxu2 %v6726_v56  ;;  %4343 = vmatpush.bf16.msra.mxu3 %v6950_v58  ;;  %v7589_v56 = vld [vmem:[#allocation16 + $0x46c] sm:$0xf]  ;;  %v6783_v58 = vld [vmem:[#allocation16 + $0x484] sm:$0xf0] }
 0x2fb   :  { %4303 = vmatpush.bf16.msra.mxu0 %v6222_v7  ;;  %4317 = vmatpush.bf16.msra.mxu1 %v6446_v8  ;;  %v7519_v7 = vld [vmem:[#allocation16 + $0x23c] sm:$0xf]  ;;  %v6503_v8 = vld [vmem:[#allocation16 + $0x254] sm:$0xf0] }
 0x2fc   :  { %v6506_v18 = vor.u32 %v7519_v7, %v6503_v8 }
 0x2fd   :  { %4330 = vmatpush.bf16.msra.mxu2 %v6698_v23  ;;  %4344 = vmatpush.bf16.msra.mxu3 %v6922_v16  ;;  %v6979_v23 = vld [vmem:[#allocation16 + $0x60c] sm:$0xf0]  ;;  %v6282_v16 = vor.u32 %v7463_v5, %v6279_v6  ;;  %v6369_v5 = vld [vmem:[#allocation16 + $0x128] sm:$0xf]  ;;  %v7488_v6 = vld [vmem:[#allocation16 + $0x140] sm:$0xf0] }
 0x2fe   :  { %4304 = vmatmul.bf16.vlgmr.msra.gmra.mxu0 %v8229_v33  ;;  %4318 = vmatmul.bf16.vlgmr.msra.gmra.mxu1 %v8231_v34  ;;  %v6982_v24 = vor.u32 %v7638_v15, %v6979_v23  ;;  %v7069_v15 = vld [vmem:[#allocation16 + $0x6a0] sm:$0xf]  ;;  %v7663_v23 = vld [vmem:[#allocation16 + $0x6b8] sm:$0xf0] }
 0x2ff   :  { %4352 = vmatpush.bf16.msrb.mxu0 %v6422_v9  ;;  %4366 = vmatpush.bf16.msrb.mxu1 %v6646_v12  ;;  %v6786_v9 = vor.u32 %v7589_v56, %v6783_v58  ;;  %v7010_v12 = vor.u32 %v7645_v59, %v7007_v63  ;;  %v7097_v56 = vld [vmem:[#allocation16 + $0x6d8] sm:$0xf]  ;;  %v7670_v58 = vld [vmem:[#allocation16 + $0x6f0] sm:$0xf0]  ;;  %v6398_v59 = vor.u32 %v7495_v49, %v6397_v38 }
 0x300   :  { %v7098_v8 = vor.u32 %v7670_v58, %v7097_v56  ;;  %v6761_v38 = vld [vmem:[#allocation16 + $0x438] sm:$0xf]  ;;  %v7586_v49 = vld [vmem:[#allocation16 + $0x450] sm:$0xf0]  ;;  %v6733_v56 = vld [vmem:[#allocation16 + $0x400] sm:$0xf] }
 0x301   :  { %4331 = vmatpush.bf16.msra.mxu2 %v6670_v41  ;;  %4345 = vmatpush.bf16.msra.mxu3 %v6894_v27  ;;  %v6478_v41 = vor.u32 %v7512_v20, %v6475_v42  ;;  %v7449_v27 = vld [vmem:[#allocation16 + $0xc] sm:$0xf]  ;;  %v6846_v20 = vor.u32 %v7607_v14, %v6845_v13  ;;  %v7070_v42 = vor.u32 %v7663_v23, %v7069_v15  ;;  %v7579_v58 = vld [vmem:[#allocation16 + $0x418] sm:$0xf0]  ;;  %v6427_v14 = vld [vmem:[#allocation16 + $0x1b4] sm:$0xf0] }
 0x302   :  { %v6226_v46 = vor.u32 %v7449_v27, %v6223_v30  ;;  %v6313_v27 = vld [vmem:[#allocation16 + $0xb8] sm:$0xf]  ;;  %v7474_v30 = vld [vmem:[#allocation16 + $0xd0] sm:$0xf0]  ;;  %v7499_v13 = vld [vmem:[#allocation16 + $0x19c] sm:$0xf] }
 0x303   :  { %4353 = vmatpush.bf16.msrb.mxu0 %v6394_v62  ;;  %4367 = vmatpush.bf16.msrb.mxu1 %v6618_v10  ;;  %v7631_v62 = vld [vmem:[#allocation16 + $0x5bc] sm:$0xf]  ;;  %v6951_v10 = vld [vmem:[#allocation16 + $0x5d4] sm:$0xf0] }
 0x304   :  { %4332 = vmatmul.bf16.vlgmr.msra.gmra.mxu2 %v8235_v60  ;;  %4346 = vmatmul.bf16.vlgmr.msra.gmra.mxu3 %v8237_v61  ;;  %v6954_v35 = vor.u32 %v7631_v62, %v6951_v10  ;;  %v7041_v62 = vld [vmem:[#allocation16 + $0x668] sm:$0xf]  ;;  %v7656_v10 = vld [vmem:[#allocation16 + $0x680] sm:$0xf0]  ;;  %v7555_v15 = vld [vmem:[#allocation16 + $0x35c] sm:$0xf] }
 0x305   :  { %4380 = vmatpush.bf16.msrb.mxu2 %v6870_v31  ;;  %4394 = vmatpush.bf16.msrb.mxu3 %v7094_v32  ;;  %v6425_v31 = vld [vmem:[#allocation16 + $0x198] sm:$0xf]  ;;  %v7502_v32 = vld [vmem:[#allocation16 + $0x1b0] sm:$0xf0]  ;;  %v7042_v29 = vor.u32 %v7656_v10, %v7041_v62  ;;  %v7548_v62 = vld [vmem:[#allocation16 + $0x324] sm:$0xf] }
 0x306   :  { %v6651_v23 = vld [vmem:[#allocation16 + $0x374] sm:$0xf0] }
 0x307   :  { %4354 = vmatpush.bf16.msrb.mxu0 %v6366_v40  ;;  %4368 = vmatpush.bf16.msrb.mxu1 %v6590_v43  ;;  %v7568_v40 = vld [vmem:[#allocation16 + $0x3c4] sm:$0xf]  ;;  %v6699_v43 = vld [vmem:[#allocation16 + $0x3dc] sm:$0xf0] }
 0x308   :  { %v6702_v11 = vor.u32 %v7568_v40, %v6699_v43  ;;  %v6314_v40 = vor.u32 %v7474_v30, %v6313_v27  ;;  %v6677_v27 = vld [vmem:[#allocation16 + $0x390] sm:$0xf]  ;;  %v7565_v30 = vld [vmem:[#allocation16 + $0x3a8] sm:$0xf0] }
 0x309   :  { %4381 = vmatpush.bf16.msrb.mxu2 %v6842_v48  ;;  %4395 = vmatpush.bf16.msrb.mxu3 %v7066_v1  ;;  %v6426_v48 = vor.u32 %v7502_v32, %v6425_v31  ;;  %v6650_v1 = vor.u32 %v7558_v39, %v6649_v36  ;;  %v6537_v31 = vld [vmem:[#allocation16 + $0x278] sm:$0xf]  ;;  %v7530_v32 = vld [vmem:[#allocation16 + $0x290] sm:$0xf0]  ;;  %v7013_v36 = vld [vmem:[#allocation16 + $0x630] sm:$0xf] }
 0x30a   :  { %v7649_v39 = vld [vmem:[#allocation16 + $0x648] sm:$0xf0]  ;;  %v6538_v43 = vor.u32 %v7530_v32, %v6537_v31  ;;  %v7611_v31 = vld [vmem:[#allocation16 + $0x51c] sm:$0xf]  ;;  %v6875_v32 = vld [vmem:[#allocation16 + $0x534] sm:$0xf0] }
 0x30b   :  { %4355 = vmatpush.bf16.msrb.mxu0 %v6338_v51  ;;  %4369 = vmatpush.bf16.msrb.mxu1 %v6562_v52  ;;  %v6926_v51 = vor.u32 %v7624_v44, %v6923_v45  ;;  %v7551_v52 = vld [vmem:[#allocation16 + $0x338] sm:$0xf0]  ;;  %v6285_v44 = vld [vmem:[#allocation16 + $0x80] sm:$0xf] }
 0x30c   :  { %v6622_v63 = vor.u32 %v7551_v52, %v6621_v50  ;;  %v7467_v45 = vld [vmem:[#allocation16 + $0x98] sm:$0xf0]  ;;  %v6985_v50 = vld [vmem:[#allocation16 + $0x5f8] sm:$0xf] }
 0x30d   :  { %4382 = vmatpush.bf16.msrb.mxu2 %v6814_v54  ;;  %4396 = vmatpush.bf16.msrb.mxu3 %v7038_v55  ;;  %v6873_v54 = vld [vmem:[#allocation16 + $0x518] sm:$0xf]  ;;  %v7614_v55 = vld [vmem:[#allocation16 + $0x530] sm:$0xf0] }
 0x30e   :  { %v6874_v7 = vor.u32 %v7614_v55, %v6873_v54  ;;  %v6481_v54 = vld [vmem:[#allocation16 + $0x208] sm:$0xf]  ;;  %v7516_v55 = vld [vmem:[#allocation16 + $0x220] sm:$0xf0] }
 0x30f   :  { %4356 = vmatpush.bf16.msrb.mxu0 %v6310_v3  ;;  %4370 = vmatpush.bf16.msrb.mxu1 %v6534_v4  ;;  %v6674_v3 = vor.u32 %v7561_v0, %v6671_v53  ;;  %v6898_v4 = vor.u32 %v7617_v17, %v6895_v57  ;;  %v6257_v0 = vld [vmem:[#allocation16 + $0x48] sm:$0xf]  ;;  %v7460_v53 = vld [vmem:[#allocation16 + $0x60] sm:$0xf0]  ;;  %v6762_v17 = vor.u32 %v7586_v49, %v6761_v38  ;;  %v6847_v49 = vld [vmem:[#allocation16 + $0x4fc] sm:$0xf0] }
 0x310   :  { %v7604_v38 = vld [vmem:[#allocation16 + $0x4e4] sm:$0xf] }
 0x311   :  { %4383 = vmatpush.bf16.msrb.mxu2 %v6786_v9  ;;  %4397 = vmatpush.bf16.msrb.mxu3 %v7010_v12  ;;  %v6593_v9 = vld [vmem:[#allocation16 + $0x2e8] sm:$0xf]  ;;  %v7544_v12 = vld [vmem:[#allocation16 + $0x300] sm:$0xf0] }
 0x313   :  { %4357 = vmatpush.bf16.msrb.mxu0 %v6282_v16  ;;  %4371 = vmatpush.bf16.msrb.mxu1 %v6506_v18  ;;  %v6370_v16 = vor.u32 %v7488_v6, %v6369_v5  ;;  %v6594_v18 = vor.u32 %v7544_v12, %v6593_v9  ;;  %v6229_v5 = vld [vmem:[#allocation16 + $0x10] sm:$0xf]  ;;  %v7453_v6 = vld [vmem:[#allocation16 + $0x28] sm:$0xf0] }
 0x314   :  { %v7509_v12 = vld [vmem:[#allocation16 + $0x1e8] sm:$0xf0] }
 0x315   :  { %4384 = vmatpush.bf16.msrb.mxu2 %v6758_v21  ;;  %4398 = vmatpush.bf16.msrb.mxu3 %v6982_v24  ;;  %v6565_v21 = vld [vmem:[#allocation16 + $0x2b0] sm:$0xf]  ;;  %v7537_v24 = vld [vmem:[#allocation16 + $0x2c8] sm:$0xf0] }
 0x317   :  { %4358 = vmatpush.bf16.msrb.mxu0 %v6254_v26  ;;  %4372 = vmatpush.bf16.msrb.mxu1 %v6478_v41  ;;  %v6342_v26 = vor.u32 %v7481_v37, %v6341_v19  ;;  %v6566_v41 = vor.u32 %v7537_v24, %v6565_v21  ;;  %v6929_v19 = vld [vmem:[#allocation16 + $0x588] sm:$0xf]  ;;  %v7628_v37 = vld [vmem:[#allocation16 + $0x5a0] sm:$0xf0]  ;;  %v6430_v21 = vor.u32 %v7499_v13, %v6427_v14  ;;  %v7590_v13 = vld [vmem:[#allocation16 + $0x474] sm:$0xf] }
 0x318   :  { %v6654_v24 = vor.u32 %v7555_v15, %v6651_v23  ;;  %v6791_v14 = vld [vmem:[#allocation16 + $0x48c] sm:$0xf0]  ;;  %v7646_v15 = vld [vmem:[#allocation16 + $0x634] sm:$0xf] }
 0x319   :  { %4385 = vmatpush.bf16.msrb.mxu2 %v6730_v22  ;;  %4399 = vmatpush.bf16.msrb.mxu3 %v6954_v35  ;;  %v6789_v22 = vld [vmem:[#allocation16 + $0x470] sm:$0xf]  ;;  %v7593_v35 = vld [vmem:[#allocation16 + $0x488] sm:$0xf0] }
 0x31a   :  { %v7015_v23 = vld [vmem:[#allocation16 + $0x64c] sm:$0xf0] }
 0x31b   :  { %4359 = vmatpush.bf16.msrb.mxu0 %v6226_v46  ;;  %4373 = vmatpush.bf16.msrb.mxu1 %v6450_v47  ;;  %v6790_v46 = vor.u32 %v7593_v35, %v6789_v22  ;;  %v7014_v47 = vor.u32 %v7649_v39, %v7013_v36  ;;  %v7667_v22 = vld [vmem:[#allocation16 + $0x6dc] sm:$0xf]  ;;  %v7099_v35 = vld [vmem:[#allocation16 + $0x6f4] sm:$0xf0]  ;;  %v6402_v36 = vor.u32 %v7492_v2, %v6399_v25 }
 0x31c   :  { %v7583_v2 = vld [vmem:[#allocation16 + $0x43c] sm:$0xf]  ;;  %v6763_v25 = vld [vmem:[#allocation16 + $0x454] sm:$0xf0] }
 0x31d   :  { %4386 = vmatpush.bf16.msrb.mxu2 %v6702_v11  ;;  %4400 = vmatpush.bf16.msrb.mxu3 %v6926_v51  ;;  %v7642_v11 = vld [vmem:[#allocation16 + $0x610] sm:$0xf0]  ;;  %v6286_v51 = vor.u32 %v7467_v45, %v6285_v44  ;;  %v7485_v44 = vld [vmem:[#allocation16 + $0x12c] sm:$0xf]  ;;  %v6371_v45 = vld [vmem:[#allocation16 + $0x144] sm:$0xf0] }
 0x31e   :  { %4360 = vmatmul.bf16.vlgmr.msrb.gmra.mxu0 %v8229_v33  ;;  %4374 = vmatmul.bf16.vlgmr.msrb.gmra.mxu1 %v8231_v34  ;;  %v6986_v57 = vor.u32 %v7642_v11, %v6985_v50  ;;  %v7660_v50 = vld [vmem:[#allocation16 + $0x6a4] sm:$0xf]  ;;  %v7071_v11 = vld [vmem:[#allocation16 + $0x6bc] sm:$0xf0] }
 0x31f   :  { %4408 = vmatpush.bf16.msra.mxu0 %v6426_v48  ;;  %4422 = vmatpush.bf16.msra.mxu1 %v6650_v1  ;;  %v6509_v48 = vld [vmem:[#allocation16 + $0x240] sm:$0xf]  ;;  %v7523_v1 = vld [vmem:[#allocation16 + $0x258] sm:$0xf0] }
 0x320   :  { %v6510_v52 = vor.u32 %v7523_v1, %v6509_v48  ;;  %v7541_v48 = vld [vmem:[#allocation16 + $0x2ec] sm:$0xf]  ;;  %v6595_v1 = vld [vmem:[#allocation16 + $0x304] sm:$0xf0] }
 0x321   :  { %4387 = vmatpush.bf16.msrb.mxu2 %v6674_v3  ;;  %4401 = vmatpush.bf16.msrb.mxu3 %v6898_v4  ;;  %v6258_v3 = vor.u32 %v7460_v53, %v6257_v0  ;;  %v6482_v4 = vor.u32 %v7516_v55, %v6481_v54  ;;  %v7478_v0 = vld [vmem:[#allocation16 + $0xf4] sm:$0xf]  ;;  %v6343_v53 = vld [vmem:[#allocation16 + $0x10c] sm:$0xf0] }
 0x322   :  { %v7534_v54 = vld [vmem:[#allocation16 + $0x2b4] sm:$0xf]  ;;  %v6567_v55 = vld [vmem:[#allocation16 + $0x2cc] sm:$0xf0] }
 0x323   :  { %4409 = vmatpush.bf16.msra.mxu0 %v6398_v59  ;;  %4423 = vmatpush.bf16.msra.mxu1 %v6622_v63  ;;  %v6957_v59 = vld [vmem:[#allocation16 + $0x5c0] sm:$0xf]  ;;  %v7635_v63 = vld [vmem:[#allocation16 + $0x5d8] sm:$0xf0] }
 0x324   :  { %4388 = vmatmul.bf16.vlgmr.msrb.gmra.mxu2 %v8235_v60  ;;  %4402 = vmatmul.bf16.vlgmr.msrb.gmra.mxu3 %v8237_v61  ;;  %v6958_v9 = vor.u32 %v7635_v63, %v6957_v59  ;;  %v7653_v59 = vld [vmem:[#allocation16 + $0x66c] sm:$0xf]  ;;  %v7043_v63 = vld [vmem:[#allocation16 + $0x684] sm:$0xf0] }
 0x325   :  { %4436 = vmatpush.bf16.msra.mxu2 %v6874_v7  ;;  %4450 = vmatpush.bf16.msra.mxu3 %v7098_v8  ;;  %v6453_v7 = vld [vmem:[#allocation16 + $0x1d0] sm:$0xf]  ;;  %v6734_v8 = vor.u32 %v7579_v58, %v6733_v56  ;;  %v7597_v56 = vld [vmem:[#allocation16 + $0x4ac] sm:$0xf]  ;;  %v6819_v58 = vld [vmem:[#allocation16 + $0x4c4] sm:$0xf0] }
 0x327   :  { %4410 = vmatpush.bf16.msra.mxu0 %v6370_v16  ;;  %4424 = vmatpush.bf16.msra.mxu1 %v6594_v18  ;;  %v6705_v16 = vld [vmem:[#allocation16 + $0x3c8] sm:$0xf]  ;;  %v7572_v18 = vld [vmem:[#allocation16 + $0x3e0] sm:$0xf0] }
 0x328   :  { %v6706_v10 = vor.u32 %v7572_v18, %v6705_v16 }
 0x329   :  { %4437 = vmatpush.bf16.msra.mxu2 %v6846_v20  ;;  %4451 = vmatpush.bf16.msra.mxu3 %v7070_v42  ;;  %v6230_v20 = vor.u32 %v7453_v6, %v6229_v5  ;;  %v6454_v42 = vor.u32 %v7509_v12, %v6453_v7  ;;  %v7471_v5 = vld [vmem:[#allocation16 + $0xbc] sm:$0xf]  ;;  %v6315_v6 = vld [vmem:[#allocation16 + $0xd4] sm:$0xf0]  ;;  %v6822_v7 = vor.u32 %v7597_v56, %v6819_v58  ;;  %v6405_v56 = vld [vmem:[#allocation16 + $0x168] sm:$0xf] }
 0x32a   :  { %v6539_v12 = vld [vmem:[#allocation16 + $0x294] sm:$0xf0]  ;;  %v6318_v16 = vor.u32 %v7471_v5, %v6315_v6  ;;  %v7496_v58 = vld [vmem:[#allocation16 + $0x180] sm:$0xf0]  ;;  %v7562_v5 = vld [vmem:[#allocation16 + $0x394] sm:$0xf] }
 0x32b   :  { %4411 = vmatpush.bf16.msra.mxu0 %v6342_v26  ;;  %4425 = vmatpush.bf16.msra.mxu1 %v6566_v41  ;;  %v6930_v26 = vor.u32 %v7628_v37, %v6929_v19  ;;  %v6623_v41 = vld [vmem:[#allocation16 + $0x33c] sm:$0xf0]  ;;  %v7464_v19 = vld [vmem:[#allocation16 + $0x84] sm:$0xf]  ;;  %v6679_v6 = vld [vmem:[#allocation16 + $0x3ac] sm:$0xf0] }
 0x32c   :  { %v6626_v39 = vor.u32 %v7548_v62, %v6623_v41  ;;  %v6287_v37 = vld [vmem:[#allocation16 + $0x9c] sm:$0xf0]  ;;  %v7639_v62 = vld [vmem:[#allocation16 + $0x5fc] sm:$0xf] }
 0x32d   :  { %4438 = vmatpush.bf16.msra.mxu2 %v6818_v28  ;;  %4452 = vmatpush.bf16.msra.mxu3 %v7042_v29  ;;  %v6901_v28 = vld [vmem:[#allocation16 + $0x550] sm:$0xf]  ;;  %v7621_v29 = vld [vmem:[#allocation16 + $0x568] sm:$0xf0] }
 0x32f   :  { %4412 = vmatpush.bf16.msra.mxu0 %v6314_v40  ;;  %4426 = vmatpush.bf16.msra.mxu1 %v6538_v43  ;;  %v6678_v40 = vor.u32 %v7565_v30, %v6677_v27  ;;  %v6902_v43 = vor.u32 %v7621_v29, %v6901_v28  ;;  %v7457_v27 = vld [vmem:[#allocation16 + $0x4c] sm:$0xf]  ;;  %v6259_v30 = vld [vmem:[#allocation16 + $0x64] sm:$0xf0]  ;;  %v6766_v28 = vor.u32 %v7583_v2, %v6763_v25  ;;  %v7608_v25 = vld [vmem:[#allocation16 + $0x500] sm:$0xf0] }
 0x330   :  { %v6853_v2 = vld [vmem:[#allocation16 + $0x4e8] sm:$0xf] }
 0x331   :  { %4439 = vmatpush.bf16.msra.mxu2 %v6790_v46  ;;  %4453 = vmatpush.bf16.msra.mxu3 %v7014_v47  ;;  %v6878_v46 = vor.u32 %v7611_v31, %v6875_v32  ;;  %v7102_v47 = vor.u32 %v7667_v22, %v7099_v35  ;;  %v7513_v31 = vld [vmem:[#allocation16 + $0x20c] sm:$0xf]  ;;  %v6483_v32 = vld [vmem:[#allocation16 + $0x224] sm:$0xf0]  ;;  %v7576_v22 = vld [vmem:[#allocation16 + $0x404] sm:$0xf] }
 0x332   :  { %v6735_v35 = vld [vmem:[#allocation16 + $0x41c] sm:$0xf0] }
 0x333   :  { %4413 = vmatpush.bf16.msra.mxu0 %v6286_v51  ;;  %4427 = vmatpush.bf16.msra.mxu1 %v6510_v52  ;;  %v6374_v51 = vor.u32 %v7485_v44, %v6371_v45  ;;  %v6598_v52 = vor.u32 %v7541_v48, %v6595_v1  ;;  %v7450_v44 = vld [vmem:[#allocation16 + $0x14] sm:$0xf]  ;;  %v6231_v45 = vld [vmem:[#allocation16 + $0x2c] sm:$0xf0] }
 0x334   :  { %v6455_v1 = vld [vmem:[#allocation16 + $0x1ec] sm:$0xf0] }
 0x335   :  { %4440 = vmatpush.bf16.msra.mxu2 %v6762_v17  ;;  %4454 = vmatpush.bf16.msra.mxu3 %v6986_v57  ;;  %v6850_v17 = vor.u32 %v7604_v38, %v6847_v49  ;;  %v7074_v57 = vor.u32 %v7660_v50, %v7071_v11  ;;  %v6433_v38 = vld [vmem:[#allocation16 + $0x1a0] sm:$0xf]  ;;  %v7503_v49 = vld [vmem:[#allocation16 + $0x1b8] sm:$0xf0] }
 0x336   :  { %v6657_v50 = vld [vmem:[#allocation16 + $0x360] sm:$0xf]  ;;  %v7559_v11 = vld [vmem:[#allocation16 + $0x378] sm:$0xf0] }
 0x337   :  { %4414 = vmatpush.bf16.msra.mxu0 %v6258_v3  ;;  %4428 = vmatpush.bf16.msra.mxu1 %v6482_v4  ;;  %v6346_v3 = vor.u32 %v7478_v0, %v6343_v53  ;;  %v6570_v4 = vor.u32 %v7534_v54, %v6567_v55  ;;  %v7625_v0 = vld [vmem:[#allocation16 + $0x58c] sm:$0xf]  ;;  %v6931_v53 = vld [vmem:[#allocation16 + $0x5a4] sm:$0xf0]  ;;  %v6434_v54 = vor.u32 %v7503_v49, %v6433_v38 }
 0x338   :  { %v6658_v55 = vor.u32 %v7559_v11, %v6657_v50  ;;  %v6545_v50 = vld [vmem:[#allocation16 + $0x280] sm:$0xf]  ;;  %v7531_v11 = vld [vmem:[#allocation16 + $0x298] sm:$0xf0] }
 0x339   :  { %4441 = vmatpush.bf16.msra.mxu2 %v6734_v8  ;;  %4455 = vmatpush.bf16.msra.mxu3 %v6958_v9  ;;  %v7046_v8 = vor.u32 %v7653_v59, %v7043_v63  ;;  %v7527_v9 = vld [vmem:[#allocation16 + $0x27c] sm:$0xf]  ;;  %v6629_v59 = vld [vmem:[#allocation16 + $0x328] sm:$0xf] }
 0x33a   :  { %v6542_v18 = vor.u32 %v7527_v9, %v6539_v12  ;;  %v6881_v9 = vld [vmem:[#allocation16 + $0x520] sm:$0xf]  ;;  %v7615_v12 = vld [vmem:[#allocation16 + $0x538] sm:$0xf0] }
 0x33b   :  { %4415 = vmatpush.bf16.msra.mxu0 %v6230_v20  ;;  %4429 = vmatpush.bf16.msra.mxu1 %v6454_v42  ;;  %v6794_v20 = vor.u32 %v7590_v13, %v6791_v14  ;;  %v7018_v42 = vor.u32 %v7646_v15, %v7015_v23  ;;  %v7105_v13 = vld [vmem:[#allocation16 + $0x6e0] sm:$0xf]  ;;  %v7671_v14 = vld [vmem:[#allocation16 + $0x6f8] sm:$0xf0]  ;;  %v6406_v15 = vor.u32 %v7496_v58, %v6405_v56  ;;  %v6293_v56 = vld [vmem:[#allocation16 + $0x88] sm:$0xf] }
 0x33c   :  { %v7468_v58 = vld [vmem:[#allocation16 + $0xa0] sm:$0xf0] }
 0x33d   :  { %4442 = vmatpush.bf16.msra.mxu2 %v6706_v10  ;;  %4456 = vmatpush.bf16.msra.mxu3 %v6930_v26  ;;  %v6987_v10 = vld [vmem:[#allocation16 + $0x614] sm:$0xf0]  ;;  %v6290_v26 = vor.u32 %v7464_v19, %v6287_v37  ;;  %v6377_v19 = vld [vmem:[#allocation16 + $0x130] sm:$0xf]  ;;  %v7489_v37 = vld [vmem:[#allocation16 + $0x148] sm:$0xf0] }
 0x33e   :  { %4416 = vmatmul.bf16.vlgmr.msra.gmra.mxu0 %v8229_v33  ;;  %4430 = vmatmul.bf16.vlgmr.msra.gmra.mxu1 %v8231_v34  ;;  %v6990_v29 = vor.u32 %v7639_v62, %v6987_v10  ;;  %v7077_v62 = vld [vmem:[#allocation16 + $0x6a8] sm:$0xf]  ;;  %v7664_v10 = vld [vmem:[#allocation16 + $0x6c0] sm:$0xf0] }
 0x33f   :  { %4464 = vmatpush.bf16.msrb.mxu0 %v6430_v21  ;;  %4478 = vmatpush.bf16.msrb.mxu1 %v6654_v24  ;;  %v7520_v21 = vld [vmem:[#allocation16 + $0x244] sm:$0xf]  ;;  %v6511_v24 = vld [vmem:[#allocation16 + $0x25c] sm:$0xf0] }
 0x340   :  { %v6514_v41 = vor.u32 %v7520_v21, %v6511_v24  ;;  %v6601_v21 = vld [vmem:[#allocation16 + $0x2f0] sm:$0xf]  ;;  %v7545_v24 = vld [vmem:[#allocation16 + $0x308] sm:$0xf0] }
 0x341   :  { %4443 = vmatpush.bf16.msra.mxu2 %v6678_v40  ;;  %4457 = vmatpush.bf16.msra.mxu3 %v6902_v43  ;;  %v6262_v40 = vor.u32 %v7457_v27, %v6259_v30  ;;  %v6486_v43 = vor.u32 %v7513_v31, %v6483_v32  ;;  %v8262_v27 = vld [vmem:[%s8394_s9] sm:$0xff]  ;;  %v6854_v31 = vor.u32 %v7608_v25, %v6853_v2  ;;  %v6965_v2 = vld [vmem:[#allocation16 + $0x5c8] sm:$0xf]  ;;  %v7636_v25 = vld [vmem:[#allocation16 + $0x5e0] sm:$0xf0]  ;;  %s8042_s9 = smov [#allocation18]  }
 0x342   :  { %v7078_v32 = vor.u32 %v7664_v10, %v7077_v62  ;;  %s4879_s25 = sshll.u32 %s8042_s9, 4  ;;  %s4880_s25 = int_to_ptr.vmem [resolvable:$true] %s4879_s25 }
 0x343   :  { %4465 = vmatpush.bf16.msrb.mxu0 %v6402_v36  ;;  %4479 = vmatpush.bf16.msrb.mxu1 %v6626_v39  ;;  %v7632_v36 = vld [vmem:[#allocation16 + $0x5c4] sm:$0xf]  ;;  %v6959_v39 = vld [vmem:[#allocation16 + $0x5dc] sm:$0xf0]  ;;  %4887 = dma.vmem_to_hbm [thread:$0]  %s4880_s25, 512, %s4882_s23, [#allocation19], %s8037_s0, %s8037_s0, %s8038_s1  }
 0x344   :  { %4444 = vmatmul.bf16.vlgmr.msra.gmra.mxu2 %v8235_v60  ;;  %4458 = vmatmul.bf16.vlgmr.msra.gmra.mxu3 %v8237_v61  ;;  %v6962_v48 = vor.u32 %v7632_v36, %v6959_v39  ;;  %v6825_v36 = vld [vmem:[#allocation16 + $0x4b0] sm:$0xf]  ;;  %v7601_v39 = vld [vmem:[#allocation16 + $0x4c8] sm:$0xf0]  ;;  %s4868_s0 = sshll.u32 %s8395_s10, 4  ;;  %s4869_s0 = int_to_ptr.hbm [resolvable:$true] %s4868_s0 }
 0x345   :  { %4492 = vmatpush.bf16.msrb.mxu2 %v6878_v46  ;;  %4506 = vmatpush.bf16.msrb.mxu3 %v7102_v47  ;;  %v7506_v46 = vld [vmem:[#allocation16 + $0x1d4] sm:$0xf]  ;;  %v6738_v47 = vor.u32 %v7576_v22, %v6735_v35  ;;  %v6573_v22 = vld [vmem:[#allocation16 + $0x2b8] sm:$0xf]  ;;  %v6826_v38 = vor.u32 %v7601_v39, %v6825_v36  ;;  %v6713_v36 = vld [vmem:[#allocation16 + $0x3d0] sm:$0xf] }
 0x346   :  { %v7538_v35 = vld [vmem:[#allocation16 + $0x2d0] sm:$0xf0]  ;;  %v7573_v39 = vld [vmem:[#allocation16 + $0x3e8] sm:$0xf0] }
 0x347   :  { %4466 = vmatpush.bf16.msrb.mxu0 %v6374_v51  ;;  %4480 = vmatpush.bf16.msrb.mxu1 %v6598_v52  ;;  %v7569_v51 = vld [vmem:[#allocation16 + $0x3cc] sm:$0xf]  ;;  %v6707_v52 = vld [vmem:[#allocation16 + $0x3e4] sm:$0xf0] }
 0x348   :  { %v6710_v63 = vor.u32 %v7569_v51, %v6707_v52  ;;  %v6797_v51 = vld [vmem:[#allocation16 + $0x478] sm:$0xf]  ;;  %v7594_v52 = vld [vmem:[#allocation16 + $0x490] sm:$0xf0] }
 0x349   :  { %4493 = vmatpush.bf16.msrb.mxu2 %v6850_v17  ;;  %4507 = vmatpush.bf16.msrb.mxu3 %v7074_v57  ;;  %v6234_v17 = vor.u32 %v7450_v44, %v6231_v45  ;;  %v6458_v57 = vor.u32 %v7506_v46, %v6455_v1  ;;  %v3018_v44 = vperm.slane %v8262_v27, 0  ;;  %v6574_v46 = vor.u32 %v7538_v35, %v6573_v22  ;;  %v7510_v35 = vld [vmem:[#allocation16 + $0x1f0] sm:$0xf0] }
 0x34a   :  { %v6966_v22 = vor.u32 %v7636_v25, %v6965_v2 }
 0x34b   :  { %4467 = vmatpush.bf16.msrb.mxu0 %v6346_v3  ;;  %4481 = vmatpush.bf16.msrb.mxu1 %v6570_v4  ;;  %v6934_v3 = vor.u32 %v7625_v0, %v6931_v53  ;;  %v7552_v4 = vld [vmem:[#allocation16 + $0x340] sm:$0xf0]  ;;  %v7021_v0 = vld [vmem:[#allocation16 + $0x638] sm:$0xf]  ;;  %v7650_v53 = vld [vmem:[#allocation16 + $0x650] sm:$0xf0] }
 0x34c   :  { %v6630_v23 = vor.u32 %v7552_v4, %v6629_v59  ;;  %v6798_v59 = vor.u32 %v7594_v52, %v6797_v51  ;;  %v7524_v4 = vld [vmem:[#allocation16 + $0x260] sm:$0xf0]  ;;  %v6685_v51 = vld [vmem:[#allocation16 + $0x398] sm:$0xf] }
 0x34d   :  { %4494 = vmatpush.bf16.msrb.mxu2 %v6822_v7  ;;  %4508 = vmatpush.bf16.msrb.mxu3 %v7046_v8  ;;  %v7618_v7 = vld [vmem:[#allocation16 + $0x554] sm:$0xf]  ;;  %v6903_v8 = vld [vmem:[#allocation16 + $0x56c] sm:$0xf0] }
 0x34f   :  { %4468 = vmatpush.bf16.msrb.mxu0 %v6318_v16  ;;  %4482 = vmatpush.bf16.msrb.mxu1 %v6542_v18  ;;  %v6682_v16 = vor.u32 %v7562_v5, %v6679_v6  ;;  %v6906_v18 = vor.u32 %v7618_v7, %v6903_v8  ;;  %v6769_v5 = vld [vmem:[#allocation16 + $0x440] sm:$0xf]  ;;  %v7587_v6 = vld [vmem:[#allocation16 + $0x458] sm:$0xf0] }
 0x350   :  { %v6993_v7 = vld [vmem:[#allocation16 + $0x600] sm:$0xf]  ;;  %v7643_v8 = vld [vmem:[#allocation16 + $0x618] sm:$0xf0] }
 0x351   :  { %4495 = vmatpush.bf16.msrb.mxu2 %v6794_v20  ;;  %4509 = vmatpush.bf16.msrb.mxu3 %v7018_v42  ;;  %v6882_v20 = vor.u32 %v7615_v12, %v6881_v9  ;;  %v7106_v42 = vor.u32 %v7671_v14, %v7105_v13  ;;  %v6294_v12 = vor.u32 %v7468_v58, %v6293_v56  ;;  %v6265_v14 = vld [vmem:[#allocation16 + $0x50] sm:$0xf] }
 0x353   :  { %4469 = vmatpush.bf16.msrb.mxu0 %v6290_v26  ;;  %4483 = vmatpush.bf16.msrb.mxu1 %v6514_v41  ;;  %v6378_v26 = vor.u32 %v7489_v37, %v6377_v19  ;;  %v6602_v41 = vor.u32 %v7545_v24, %v6601_v21  ;;  %v6994_v19 = vor.u32 %v7643_v8, %v6993_v7  ;;  %v6489_v37 = vld [vmem:[#allocation16 + $0x210] sm:$0xf]  ;;  %v7580_v24 = vld [vmem:[#allocation16 + $0x420] sm:$0xf0] }
 0x355   :  { %4496 = vmatpush.bf16.msrb.mxu2 %v6766_v28  ;;  %4510 = vmatpush.bf16.msrb.mxu3 %v6990_v29  ;;  %v6349_v28 = vld [vmem:[#allocation16 + $0xf8] sm:$0xf]  ;;  %v7482_v29 = vld [vmem:[#allocation16 + $0x110] sm:$0xf0] }
 0x356   :  { %v6350_v45 = vor.u32 %v7482_v29, %v6349_v28  ;;  %v6237_v28 = vld [vmem:[#allocation16 + $0x18] sm:$0xf]  ;;  %v7454_v29 = vld [vmem:[#allocation16 + $0x30] sm:$0xf0] }
 0x357   :  { %4470 = vmatpush.bf16.msrb.mxu0 %v6262_v40  ;;  %4484 = vmatpush.bf16.msrb.mxu1 %v6486_v43  ;;  %v7049_v40 = vld [vmem:[#allocation16 + $0x670] sm:$0xf]  ;;  %v7657_v43 = vld [vmem:[#allocation16 + $0x688] sm:$0xf0] }
 0x358   :  { %v7050_v49 = vor.u32 %v7657_v43, %v7049_v40 }
 0x359   :  { %4497 = vmatpush.bf16.msrb.mxu2 %v6738_v47  ;;  %4511 = vmatpush.bf16.msrb.mxu3 %v6962_v48  ;;  %v6321_v47 = vld [vmem:[#allocation16 + $0xc0] sm:$0xf]  ;;  %v7475_v48 = vld [vmem:[#allocation16 + $0xd8] sm:$0xf0] }
 0x35a   :  { %v4193_v30 = vpop.f32.mrf.mxu0  ;;  %v4207_v1 = vpop.f32.mrf.mxu1 }
 0x35b   :  { %4471 = vmatpush.bf16.msrb.mxu0 %v6234_v17  ;;  %4485 = vmatpush.bf16.msrb.mxu1 %v6458_v57  ;;  %v4194_v17 = vadd.f32 %v4193_v30, %v3018_v44  ;;  %v6322_v57 = vor.u32 %v7475_v48, %v6321_v47  ;;  %v6238_v48 = vor.u32 %v7454_v29, %v6237_v28 }
 0x35d   :  { %4498 = vmatpush.bf16.msrb.mxu2 %v6710_v63  ;;  %4512 = vmatpush.bf16.msrb.mxu3 %v6934_v3  ;;  %v7022_v63 = vor.u32 %v7650_v53, %v7021_v0  ;;  %v6517_v3 = vld [vmem:[#allocation16 + $0x248] sm:$0xf]  ;;  %v4208_v9 = vadd.f32 %v4207_v1, %v4194_v17  ;;  %v7566_v0 = vld [vmem:[#allocation16 + $0x3b0] sm:$0xf0]  ;;  %v6909_v53 = vld [vmem:[#allocation16 + $0x558] sm:$0xf] }
 0x35e   :  { %4472 = vmatmul.bf16.vlgmr.msrb.gmra.mxu0 %v8229_v33  ;;  %4486 = vmatmul.bf16.vlgmr.msrb.gmra.mxu1 %v8231_v34  ;;  %v6518_v13 = vor.u32 %v7524_v4, %v6517_v3  ;;  %v7622_v17 = vld [vmem:[#allocation16 + $0x570] sm:$0xf0]  ;;  %v6686_v56 = vor.u32 %v7566_v0, %v6685_v51 }
 0x35f   :  { %4520 = vmatpush.bf16.msra.mxu0 %v6434_v54  ;;  %4534 = vmatpush.bf16.msra.mxu1 %v6658_v55  ;;  %v6546_v54 = vor.u32 %v7531_v11, %v6545_v50  ;;  %v6714_v50 = vor.u32 %v7573_v39, %v6713_v36  ;;  %v6910_v58 = vor.u32 %v7622_v17, %v6909_v53 }
 0x361   :  { %4499 = vmatpush.bf16.msrb.mxu2 %v6682_v16  ;;  %4513 = vmatpush.bf16.msrb.mxu3 %v6906_v18  ;;  %v6770_v18 = vor.u32 %v7587_v6, %v6769_v5 }
 0x362   :  { %v4195_v55 = vpop.f32.mrf.mxu0  ;;  %v4209_v62 = vpop.f32.mrf.mxu1 }
 0x363   :  { %4521 = vmatpush.bf16.msra.mxu0 %v6406_v15  ;;  %4535 = vmatpush.bf16.msra.mxu1 %v6630_v23  ;;  %v7461_v15 = vld [vmem:[#allocation16 + $0x68] sm:$0xf0] }
 0x364   :  { %4500 = vmatmul.bf16.vlgmr.msrb.gmra.mxu2 %v8235_v60  ;;  %4514 = vmatmul.bf16.vlgmr.msrb.gmra.mxu3 %v8237_v61  ;;  %v6266_v10 = vor.u32 %v7461_v15, %v6265_v14 }
 0x365   :  { %4548 = vmatpush.bf16.msra.mxu2 %v6882_v20  ;;  %4562 = vmatpush.bf16.msra.mxu3 %v7106_v42  ;;  %v7517_v20 = vld [vmem:[#allocation16 + $0x228] sm:$0xf0]  ;;  %v6741_v42 = vld [vmem:[#allocation16 + $0x408] sm:$0xf] }
 0x366   :  { %v6490_v30 = vor.u32 %v7517_v20, %v6489_v37 }
 0x367   :  { %4522 = vmatpush.bf16.msra.mxu0 %v6378_v26  ;;  %4536 = vmatpush.bf16.msra.mxu1 %v6602_v41  ;;  %v4221_v23 = vpop.f32.mrf.mxu2  ;;  %v4235_v16 = vpop.f32.mrf.mxu3  ;;  %v4196_v26 = vadd.f32 %v4195_v55, %v3018_v44  ;;  %v3019_v44 = vperm.slane %v8262_v27, 1 }
 0x368   :  { %v4222_v21 = vadd.f32 %v4221_v23, %v4208_v9 }
 0x369   :  { %4549 = vmatpush.bf16.msra.mxu2 %v6854_v31  ;;  %4563 = vmatpush.bf16.msra.mxu3 %v7078_v32  ;;  %v6461_v31 = vld [vmem:[#allocation16 + $0x1d8] sm:$0xf]  ;;  %v6742_v32 = vor.u32 %v7580_v24, %v6741_v42  ;;  %v4210_v47 = vadd.f32 %v4209_v62, %v4196_v26  ;;  %v3020_v24 = vperm.slane %v8262_v27, 2 }
 0x36a   :  { %v4236_v41 = vadd.f32 %v4235_v16, %v4222_v21  ;;  %v6462_v1 = vor.u32 %v7510_v35, %v6461_v31 }
 0x36b   :  { %4523 = vmatpush.bf16.msra.mxu0 %v6350_v45  ;;  %4537 = vmatpush.bf16.msra.mxu1 %v6574_v46  ;;  %v4249_v43 = vpop.f32.mrf.mxu0  ;;  %v6937_v45 = vld [vmem:[#allocation16 + $0x590] sm:$0xf]  ;;  %v7629_v46 = vld [vmem:[#allocation16 + $0x5a8] sm:$0xf0]  ;;  %v4263_v55 = vpop.f32.mrf.mxu1 }
 0x36c   :  { %v7107_v40 = vmul.f32 -1.442695, %v4236_v41  ;;  %v6938_v11 = vor.u32 %v7629_v46, %v6937_v45 }
 0x36d   :  { %4550 = vmatpush.bf16.msra.mxu2 %v6826_v38  ;;  %4564 = vmatpush.bf16.msra.mxu3 %v7050_v49 }
 0x36e   :  { %7693 = vpow2.f32 %v7107_v40 }
 0x36f   :  { %4524 = vmatpush.bf16.msra.mxu0 %v6322_v57  ;;  %4538 = vmatpush.bf16.msra.mxu1 %v6546_v54  ;;  %v4223_v38 = vpop.f32.mrf.mxu2  ;;  %v4237_v49 = vpop.f32.mrf.mxu3  ;;  %v4250_v57 = vadd.f32 %v4249_v43, %v3019_v44 }
 0x370   :  { %v4224_v52 = vadd.f32 %v4223_v38, %v4210_v47 }
 0x371   :  { %4551 = vmatpush.bf16.msra.mxu2 %v6798_v59  ;;  %4565 = vmatpush.bf16.msra.mxu3 %v7022_v63  ;;  %v4264_v3 = vadd.f32 %v4263_v55, %v4250_v57 }
 0x372   :  { %v4238_v54 = vadd.f32 %v4237_v49, %v4224_v52 }
 0x373   :  { %4525 = vmatpush.bf16.msra.mxu0 %v6294_v12  ;;  %4539 = vmatpush.bf16.msra.mxu1 %v6518_v13  ;;  %v4251_v4 = vpop.f32.mrf.mxu0  ;;  %v4265_v13 = vpop.f32.mrf.mxu1 }
 0x374   :  { %v7694_v59 = vpop.eup %7693  ;;  %v7114_v63 = vmul.f32 -1.442695, %v4238_v54  ;;  %v4252_v9 = vadd.f32 %v4251_v4, %v3019_v44 }
 0x375   :  { %4552 = vmatpush.bf16.msra.mxu2 %v6770_v18  ;;  %4566 = vmatpush.bf16.msra.mxu3 %v6994_v19  ;;  %v8270_v5 = vadd.f32 1.0, %v7694_v59 }
 0x376   :  { %7695 = vpow2.f32 %v7114_v63  ;;  %v4266_v14 = vadd.f32 %v4265_v13, %v4252_v9 }
 0x377   :  { %4526 = vmatpush.bf16.msra.mxu0 %v6266_v10  ;;  %4540 = vmatpush.bf16.msra.mxu1 %v6490_v30  ;;  %v4277_v6 = vpop.f32.mrf.mxu2  ;;  %v4291_v7 = vpop.f32.mrf.mxu3  ;;  %7697 = vrcp.f32 %v8270_v5  ;;  %vm4637_vm1 = vweird.f32 %v8270_v5  ;;  %v4643_v46 = vand.u32 2147483648, %v8270_v5 }
 0x378   :  { %v4278_v8 = vadd.f32 %v4277_v6, %v4264_v3 }
 0x379   :  { %4553 = vmatpush.bf16.msra.mxu2 %v6742_v32  ;;  %4567 = vmatpush.bf16.msra.mxu3 %v6966_v22  ;;  %v4644_v57 = vor.u32 1.1754944e-38, %v4643_v46 }
 0x37a   :  { %v4292_v12 = vadd.f32 %v4291_v7, %v4278_v8 }
 0x37b   :  { %4527 = vmatpush.bf16.msra.mxu0 %v6238_v48  ;;  %4541 = vmatpush.bf16.msra.mxu1 %v6462_v1  ;;  %v4319_v10 = vpop.f32.mrf.mxu1  ;;  %v4641_v48 = vand.u32 2147483647, %v8270_v5 }
 0x37d   :  { %4554 = vmatpush.bf16.msra.mxu2 %v6714_v50  ;;  %4568 = vmatpush.bf16.msra.mxu3 %v6938_v11  ;;  %vm4642_vm6 = vcmp.eq.f32.partialorder %v4641_v48, 8.507059e+37 }
 0x37e   :  { %4528 = vmatmul.bf16.vlgmr.msra.gmra.mxu0 %v8229_v33  ;;  %4542 = vmatmul.bf16.vlgmr.msra.gmra.mxu1 %v8231_v34  ;;  %v7696_v33 = vpop.eup %7695  ;;  %v7108_v34 = vmul.f32 -1.442695, %v4292_v12 }
 0x37f   :  { %v8275_v15 = vadd.f32 1.0, %v7696_v33  ;;  %v4279_v23 = vpop.f32.mrf.mxu2  ;;  %v7698_v18 = vpop.eup %7697 }
 0x380   :  { %7699 = vpow2.f32 %v7108_v34  ;;  %v4280_v16 = vadd.f32 %v4279_v23, %v4266_v14  ;;  %v4293_v19 = vpop.f32.mrf.mxu3  ;;  %vm4638_vm0 = vweird.f32 %v7698_v18 }
 0x381   :  { %4555 = vmatpush.bf16.msra.mxu2 %v6686_v56  ;;  %4569 = vmatpush.bf16.msra.mxu3 %v6910_v58  ;;  %7701 = vrcp.f32 %v8275_v15  ;;  %vm8290_vm3 = vmor %vm4637_vm1, %vm4638_vm0  ;;  %vm4742_vm9 = vweird.f32 %v8275_v15  ;;  %v4748_v8 = vand.u32 2147483648, %v8275_v15  ;;  %v4746_v33 = vand.u32 2147483647, %v8275_v15 }
 0x382   :  { %v4294_v37 = vadd.f32 %v4293_v19, %v4280_v16  ;;  %v3021_v16 = vperm.slane %v8262_v27, 3 }
 0x383   :  { %v4321_v0 = vpop.f32.mrf.mxu1  ;;  %vm4747_vm14 = vcmp.eq.f32.partialorder %v4746_v33, 8.507059e+37 }
 0x384   :  { %4556 = vmatmul.bf16.vlgmr.msra.gmra.mxu2 %v8235_v60  ;;  %4570 = vmatmul.bf16.vlgmr.msra.gmra.mxu3 %v8237_v61  ;;  %v4633_v60 = vmul.f32 %v7698_v18, %v8270_v5  ;;  %v4305_v61 = vpop.f32.mrf.mxu0  ;;  %v7115_v42 = vmul.f32 -1.442695, %v4294_v37  ;;  %v4749_v37 = vor.u32 1.1754944e-38, %v4748_v8 }
 0x385   :  { %v4306_v62 = vadd.f32 %v4305_v61, %v3020_v24 }
 0x386   :  { %v7700_v20 = vpop.eup %7699  ;;  %7703 = vpow2.f32 %v7115_v42  ;;  %v4634_v2 = vsub.f32 1.0, %v4633_v60 }
 0x387   :  { %v4619_v21 = vadd.f32 1.0, %v7700_v20  ;;  %v8280_v25 = vpop.eup %7701  ;;  %v4333_v26 = vpop.f32.mrf.mxu2  ;;  %v4320_v31 = vadd.f32 %v4319_v10, %v4306_v62 }
 0x388   :  { %v4635_v30 = vmul.f32 %v7698_v18, %v4634_v2  ;;  %v4738_v28 = vmul.f32 %v8280_v25, %v8275_v15  ;;  %v4347_v45 = vpop.f32.mrf.mxu3  ;;  %vm4743_vm8 = vweird.f32 %v8280_v25 }
 0x389   :  { %7705 = vrcp.f32 %v4619_v21  ;;  %v4334_v36 = vadd.f32 %v4333_v26, %v4320_v31  ;;  %v4658_v44 = vand.u32 2147483648, %v4619_v21  ;;  %v4656_v38 = vand.u32 2147483647, %v4619_v21  ;;  %vm4744_vm11 = vmor %vm4742_vm9, %vm4743_vm8 }
 0x38a   :  { %v4636_v39 = vadd.f32 %v7698_v18, %v4635_v30  ;;  %v4739_v40 = vsub.f32 1.0, %v4738_v28  ;;  %vm4652_vm4 = vweird.f32 %v4619_v21 }
 0x38b   :  { %v4348_v50 = vadd.f32 %v4347_v45, %v4334_v36  ;;  %v4659_v54 = vor.u32 1.1754944e-38, %v4658_v44  ;;  %vm4657_vm7 = vcmp.eq.f32.partialorder %v4656_v38, 8.507059e+37 }
 0x38c   :  { %v7704_v41 = vpop.eup %7703  ;;  %v4307_v35 = vpop.f32.mrf.mxu0  ;;  %v4640_v11 = vsel %vm8290_vm3, %v7698_v18, %v4636_v39  ;;  %v4740_v51 = vmul.f32 %v8280_v25, %v4739_v40 }
 0x38d   :  { %v8284_v32 = vadd.f32 1.0, %v7704_v41  ;;  %v4308_v47 = vadd.f32 %v4307_v35, %v3020_v24  ;;  %v4645_v59 = vsel %vm4642_vm6, %v4644_v57, %v4640_v11  ;;  %v7109_v3 = vmul.f32 -1.442695, %v4348_v50 }
 0x38e   :  { %v4741_v5 = vadd.f32 %v8280_v25, %v4740_v51 }
 0x38f   :  { %v7706_v29 = vpop.eup %7705  ;;  %7707 = vrcp.f32 %v8284_v32  ;;  %v4335_v53 = vpop.f32.mrf.mxu2  ;;  %v4322_v55 = vadd.f32 %v4321_v0, %v4308_v47  ;;  %v4763_v9 = vand.u32 2147483648, %v8284_v32  ;;  %v4761_v13 = vand.u32 2147483647, %v8284_v32 }
 0x390   :  { %v4648_v22 = vmul.f32 %v7706_v29, %v4619_v21  ;;  %vm4653_vm2 = vweird.f32 %v7706_v29  ;;  %v4349_v14 = vpop.f32.mrf.mxu3  ;;  %7709 = vpow2.f32 %v7109_v3  ;;  %v4745_v18 = vsel %vm4744_vm11, %v8280_v25, %v4741_v5 }
 0x391   :  { %vm4654_vm5 = vmor %vm4652_vm4, %vm4653_vm2  ;;  %v4336_v4 = vadd.f32 %v4335_v53, %v4322_v55  ;;  %vm4757_vm12 = vweird.f32 %v8284_v32  ;;  %v4764_v20 = vor.u32 1.1754944e-38, %v4763_v9  ;;  %vm4762_vm15 = vcmp.eq.f32.partialorder %v4761_v13, 8.507059e+37 }
 0x392   :  { %v4649_v43 = vsub.f32 1.0, %v4648_v22  ;;  %v4750_v60 = vsel %vm4747_vm14, %v4749_v37, %v4745_v18  ;;  %v3022_v5 = vperm.slane %v8262_v27, 4 }
 0x393   :  { %v4350_v23 = vadd.f32 %v4349_v14, %v4336_v4 }
 0x394   :  { %v4650_v1 = vmul.f32 %v7706_v29, %v4649_v43 }
 0x395   :  { %v7708_v17 = vpop.eup %7707  ;;  %v7116_v42 = vmul.f32 -1.442695, %v4350_v23 }
 0x396   :  { %v4651_v52 = vadd.f32 %v7706_v29, %v4650_v1  ;;  %v4753_v58 = vmul.f32 %v7708_v17, %v8284_v32  ;;  %vm4758_vm10 = vweird.f32 %v7708_v17  ;;  %v7710_v62 = vpop.eup %7709 }
 0x397   :  { %vm4759_vm13 = vmor %vm4757_vm12, %vm4758_vm10  ;;  %7711 = vpow2.f32 %v7116_v42  ;;  %v4620_v26 = vadd.f32 1.0, %v7710_v62 }
 0x398   :  { %v4655_v56 = vsel %vm4654_vm5, %v7706_v29, %v4651_v52  ;;  %v4754_v7 = vsub.f32 1.0, %v4753_v58 }
 0x399   :  { %v4660_v63 = vsel %vm4657_vm7, %v4659_v54, %v4655_v56  ;;  %7713 = vrcp.f32 %v4620_v26  ;;  %vm4667_vm1 = vweird.f32 %v4620_v26  ;;  %v4673_v56 = vand.u32 2147483648, %v4620_v26 }
 0x39a   :  { %v4842_v6 = vpack.c.bf16 %v4660_v63, %v4645_v59  ;;  %v4755_v34 = vmul.f32 %v7708_v17, %v4754_v7  ;;  %v4671_v59 = vand.u32 2147483647, %v4620_v26 }
 0x39b   :  { %v4361_v12 = vpop.f32.mrf.mxu0  ;;  %v4375_v2 = vpop.f32.mrf.mxu1  ;;  %v4674_v33 = vor.u32 1.1754944e-38, %v4673_v56 }
 0x39c   :  { %4850 = vst [vmem:[#allocation17] sm:$0xff] %v4842_v6  ;;  %v4756_v19 = vadd.f32 %v7708_v17, %v4755_v34  ;;  %v4362_v21 = vadd.f32 %v4361_v12, %v3021_v16  ;;  %vm4672_vm6 = vcmp.eq.f32.partialorder %v4671_v59, 8.507059e+37 }
 0x39d   :  { %v7712_v32 = vpop.eup %7711 }
 0x39e   :  { %v4760_v15 = vsel %vm4759_vm13, %v7708_v17, %v4756_v19  ;;  %v4376_v10 = vadd.f32 %v4375_v2, %v4362_v21  ;;  %v8311_v39 = vadd.f32 1.0, %v7712_v32 }
 0x39f   :  { %v4765_v61 = vsel %vm4762_vm15, %v4764_v20, %v4760_v15  ;;  %v7714_v45 = vpop.eup %7713 }
 0x3a0   :  { %v4846_v24 = vpack.c.bf16 %v4765_v61, %v4750_v60  ;;  %v4663_v48 = vmul.f32 %v7714_v45, %v4620_v26  ;;  %vm4668_vm0 = vweird.f32 %v7714_v45  ;;  %vm4772_vm9 = vweird.f32 %v8311_v39 }
 0x3a1   :  { %vm8321_vm3 = vmor %vm4667_vm1, %vm4668_vm0  ;;  %v4778_v15 = vand.u32 2147483648, %v8311_v39  ;;  %v4776_v21 = vand.u32 2147483647, %v8311_v39 }
 0x3a2   :  { %4854 = vst [vmem:[#allocation17 + $0x1c] sm:$0xff] %v4846_v24  ;;  %v4664_v49 = vsub.f32 1.0, %v4663_v48 }
 0x3a3   :  { %v4363_v25 = vpop.f32.mrf.mxu0  ;;  %v4377_v35 = vpop.f32.mrf.mxu1  ;;  %v4779_v26 = vor.u32 1.1754944e-38, %v4778_v15  ;;  %vm4777_vm14 = vcmp.eq.f32.partialorder %v4776_v21, 8.507059e+37 }
 0x3a4   :  { %v4364_v29 = vadd.f32 %v4363_v25, %v3021_v16  ;;  %v4665_v51 = vmul.f32 %v7714_v45, %v4664_v49 }
 0x3a6   :  { %v4378_v36 = vadd.f32 %v4377_v35, %v4364_v29  ;;  %v4666_v57 = vadd.f32 %v7714_v45, %v4665_v51 }
 0x3a7   :  { %v4389_v41 = vpop.f32.mrf.mxu2  ;;  %v4403_v30 = vpop.f32.mrf.mxu3 }
 0x3a8   :  { %v4390_v28 = vadd.f32 %v4389_v41, %v4376_v10  ;;  %v4670_v7 = vsel %vm8321_vm3, %v7714_v45, %v4666_v57 }
 0x3a9   :  { %v4675_v23 = vsel %vm4672_vm6, %v4674_v33, %v4670_v7 }
 0x3aa   :  { %v4404_v31 = vadd.f32 %v4403_v30, %v4390_v28 }
 0x3ac   :  { %v7110_v22 = vmul.f32 -1.442695, %v4404_v31 }
 0x3ae   :  { %7715 = vpow2.f32 %v7110_v22 }
 0x3af   :  { %v4391_v40 = vpop.f32.mrf.mxu2  ;;  %v4405_v46 = vpop.f32.mrf.mxu3  ;;  %7717 = vrcp.f32 %v8311_v39 }
 0x3b0   :  { %v4392_v43 = vadd.f32 %v4391_v40, %v4378_v36 }
 0x3b2   :  { %v4406_v44 = vadd.f32 %v4405_v46, %v4392_v43 }
 0x3b4   :  { %v7716_v47 = vpop.eup %7715  ;;  %v7117_v1 = vmul.f32 -1.442695, %v4406_v44 }
 0x3b5   :  { %v4621_v38 = vadd.f32 1.0, %v7716_v47  ;;  %v8317_v50 = vpop.eup %7717 }
 0x3b6   :  { %7719 = vpow2.f32 %v7117_v1  ;;  %v4768_v52 = vmul.f32 %v8317_v50, %v8311_v39  ;;  %vm4773_vm8 = vweird.f32 %v8317_v50 }
 0x3b7   :  { %7721 = vrcp.f32 %v4621_v38  ;;  %v4688_v58 = vand.u32 2147483648, %v4621_v38  ;;  %v4686_v3 = vand.u32 2147483647, %v4621_v38  ;;  %vm4682_vm4 = vweird.f32 %v4621_v38  ;;  %vm4774_vm11 = vmor %vm4772_vm9, %vm4773_vm8 }
 0x3b8   :  { %v4769_v54 = vsub.f32 1.0, %v4768_v52 }
 0x3b9   :  { %v4689_v34 = vor.u32 1.1754944e-38, %v4688_v58  ;;  %vm4687_vm7 = vcmp.eq.f32.partialorder %v4686_v3, 8.507059e+37 }
 0x3ba   :  { %v4770_v8 = vmul.f32 %v8317_v50, %v4769_v54 }
 0x3bb   :  { %v4417_v6 = vpop.f32.mrf.mxu0  ;;  %v4431_v61 = vpop.f32.mrf.mxu1 }
 0x3bc   :  { %v7720_v11 = vpop.eup %7719  ;;  %v4771_v18 = vadd.f32 %v8317_v50, %v4770_v8  ;;  %v4418_v20 = vadd.f32 %v4417_v6, %v3022_v5 }
 0x3bd   :  { %v7722_v0 = vpop.eup %7721  ;;  %v4628_v53 = vadd.f32 1.0, %v7720_v11 }
 0x3be   :  { %v4678_v17 = vmul.f32 %v7722_v0, %v4621_v38  ;;  %vm4683_vm2 = vweird.f32 %v7722_v0  ;;  %v4775_v62 = vsel %vm4774_vm11, %v8317_v50, %v4771_v18  ;;  %v4432_v25 = vadd.f32 %v4431_v61, %v4418_v20 }
 0x3bf   :  { %7723 = vrcp.f32 %v4628_v53  ;;  %vm4684_vm5 = vmor %vm4682_vm4, %vm4683_vm2  ;;  %v4793_v60 = vand.u32 2147483648, %v4628_v53  ;;  %v4791_v2 = vand.u32 2147483647, %v4628_v53  ;;  %vm4787_vm12 = vweird.f32 %v4628_v53 }
 0x3c0   :  { %v4679_v55 = vsub.f32 1.0, %v4678_v17  ;;  %v4780_v31 = vsel %vm4777_vm14, %v4779_v26, %v4775_v62  ;;  %v3023_v38 = vperm.slane %v8262_v27, 5  ;;  %v3024_v18 = vperm.slane %v8262_v27, 6 }
 0x3c1   :  { %v4794_v41 = vor.u32 1.1754944e-38, %v4793_v60  ;;  %vm4792_vm15 = vcmp.eq.f32.partialorder %v4791_v2, 8.507059e+37 }
 0x3c2   :  { %v4680_v63 = vmul.f32 %v7722_v0, %v4679_v55 }
 0x3c3   :  { %v4419_v30 = vpop.f32.mrf.mxu0  ;;  %v4433_v40 = vpop.f32.mrf.mxu1 }
 0x3c4   :  { %v4681_v9 = vadd.f32 %v7722_v0, %v4680_v63  ;;  %v4420_v36 = vadd.f32 %v4419_v30, %v3022_v5 }
 0x3c5   :  { %v7724_v12 = vpop.eup %7723 }
 0x3c6   :  { %v4685_v13 = vsel %vm4684_vm5, %v7722_v0, %v4681_v9  ;;  %v4783_v14 = vmul.f32 %v7724_v12, %v4628_v53  ;;  %vm4788_vm10 = vweird.f32 %v7724_v12  ;;  %v4434_v45 = vadd.f32 %v4433_v40, %v4420_v36 }
 0x3c7   :  { %v4690_v16 = vsel %vm4687_vm7, %v4689_v34, %v4685_v13  ;;  %v4445_v42 = vpop.f32.mrf.mxu2  ;;  %vm4789_vm13 = vmor %vm4787_vm12, %vm4788_vm10  ;;  %v4459_v22 = vpop.f32.mrf.mxu3 }
 0x3c8   :  { %v4843_v19 = vpack.c.bf16 %v4690_v16, %v4675_v23  ;;  %v4784_v37 = vsub.f32 1.0, %v4783_v14  ;;  %v4446_v29 = vadd.f32 %v4445_v42, %v4432_v25 }
 0x3ca   :  { %4851 = vst [vmem:[#allocation17 + $0x8] sm:$0xff] %v4843_v19  ;;  %v4785_v24 = vmul.f32 %v7724_v12, %v4784_v37  ;;  %v4460_v39 = vadd.f32 %v4459_v22, %v4446_v29 }
 0x3cc   :  { %v4786_v10 = vadd.f32 %v7724_v12, %v4785_v24  ;;  %v7111_v46 = vmul.f32 -1.442695, %v4460_v39 }
 0x3ce   :  { %v4790_v28 = vsel %vm4789_vm13, %v7724_v12, %v4786_v10  ;;  %7725 = vpow2.f32 %v7111_v46 }
 0x3cf   :  { %v4795_v32 = vsel %vm4792_vm15, %v4794_v41, %v4790_v28  ;;  %v4447_v43 = vpop.f32.mrf.mxu2  ;;  %v4461_v48 = vpop.f32.mrf.mxu3 }
 0x3d0   :  { %v4847_v35 = vpack.c.bf16 %v4795_v32, %v4780_v31  ;;  %v4448_v44 = vadd.f32 %v4447_v43, %v4434_v45 }
 0x3d2   :  { %4855 = vst [vmem:[#allocation17 + $0x24] sm:$0xff] %v4847_v35  ;;  %v4462_v1 = vadd.f32 %v4461_v48, %v4448_v44 }
 0x3d4   :  { %v7118_v49 = vmul.f32 -1.442695, %v4462_v1  ;;  %v7726_v51 = vpop.eup %7725 }
 0x3d5   :  { %v8338_v53 = vadd.f32 1.0, %v7726_v51 }
 0x3d6   :  { %7727 = vpow2.f32 %v7118_v49 }
 0x3d7   :  { %7729 = vrcp.f32 %v8338_v53  ;;  %vm4697_vm1 = vweird.f32 %v8338_v53  ;;  %v4703_v27 = vand.u32 2147483648, %v8338_v53  ;;  %v4701_v25 = vand.u32 2147483647, %v8338_v53 }
 0x3d9   :  { %v4704_v40 = vor.u32 1.1754944e-38, %v4703_v27  ;;  %vm4702_vm6 = vcmp.eq.f32.partialorder %v4701_v25, 8.507059e+37 }
 0x3db   :  { %v4473_v47 = vpop.f32.mrf.mxu0  ;;  %v4487_v11 = vpop.f32.mrf.mxu1 }
 0x3dc   :  { %v4474_v50 = vadd.f32 %v4473_v47, %v3023_v38  ;;  %v7728_v58 = vpop.eup %7727 }
 0x3dd   :  { %v8341_v4 = vadd.f32 1.0, %v7728_v58  ;;  %v7730_v7 = vpop.eup %7729 }
 0x3de   :  { %v4488_v52 = vadd.f32 %v4487_v11, %v4474_v50  ;;  %v4693_v33 = vmul.f32 %v7730_v7, %v8338_v53  ;;  %vm4698_vm0 = vweird.f32 %v7730_v7 }
 0x3df   :  { %vm8356_vm3 = vmor %vm4697_vm1, %vm4698_vm0  ;;  %vm4802_vm9 = vweird.f32 %v8341_v4  ;;  %v4808_v51 = vand.u32 2147483648, %v8341_v4  ;;  %v4806_v53 = vand.u32 2147483647, %v8341_v4 }
 0x3e0   :  { %v4694_v14 = vsub.f32 1.0, %v4693_v33 }
 0x3e1   :  { %vm4807_vm14 = vcmp.eq.f32.partialorder %v4806_v53, 8.507059e+37 }
 0x3e2   :  { %v4695_v37 = vmul.f32 %v7730_v7, %v4694_v14 }
 0x3e3   :  { %v4475_v0 = vpop.f32.mrf.mxu0  ;;  %v4489_v63 = vpop.f32.mrf.mxu1 }
 0x3e4   :  { %v4476_v55 = vadd.f32 %v4475_v0, %v3023_v38  ;;  %v4696_v21 = vadd.f32 %v7730_v7, %v4695_v37 }
 0x3e6   :  { %v4490_v3 = vadd.f32 %v4489_v63, %v4476_v55  ;;  %v4700_v31 = vsel %vm8356_vm3, %v7730_v7, %v4696_v21 }
 0x3e7   :  { %v4501_v17 = vpop.f32.mrf.mxu2  ;;  %v4515_v57 = vpop.f32.mrf.mxu3  ;;  %v4705_v47 = vsel %vm4702_vm6, %v4704_v40, %v4700_v31 }
 0x3e8   :  { %v4502_v54 = vadd.f32 %v4501_v17, %v4488_v52 }
 0x3ea   :  { %v4516_v56 = vadd.f32 %v4515_v57, %v4502_v54 }
 0x3ec   :  { %v7112_v59 = vmul.f32 -1.442695, %v4516_v56 }
 0x3ee   :  { %7731 = vpow2.f32 %v7112_v59 }
 0x3ef   :  { %v4503_v5 = vpop.f32.mrf.mxu2  ;;  %v4517_v8 = vpop.f32.mrf.mxu3  ;;  %7733 = vrcp.f32 %v8341_v4 }
 0x3f0   :  { %v4504_v6 = vadd.f32 %v4503_v5, %v4490_v3  ;;  %v4809_v3 = vor.u32 1.1754944e-38, %v4808_v51 }
 0x3f2   :  { %v4518_v9 = vadd.f32 %v4517_v8, %v4504_v6 }
 0x3f4   :  { %v7732_v12 = vpop.eup %7731  ;;  %v7119_v34 = vmul.f32 -1.442695, %v4518_v9 }
 0x3f5   :  { %v4623_v13 = vadd.f32 1.0, %v7732_v12  ;;  %v8345_v23 = vpop.eup %7733 }
 0x3f6   :  { %7735 = vpow2.f32 %v7119_v34  ;;  %v4798_v20 = vmul.f32 %v8345_v23, %v8341_v4  ;;  %vm4803_vm8 = vweird.f32 %v8345_v23 }
 0x3f7   :  { %7737 = vrcp.f32 %v4623_v13  ;;  %v4718_v10 = vand.u32 2147483648, %v4623_v13  ;;  %v4716_v41 = vand.u32 2147483647, %v4623_v13  ;;  %vm4712_vm4 = vweird.f32 %v4623_v13  ;;  %vm8371_vm11 = vmor %vm4802_vm9, %vm4803_vm8 }
 0x3f8   :  { %v4799_v24 = vsub.f32 1.0, %v4798_v20 }
 0x3f9   :  { %v4719_v43 = vor.u32 1.1754944e-38, %v4718_v10  ;;  %vm4717_vm7 = vcmp.eq.f32.partialorder %v4716_v41, 8.507059e+37 }
 0x3fa   :  { %v4800_v32 = vmul.f32 %v8345_v23, %v4799_v24 }
 0x3fb   :  { %v4529_v16 = vpop.f32.mrf.mxu0  ;;  %v4543_v62 = vpop.f32.mrf.mxu1 }
 0x3fc   :  { %v7736_v19 = vpop.eup %7735  ;;  %v4530_v42 = vadd.f32 %v4529_v16, %v3024_v18  ;;  %v4801_v49 = vadd.f32 %v8345_v23, %v4800_v32 }
 0x3fd   :  { %v7738_v15 = vpop.eup %7737  ;;  %v8350_v60 = vadd.f32 1.0, %v7736_v19 }
 0x3fe   :  { %v4708_v61 = vmul.f32 %v7738_v15, %v4623_v13  ;;  %vm4713_vm2 = vweird.f32 %v7738_v15  ;;  %v4544_v28 = vadd.f32 %v4543_v62, %v4530_v42  ;;  %v4805_v58 = vsel %vm8371_vm11, %v8345_v23, %v4801_v49 }
 0x3ff   :  { %7739 = vrcp.f32 %v8350_v60  ;;  %vm4714_vm5 = vmor %vm4712_vm4, %vm4713_vm2  ;;  %v4823_v52 = vand.u32 2147483648, %v8350_v60  ;;  %v4821_v57 = vand.u32 2147483647, %v8350_v60  ;;  %vm4817_vm12 = vweird.f32 %v8350_v60 }
 0x400   :  { %v4709_v2 = vsub.f32 1.0, %v4708_v61  ;;  %v4810_v8 = vsel %vm4807_vm14, %v4809_v3, %v4805_v58 }
 0x401   :  { %v4824_v4 = vor.u32 1.1754944e-38, %v4823_v52  ;;  %vm4822_vm15 = vcmp.eq.f32.partialorder %v4821_v57, 8.507059e+37 }
 0x402   :  { %v4710_v26 = vmul.f32 %v7738_v15, %v4709_v2 }
 0x403   :  { %v4531_v29 = vpop.f32.mrf.mxu0  ;;  %v4545_v54 = vpop.f32.mrf.mxu1 }
 0x404   :  { %v4711_v22 = vadd.f32 %v7738_v15, %v4710_v26  ;;  %v4532_v1 = vadd.f32 %v4531_v29, %v3024_v18 }
 0x405   :  { %v7740_v39 = vpop.eup %7739 }
 0x406   :  { %v4715_v46 = vsel %vm4714_vm5, %v7738_v15, %v4711_v22  ;;  %v4813_v44 = vmul.f32 %v7740_v39, %v8350_v60  ;;  %vm4818_vm10 = vweird.f32 %v7740_v39  ;;  %v4546_v56 = vadd.f32 %v4545_v54, %v4532_v1 }
 0x407   :  { %v4557_v35 = vpop.f32.mrf.mxu2  ;;  %v4571_v36 = vpop.f32.mrf.mxu3  ;;  %v4720_v48 = vsel %vm4717_vm7, %v4719_v43, %v4715_v46  ;;  %vm4819_vm13 = vmor %vm4817_vm12, %vm4818_vm10 }
 0x408   :  { %v4558_v45 = vadd.f32 %v4557_v35, %v4544_v28  ;;  %v4844_v50 = vpack.c.bf16 %v4720_v48, %v4705_v47  ;;  %v4814_v11 = vsub.f32 1.0, %v4813_v44 }
 0x40a   :  { %v4572_v38 = vadd.f32 %v4571_v36, %v4558_v45  ;;  %4852 = vst [vmem:[#allocation17 + $0x10] sm:$0xff] %v4844_v50  ;;  %v4815_v17 = vmul.f32 %v7740_v39, %v4814_v11 }
 0x40c   :  { %v7113_v0 = vmul.f32 -1.442695, %v4572_v38  ;;  %v4816_v59 = vadd.f32 %v7740_v39, %v4815_v17 }
 0x40e   :  { %7741 = vpow2.f32 %v7113_v0  ;;  %v4820_v6 = vsel %vm4819_vm13, %v7740_v39, %v4816_v59 }
 0x40f   :  { %v4559_v63 = vpop.f32.mrf.mxu2  ;;  %v4573_v7 = vpop.f32.mrf.mxu3  ;;  %v4825_v9 = vsel %vm4822_vm15, %v4824_v4, %v4820_v6 }
 0x410   :  { %v4560_v5 = vadd.f32 %v4559_v63, %v4546_v56  ;;  %v4848_v33 = vpack.c.bf16 %v4825_v9, %v4810_v8 }
 0x412   :  { %v4574_v12 = vadd.f32 %v4573_v7, %v4560_v5  ;;  %4856 = vst [vmem:[#allocation17 + $0x2c] sm:$0xff] %v4848_v33 }
 0x414   :  { %v7742_v34 = vpop.eup %7741  ;;  %v7120_v13 = vmul.f32 -1.442695, %v4574_v12 }
 0x415   :  { %v4624_v14 = vadd.f32 1.0, %v7742_v34 }
 0x416   :  { %7743 = vpow2.f32 %v7120_v13 }
 0x417   :  { %7745 = vrcp.f32 %v4624_v14  ;;  %v4733_v20 = vand.u32 2147483648, %v4624_v14  ;;  %v4731_v60 = vand.u32 2147483647, %v4624_v14  ;;  %vm4727_vm1 = vweird.f32 %v4624_v14 }
 0x419   :  { %v4734_v21 = vor.u32 1.1754944e-38, %v4733_v20  ;;  %vm4732_vm3 = vcmp.eq.f32.partialorder %v4731_v60, 8.507059e+37 }
 0x41c   :  { %v7744_v23 = vpop.eup %7743 }
 0x41d   :  { %v7746_v16 = vpop.eup %7745  ;;  %v4631_v18 = vadd.f32 1.0, %v7744_v23 }
 0x41e   :  { %v4723_v19 = vmul.f32 %v7746_v16, %v4624_v14  ;;  %vm4728_vm0 = vweird.f32 %v7746_v16 }
 0x41f   :  { %7747 = vrcp.f32 %v4631_v18  ;;  %vm4729_vm2 = vmor %vm4727_vm1, %vm4728_vm0  ;;  %v4838_v25 = vand.u32 2147483648, %v4631_v18  ;;  %v4836_v41 = vand.u32 2147483647, %v4631_v18  ;;  %vm4832_vm5 = vweird.f32 %v4631_v18 }
 0x420   :  { %v4724_v37 = vsub.f32 1.0, %v4723_v19 }
 0x421   :  { %v4839_v28 = vor.u32 1.1754944e-38, %v4838_v25  ;;  %vm4837_vm7 = vcmp.eq.f32.partialorder %v4836_v41, 8.507059e+37 }
 0x422   :  { %v4725_v15 = vmul.f32 %v7746_v16, %v4724_v37 }
 0x424   :  { %v4726_v61 = vadd.f32 %v7746_v16, %v4725_v15 }
 0x425   :  { %v7748_v42 = vpop.eup %7747 }
 0x426   :  { %v4730_v24 = vsel %vm4729_vm2, %v7746_v16, %v4726_v61  ;;  %v4828_v2 = vmul.f32 %v7748_v42, %v4631_v18  ;;  %vm4833_vm4 = vweird.f32 %v7748_v42 }
 0x427   :  { %v4735_v62 = vsel %vm4732_vm3, %v4734_v21, %v4730_v24  ;;  %vm4834_vm6 = vmor %vm4832_vm5, %vm4833_vm4 }
 0x428   :  { %v4845_v27 = vpack.c.bf16 %v4735_v62, %v4735_v62  ;;  %v4829_v10 = vsub.f32 1.0, %v4828_v2 }
 0x42a   :  { %4853 = vst [vmem:[#allocation17 + $0x18] sm:$0xf] %v4845_v27  ;;  %v4830_v26 = vmul.f32 %v7748_v42, %v4829_v10 }
 0x42c   :  { %v4831_v30 = vadd.f32 %v7748_v42, %v4830_v26 }
 0x42e   :  { %v4835_v29 = vsel %vm4834_vm6, %v7748_v42, %v4831_v30 }
 0x42f   :  { %v4840_v31 = vsel %vm4837_vm7, %v4839_v28, %v4835_v29 }
 0x430   :  { %v4849_v32 = vpack.c.bf16 %v4840_v31, %v4840_v31 }
 0x432   :  { %4857 = vst [vmem:[#allocation17 + $0x34] sm:$0xf] %v4849_v32 }
 0x433   :  { %4874 = dma.vmem_to_hbm [thread:$0]  %s4867_s7, 896, %s4869_s0, [#allocation4], %s8034_s24, %s8034_s24, %s8035_s27  }
 0x434   :  { %8023 = dma.done.wait [#allocation4], 896  }
 0x435   :  { %8024 = vsyncadd [#allocation4], 4294966400 }
 0x436   :  { %8025 = dma.done.wait [#allocation19], 512  }
 0x437   :  { %8026 = vsyncadd [#allocation19], 4294966784 }
 0x438   :  { %4896 = vsyncpa [#allocation3], 1 }
 0x439   :  { %4897 = vsyncpa [#allocation6], 1 }
 0x43a   :  { %4898 = vsyncpa [#allocation9], 1 }
 0x43b   :  { %4899 = vsyncpa [#allocation12], 1 }
 0x43c   :  { %4900 = vsyncpa [#allocation15], 1 }
 0x43d   :  { %4901 = vsyncpa [#allocation4], 1 }
 0x43e   :  { %4902 = vsyncpa [#allocation19], 1 }

// kernel: _vae_forward_impl.1
= control target key start
LH: loop header
LB: loop body
LE: loop exit
PB: predicated region body
PF: predicated region fallthrough
CT: control target
= control target key end

     0   :  { %17 = vsyncpa [#allocation3], 0  ;;  %s8385_s0 = inlined_call_operand.hbm [shape: bf16[16,896], index: 0, kind: input, shape index: {}]   ;;  %s8386_s1 = inlined_call_operand.hbm [shape: f32[16,128], index: 1, kind: input, shape index: {}]   ;;  %s8387_s2 = inlined_call_operand.hbm [shape: bf16[896,512], index: 2, kind: input, shape index: {}]   ;;  %s8388_s3 = inlined_call_operand.hbm [shape: f32[1,512], index: 3, kind: input, shape index: {}]   ;;  %s8389_s4 = inlined_call_operand.hbm [shape: bf16[512,256], index: 4, kind: input, shape index: {}]   ;;  %s8390_s5 = inlined_call_operand.hbm [shape: f32[1,256], index: 5, kind: input, shape index: {}]   ;;  %s8391_s6 = inlined_call_operand.hbm [shape: bf16[128,512], index: 6, kind: input, shape index: {}]   ;;  %s8392_s7 = inlined_call_operand.hbm [shape: f32[1,512], index: 7, kind: input, shape index: {}]   ;;  %s8393_s8 = inlined_call_operand.hbm [shape: bf16[512,896], index: 8, kind: input, shape index: {}]   ;;  %s8394_s9 = inlined_call_operand.vmem [shape: f32[1,896], index: 9, kind: input, shape index: {}]   ;;  %s8395_s10 = inlined_call_operand.hbm [shape: bf16[16,896], index: 10, kind: output, shape index: {0}]   ;;  %s8396_s11 = inlined_call_operand.hbm [shape: f32[16,256], index: 11, kind: output, shape index: {1}]  }
   0x1   :  { %18 = vsyncpa [#allocation6], 0 }
   0x2   :  { %19 = vsyncpa [#allocation9], 0 }
   0x3   :  { %20 = vsyncpa [#allocation12], 0 }
   0x4   :  { %21 = vsyncpa [#allocation15], 0 }
   0x5   :  { %22 = vsyncpa [#allocation4], 0  ;;  %s41_s19 = sshll.u32 %s8386_s1, 4  ;;  %s42_s19 = int_to_ptr.hbm [resolvable:$true] %s41_s19 }
   0x6   :  { %23 = vsyncpa [#allocation19], 0  ;;  %s8027_s20 = smov [#allocation5]   ;;  %s68_s24 = sshll.u32 %s8388_s3, 4  ;;  %s69_s24 = int_to_ptr.hbm [resolvable:$true] %s68_s24 }
   0x7   :  { %s43_s21 = sshll.u32 %s8027_s20, 4  ;;  %s8028_s25 = smov 128   ;;  %s44_s21 = int_to_ptr.vmem [resolvable:$true] %s43_s21 }
   0x8   :  { %s8029_s26 = smov 8   ;;  %s8030_s27 = smov [#allocation8]  }
   0x9   :  { %49 = dma.hbm_to_vmem [thread:$0]  %s42_s19, 256, %s44_s21, [#allocation6], %s8028_s25, %s8028_s25, %s8029_s26  }
   0xa   :  { %s70_s28 = sshll.u32 %s8030_s27, 4  ;;  %s92_s30 = sshll.u32 %s8390_s5, 4  ;;  %s71_s28 = int_to_ptr.vmem [resolvable:$true] %s70_s28  ;;  %s93_s30 = int_to_ptr.hbm [resolvable:$true] %s92_s30 }
   0xb   :  { %73 = dma.hbm_to_vmem [thread:$0]  %s69_s24, 64, %s71_s28, [#allocation9]  }
   0xc   :  { %s116_s3 = sshll.u32 %s8392_s7, 4  ;;  %s8031_s14 = smov [#allocation11]   ;;  %s117_s3 = int_to_ptr.hbm [resolvable:$true] %s116_s3 }
   0xd   :  { %s94_s15 = sshll.u32 %s8031_s14, 4  ;;  %s8032_s16 = smov [#allocation14]   ;;  %s95_s15 = int_to_ptr.vmem [resolvable:$true] %s94_s15 }
   0xe   :  { %97 = dma.hbm_to_vmem [thread:$0]  %s93_s30, 32, %s95_s15, [#allocation12]  }
   0xf   :  { %s118_s17 = sshll.u32 %s8032_s16, 4  ;;  %s28_s20 = sshll.u32 %s8385_s0, 4  ;;  %s119_s17 = int_to_ptr.vmem [resolvable:$true] %s118_s17  ;;  %s29_s20 = int_to_ptr.hbm [resolvable:$true] %s28_s20 }
  0x10   :  { %121 = dma.hbm_to_vmem [thread:$0]  %s117_s3, 64, %s119_s17, [#allocation15]  }
  0x11   :  { %s8033_s5 = smov [#allocation2]   ;;  %s54_s7 = sshll.u32 %s8387_s2, 4  ;;  %s55_s7 = int_to_ptr.hbm [resolvable:$true] %s54_s7 }
  0x12   :  { %s30_s21 = sshll.u32 %s8033_s5, 4  ;;  %s8034_s24 = smov 448   ;;  %s31_s21 = int_to_ptr.vmem [resolvable:$true] %s30_s21 }
  0x13   :  { %s8035_s27 = smov 28   ;;  %s8036_s28 = smov [#allocation7]  }
  0x14   :  { %36 = dma.hbm_to_vmem [thread:$0]  %s29_s20, 896, %s31_s21, [#allocation3], %s8034_s24, %s8034_s24, %s8035_s27  }
  0x15   :  { %s56_s29 = sshll.u32 %s8036_s28, 4  ;;  %s8037_s0 = smov 256   ;;  %s57_s29 = int_to_ptr.vmem [resolvable:$true] %s56_s29 }
  0x16   :  { %s8038_s1 = smov 16   ;;  %s78_s2 = sshll.u32 %s8389_s4, 4  ;;  %s79_s2 = int_to_ptr.hbm [resolvable:$true] %s78_s2 }
  0x17   :  { %62 = dma.hbm_to_vmem [thread:$0]  %s55_s7, 28672, %s57_s29, [#allocation6], %s8037_s0, %s8037_s0, %s8038_s1  }
  0x18   :  { %s8039_s13 = smov [#allocation10]   ;;  %s102_s16 = sshll.u32 %s8391_s6, 4  ;;  %s103_s16 = int_to_ptr.hbm [resolvable:$true] %s102_s16 }
  0x19   :  { %s80_s3 = sshll.u32 %s8039_s13, 4  ;;  %s8040_s17 = smov [#allocation13]   ;;  %s81_s3 = int_to_ptr.vmem [resolvable:$true] %s80_s3 }
  0x1a   :  { %86 = dma.hbm_to_vmem [thread:$0]  %s79_s2, 8192, %s81_s3, [#allocation9], %s8028_s25, %s8028_s25, %s8029_s26  }
  0x1b   :  { %s104_s18 = sshll.u32 %s8040_s17, 4  ;;  %s126_s5 = sshll.u32 %s8393_s8, 4  ;;  %s105_s18 = int_to_ptr.vmem [resolvable:$true] %s104_s18  ;;  %s127_s5 = int_to_ptr.hbm [resolvable:$true] %s126_s5 }
  0x1c   :  { %110 = dma.hbm_to_vmem [thread:$0]  %s103_s16, 4096, %s105_s18, [#allocation12], %s8037_s0, %s8037_s0, %s8038_s1  }
  0x1d   :  { %s8041_s4 = smov [#allocation16]  }
  0x1e   :  { %s128_s21 = sshll.u32 %s8041_s4, 4  ;;  %s129_s21 = int_to_ptr.vmem [resolvable:$true] %s128_s21 }
  0x1f   :  { %134 = dma.hbm_to_vmem [thread:$0]  %s127_s5, 28672, %s129_s21, [#allocation15], %s8034_s24, %s8034_s24, %s8035_s27  }
  0x20   :  { %8013 = dma.done.wait [#allocation3], 896  }
  0x21   :  { %8014 = vsyncadd [#allocation3], 4294966400 }
  0x22   :  { %8015 = dma.done.wait [#allocation6], 28928  }
  0x23   :  { %8016 = vsyncadd [#allocation6], 4294938368 }
  0x24   :  { %8017 = dma.done.wait [#allocation9], 8256  }
  0x25   :  { %8018 = vsyncadd [#allocation9], 4294959040 }
  0x26   :  { %8019 = dma.done.wait [#allocation12], 4128  }
  0x27   :  { %8020 = vsyncadd [#allocation12], 4294963168 }
  0x28   :  { %8021 = dma.done.wait [#allocation15], 28736  }
  0x29   :  { %8022 = vsyncadd [#allocation15], 4294938560  ;;  %v5045_v0 = vld [vmem:[#allocation7 + $0xe0] sm:$0xf]  ;;  %v7158_v1 = vld [vmem:[#allocation7 + $0xec] sm:$0xf0] }
  0x2a   :  { %v5173_v2 = vld [vmem:[#allocation7 + $0x1e0] sm:$0xf]  ;;  %v5046_v3 = vor.u32 %v7158_v1, %v5045_v0  ;;  %v7190_v4 = vld [vmem:[#allocation7 + $0x1ec] sm:$0xf0]  ;;  %s4881_s23 = sshll.u32 %s8396_s11, 4  ;;  %s8043_s11 = smov [#allocation17]   ;;  %s4882_s23 = int_to_ptr.hbm [resolvable:$true] %s4881_s23 }
  0x2b   :  { %v5301_v5 = vld [vmem:[#allocation7 + $0x2e0] sm:$0xf]  ;;  %v7222_v6 = vld [vmem:[#allocation7 + $0x2ec] sm:$0xf0]  ;;  %v5174_v7 = vor.u32 %v7190_v4, %v5173_v2  ;;  %s4866_s7 = sshll.u32 %s8043_s11, 4  ;;  %s4867_s7 = int_to_ptr.vmem [resolvable:$true] %s4866_s7 }
  0x2c   :  { %v5302_v8 = vor.u32 %v7222_v6, %v5301_v5  ;;  %v5429_v9 = vld [vmem:[#allocation7 + $0x3e0] sm:$0xf]  ;;  %v7254_v10 = vld [vmem:[#allocation7 + $0x3ec] sm:$0xf0]  ;;  %1571 = vmatpush.bf16.msra.mxu0 %v5046_v3 }
  0x2d   :  { %v5029_v11 = vld [vmem:[#allocation7 + $0xc0] sm:$0xf]  ;;  %v5430_v12 = vor.u32 %v7254_v10, %v5429_v9  ;;  %v7154_v13 = vld [vmem:[#allocation7 + $0xcc] sm:$0xf0]  ;;  %1585 = vmatpush.bf16.msra.mxu1 %v5174_v7 }
  0x2e   :  { %v5157_v14 = vld [vmem:[#allocation7 + $0x1c0] sm:$0xf]  ;;  %v7186_v15 = vld [vmem:[#allocation7 + $0x1cc] sm:$0xf0]  ;;  %1599 = vmatpush.bf16.msra.mxu2 %v5302_v8  ;;  %v5030_v16 = vor.u32 %v7154_v13, %v5029_v11 }
  0x2f   :  { %v5158_v17 = vor.u32 %v7186_v15, %v5157_v14  ;;  %v5285_v18 = vld [vmem:[#allocation7 + $0x2c0] sm:$0xf]  ;;  %v7218_v19 = vld [vmem:[#allocation7 + $0x2cc] sm:$0xf0]  ;;  %1613 = vmatpush.bf16.msra.mxu3 %v5430_v12 }
  0x30   :  { %v5413_v20 = vld [vmem:[#allocation7 + $0x3c0] sm:$0xf]  ;;  %v5286_v21 = vor.u32 %v7218_v19, %v5285_v18  ;;  %v7250_v22 = vld [vmem:[#allocation7 + $0x3cc] sm:$0xf0]  ;;  %1572 = vmatpush.bf16.msra.mxu0 %v5030_v16 }
  0x31   :  { %v5013_v23 = vld [vmem:[#allocation7 + $0xa0] sm:$0xf]  ;;  %v7150_v24 = vld [vmem:[#allocation7 + $0xac] sm:$0xf0]  ;;  %v5414_v25 = vor.u32 %v7250_v22, %v5413_v20  ;;  %1586 = vmatpush.bf16.msra.mxu1 %v5158_v17 }
  0x32   :  { %v5141_v26 = vld [vmem:[#allocation7 + $0x1a0] sm:$0xf]  ;;  %v7182_v27 = vld [vmem:[#allocation7 + $0x1ac] sm:$0xf0]  ;;  %v5014_v29 = vor.u32 %v7150_v24, %v5013_v23  ;;  %1600 = vmatpush.bf16.msra.mxu2 %v5286_v21 }
  0x33   :  { %v5269_v28 = vld [vmem:[#allocation7 + $0x2a0] sm:$0xf]  ;;  %v7214_v30 = vld [vmem:[#allocation7 + $0x2ac] sm:$0xf0]  ;;  %v5142_v33 = vor.u32 %v7182_v27, %v5141_v26  ;;  %1614 = vmatpush.bf16.msra.mxu3 %v5414_v25 }
  0x34   :  { %v5397_v31 = vld [vmem:[#allocation7 + $0x3a0] sm:$0xf]  ;;  %v7246_v32 = vld [vmem:[#allocation7 + $0x3ac] sm:$0xf0]  ;;  %v5270_v34 = vor.u32 %v7214_v30, %v5269_v28  ;;  %1573 = vmatpush.bf16.msra.mxu0 %v5014_v29 }
  0x35   :  { %v4997_v35 = vld [vmem:[#allocation7 + $0x80] sm:$0xf]  ;;  %v7146_v36 = vld [vmem:[#allocation7 + $0x8c] sm:$0xf0]  ;;  %v5398_v38 = vor.u32 %v7246_v32, %v5397_v31  ;;  %1587 = vmatpush.bf16.msra.mxu1 %v5142_v33 }
  0x36   :  { %v5125_v37 = vld [vmem:[#allocation7 + $0x180] sm:$0xf]  ;;  %v7178_v39 = vld [vmem:[#allocation7 + $0x18c] sm:$0xf0]  ;;  %v4998_v44 = vor.u32 %v7146_v36, %v4997_v35  ;;  %1601 = vmatpush.bf16.msra.mxu2 %v5270_v34 }
  0x37   :  { %v5253_v40 = vld [vmem:[#allocation7 + $0x280] sm:$0xf]  ;;  %v7210_v41 = vld [vmem:[#allocation7 + $0x28c] sm:$0xf0]  ;;  %v5126_v45 = vor.u32 %v7178_v39, %v5125_v37  ;;  %1615 = vmatpush.bf16.msra.mxu3 %v5398_v38  ;;  %v7156_v37 = vld [vmem:[#allocation7 + $0xe4] sm:$0xf] }
  0x38   :  { %v5381_v42 = vld [vmem:[#allocation7 + $0x380] sm:$0xf]  ;;  %v7242_v43 = vld [vmem:[#allocation7 + $0x38c] sm:$0xf0]  ;;  %v5254_v46 = vor.u32 %v7210_v41, %v5253_v40  ;;  %1574 = vmatpush.bf16.msra.mxu0 %v4998_v44  ;;  %v5047_v38 = vld [vmem:[#allocation7 + $0xf0] sm:$0xf0] }
  0x39   :  { %v4981_v47 = vld [vmem:[#allocation7 + $0x60] sm:$0xf]  ;;  %v7142_v48 = vld [vmem:[#allocation7 + $0x6c] sm:$0xf0]  ;;  %v5382_v50 = vor.u32 %v7242_v43, %v5381_v42  ;;  %1588 = vmatpush.bf16.msra.mxu1 %v5126_v45 }
  0x3a   :  { %v5109_v49 = vld [vmem:[#allocation7 + $0x160] sm:$0xf]  ;;  %v7174_v51 = vld [vmem:[#allocation7 + $0x16c] sm:$0xf0]  ;;  %v4982_v56 = vor.u32 %v7142_v48, %v4981_v47  ;;  %1602 = vmatpush.bf16.msra.mxu2 %v5254_v46  ;;  %v5050_v48 = vor.u32 %v7156_v37, %v5047_v38 }
  0x3b   :  { %v5237_v52 = vld [vmem:[#allocation7 + $0x260] sm:$0xf]  ;;  %v7206_v53 = vld [vmem:[#allocation7 + $0x26c] sm:$0xf0]  ;;  %v5110_v57 = vor.u32 %v7174_v51, %v5109_v49  ;;  %1616 = vmatpush.bf16.msra.mxu3 %v5382_v50  ;;  %v7152_v50 = vld [vmem:[#allocation7 + $0xc4] sm:$0xf] }
  0x3c   :  { %v5365_v54 = vld [vmem:[#allocation7 + $0x360] sm:$0xf]  ;;  %v7238_v55 = vld [vmem:[#allocation7 + $0x36c] sm:$0xf0]  ;;  %v5238_v58 = vor.u32 %v7206_v53, %v5237_v52  ;;  %1575 = vmatpush.bf16.msra.mxu0 %v4982_v56  ;;  %v5031_v51 = vld [vmem:[#allocation7 + $0xd0] sm:$0xf0] }
  0x3d   :  { %v4965_v59 = vld [vmem:[#allocation7 + $0x40] sm:$0xf]  ;;  %v7138_v60 = vld [vmem:[#allocation7 + $0x4c] sm:$0xf0]  ;;  %v5366_v62 = vor.u32 %v7238_v55, %v5365_v54  ;;  %1589 = vmatpush.bf16.msra.mxu1 %v5110_v57  ;;  %v4905_v52 = vld [vmem:[#allocation2] sm:$0xf] }
  0x3e   :  { %v5093_v61 = vld [vmem:[#allocation7 + $0x140] sm:$0xf]  ;;  %v7170_v63 = vld [vmem:[#allocation7 + $0x14c] sm:$0xf0]  ;;  %v4966_v4 = vor.u32 %v7138_v60, %v4965_v59  ;;  %1603 = vmatpush.bf16.msra.mxu2 %v5238_v58  ;;  %v7124_v53 = vld [vmem:[#allocation2 + $0x18] sm:$0xf0] }
  0x3f   :  { %v5221_v0 = vld [vmem:[#allocation7 + $0x240] sm:$0xf]  ;;  %v7202_v1 = vld [vmem:[#allocation7 + $0x24c] sm:$0xf0]  ;;  %v5094_v5 = vor.u32 %v7170_v63, %v5093_v61  ;;  %1617 = vmatpush.bf16.msra.mxu3 %v5366_v62  ;;  %v8149_v57 = vor.u32 %v7124_v53, %v4905_v52  ;;  %v7125_v58 = vld [vmem:[#allocation2 + $0x20] sm:$0xf0] }
  0x40   :  { %v5349_v2 = vld [vmem:[#allocation7 + $0x340] sm:$0xf]  ;;  %v7234_v3 = vld [vmem:[#allocation7 + $0x34c] sm:$0xf0]  ;;  %v5222_v6 = vor.u32 %v7202_v1, %v5221_v0  ;;  %1576 = vmatpush.bf16.msra.mxu0 %v4966_v4  ;;  %v5034_v1 = vor.u32 %v7152_v50, %v5031_v51  ;;  %v7148_v4 = vld [vmem:[#allocation7 + $0xa4] sm:$0xf] }
  0x41   :  { %v4949_v7 = vld [vmem:[#allocation7 + $0x20] sm:$0xf]  ;;  %v7134_v8 = vld [vmem:[#allocation7 + $0x2c] sm:$0xf0]  ;;  %v5350_v10 = vor.u32 %v7234_v3, %v5349_v2  ;;  %1590 = vmatpush.bf16.msra.mxu1 %v5094_v5  ;;  %v5015_v5 = vld [vmem:[#allocation7 + $0xb0] sm:$0xf0] }
  0x42   :  { %v5077_v9 = vld [vmem:[#allocation7 + $0x120] sm:$0xf]  ;;  %v7166_v11 = vld [vmem:[#allocation7 + $0x12c] sm:$0xf0]  ;;  %v4950_v16 = vor.u32 %v7134_v8, %v4949_v7  ;;  %1604 = vmatpush.bf16.msra.mxu2 %v5222_v6  ;;  %v7121_v6 = vld [vmem:[#allocation2 + $0x4] sm:$0xf] }
  0x43   :  { %v5205_v12 = vld [vmem:[#allocation7 + $0x220] sm:$0xf]  ;;  %v7198_v13 = vld [vmem:[#allocation7 + $0x22c] sm:$0xf0]  ;;  %v5078_v19 = vor.u32 %v7166_v11, %v5077_v9  ;;  %1618 = vmatpush.bf16.msra.mxu3 %v5350_v10  ;;  %v4907_v7 = vld [vmem:[#allocation2 + $0x1c] sm:$0xf0] }
  0x44   :  { %v5333_v14 = vld [vmem:[#allocation7 + $0x320] sm:$0xf]  ;;  %v7230_v15 = vld [vmem:[#allocation7 + $0x32c] sm:$0xf0]  ;;  %v5206_v20 = vor.u32 %v7198_v13, %v5205_v12  ;;  %1577 = vmatpush.bf16.msra.mxu0 %v4950_v16  ;;  %v8155_v11 = vor.u32 %v7121_v6, %v4907_v7  ;;  %v7128_v7 = vld [vmem:[#allocation7 + $0x4] sm:$0xf] }
  0x45   :  { %v4933_v17 = vld [vmem:[#allocation7] sm:$0xf]  ;;  %v7130_v18 = vld [vmem:[#allocation7 + $0xc] sm:$0xf0]  ;;  %v5334_v24 = vor.u32 %v7230_v15, %v5333_v14  ;;  %1591 = vmatpush.bf16.msra.mxu1 %v5078_v19  ;;  %v7122_v19 = vld [vmem:[#allocation2 + $0xc] sm:$0xf] }
  0x46   :  { %v5061_v21 = vld [vmem:[#allocation7 + $0x100] sm:$0xf]  ;;  %v7162_v22 = vld [vmem:[#allocation7 + $0x10c] sm:$0xf0]  ;;  %v4934_v31 = vor.u32 %v7130_v18, %v4933_v17  ;;  %1605 = vmatpush.bf16.msra.mxu2 %v5206_v20  ;;  %v5018_v17 = vor.u32 %v7148_v4, %v5015_v5 }
  0x47   :  { %v5189_v23 = vld [vmem:[#allocation7 + $0x200] sm:$0xf]  ;;  %v7194_v25 = vld [vmem:[#allocation7 + $0x20c] sm:$0xf0]  ;;  %v5062_v35 = vor.u32 %v7162_v22, %v5061_v21  ;;  %1619 = vmatpush.bf16.msra.mxu3 %v5334_v24  ;;  %v7144_v21 = vld [vmem:[#allocation7 + $0x84] sm:$0xf] }
  0x48   :  { %v5317_v26 = vld [vmem:[#allocation7 + $0x300] sm:$0xf]  ;;  %v7226_v27 = vld [vmem:[#allocation7 + $0x30c] sm:$0xf0]  ;;  %v5190_v36 = vor.u32 %v7194_v25, %v5189_v23  ;;  %1578 = vmatpush.bf16.msra.mxu0 %v4934_v31  ;;  %v4999_v22 = vld [vmem:[#allocation7 + $0x90] sm:$0xf0] }
  0x49   :  { %v5557_v28 = vld [vmem:[#allocation7 + $0x4e0] sm:$0xf]  ;;  %v7286_v29 = vld [vmem:[#allocation7 + $0x4ec] sm:$0xf0]  ;;  %v5318_v39 = vor.u32 %v7226_v27, %v5317_v26  ;;  %1592 = vmatpush.bf16.msra.mxu1 %v5062_v35  ;;  %v4983_v35 = vld [vmem:[#allocation7 + $0x70] sm:$0xf0] }
  0x4a   :  { %v5685_v30 = vld [vmem:[#allocation7 + $0x5e0] sm:$0xf]  ;;  %v7318_v32 = vld [vmem:[#allocation7 + $0x5ec] sm:$0xf0]  ;;  %v5558_v40 = vor.u32 %v7286_v29, %v5557_v28  ;;  %1606 = vmatpush.bf16.msra.mxu2 %v5190_v36 }
  0x4b   :  { %v5813_v33 = vld [vmem:[#allocation7 + $0x6e0] sm:$0xf]  ;;  %v7350_v34 = vld [vmem:[#allocation7 + $0x6ec] sm:$0xf0]  ;;  %v5686_v43 = vor.u32 %v7318_v32, %v5685_v30  ;;  %1620 = vmatpush.bf16.msra.mxu3 %v5318_v39  ;;  %1579 = vmatmul.bf16.vlgmr.msra.gmra.mxu0 %v8149_v57  ;;  %v5002_v30 = vor.u32 %v7144_v21, %v4999_v22  ;;  %v4921_v22 = vld [vmem:[#allocation2 + $0x10] sm:$0xf] }
  0x4c   :  { %v5541_v41 = vld [vmem:[#allocation7 + $0x4c0] sm:$0xf]  ;;  %v7282_v42 = vld [vmem:[#allocation7 + $0x4cc] sm:$0xf0]  ;;  %v5814_v44 = vor.u32 %v7350_v34, %v5813_v33  ;;  %1627 = vmatpush.bf16.msrb.mxu0 %v5558_v40  ;;  %1593 = vmatmul.bf16.vlgmr.msra.gmra.mxu1 %v8155_v11  ;;  %v7140_v34 = vld [vmem:[#allocation7 + $0x64] sm:$0xf] }
  0x4d   :  { %v5669_v45 = vld [vmem:[#allocation7 + $0x5c0] sm:$0xf]  ;;  %v7314_v46 = vld [vmem:[#allocation7 + $0x5cc] sm:$0xf0]  ;;  %v5542_v55 = vor.u32 %v7282_v42, %v5541_v41  ;;  %1641 = vmatpush.bf16.msrb.mxu1 %v5686_v43  ;;  %v4986_v42 = vor.u32 %v7140_v34, %v4983_v35  ;;  %v5159_v34 = vld [vmem:[#allocation7 + $0x1d0] sm:$0xf0] }
  0x4e   :  { %v5797_v47 = vld [vmem:[#allocation7 + $0x6c0] sm:$0xf]  ;;  %v7346_v49 = vld [vmem:[#allocation7 + $0x6cc] sm:$0xf0]  ;;  %1655 = vmatpush.bf16.msrb.mxu2 %v5814_v44  ;;  %v5670_v59 = vor.u32 %v7314_v46, %v5669_v45  ;;  %v7136_v46 = vld [vmem:[#allocation7 + $0x44] sm:$0xf] }
  0x4f   :  { %v4913_v54 = vld [vmem:[#allocation2 + $0x8] sm:$0xf]  ;;  %v5798_v60 = vor.u32 %v7346_v49, %v5797_v47  ;;  %v7278_v61 = vld [vmem:[#allocation7 + $0x4ac] sm:$0xf0]  ;;  %1669 = vmatpush.bf16.msrb.mxu3 %v5050_v48  ;;  %v4967_v47 = vld [vmem:[#allocation7 + $0x50] sm:$0xf0] }
  0x50   :  { %v5525_v56 = vld [vmem:[#allocation7 + $0x4a0] sm:$0xf]  ;;  %v7310_v63 = vld [vmem:[#allocation7 + $0x5ac] sm:$0xf0]  ;;  %v8151_v0 = vor.u32 %v7125_v58, %v4913_v54  ;;  %1628 = vmatpush.bf16.msrb.mxu0 %v5542_v55  ;;  %v4970_v54 = vor.u32 %v7136_v46, %v4967_v47  ;;  %v7216_v35 = vld [vmem:[#allocation7 + $0x2c4] sm:$0xf] }
  0x51   :  { %v5653_v62 = vld [vmem:[#allocation7 + $0x5a0] sm:$0xf]  ;;  %v7342_v3 = vld [vmem:[#allocation7 + $0x6ac] sm:$0xf0]  ;;  %v5526_v8 = vor.u32 %v7278_v61, %v5525_v56  ;;  %1642 = vmatpush.bf16.msrb.mxu1 %v5670_v59  ;;  %v7132_v59 = vld [vmem:[#allocation7 + $0x24] sm:$0xf] }
  0x52   :  { %v5781_v2 = vld [vmem:[#allocation7 + $0x6a0] sm:$0xf]  ;;  %1607 = vmatmul.bf16.vlgmr.msra.gmra.mxu2 %v8151_v0  ;;  %v7274_v10 = vld [vmem:[#allocation7 + $0x48c] sm:$0xf0]  ;;  %v5654_v12 = vor.u32 %v7310_v63, %v5653_v62 }
  0x53   :  { %v5509_v9 = vld [vmem:[#allocation7 + $0x480] sm:$0xf]  ;;  %1656 = vmatpush.bf16.msrb.mxu2 %v5798_v60  ;;  %v5782_v13 = vor.u32 %v7342_v3, %v5781_v2  ;;  %v7306_v15 = vld [vmem:[#allocation7 + $0x58c] sm:$0xf0]  ;;  %1670 = vmatpush.bf16.msrb.mxu3 %v5034_v1  ;;  %v4951_v60 = vld [vmem:[#allocation7 + $0x30] sm:$0xf0] }
  0x54   :  { %v5637_v14 = vld [vmem:[#allocation7 + $0x580] sm:$0xf]  ;;  %v7338_v18 = vld [vmem:[#allocation7 + $0x68c] sm:$0xf0]  ;;  %1629 = vmatpush.bf16.msrb.mxu0 %v5526_v8  ;;  %v5510_v24 = vor.u32 %v7274_v10, %v5509_v9  ;;  %v4954_v8 = vor.u32 %v7132_v59, %v4951_v60  ;;  %v4935_v9 = vld [vmem:[#allocation7 + $0x10] sm:$0xf0] }
  0x55   :  { %v5765_v16 = vld [vmem:[#allocation7 + $0x680] sm:$0xf]  ;;  %1643 = vmatpush.bf16.msrb.mxu1 %v5654_v12  ;;  %v5638_v25 = vor.u32 %v7306_v15, %v5637_v14  ;;  %v7270_v28 = vld [vmem:[#allocation7 + $0x46c] sm:$0xf0]  ;;  %v7188_v10 = vld [vmem:[#allocation7 + $0x1e4] sm:$0xf] }
  0x56   :  { %v4915_v20 = vld [vmem:[#allocation2 + $0x24] sm:$0xf0]  ;;  %v5766_v26 = vor.u32 %v7338_v18, %v5765_v16  ;;  %v7302_v31 = vld [vmem:[#allocation7 + $0x56c] sm:$0xf0]  ;;  %v5175_v12 = vld [vmem:[#allocation7 + $0x1f0] sm:$0xf0] }
  0x57   :  { %v8158_v23 = vor.u32 %v7122_v19, %v4915_v20  ;;  %1657 = vmatpush.bf16.msrb.mxu2 %v5782_v13  ;;  %v5493_v27 = vld [vmem:[#allocation7 + $0x460] sm:$0xf]  ;;  %1671 = vmatpush.bf16.msrb.mxu3 %v5018_v17  ;;  %v7334_v33 = vld [vmem:[#allocation7 + $0x66c] sm:$0xf0]  ;;  %v7220_v13 = vld [vmem:[#allocation7 + $0x2e4] sm:$0xf] }
  0x58   :  { %v5621_v29 = vld [vmem:[#allocation7 + $0x560] sm:$0xf]  ;;  %1630 = vmatpush.bf16.msrb.mxu0 %v5510_v24  ;;  %v5494_v36 = vor.u32 %v7270_v28, %v5493_v27  ;;  %v7266_v40 = vld [vmem:[#allocation7 + $0x44c] sm:$0xf0]  ;;  %v5303_v14 = vld [vmem:[#allocation7 + $0x2f0] sm:$0xf0]  ;;  %v5178_v27 = vor.u32 %v7188_v10, %v5175_v12 }
  0x59   :  { %v5749_v32 = vld [vmem:[#allocation7 + $0x660] sm:$0xf]  ;;  %1621 = vmatmul.bf16.vlgmr.msra.gmra.mxu3 %v8158_v23  ;;  %1644 = vmatpush.bf16.msrb.mxu1 %v5638_v25  ;;  %v5622_v37 = vor.u32 %v7302_v31, %v5621_v29  ;;  %v7298_v43 = vld [vmem:[#allocation7 + $0x54c] sm:$0xf0]  ;;  %v7252_v15 = vld [vmem:[#allocation7 + $0x3e4] sm:$0xf]  ;;  %v5306_v31 = vor.u32 %v7220_v13, %v5303_v14 }
  0x5a   :  { %v5750_v38 = vor.u32 %v7334_v33, %v5749_v32  ;;  %v5477_v39 = vld [vmem:[#allocation7 + $0x440] sm:$0xf]  ;;  %v7330_v45 = vld [vmem:[#allocation7 + $0x64c] sm:$0xf0]  ;;  %v5431_v17 = vld [vmem:[#allocation7 + $0x3f0] sm:$0xf0] }
  0x5b   :  { %1658 = vmatpush.bf16.msrb.mxu2 %v5766_v26  ;;  %v5605_v41 = vld [vmem:[#allocation7 + $0x540] sm:$0xf]  ;;  %1672 = vmatpush.bf16.msrb.mxu3 %v5002_v30  ;;  %v5478_v48 = vor.u32 %v7266_v40, %v5477_v39  ;;  %v7262_v52 = vld [vmem:[#allocation7 + $0x42c] sm:$0xf0]  ;;  %v7284_v18 = vld [vmem:[#allocation7 + $0x4e4] sm:$0xf]  ;;  %v4938_v26 = vor.u32 %v7128_v7, %v4935_v9  ;;  %v5434_v32 = vor.u32 %v7252_v15, %v5431_v17 }
  0x5c   :  { %v5733_v44 = vld [vmem:[#allocation7 + $0x640] sm:$0xf]  ;;  %1631 = vmatpush.bf16.msrb.mxu0 %v5494_v36  ;;  %v5606_v49 = vor.u32 %v7298_v43, %v5605_v41  ;;  %v7294_v55 = vld [vmem:[#allocation7 + $0x52c] sm:$0xf0]  ;;  %v5559_v19 = vld [vmem:[#allocation7 + $0x4f0] sm:$0xf0] }
  0x5d   :  { %1645 = vmatpush.bf16.msrb.mxu1 %v5622_v37  ;;  %v5734_v50 = vor.u32 %v7330_v45, %v5733_v44  ;;  %v5461_v51 = vld [vmem:[#allocation7 + $0x420] sm:$0xf]  ;;  %v7326_v58 = vld [vmem:[#allocation7 + $0x62c] sm:$0xf0]  ;;  %v7126_v24 = vld [vmem:[#allocation2 + $0x28] sm:$0xf0]  ;;  %v5562_v36 = vor.u32 %v7284_v18, %v5559_v19 }
  0x5e   :  { %v5589_v53 = vld [vmem:[#allocation7 + $0x520] sm:$0xf]  ;;  %v5462_v62 = vor.u32 %v7262_v52, %v5461_v51  ;;  %v7258_v63 = vld [vmem:[#allocation7 + $0x40c] sm:$0xf0]  ;;  %v7127_v28 = vld [vmem:[#allocation2 + $0x30] sm:$0xf0]  ;;  %v8161_v37 = vor.u32 %v7126_v24, %v4921_v22 }
  0x5f   :  { %1659 = vmatpush.bf16.msrb.mxu2 %v5750_v38  ;;  %1673 = vmatpush.bf16.msrb.mxu3 %v4986_v42  ;;  %v5717_v56 = vld [vmem:[#allocation7 + $0x620] sm:$0xf]  ;;  %v7290_v2 = vld [vmem:[#allocation7 + $0x50c] sm:$0xf0]  ;;  %v5590_v3 = vor.u32 %v7294_v55, %v5589_v53  ;;  %v7123_v29 = vld [vmem:[#allocation2 + $0x14] sm:$0xf] }
  0x60   :  { %v5445_v61 = vld [vmem:[#allocation7 + $0x400] sm:$0xf]  ;;  %1632 = vmatpush.bf16.msrb.mxu0 %v5478_v48  ;;  %v5718_v4 = vor.u32 %v7326_v58, %v5717_v56  ;;  %v7322_v6 = vld [vmem:[#allocation7 + $0x60c] sm:$0xf0]  ;;  %v4923_v30 = vld [vmem:[#allocation2 + $0x2c] sm:$0xf0] }
  0x61   :  { %v5573_v1 = vld [vmem:[#allocation7 + $0x500] sm:$0xf]  ;;  %1646 = vmatpush.bf16.msrb.mxu1 %v5606_v49  ;;  %v5446_v16 = vor.u32 %v7258_v63, %v5445_v61  ;;  %v4929_v25 = vld [vmem:[#allocation2 + $0x18] sm:$0xf]  ;;  %v7184_v33 = vld [vmem:[#allocation7 + $0x1c4] sm:$0xf]  ;;  %v8165_v42 = vor.u32 %v7123_v29, %v4923_v30 }
  0x62   :  { %v5701_v5 = vld [vmem:[#allocation7 + $0x600] sm:$0xf]  ;;  %v5574_v20 = vor.u32 %v7290_v2, %v5573_v1  ;;  %v5287_v38 = vld [vmem:[#allocation7 + $0x2d0] sm:$0xf0]  ;;  %v7248_v39 = vld [vmem:[#allocation7 + $0x3c4] sm:$0xf]  ;;  %v8163_v41 = vor.u32 %v7127_v28, %v4929_v25  ;;  %v5162_v45 = vor.u32 %v7184_v33, %v5159_v34 }
  0x63   :  { %1660 = vmatpush.bf16.msrb.mxu2 %v5734_v50  ;;  %1674 = vmatpush.bf16.msrb.mxu3 %v4970_v54  ;;  %v5702_v21 = vor.u32 %v7322_v6, %v5701_v5  ;;  %v5415_v40 = vld [vmem:[#allocation7 + $0x3d0] sm:$0xf0]  ;;  %v7280_v43 = vld [vmem:[#allocation7 + $0x4c4] sm:$0xf]  ;;  %v5290_v46 = vor.u32 %v7216_v35, %v5287_v38 }
  0x64   :  { %1633 = vmatpush.bf16.msrb.mxu0 %v5462_v62  ;;  %v5543_v44 = vld [vmem:[#allocation7 + $0x4d0] sm:$0xf0]  ;;  %v5418_v47 = vor.u32 %v7248_v39, %v5415_v40  ;;  %v7180_v48 = vld [vmem:[#allocation7 + $0x1a4] sm:$0xf] }
  0x65   :  { %1647 = vmatpush.bf16.msrb.mxu1 %v5590_v3  ;;  %v5143_v49 = vld [vmem:[#allocation7 + $0x1b0] sm:$0xf0]  ;;  %v7212_v50 = vld [vmem:[#allocation7 + $0x2a4] sm:$0xf]  ;;  %v5546_v51 = vor.u32 %v7280_v43, %v5543_v44 }
  0x66   :  { %v5271_v52 = vld [vmem:[#allocation7 + $0x2b0] sm:$0xf0]  ;;  %v7244_v53 = vld [vmem:[#allocation7 + $0x3a4] sm:$0xf]  ;;  %v5146_v58 = vor.u32 %v7180_v48, %v5143_v49 }
  0x67   :  { %1661 = vmatpush.bf16.msrb.mxu2 %v5718_v4  ;;  %1675 = vmatpush.bf16.msrb.mxu3 %v4954_v8  ;;  %v5399_v54 = vld [vmem:[#allocation7 + $0x3b0] sm:$0xf0]  ;;  %v7276_v55 = vld [vmem:[#allocation7 + $0x4a4] sm:$0xf]  ;;  %v5274_v59 = vor.u32 %v7212_v50, %v5271_v52 }
  0x68   :  { %1634 = vmatpush.bf16.msrb.mxu0 %v5446_v16  ;;  %v5527_v56 = vld [vmem:[#allocation7 + $0x4b0] sm:$0xf0]  ;;  %v5402_v60 = vor.u32 %v7244_v53, %v5399_v54  ;;  %v7176_v61 = vld [vmem:[#allocation7 + $0x184] sm:$0xf] }
  0x69   :  { %1648 = vmatpush.bf16.msrb.mxu1 %v5574_v20  ;;  %v5127_v62 = vld [vmem:[#allocation7 + $0x190] sm:$0xf0]  ;;  %v7208_v63 = vld [vmem:[#allocation7 + $0x284] sm:$0xf]  ;;  %v5530_v1 = vor.u32 %v7276_v55, %v5527_v56 }
  0x6a   :  { %v5255_v2 = vld [vmem:[#allocation7 + $0x290] sm:$0xf0]  ;;  %v7240_v3 = vld [vmem:[#allocation7 + $0x384] sm:$0xf]  ;;  %v5130_v7 = vor.u32 %v7176_v61, %v5127_v62 }
  0x6b   :  { %1662 = vmatpush.bf16.msrb.mxu2 %v5702_v21  ;;  %1676 = vmatpush.bf16.msrb.mxu3 %v4938_v26  ;;  %v5383_v4 = vld [vmem:[#allocation7 + $0x390] sm:$0xf0]  ;;  %v7272_v5 = vld [vmem:[#allocation7 + $0x484] sm:$0xf]  ;;  %v5258_v8 = vor.u32 %v7208_v63, %v5255_v2 }
  0x6c   :  { %1683 = vmatpush.bf16.msra.mxu0 %v5178_v27  ;;  %1649 = vmatmul.bf16.vlgmr.msrb.gmra.mxu1 %v8165_v42  ;;  %v5511_v6 = vld [vmem:[#allocation7 + $0x490] sm:$0xf0]  ;;  %v5386_v9 = vor.u32 %v7240_v3, %v5383_v4  ;;  %v7172_v10 = vld [vmem:[#allocation7 + $0x164] sm:$0xf]  ;;  %v5053_v3 = vld [vmem:[#allocation7 + $0xe8] sm:$0xf] }
  0x6d   :  { %1697 = vmatpush.bf16.msra.mxu1 %v5306_v31  ;;  %1635 = vmatmul.bf16.vlgmr.msrb.gmra.mxu0 %v8161_v37  ;;  %v5111_v12 = vld [vmem:[#allocation7 + $0x170] sm:$0xf0]  ;;  %v7204_v13 = vld [vmem:[#allocation7 + $0x264] sm:$0xf]  ;;  %v5514_v14 = vor.u32 %v7272_v5, %v5511_v6  ;;  %v7159_v4 = vld [vmem:[#allocation7 + $0xf4] sm:$0xf0] }
  0x6e   :  { %1663 = vmatmul.bf16.vlgmr.msrb.gmra.mxu2 %v8163_v41  ;;  %1677 = vmatmul.bf16.vlgmr.msrb.gmra.mxu3 %v8149_v57  ;;  %v5239_v15 = vld [vmem:[#allocation7 + $0x270] sm:$0xf0]  ;;  %v7236_v16 = vld [vmem:[#allocation7 + $0x364] sm:$0xf]  ;;  %v5114_v20 = vor.u32 %v7172_v10, %v5111_v12 }
  0x6f   :  { %1711 = vmatpush.bf16.msra.mxu2 %v5434_v32  ;;  %1725 = vmatpush.bf16.msra.mxu3 %v5562_v36  ;;  %v5367_v17 = vld [vmem:[#allocation7 + $0x370] sm:$0xf0]  ;;  %v7268_v18 = vld [vmem:[#allocation7 + $0x464] sm:$0xf]  ;;  %v5242_v21 = vor.u32 %v7204_v13, %v5239_v15  ;;  %v5054_v13 = vor.u32 %v7159_v4, %v5053_v3 }
  0x70   :  { %1684 = vmatpush.bf16.msra.mxu0 %v5162_v45  ;;  %v5495_v19 = vld [vmem:[#allocation7 + $0x470] sm:$0xf0]  ;;  %v5370_v22 = vor.u32 %v7236_v16, %v5367_v17  ;;  %v7168_v24 = vld [vmem:[#allocation7 + $0x144] sm:$0xf] }
  0x71   :  { %1698 = vmatpush.bf16.msra.mxu1 %v5290_v46  ;;  %v5095_v25 = vld [vmem:[#allocation7 + $0x150] sm:$0xf0]  ;;  %v7200_v26 = vld [vmem:[#allocation7 + $0x244] sm:$0xf]  ;;  %v5498_v27 = vor.u32 %v7268_v18, %v5495_v19  ;;  %v5037_v19 = vld [vmem:[#allocation7 + $0xc8] sm:$0xf] }
  0x72   :  { %v5223_v28 = vld [vmem:[#allocation7 + $0x250] sm:$0xf0]  ;;  %v7232_v29 = vld [vmem:[#allocation7 + $0x344] sm:$0xf]  ;;  %v5098_v33 = vor.u32 %v7168_v24, %v5095_v25 }
  0x73   :  { %1712 = vmatpush.bf16.msra.mxu2 %v5418_v47  ;;  %1726 = vmatpush.bf16.msra.mxu3 %v5546_v51  ;;  %v5351_v30 = vld [vmem:[#allocation7 + $0x350] sm:$0xf0]  ;;  %v7264_v31 = vld [vmem:[#allocation7 + $0x444] sm:$0xf]  ;;  %v5226_v34 = vor.u32 %v7200_v26, %v5223_v28 }
  0x74   :  { %1685 = vmatpush.bf16.msra.mxu0 %v5146_v58  ;;  %v5479_v32 = vld [vmem:[#allocation7 + $0x450] sm:$0xf0]  ;;  %v5354_v35 = vor.u32 %v7232_v29, %v5351_v30  ;;  %v7164_v36 = vld [vmem:[#allocation7 + $0x124] sm:$0xf] }
  0x75   :  { %1699 = vmatpush.bf16.msra.mxu1 %v5274_v59  ;;  %v5079_v38 = vld [vmem:[#allocation7 + $0x130] sm:$0xf0]  ;;  %v7196_v39 = vld [vmem:[#allocation7 + $0x224] sm:$0xf]  ;;  %v5482_v40 = vor.u32 %v7264_v31, %v5479_v32  ;;  %v5021_v32 = vld [vmem:[#allocation7 + $0xa8] sm:$0xf] }
  0x76   :  { %v5207_v43 = vld [vmem:[#allocation7 + $0x230] sm:$0xf0]  ;;  %v7228_v44 = vld [vmem:[#allocation7 + $0x324] sm:$0xf]  ;;  %v5082_v48 = vor.u32 %v7164_v36, %v5079_v38 }
  0x77   :  { %1713 = vmatpush.bf16.msra.mxu2 %v5402_v60  ;;  %1727 = vmatpush.bf16.msra.mxu3 %v5530_v1  ;;  %v5335_v45 = vld [vmem:[#allocation7 + $0x330] sm:$0xf0]  ;;  %v7260_v46 = vld [vmem:[#allocation7 + $0x424] sm:$0xf]  ;;  %v5210_v51 = vor.u32 %v7196_v39, %v5207_v43 }
  0x78   :  { %1686 = vmatpush.bf16.msra.mxu0 %v5130_v7  ;;  %v5463_v47 = vld [vmem:[#allocation7 + $0x430] sm:$0xf0]  ;;  %v7160_v49 = vld [vmem:[#allocation7 + $0x104] sm:$0xf]  ;;  %v5338_v52 = vor.u32 %v7228_v44, %v5335_v45  ;;  %v5181_v7 = vld [vmem:[#allocation7 + $0x1e8] sm:$0xf] }
  0x79   :  { %1700 = vmatpush.bf16.msra.mxu1 %v5258_v8  ;;  %v5063_v50 = vld [vmem:[#allocation7 + $0x110] sm:$0xf0]  ;;  %v7192_v53 = vld [vmem:[#allocation7 + $0x204] sm:$0xf]  ;;  %v5466_v56 = vor.u32 %v7260_v46, %v5463_v47  ;;  %v7191_v8 = vld [vmem:[#allocation7 + $0x1f4] sm:$0xf0] }
  0x7a   :  { %v5191_v54 = vld [vmem:[#allocation7 + $0x210] sm:$0xf0]  ;;  %v7224_v55 = vld [vmem:[#allocation7 + $0x304] sm:$0xf]  ;;  %v5066_v1 = vor.u32 %v7160_v49, %v5063_v50  ;;  %v5182_v17 = vor.u32 %v7191_v8, %v5181_v7  ;;  %v5005_v47 = vld [vmem:[#allocation7 + $0x88] sm:$0xf] }
  0x7b   :  { %1714 = vmatpush.bf16.msra.mxu2 %v5386_v9  ;;  %1728 = vmatpush.bf16.msra.mxu3 %v5514_v14  ;;  %v5319_v58 = vld [vmem:[#allocation7 + $0x310] sm:$0xf0]  ;;  %v7256_v59 = vld [vmem:[#allocation7 + $0x404] sm:$0xf]  ;;  %v5194_v5 = vor.u32 %v7192_v53, %v5191_v54  ;;  %v5133_v49 = vld [vmem:[#allocation7 + $0x188] sm:$0xf] }
  0x7c   :  { %1687 = vmatpush.bf16.msra.mxu0 %v5114_v20  ;;  %v5447_v60 = vld [vmem:[#allocation7 + $0x410] sm:$0xf0]  ;;  %v7316_v61 = vld [vmem:[#allocation7 + $0x5e4] sm:$0xf]  ;;  %v5322_v6 = vor.u32 %v7224_v55, %v5319_v58  ;;  %v7155_v20 = vld [vmem:[#allocation7 + $0xd4] sm:$0xf0] }
  0x7d   :  { %1701 = vmatpush.bf16.msra.mxu1 %v5242_v21  ;;  %v5687_v62 = vld [vmem:[#allocation7 + $0x5f0] sm:$0xf0]  ;;  %v7348_v63 = vld [vmem:[#allocation7 + $0x6e4] sm:$0xf]  ;;  %v5450_v9 = vor.u32 %v7256_v59, %v5447_v60  ;;  %v5165_v21 = vld [vmem:[#allocation7 + $0x1c8] sm:$0xf]  ;;  %v5038_v26 = vor.u32 %v7155_v20, %v5037_v19 }
  0x7e   :  { %v5815_v2 = vld [vmem:[#allocation7 + $0x6f0] sm:$0xf0]  ;;  %v5690_v10 = vor.u32 %v7316_v61, %v5687_v62  ;;  %v7312_v14 = vld [vmem:[#allocation7 + $0x5c4] sm:$0xf]  ;;  %v7179_v50 = vld [vmem:[#allocation7 + $0x194] sm:$0xf0] }
  0x7f   :  { %1715 = vmatpush.bf16.msra.mxu2 %v5370_v22  ;;  %1729 = vmatpush.bf16.msra.mxu3 %v5498_v27  ;;  %v5818_v12 = vor.u32 %v7348_v63, %v5815_v2  ;;  %v5671_v15 = vld [vmem:[#allocation7 + $0x5d0] sm:$0xf0]  ;;  %v7344_v16 = vld [vmem:[#allocation7 + $0x6c4] sm:$0xf]  ;;  %v7187_v22 = vld [vmem:[#allocation7 + $0x1d4] sm:$0xf0]  ;;  %v5134_v58 = vor.u32 %v7179_v50, %v5133_v49 }
  0x80   :  { %1688 = vmatpush.bf16.msra.mxu0 %v5098_v33  ;;  %v5799_v18 = vld [vmem:[#allocation7 + $0x6d0] sm:$0xf0]  ;;  %v5674_v24 = vor.u32 %v7312_v14, %v5671_v15  ;;  %v7308_v27 = vld [vmem:[#allocation7 + $0x5a4] sm:$0xf]  ;;  %v5166_v30 = vor.u32 %v7187_v22, %v5165_v21  ;;  %v7151_v33 = vld [vmem:[#allocation7 + $0xb4] sm:$0xf0] }
  0x81   :  { %1702 = vmatpush.bf16.msra.mxu1 %v5226_v34  ;;  %v5802_v25 = vor.u32 %v7344_v16, %v5799_v18  ;;  %v5655_v28 = vld [vmem:[#allocation7 + $0x5b0] sm:$0xf0]  ;;  %v7340_v29 = vld [vmem:[#allocation7 + $0x6a4] sm:$0xf]  ;;  %v5149_v34 = vld [vmem:[#allocation7 + $0x1a8] sm:$0xf]  ;;  %v5022_v39 = vor.u32 %v7151_v33, %v5021_v32 }
  0x82   :  { %v5783_v31 = vld [vmem:[#allocation7 + $0x6b0] sm:$0xf0]  ;;  %v5658_v36 = vor.u32 %v7308_v27, %v5655_v28  ;;  %v7336_v44 = vld [vmem:[#allocation7 + $0x684] sm:$0xf]  ;;  %v4989_v60 = vld [vmem:[#allocation7 + $0x68] sm:$0xf] }
  0x83   :  { %1716 = vmatpush.bf16.msra.mxu2 %v5354_v35  ;;  %1730 = vmatpush.bf16.msra.mxu3 %v5482_v40  ;;  %v7183_v35 = vld [vmem:[#allocation7 + $0x1b4] sm:$0xf0]  ;;  %v5786_v38 = vor.u32 %v7340_v29, %v5783_v31  ;;  %v7304_v40 = vld [vmem:[#allocation7 + $0x584] sm:$0xf]  ;;  %v5639_v43 = vld [vmem:[#allocation7 + $0x590] sm:$0xf0] }
  0x84   :  { %1689 = vmatpush.bf16.msra.mxu0 %v5082_v48  ;;  %v5150_v45 = vor.u32 %v7183_v35, %v5149_v34  ;;  %v5767_v46 = vld [vmem:[#allocation7 + $0x690] sm:$0xf0]  ;;  %v7147_v48 = vld [vmem:[#allocation7 + $0x94] sm:$0xf0]  ;;  %v7300_v54 = vld [vmem:[#allocation7 + $0x564] sm:$0xf] }
  0x85   :  { %1703 = vmatpush.bf16.msra.mxu1 %v5210_v51  ;;  %v5642_v51 = vor.u32 %v7304_v40, %v5639_v43  ;;  %v5006_v53 = vor.u32 %v7147_v48, %v5005_v47  ;;  %v5623_v55 = vld [vmem:[#allocation7 + $0x570] sm:$0xf0]  ;;  %v7143_v61 = vld [vmem:[#allocation7 + $0x74] sm:$0xf0]  ;;  %v5117_v62 = vld [vmem:[#allocation7 + $0x168] sm:$0xf] }
  0x86   :  { %v5751_v59 = vld [vmem:[#allocation7 + $0x670] sm:$0xf0]  ;;  %v7175_v63 = vld [vmem:[#allocation7 + $0x174] sm:$0xf0]  ;;  %v4990_v3 = vor.u32 %v7143_v61, %v4989_v60  ;;  %v7296_v4 = vld [vmem:[#allocation7 + $0x544] sm:$0xf] }
  0x87   :  { %1717 = vmatpush.bf16.msra.mxu2 %v5338_v52  ;;  %1731 = vmatpush.bf16.msra.mxu3 %v5466_v56  ;;  %v5770_v52 = vor.u32 %v7336_v44, %v5767_v46  ;;  %v7332_v56 = vld [vmem:[#allocation7 + $0x664] sm:$0xf]  ;;  %v5118_v7 = vor.u32 %v7175_v63, %v5117_v62  ;;  %v5735_v8 = vld [vmem:[#allocation7 + $0x650] sm:$0xf0]  ;;  %v4957_v22 = vld [vmem:[#allocation7 + $0x28] sm:$0xf] }
  0x88   :  { %1690 = vmatpush.bf16.msra.mxu0 %v5066_v1  ;;  %v5626_v1 = vor.u32 %v7300_v54, %v5623_v55  ;;  %v5754_v2 = vor.u32 %v7332_v56, %v5751_v59  ;;  %v5591_v18 = vld [vmem:[#allocation7 + $0x530] sm:$0xf0]  ;;  %v7324_v19 = vld [vmem:[#allocation7 + $0x624] sm:$0xf]  ;;  %v4941_v34 = vld [vmem:[#allocation7 + $0x8] sm:$0xf] }
  0x89   :  { %1704 = vmatpush.bf16.msra.mxu1 %v5194_v5  ;;  %v5607_v5 = vld [vmem:[#allocation7 + $0x550] sm:$0xf0]  ;;  %v7288_v28 = vld [vmem:[#allocation7 + $0x504] sm:$0xf]  ;;  %v5309_v40 = vld [vmem:[#allocation7 + $0x2e8] sm:$0xf] }
  0x8a   :  { %v5610_v14 = vor.u32 %v7296_v4, %v5607_v5  ;;  %v5719_v21 = vld [vmem:[#allocation7 + $0x630] sm:$0xf0]  ;;  %v7320_v32 = vld [vmem:[#allocation7 + $0x604] sm:$0xf]  ;;  %v7223_v43 = vld [vmem:[#allocation7 + $0x2f4] sm:$0xf0] }
  0x8b   :  { %1718 = vmatpush.bf16.msra.mxu2 %v5322_v6  ;;  %1732 = vmatpush.bf16.msra.mxu3 %v5450_v9  ;;  %v7328_v6 = vld [vmem:[#allocation7 + $0x644] sm:$0xf]  ;;  %v4973_v9 = vld [vmem:[#allocation7 + $0x48] sm:$0xf]  ;;  %v5575_v29 = vld [vmem:[#allocation7 + $0x510] sm:$0xf0]  ;;  %v5310_v54 = vor.u32 %v7223_v43, %v5309_v40 }
  0x8c   :  { %1739 = vmatpush.bf16.msrb.mxu0 %v5690_v10  ;;  %1705 = vmatmul.bf16.vlgmr.msra.gmra.mxu1 %v8151_v0  ;;  %v7139_v10 = vld [vmem:[#allocation7 + $0x54] sm:$0xf0]  ;;  %v5738_v15 = vor.u32 %v7328_v6, %v5735_v8  ;;  %v5703_v33 = vld [vmem:[#allocation7 + $0x610] sm:$0xf0]  ;;  %v5437_v44 = vld [vmem:[#allocation7 + $0x3e8] sm:$0xf] }
  0x8d   :  { %1753 = vmatpush.bf16.msrb.mxu1 %v5818_v12  ;;  %1691 = vmatmul.bf16.vlgmr.msra.gmra.mxu0 %v8155_v11  ;;  %v5101_v12 = vld [vmem:[#allocation7 + $0x148] sm:$0xf]  ;;  %v4974_v16 = vor.u32 %v7139_v10, %v4973_v9  ;;  %v7255_v46 = vld [vmem:[#allocation7 + $0x3f4] sm:$0xf0]  ;;  %v5706_v49 = vor.u32 %v7320_v32, %v5703_v33 }
  0x8e   :  { %1719 = vmatmul.bf16.vlgmr.msra.gmra.mxu2 %v8158_v23  ;;  %1733 = vmatmul.bf16.vlgmr.msra.gmra.mxu3 %v8161_v37  ;;  %v5565_v47 = vld [vmem:[#allocation7 + $0x4e8] sm:$0xf]  ;;  %v7287_v48 = vld [vmem:[#allocation7 + $0x4f4] sm:$0xf0]  ;;  %v5438_v55 = vor.u32 %v7255_v46, %v5437_v44 }
  0x8f   :  { %1767 = vmatpush.bf16.msrb.mxu2 %v5054_v13  ;;  %1781 = vmatpush.bf16.msrb.mxu3 %v5182_v17  ;;  %v7171_v13 = vld [vmem:[#allocation7 + $0x154] sm:$0xf0]  ;;  %v7292_v17 = vld [vmem:[#allocation7 + $0x524] sm:$0xf]  ;;  %v5566_v56 = vor.u32 %v7287_v48, %v5565_v47  ;;  %v5421_v60 = vld [vmem:[#allocation7 + $0x3c8] sm:$0xf] }
  0x90   :  { %1740 = vmatpush.bf16.msrb.mxu0 %v5674_v24  ;;  %v5102_v20 = vor.u32 %v7171_v13, %v5101_v12  ;;  %v7135_v24 = vld [vmem:[#allocation7 + $0x34] sm:$0xf0]  ;;  %v5594_v27 = vor.u32 %v7292_v17, %v5591_v18  ;;  %v5549_v63 = vld [vmem:[#allocation7 + $0x4c8] sm:$0xf] }
  0x91   :  { %1754 = vmatpush.bf16.msrb.mxu1 %v5802_v25  ;;  %v5085_v25 = vld [vmem:[#allocation7 + $0x128] sm:$0xf]  ;;  %v4958_v31 = vor.u32 %v7135_v24, %v4957_v22  ;;  %v7219_v59 = vld [vmem:[#allocation7 + $0x2d4] sm:$0xf0] }
  0x92   :  { %v7251_v62 = vld [vmem:[#allocation7 + $0x3d4] sm:$0xf0]  ;;  %v5405_v9 = vld [vmem:[#allocation7 + $0x3a8] sm:$0xf] }
  0x93   :  { %1768 = vmatpush.bf16.msrb.mxu2 %v5038_v26  ;;  %1782 = vmatpush.bf16.msrb.mxu3 %v5166_v30  ;;  %v7167_v26 = vld [vmem:[#allocation7 + $0x134] sm:$0xf0]  ;;  %v5722_v30 = vor.u32 %v7324_v19, %v5719_v21  ;;  %v5422_v5 = vor.u32 %v7251_v62, %v5421_v60  ;;  %v5533_v13 = vld [vmem:[#allocation7 + $0x4a8] sm:$0xf] }
  0x94   :  { %1741 = vmatpush.bf16.msrb.mxu0 %v5658_v36  ;;  %v5086_v35 = vor.u32 %v7167_v26, %v5085_v25  ;;  %v7131_v36 = vld [vmem:[#allocation7 + $0x14] sm:$0xf0]  ;;  %v5389_v22 = vld [vmem:[#allocation7 + $0x388] sm:$0xf] }
  0x95   :  { %1755 = vmatpush.bf16.msrb.mxu1 %v5786_v38  ;;  %v5069_v38 = vld [vmem:[#allocation7 + $0x108] sm:$0xf]  ;;  %v4942_v50 = vor.u32 %v7131_v36, %v4941_v34  ;;  %v7215_v8 = vld [vmem:[#allocation7 + $0x2b4] sm:$0xf0] }
  0x96   :  { %v7247_v12 = vld [vmem:[#allocation7 + $0x3b4] sm:$0xf0]  ;;  %v5517_v26 = vld [vmem:[#allocation7 + $0x488] sm:$0xf] }
  0x97   :  { %1769 = vmatpush.bf16.msrb.mxu2 %v5022_v39  ;;  %1783 = vmatpush.bf16.msrb.mxu3 %v5150_v45  ;;  %v7163_v39 = vld [vmem:[#allocation7 + $0x114] sm:$0xf0]  ;;  %v5578_v45 = vor.u32 %v7288_v28, %v5575_v29  ;;  %v5406_v18 = vor.u32 %v7247_v12, %v5405_v9  ;;  %v5645_v28 = vld [vmem:[#allocation7 + $0x588] sm:$0xf] }
  0x98   :  { %1742 = vmatpush.bf16.msrb.mxu0 %v5642_v51  ;;  %v5693_v51 = vld [vmem:[#allocation7 + $0x5e8] sm:$0xf]  ;;  %v7211_v21 = vld [vmem:[#allocation7 + $0x294] sm:$0xf0] }
  0x99   :  { %1756 = vmatpush.bf16.msrb.mxu1 %v5770_v52  ;;  %v7319_v52 = vld [vmem:[#allocation7 + $0x5f4] sm:$0xf0]  ;;  %v5245_v33 = vld [vmem:[#allocation7 + $0x268] sm:$0xf] }
  0x9a   :  { %v5694_v61 = vor.u32 %v7319_v52, %v5693_v51  ;;  %v7243_v25 = vld [vmem:[#allocation7 + $0x394] sm:$0xf0]  ;;  %v5629_v43 = vld [vmem:[#allocation7 + $0x568] sm:$0xf] }
  0x9b   :  { %1770 = vmatpush.bf16.msrb.mxu2 %v5006_v53  ;;  %1784 = vmatpush.bf16.msrb.mxu3 %v5134_v58  ;;  %v5070_v53 = vor.u32 %v7163_v39, %v5069_v38  ;;  %v5293_v58 = vld [vmem:[#allocation7 + $0x2c8] sm:$0xf]  ;;  %v7307_v29 = vld [vmem:[#allocation7 + $0x594] sm:$0xf0] }
  0x9c   :  { %1743 = vmatpush.bf16.msrb.mxu0 %v5626_v1  ;;  %v7283_v1 = vld [vmem:[#allocation7 + $0x4d4] sm:$0xf0]  ;;  %v5294_v4 = vor.u32 %v7219_v59, %v5293_v58  ;;  %v5646_v36 = vor.u32 %v7307_v29, %v5645_v28  ;;  %v5501_v39 = vld [vmem:[#allocation7 + $0x468] sm:$0xf] }
  0x9d   :  { %1757 = vmatpush.bf16.msrb.mxu1 %v5754_v2  ;;  %v5677_v2 = vld [vmem:[#allocation7 + $0x5c8] sm:$0xf]  ;;  %v5550_v6 = vor.u32 %v7283_v1, %v5549_v63  ;;  %v7207_v34 = vld [vmem:[#allocation7 + $0x274] sm:$0xf0] }
  0x9e   :  { %v7239_v38 = vld [vmem:[#allocation7 + $0x374] sm:$0xf0]  ;;  %v5229_v48 = vld [vmem:[#allocation7 + $0x248] sm:$0xf] }
  0x9f   :  { %1771 = vmatpush.bf16.msrb.mxu2 %v4990_v3  ;;  %1785 = vmatpush.bf16.msrb.mxu3 %v5118_v7  ;;  %v7315_v3 = vld [vmem:[#allocation7 + $0x5d4] sm:$0xf0]  ;;  %v5277_v7 = vld [vmem:[#allocation7 + $0x2a8] sm:$0xf] }
  0xa0   :  { %1744 = vmatpush.bf16.msrb.mxu0 %v5610_v14  ;;  %v5678_v10 = vor.u32 %v7315_v3, %v5677_v2  ;;  %v7279_v14 = vld [vmem:[#allocation7 + $0x4b4] sm:$0xf0]  ;;  %v5278_v17 = vor.u32 %v7215_v8, %v5277_v7  ;;  %v5341_v63 = vld [vmem:[#allocation7 + $0x328] sm:$0xf] }
  0xa1   :  { %1758 = vmatpush.bf16.msrb.mxu1 %v5738_v15  ;;  %v5661_v15 = vld [vmem:[#allocation7 + $0x5a8] sm:$0xf]  ;;  %v5534_v19 = vor.u32 %v7279_v14, %v5533_v13  ;;  %v7271_v40 = vld [vmem:[#allocation7 + $0x474] sm:$0xf0] }
  0xa2   :  { %v7303_v44 = vld [vmem:[#allocation7 + $0x574] sm:$0xf0]  ;;  %v5502_v47 = vor.u32 %v7271_v40, %v5501_v39  ;;  %v5469_v3 = vld [vmem:[#allocation7 + $0x428] sm:$0xf]  ;;  %v7153_v39 = vld [vmem:[#allocation7 + $0xcc] sm:$0xf] }
  0xa3   :  { %1772 = vmatpush.bf16.msrb.mxu2 %v4974_v16  ;;  %1786 = vmatpush.bf16.msrb.mxu3 %v5102_v20  ;;  %v7311_v16 = vld [vmem:[#allocation7 + $0x5b4] sm:$0xf0]  ;;  %v5261_v20 = vld [vmem:[#allocation7 + $0x288] sm:$0xf]  ;;  %v5630_v51 = vor.u32 %v7303_v44, %v5629_v43  ;;  %v5039_v43 = vld [vmem:[#allocation7 + $0xd8] sm:$0xf0] }
  0xa4   :  { %1745 = vmatpush.bf16.msrb.mxu0 %v5594_v27  ;;  %v5662_v24 = vor.u32 %v7311_v16, %v5661_v15  ;;  %v7275_v27 = vld [vmem:[#allocation7 + $0x494] sm:$0xf0]  ;;  %v5197_v8 = vld [vmem:[#allocation7 + $0x208] sm:$0xf]  ;;  %v7185_v44 = vld [vmem:[#allocation7 + $0x1cc] sm:$0xf] }
  0xa5   :  { %1759 = vmatpush.bf16.msrb.mxu1 %v5722_v30  ;;  %v5262_v30 = vor.u32 %v7211_v21, %v5261_v20  ;;  %v5518_v32 = vor.u32 %v7275_v27, %v5517_v26  ;;  %v7235_v52 = vld [vmem:[#allocation7 + $0x354] sm:$0xf0]  ;;  %v5325_v13 = vld [vmem:[#allocation7 + $0x308] sm:$0xf]  ;;  %v7189_v26 = vld [vmem:[#allocation7 + $0x1ec] sm:$0xf] }
  0xa6   :  { %v7199_v62 = vld [vmem:[#allocation7 + $0x234] sm:$0xf0]  ;;  %v5453_v15 = vld [vmem:[#allocation7 + $0x408] sm:$0xf]  ;;  %v5183_v27 = vld [vmem:[#allocation7 + $0x1f8] sm:$0xf0] }
  0xa7   :  { %1773 = vmatpush.bf16.msrb.mxu2 %v4958_v31  ;;  %1787 = vmatpush.bf16.msrb.mxu3 %v5086_v35  ;;  %v5390_v31 = vor.u32 %v7243_v25, %v5389_v22  ;;  %v5373_v35 = vld [vmem:[#allocation7 + $0x368] sm:$0xf]  ;;  %v7231_v2 = vld [vmem:[#allocation7 + $0x334] sm:$0xf0]  ;;  %v7157_v22 = vld [vmem:[#allocation7 + $0xec] sm:$0xf] }
  0xa8   :  { %1746 = vmatpush.bf16.msrb.mxu0 %v5578_v45  ;;  %v5246_v45 = vor.u32 %v7207_v34, %v5245_v33  ;;  %v5374_v46 = vor.u32 %v7239_v38, %v5373_v35  ;;  %v7195_v9 = vld [vmem:[#allocation7 + $0x214] sm:$0xf0]  ;;  %v5821_v20 = vld [vmem:[#allocation7 + $0x6e8] sm:$0xf]  ;;  %v5055_v25 = vld [vmem:[#allocation7 + $0xf8] sm:$0xf0]  ;;  %v5186_v35 = vor.u32 %v7189_v26, %v5183_v27 }
  0xa9   :  { %1760 = vmatpush.bf16.msrb.mxu1 %v5706_v49  ;;  %v7203_v49 = vld [vmem:[#allocation7 + $0x254] sm:$0xf0]  ;;  %v5058_v34 = vor.u32 %v7157_v22, %v5055_v25  ;;  %v5247_v22 = vld [vmem:[#allocation7 + $0x278] sm:$0xf0]  ;;  %v5741_v27 = vld [vmem:[#allocation7 + $0x648] sm:$0xf] }
  0xaa   :  { %v5230_v58 = vor.u32 %v7203_v49, %v5229_v48  ;;  %v7227_v14 = vld [vmem:[#allocation7 + $0x314] sm:$0xf0]  ;;  %v5042_v49 = vor.u32 %v7153_v39, %v5039_v43 }
  0xab   :  { %1774 = vmatpush.bf16.msrb.mxu2 %v4942_v50  ;;  %1788 = vmatpush.bf16.msrb.mxu3 %v5070_v53  ;;  %v5357_v50 = vld [vmem:[#allocation7 + $0x348] sm:$0xf]  ;;  %v7351_v21 = vld [vmem:[#allocation7 + $0x6f4] sm:$0xf0]  ;;  %v5326_v28 = vor.u32 %v7227_v14, %v5325_v13 }
  0xac   :  { %1795 = vmatpush.bf16.msra.mxu0 %v5310_v54  ;;  %1761 = vmatmul.bf16.vlgmr.msrb.gmra.mxu1 %v8163_v41  ;;  %v5485_v53 = vld [vmem:[#allocation7 + $0x448] sm:$0xf]  ;;  %v7267_v54 = vld [vmem:[#allocation7 + $0x454] sm:$0xf0]  ;;  %v5358_v59 = vor.u32 %v7235_v52, %v5357_v50  ;;  %v5822_v33 = vor.u32 %v7351_v21, %v5821_v20  ;;  %v5119_v20 = vld [vmem:[#allocation7 + $0x178] sm:$0xf0] }
  0xad   :  { %1809 = vmatpush.bf16.msra.mxu1 %v5438_v55  ;;  %1747 = vmatmul.bf16.vlgmr.msrb.gmra.mxu0 %v8165_v42  ;;  %v5613_v55 = vld [vmem:[#allocation7 + $0x548] sm:$0xf]  ;;  %v5486_v60 = vor.u32 %v7267_v54, %v5485_v53  ;;  %v7347_v38 = vld [vmem:[#allocation7 + $0x6d4] sm:$0xf0]  ;;  %v7149_v53 = vld [vmem:[#allocation7 + $0xac] sm:$0xf] }
  0xae   :  { %1775 = vmatmul.bf16.vlgmr.msrb.gmra.mxu2 %v8149_v57  ;;  %1789 = vmatmul.bf16.vlgmr.msrb.gmra.mxu3 %v8155_v11  ;;  %v7343_v52 = vld [vmem:[#allocation7 + $0x6b4] sm:$0xf0]  ;;  %v5757_v14 = vld [vmem:[#allocation7 + $0x668] sm:$0xf]  ;;  %v7205_v21 = vld [vmem:[#allocation7 + $0x26c] sm:$0xf] }
  0xaf   :  { %1823 = vmatpush.bf16.msra.mxu2 %v5566_v56  ;;  %1837 = vmatpush.bf16.msra.mxu3 %v5694_v61  ;;  %v7299_v56 = vld [vmem:[#allocation7 + $0x554] sm:$0xf0]  ;;  %v5213_v61 = vld [vmem:[#allocation7 + $0x228] sm:$0xf] }
  0xb0   :  { %1796 = vmatpush.bf16.msra.mxu0 %v5294_v4  ;;  %v5614_v1 = vor.u32 %v7299_v56, %v5613_v55  ;;  %v7263_v4 = vld [vmem:[#allocation7 + $0x434] sm:$0xf0]  ;;  %v5214_v7 = vor.u32 %v7199_v62, %v5213_v61  ;;  %v5023_v55 = vld [vmem:[#allocation7 + $0xb8] sm:$0xf0]  ;;  %v7181_v56 = vld [vmem:[#allocation7 + $0x1ac] sm:$0xf] }
  0xb1   :  { %1810 = vmatpush.bf16.msra.mxu1 %v5422_v5  ;;  %v5597_v5 = vld [vmem:[#allocation7 + $0x528] sm:$0xf]  ;;  %v5470_v12 = vor.u32 %v7263_v4, %v5469_v3  ;;  %v5026_v62 = vor.u32 %v7149_v53, %v5023_v55  ;;  %v7145_v3 = vld [vmem:[#allocation7 + $0x8c] sm:$0xf]  ;;  %v7327_v43 = vld [vmem:[#allocation7 + $0x634] sm:$0xf0] }
  0xb2   :  { %v7323_v53 = vld [vmem:[#allocation7 + $0x614] sm:$0xf0] }
  0xb3   :  { %1824 = vmatpush.bf16.msra.mxu2 %v5550_v6  ;;  %1838 = vmatpush.bf16.msra.mxu3 %v5678_v10  ;;  %v7295_v6 = vld [vmem:[#allocation7 + $0x534] sm:$0xf0]  ;;  %v5342_v10 = vor.u32 %v7231_v2, %v5341_v63 }
  0xb4   :  { %1797 = vmatpush.bf16.msra.mxu0 %v5278_v17  ;;  %v5598_v16 = vor.u32 %v7295_v6, %v5597_v5  ;;  %v7259_v17 = vld [vmem:[#allocation7 + $0x414] sm:$0xf0]  ;;  %v5007_v5 = vld [vmem:[#allocation7 + $0x98] sm:$0xf0]  ;;  %v7177_v6 = vld [vmem:[#allocation7 + $0x18c] sm:$0xf] }
  0xb5   :  { %1811 = vmatpush.bf16.msra.mxu1 %v5406_v18  ;;  %v5581_v18 = vld [vmem:[#allocation7 + $0x508] sm:$0xf]  ;;  %v5454_v29 = vor.u32 %v7259_v17, %v5453_v15  ;;  %v7339_v2 = vld [vmem:[#allocation7 + $0x694] sm:$0xf0] }
  0xb6   :  { %v7335_v15 = vld [vmem:[#allocation7 + $0x674] sm:$0xf0] }
  0xb7   :  { %1825 = vmatpush.bf16.msra.mxu2 %v5534_v19  ;;  %1839 = vmatpush.bf16.msra.mxu3 %v5662_v24  ;;  %v7291_v19 = vld [vmem:[#allocation7 + $0x514] sm:$0xf0]  ;;  %v5198_v24 = vor.u32 %v7195_v9, %v5197_v8  ;;  %v7209_v8 = vld [vmem:[#allocation7 + $0x28c] sm:$0xf]  ;;  %v5263_v9 = vld [vmem:[#allocation7 + $0x298] sm:$0xf0] }
  0xb8   :  { %1798 = vmatpush.bf16.msra.mxu0 %v5262_v30  ;;  %v7221_v30 = vld [vmem:[#allocation7 + $0x2ec] sm:$0xf]  ;;  %v5266_v17 = vor.u32 %v7209_v8, %v5263_v9 }
  0xb9   :  { %1812 = vmatpush.bf16.msra.mxu1 %v5390_v31  ;;  %v5311_v31 = vld [vmem:[#allocation7 + $0x2f8] sm:$0xf0] }
  0xba   :  { %v5314_v40 = vor.u32 %v7221_v30, %v5311_v31  ;;  %v5250_v30 = vor.u32 %v7205_v21, %v5247_v22  ;;  %v4975_v31 = vld [vmem:[#allocation7 + $0x58] sm:$0xf0]  ;;  %v7313_v22 = vld [vmem:[#allocation7 + $0x5cc] sm:$0xf] }
  0xbb   :  { %1826 = vmatpush.bf16.msra.mxu2 %v5518_v32  ;;  %1840 = vmatpush.bf16.msra.mxu3 %v5646_v36  ;;  %v5582_v32 = vor.u32 %v7291_v19, %v5581_v18  ;;  %v5805_v36 = vld [vmem:[#allocation7 + $0x6c8] sm:$0xf]  ;;  %v4991_v18 = vld [vmem:[#allocation7 + $0x78] sm:$0xf0]  ;;  %v7173_v19 = vld [vmem:[#allocation7 + $0x16c] sm:$0xf] }
  0xbc   :  { %1799 = vmatpush.bf16.msra.mxu0 %v5246_v45  ;;  %v5167_v45 = vld [vmem:[#allocation7 + $0x1d8] sm:$0xf0]  ;;  %v5806_v48 = vor.u32 %v7347_v38, %v5805_v36  ;;  %v5122_v26 = vor.u32 %v7173_v19, %v5119_v20  ;;  %v7281_v19 = vld [vmem:[#allocation7 + $0x4cc] sm:$0xf] }
  0xbd   :  { %1813 = vmatpush.bf16.msra.mxu1 %v5374_v46  ;;  %v7217_v46 = vld [vmem:[#allocation7 + $0x2cc] sm:$0xf]  ;;  %v5170_v50 = vor.u32 %v7185_v44, %v5167_v45  ;;  %v5551_v21 = vld [vmem:[#allocation7 + $0x4d8] sm:$0xf0] }
  0xbe   :  { %v7133_v44 = vld [vmem:[#allocation7 + $0x2c] sm:$0xf] }
  0xbf   :  { %1827 = vmatpush.bf16.msra.mxu2 %v5502_v47  ;;  %1841 = vmatpush.bf16.msra.mxu3 %v5630_v51  ;;  %v5295_v47 = vld [vmem:[#allocation7 + $0x2d8] sm:$0xf0]  ;;  %v5789_v51 = vld [vmem:[#allocation7 + $0x6a8] sm:$0xf] }
  0xc0   :  { %1800 = vmatpush.bf16.msra.mxu0 %v5230_v58  ;;  %v5298_v54 = vor.u32 %v7217_v46, %v5295_v47  ;;  %v5151_v58 = vld [vmem:[#allocation7 + $0x1b8] sm:$0xf0]  ;;  %v5790_v61 = vor.u32 %v7343_v52, %v5789_v51  ;;  %v7165_v47 = vld [vmem:[#allocation7 + $0x12c] sm:$0xf]  ;;  %v5709_v52 = vld [vmem:[#allocation7 + $0x608] sm:$0xf] }
  0xc1   :  { %1814 = vmatpush.bf16.msra.mxu1 %v5358_v59  ;;  %v7213_v59 = vld [vmem:[#allocation7 + $0x2ac] sm:$0xf]  ;;  %v5154_v63 = vor.u32 %v7181_v56, %v5151_v58  ;;  %v4959_v46 = vld [vmem:[#allocation7 + $0x38] sm:$0xf0] }
  0xc2   :  { %v7129_v56 = vld [vmem:[#allocation7 + $0xc] sm:$0xf]  ;;  %v4943_v58 = vld [vmem:[#allocation7 + $0x18] sm:$0xf0] }
  0xc3   :  { %1828 = vmatpush.bf16.msra.mxu2 %v5486_v60  ;;  %1842 = vmatpush.bf16.msra.mxu3 %v5614_v1  ;;  %v5279_v60 = vld [vmem:[#allocation7 + $0x2b8] sm:$0xf0]  ;;  %v5773_v1 = vld [vmem:[#allocation7 + $0x688] sm:$0xf]  ;;  %v4946_v8 = vor.u32 %v7129_v56, %v4943_v58  ;;  %v7269_v56 = vld [vmem:[#allocation7 + $0x46c] sm:$0xf] }
  0xc4   :  { %1801 = vmatpush.bf16.msra.mxu0 %v5214_v7  ;;  %v5282_v4 = vor.u32 %v7213_v59, %v5279_v60  ;;  %v5135_v7 = vld [vmem:[#allocation7 + $0x198] sm:$0xf0]  ;;  %v7161_v59 = vld [vmem:[#allocation7 + $0x10c] sm:$0xf] }
  0xc5   :  { %1815 = vmatpush.bf16.msra.mxu1 %v5342_v10  ;;  %v5774_v10 = vor.u32 %v7339_v2, %v5773_v1  ;;  %v5138_v13 = vor.u32 %v7177_v6, %v5135_v7  ;;  %v7253_v1 = vld [vmem:[#allocation7 + $0x3ec] sm:$0xf]  ;;  %v5439_v2 = vld [vmem:[#allocation7 + $0x3f8] sm:$0xf0] }
  0xc6   :  { %v7317_v6 = vld [vmem:[#allocation7 + $0x5ec] sm:$0xf]  ;;  %v5695_v7 = vld [vmem:[#allocation7 + $0x5f8] sm:$0xf0] }
  0xc7   :  { %1829 = vmatpush.bf16.msra.mxu2 %v5470_v12  ;;  %1843 = vmatpush.bf16.msra.mxu3 %v5598_v16  ;;  %v5010_v12 = vor.u32 %v7145_v3, %v5007_v5  ;;  %v7141_v16 = vld [vmem:[#allocation7 + $0x6c] sm:$0xf]  ;;  %v5567_v5 = vld [vmem:[#allocation7 + $0x4f8] sm:$0xf0] }
  0xc8   :  { %1802 = vmatpush.bf16.msra.mxu0 %v5198_v24  ;;  %v5758_v24 = vor.u32 %v7335_v15, %v5757_v14  ;;  %v4994_v25 = vor.u32 %v7141_v16, %v4991_v18  ;;  %v7285_v3 = vld [vmem:[#allocation7 + $0x4ec] sm:$0xf]  ;;  %v5442_v14 = vor.u32 %v7253_v1, %v5439_v2  ;;  %v5698_v16 = vor.u32 %v7317_v6, %v5695_v7  ;;  %v5423_v18 = vld [vmem:[#allocation7 + $0x3d8] sm:$0xf0] }
  0xc9   :  { %1816 = vmatpush.bf16.msra.mxu1 %v5326_v28  ;;  %v7331_v28 = vld [vmem:[#allocation7 + $0x654] sm:$0xf0]  ;;  %v5570_v15 = vor.u32 %v7285_v3, %v5567_v5  ;;  %v5759_v1 = vld [vmem:[#allocation7 + $0x678] sm:$0xf0]  ;;  %v8189_v2 = vpop.f32.mrf.mxu1  ;;  %v7233_v6 = vld [vmem:[#allocation7 + $0x34c] sm:$0xf] }
  0xca   :  { %v5742_v36 = vor.u32 %v7331_v28, %v5741_v27  ;;  %v5554_v28 = vor.u32 %v7281_v19, %v5551_v21  ;;  %v5359_v7 = vld [vmem:[#allocation7 + $0x358] sm:$0xf0]  ;;  %v7229_v19 = vld [vmem:[#allocation7 + $0x32c] sm:$0xf] }
  0xcb   :  { %1830 = vmatpush.bf16.msra.mxu2 %v5454_v29  ;;  %1844 = vmatpush.bf16.msra.mxu3 %v5582_v32  ;;  %v7137_v29 = vld [vmem:[#allocation7 + $0x4c] sm:$0xf] }
  0xcc   :  { %1851 = vmatpush.bf16.msrb.mxu0 %v5822_v33  ;;  %1817 = vmatmul.bf16.vlgmr.msra.gmra.mxu1 %v8158_v23  ;;  %v7169_v32 = vld [vmem:[#allocation7 + $0x14c] sm:$0xf]  ;;  %v5103_v33 = vld [vmem:[#allocation7 + $0x158] sm:$0xf0]  ;;  %v4978_v38 = vor.u32 %v7137_v29, %v4975_v31 }
  0xcd   :  { %1865 = vmatpush.bf16.msrb.mxu1 %v5058_v34  ;;  %1803 = vmatmul.bf16.vlgmr.msra.gmra.mxu0 %v8151_v0  ;;  %v7201_v34 = vld [vmem:[#allocation7 + $0x24c] sm:$0xf]  ;;  %v5106_v39 = vor.u32 %v7169_v32, %v5103_v33  ;;  %v5407_v31 = vld [vmem:[#allocation7 + $0x3b8] sm:$0xf0] }
  0xce   :  { %1831 = vmatmul.bf16.vlgmr.msra.gmra.mxu2 %v8161_v37  ;;  %1845 = vmatmul.bf16.vlgmr.msra.gmra.mxu3 %v8165_v42  ;;  %v7277_v32 = vld [vmem:[#allocation7 + $0x4ac] sm:$0xf] }
  0xcf   :  { %1879 = vmatpush.bf16.msrb.mxu2 %v5186_v35  ;;  %1893 = vmatpush.bf16.msrb.mxu3 %v5314_v40  ;;  %v5231_v35 = vld [vmem:[#allocation7 + $0x258] sm:$0xf0]  ;;  %v5725_v40 = vld [vmem:[#allocation7 + $0x628] sm:$0xf]  ;;  %v7261_v21 = vld [vmem:[#allocation7 + $0x42c] sm:$0xf] }
  0xd0   :  { %1852 = vmatpush.bf16.msrb.mxu0 %v5806_v48  ;;  %v5234_v45 = vor.u32 %v7201_v34, %v5231_v35  ;;  %v5087_v48 = vld [vmem:[#allocation7 + $0x138] sm:$0xf0]  ;;  %v5726_v51 = vor.u32 %v7327_v43, %v5725_v40  ;;  %v7309_v35 = vld [vmem:[#allocation7 + $0x5ac] sm:$0xf] }
  0xd1   :  { %1866 = vmatpush.bf16.msrb.mxu1 %v5042_v49  ;;  %v7197_v49 = vld [vmem:[#allocation7 + $0x22c] sm:$0xf]  ;;  %v5090_v55 = vor.u32 %v7165_v47, %v5087_v48  ;;  %v5535_v34 = vld [vmem:[#allocation7 + $0x4b8] sm:$0xf0] }
  0xd2   :  { %v5538_v43 = vor.u32 %v7277_v32, %v5535_v34  ;;  %v7273_v47 = vld [vmem:[#allocation7 + $0x48c] sm:$0xf] }
  0xd3   :  { %1880 = vmatpush.bf16.msrb.mxu2 %v5170_v50  ;;  %1894 = vmatpush.bf16.msrb.mxu3 %v5298_v54  ;;  %v5215_v50 = vld [vmem:[#allocation7 + $0x238] sm:$0xf0]  ;;  %v4962_v54 = vor.u32 %v7133_v44, %v4959_v46  ;;  %v7225_v32 = vld [vmem:[#allocation7 + $0x30c] sm:$0xf] }
  0xd4   :  { %1853 = vmatpush.bf16.msrb.mxu0 %v5790_v61  ;;  %v5218_v60 = vor.u32 %v7197_v49, %v5215_v50  ;;  %v5071_v61 = vld [vmem:[#allocation7 + $0x118] sm:$0xf0]  ;;  %v7305_v50 = vld [vmem:[#allocation7 + $0x58c] sm:$0xf] }
  0xd5   :  { %1867 = vmatpush.bf16.msrb.mxu1 %v5026_v62  ;;  %v7193_v62 = vld [vmem:[#allocation7 + $0x20c] sm:$0xf]  ;;  %v5074_v9 = vor.u32 %v7161_v59, %v5071_v61  ;;  %v5391_v46 = vld [vmem:[#allocation7 + $0x398] sm:$0xf0] }
  0xd6   :  { %v5519_v49 = vld [vmem:[#allocation7 + $0x498] sm:$0xf0] }
  0xd7   :  { %1881 = vmatpush.bf16.msrb.mxu2 %v5154_v63  ;;  %1895 = vmatpush.bf16.msrb.mxu3 %v5282_v4  ;;  %v5199_v63 = vld [vmem:[#allocation7 + $0x218] sm:$0xf0]  ;;  %v5710_v4 = vor.u32 %v7323_v53, %v5709_v52  ;;  %v5522_v53 = vor.u32 %v7273_v47, %v5519_v49  ;;  %v5885_v49 = vld [vmem:[#allocation10 + $0x70] sm:$0xf] }
  0xd8   :  { %1854 = vmatpush.bf16.msrb.mxu0 %v5774_v10  ;;  %v7349_v10 = vld [vmem:[#allocation7 + $0x6ec] sm:$0xf]  ;;  %v5775_v52 = vld [vmem:[#allocation7 + $0x698] sm:$0xf0] }
  0xd9   :  { %1868 = vmatpush.bf16.msrb.mxu1 %v5010_v12  ;;  %v5823_v12 = vld [vmem:[#allocation7 + $0x6f8] sm:$0xf0] }
  0xda   :  { %v5826_v20 = vor.u32 %v7349_v10, %v5823_v12  ;;  %v5503_v59 = vld [vmem:[#allocation7 + $0x478] sm:$0xf0]  ;;  %v7297_v12 = vld [vmem:[#allocation7 + $0x54c] sm:$0xf] }
  0xdb   :  { %1882 = vmatpush.bf16.msrb.mxu2 %v5138_v13  ;;  %1896 = vmatpush.bf16.msrb.mxu3 %v5266_v17  ;;  %v5202_v13 = vor.u32 %v7193_v62, %v5199_v63  ;;  %v7249_v17 = vld [vmem:[#allocation7 + $0x3cc] sm:$0xf]  ;;  %v5631_v61 = vld [vmem:[#allocation7 + $0x578] sm:$0xf0]  ;;  %v8187_v62 = vpop.f32.mrf.mxu0 }
  0xdc   :  { %1855 = vmatpush.bf16.msrb.mxu0 %v5758_v24  ;;  %v5679_v24 = vld [vmem:[#allocation7 + $0x5d8] sm:$0xf0]  ;;  %v5426_v27 = vor.u32 %v7249_v17, %v5423_v18  ;;  %v7333_v63 = vld [vmem:[#allocation7 + $0x66c] sm:$0xf]  ;;  %v8195_v47 = vpop.f32.mrf.mxu3 }
  0xdd   :  { %1869 = vmatpush.bf16.msrb.mxu1 %v4994_v25  ;;  %v7345_v25 = vld [vmem:[#allocation7 + $0x6cc] sm:$0xf]  ;;  %v5682_v29 = vor.u32 %v7313_v22, %v5679_v24  ;;  %v5487_v10 = vld [vmem:[#allocation7 + $0x458] sm:$0xf0]  ;;  %v8191_v22 = vpop.f32.mrf.mxu2 }
  0xdf   :  { %1883 = vmatpush.bf16.msrb.mxu2 %v5122_v26  ;;  %1897 = vmatpush.bf16.msrb.mxu3 %v5250_v30  ;;  %v5807_v26 = vld [vmem:[#allocation7 + $0x6d8] sm:$0xf0]  ;;  %v7245_v30 = vld [vmem:[#allocation7 + $0x3ac] sm:$0xf] }
  0xe0   :  { %1856 = vmatpush.bf16.msrb.mxu0 %v5742_v36  ;;  %v5810_v33 = vor.u32 %v7345_v25, %v5807_v26  ;;  %v5663_v36 = vld [vmem:[#allocation7 + $0x5b8] sm:$0xf0]  ;;  %v5410_v40 = vor.u32 %v7245_v30, %v5407_v31  ;;  %v7293_v26 = vld [vmem:[#allocation7 + $0x52c] sm:$0xf]  ;;  %v8193_v30 = vld [vmem:[#allocation8] sm:$0xf] }
  0xe1   :  { %1870 = vmatpush.bf16.msrb.mxu1 %v4978_v38  ;;  %v7341_v38 = vld [vmem:[#allocation7 + $0x6ac] sm:$0xf]  ;;  %v5666_v44 = vor.u32 %v7309_v35, %v5663_v36  ;;  %v5471_v25 = vld [vmem:[#allocation7 + $0x438] sm:$0xf0] }
  0xe2   :  { %v5474_v34 = vor.u32 %v7261_v21, %v5471_v25  ;;  %v5327_v36 = vld [vmem:[#allocation7 + $0x318] sm:$0xf0] }
  0xe3   :  { %1884 = vmatpush.bf16.msrb.mxu2 %v5106_v39  ;;  %1898 = vmatpush.bf16.msrb.mxu3 %v5234_v45  ;;  %v5791_v39 = vld [vmem:[#allocation7 + $0x6b8] sm:$0xf0]  ;;  %v7241_v45 = vld [vmem:[#allocation7 + $0x38c] sm:$0xf] }
  0xe4   :  { %1857 = vmatpush.bf16.msrb.mxu0 %v5726_v51  ;;  %v5794_v48 = vor.u32 %v7341_v38, %v5791_v39  ;;  %v7337_v51 = vld [vmem:[#allocation7 + $0x68c] sm:$0xf]  ;;  %v5455_v39 = vld [vmem:[#allocation7 + $0x418] sm:$0xf0] }
  0xe5   :  { %1871 = vmatpush.bf16.msrb.mxu1 %v4962_v54  ;;  %v7237_v54 = vld [vmem:[#allocation7 + $0x36c] sm:$0xf]  ;;  %v5778_v58 = vor.u32 %v7337_v51, %v5775_v52  ;;  %v5949_v51 = vld [vmem:[#allocation10 + $0xf0] sm:$0xf]  ;;  %v7383_v52 = vld [vmem:[#allocation10 + $0xf4] sm:$0xf0] }
  0xe6   :  { %v7257_v38 = vld [vmem:[#allocation7 + $0x40c] sm:$0xf] }
  0xe7   :  { %1885 = vmatpush.bf16.msrb.mxu2 %v5090_v55  ;;  %1899 = vmatpush.bf16.msrb.mxu3 %v5218_v60  ;;  %v5375_v55 = vld [vmem:[#allocation7 + $0x378] sm:$0xf0]  ;;  %v7301_v60 = vld [vmem:[#allocation7 + $0x56c] sm:$0xf] }
  0xe8   :  { %1858 = vmatpush.bf16.msrb.mxu0 %v5710_v4  ;;  %v5378_v3 = vor.u32 %v7237_v54, %v5375_v55  ;;  %v5506_v4 = vor.u32 %v7269_v56, %v5503_v59  ;;  %v5634_v5 = vor.u32 %v7301_v60, %v5631_v61  ;;  %v5877_v56 = vld [vmem:[#allocation10 + $0x60] sm:$0xf]  ;;  %v5950_v59 = vor.u32 %v7383_v52, %v5949_v51  ;;  %v1610_v60 = vpop.f32.mrf.mxu2 }
  0xe9   :  { %1872 = vmatpush.bf16.msrb.mxu1 %v4946_v8  ;;  %v7265_v8 = vld [vmem:[#allocation7 + $0x44c] sm:$0xf]  ;;  %v5941_v61 = vld [vmem:[#allocation10 + $0xe0] sm:$0xf]  ;;  %v408_v52 = vperm.slane %v8193_v30, 1 }
  0xea   :  { %v5490_v17 = vor.u32 %v7265_v8, %v5487_v10  ;;  %v5933_v10 = vld [vmem:[#allocation10 + $0xd0] sm:$0xf] }
  0xeb   :  { %1886 = vmatpush.bf16.msrb.mxu2 %v5074_v9  ;;  %1900 = vmatpush.bf16.msrb.mxu3 %v5202_v13  ;;  %v5762_v9 = vor.u32 %v7333_v63, %v5759_v1  ;;  %v5615_v13 = vld [vmem:[#allocation7 + $0x558] sm:$0xf0]  ;;  %v7381_v63 = vld [vmem:[#allocation10 + $0xe4] sm:$0xf0] }
  0xec   :  { %1907 = vmatpush.bf16.msra.mxu0 %v5442_v14  ;;  %1873 = vmatmul.bf16.vlgmr.msrb.gmra.mxu1 %v8149_v57  ;;  %v7329_v14 = vld [vmem:[#allocation7 + $0x64c] sm:$0xf]  ;;  %v5618_v18 = vor.u32 %v7297_v12, %v5615_v13  ;;  %v5942_v8 = vor.u32 %v7381_v63, %v5941_v61  ;;  %v5893_v61 = vld [vmem:[#allocation10 + $0x80] sm:$0xf] }
  0xed   :  { %1921 = vmatpush.bf16.msra.mxu1 %v5570_v15  ;;  %1859 = vmatmul.bf16.vlgmr.msrb.gmra.mxu0 %v8163_v41  ;;  %v5743_v15 = vld [vmem:[#allocation7 + $0x658] sm:$0xf0]  ;;  %v7369_v63 = vld [vmem:[#allocation10 + $0x84] sm:$0xf0] }
  0xee   :  { %1887 = vmatmul.bf16.vlgmr.msrb.gmra.mxu2 %v8155_v11  ;;  %1901 = vmatmul.bf16.vlgmr.msrb.gmra.mxu3 %v8151_v0  ;;  %v5647_v11 = vld [vmem:[#allocation7 + $0x598] sm:$0xf0]  ;;  %v5394_v0 = vor.u32 %v7241_v45, %v5391_v46  ;;  %v5746_v24 = vor.u32 %v7329_v14, %v5743_v15  ;;  %v7321_v46 = vld [vmem:[#allocation7 + $0x60c] sm:$0xf]  ;;  %v1624_v14 = vpop.f32.mrf.mxu3 }
  0xef   :  { %1935 = vmatpush.bf16.msra.mxu2 %v5698_v16  ;;  %1949 = vmatpush.bf16.msra.mxu3 %v5826_v20  ;;  %v5650_v57 = vor.u32 %v7305_v50, %v5647_v11  ;;  %v5362_v16 = vor.u32 %v7233_v6, %v5359_v7  ;;  %v5343_v20 = vld [vmem:[#allocation7 + $0x338] sm:$0xf0]  ;;  %v5330_v11 = vor.u32 %v7225_v32, %v5327_v36  ;;  %v5869_v6 = vld [vmem:[#allocation10 + $0x50] sm:$0xf]  ;;  %v5909_v36 = vld [vmem:[#allocation10 + $0xa0] sm:$0xf] }
  0xf0   :  { %1908 = vmatpush.bf16.msra.mxu0 %v5426_v27  ;;  %v5599_v27 = vld [vmem:[#allocation7 + $0x538] sm:$0xf0]  ;;  %v5346_v31 = vor.u32 %v7229_v19, %v5343_v20  ;;  %v7377_v19 = vld [vmem:[#allocation10 + $0xc4] sm:$0xf0] }
  0xf1   :  { %1922 = vmatpush.bf16.msra.mxu1 %v5554_v28  ;;  %v7325_v28 = vld [vmem:[#allocation7 + $0x62c] sm:$0xf]  ;;  %v5602_v35 = vor.u32 %v7293_v26, %v5599_v27  ;;  %v5583_v45 = vld [vmem:[#allocation7 + $0x518] sm:$0xf0]  ;;  %v5917_v26 = vld [vmem:[#allocation10 + $0xb0] sm:$0xf] }
  0xf2   :  { %v7367_v50 = vld [vmem:[#allocation10 + $0x74] sm:$0xf0] }
  0xf3   :  { %1936 = vmatpush.bf16.msra.mxu2 %v5682_v29  ;;  %1950 = vmatpush.bf16.msra.mxu3 %v5810_v33  ;;  %v5727_v29 = vld [vmem:[#allocation7 + $0x638] sm:$0xf0]  ;;  %v1582_v33 = vpop.f32.mrf.mxu0  ;;  %v5886_v55 = vor.u32 %v7367_v50, %v5885_v49 }
  0xf4   :  { %1909 = vmatpush.bf16.msra.mxu0 %v5410_v40  ;;  %v1596_v40 = vpop.f32.mrf.mxu1  ;;  %v7363_v7 = vld [vmem:[#allocation10 + $0x54] sm:$0xf0] }
  0xf5   :  { %1923 = vmatpush.bf16.msra.mxu1 %v5538_v43  ;;  %v5730_v43 = vor.u32 %v7325_v28, %v5727_v29  ;;  %v5870_v15 = vor.u32 %v7363_v7, %v5869_v6  ;;  %v7371_v49 = vld [vmem:[#allocation10 + $0x94] sm:$0xf0] }
  0xf7   :  { %1937 = vmatpush.bf16.msra.mxu2 %v5666_v44  ;;  %1951 = vmatpush.bf16.msra.mxu3 %v5794_v48  ;;  %v7289_v44 = vld [vmem:[#allocation7 + $0x50c] sm:$0xf]  ;;  %v5711_v48 = vld [vmem:[#allocation7 + $0x618] sm:$0xf0] }
  0xf8   :  { %1910 = vmatpush.bf16.msra.mxu0 %v5394_v0  ;;  %v407_v0 = vperm.slane %v8193_v30, 0  ;;  %v5714_v54 = vor.u32 %v7321_v46, %v5711_v48  ;;  %v5901_v48 = vld [vmem:[#allocation10 + $0x90] sm:$0xf] }
  0xf9   :  { %1924 = vmatpush.bf16.msra.mxu1 %v5522_v53  ;;  %v5458_v53 = vor.u32 %v7257_v38, %v5455_v39  ;;  %v7373_v38 = vld [vmem:[#allocation10 + $0xa4] sm:$0xf0] }
  0xfa   :  { %v1581_v1 = vadd.f32 %v8187_v62, %v407_v0  ;;  %v7379_v62 = vld [vmem:[#allocation10 + $0xd4] sm:$0xf0]  ;;  %v5910_v46 = vor.u32 %v7373_v38, %v5909_v36 }
  0xfb   :  { %1938 = vmatpush.bf16.msra.mxu2 %v5650_v57  ;;  %1952 = vmatpush.bf16.msra.mxu3 %v5778_v58  ;;  %v5586_v57 = vor.u32 %v7289_v44, %v5583_v45  ;;  %v7365_v58 = vld [vmem:[#allocation10 + $0x64] sm:$0xf0]  ;;  %v5837_v44 = vld [vmem:[#allocation10 + $0x10] sm:$0xf]  ;;  %v7355_v45 = vld [vmem:[#allocation10 + $0x14] sm:$0xf0] }
  0xfc   :  { %1911 = vmatpush.bf16.msra.mxu0 %v5378_v3  ;;  %v1583_v3 = vadd.f32 %v1582_v33, %v407_v0  ;;  %v1595_v12 = vadd.f32 %v8189_v2, %v1581_v1  ;;  %v7359_v2 = vld [vmem:[#allocation10 + $0x34] sm:$0xf0] }
  0xfd   :  { %1925 = vmatpush.bf16.msra.mxu1 %v5506_v4  ;;  %v5878_v4 = vor.u32 %v7365_v58, %v5877_v56  ;;  %v7353_v56 = vld [vmem:[#allocation10 + $0x4] sm:$0xf0]  ;;  %v7366_v58 = vld [vmem:[#allocation10 + $0x74] sm:$0xf] }
  0xfe   :  { %v1597_v13 = vadd.f32 %v1596_v40, %v1583_v3  ;;  %v7382_v3 = vld [vmem:[#allocation10 + $0xf4] sm:$0xf] }
  0xff   :  { %1939 = vmatpush.bf16.msra.mxu2 %v5634_v5  ;;  %1953 = vmatpush.bf16.msra.mxu3 %v5762_v9  ;;  %v1636_v5 = vpop.f32.mrf.mxu0  ;;  %v1650_v9 = vpop.f32.mrf.mxu1 }
 0x100   :  { %1912 = vmatpush.bf16.msra.mxu0 %v5362_v16  ;;  %v7361_v16 = vld [vmem:[#allocation10 + $0x44] sm:$0xf0]  ;;  %v1611_v20 = vadd.f32 %v1610_v60, %v1597_v13  ;;  %v5887_v60 = vld [vmem:[#allocation10 + $0x78] sm:$0xf0] }
 0x101   :  { %1926 = vmatpush.bf16.msra.mxu1 %v5490_v17  ;;  %v5934_v17 = vor.u32 %v7379_v62, %v5933_v10  ;;  %v7364_v10 = vld [vmem:[#allocation10 + $0x64] sm:$0xf]  ;;  %v5879_v62 = vld [vmem:[#allocation10 + $0x68] sm:$0xf0] }
 0x102   :  { %v1625_v28 = vadd.f32 %v1624_v14, %v1611_v20 }
 0x103   :  { %1940 = vmatpush.bf16.msra.mxu2 %v5618_v18  ;;  %1954 = vmatpush.bf16.msra.mxu3 %v5746_v24  ;;  %v5925_v18 = vld [vmem:[#allocation10 + $0xc0] sm:$0xf]  ;;  %v5853_v24 = vld [vmem:[#allocation10 + $0x30] sm:$0xf] }
 0x104   :  { %1913 = vmatpush.bf16.msra.mxu0 %v5346_v31  ;;  %v5926_v25 = vor.u32 %v7377_v19, %v5925_v18  ;;  %v1678_v31 = vpop.f32.mrf.mxu3  ;;  %v5854_v33 = vor.u32 %v7359_v2, %v5853_v24  ;;  %v5882_v19 = vor.u32 %v7364_v10, %v5879_v62  ;;  %v5839_v62 = vld [vmem:[#allocation10 + $0x18] sm:$0xf0] }
 0x105   :  { %1927 = vmatpush.bf16.msra.mxu1 %v5474_v34  ;;  %v5845_v34 = vld [vmem:[#allocation10 + $0x20] sm:$0xf] }
 0x107   :  { %1941 = vmatpush.bf16.msra.mxu2 %v5602_v35  ;;  %1955 = vmatpush.bf16.msra.mxu3 %v5730_v43  ;;  %v1638_v29 = vpop.f32.mrf.mxu0  ;;  %v1652_v32 = vpop.f32.mrf.mxu1 }
 0x108   :  { %1914 = vmatpush.bf16.msra.mxu0 %v5330_v11  ;;  %v1639_v40 = vadd.f32 %v1638_v29, %v1625_v28  ;;  %v7360_v29 = vld [vmem:[#allocation10 + $0x44] sm:$0xf] }
 0x109   :  { %1928 = vmatpush.bf16.msra.mxu1 %v5458_v53  ;;  %v5838_v53 = vor.u32 %v7355_v45, %v5837_v44  ;;  %v7358_v44 = vld [vmem:[#allocation10 + $0x34] sm:$0xf] }
 0x10a   :  { %v1653_v11 = vadd.f32 %v1652_v32, %v1639_v40 }
 0x10b   :  { %1942 = vmatpush.bf16.msra.mxu2 %v5586_v57  ;;  %1956 = vmatpush.bf16.msra.mxu3 %v5714_v54 }
 0x10c   :  { %2365 = vmatpush.bf16.msrb.mxu0 %v5886_v55  ;;  %1929 = vmatmul.bf16.vlgmr.msra.gmra.mxu1 %v8161_v37  ;;  %v1609_v37 = vadd.f32 %v8191_v22, %v1595_v12  ;;  %v7357_v22 = vld [vmem:[#allocation10 + $0x24] sm:$0xf0]  ;;  %v1680_v54 = vpop.f32.mrf.mxu3  ;;  %v5829_v55 = vld [vmem:[#allocation10] sm:$0xf] }
 0x10d   :  { %1915 = vmatmul.bf16.vlgmr.msra.gmra.mxu0 %v8158_v23  ;;  %2379 = vmatpush.bf16.msrb.mxu1 %v5950_v59  ;;  %v5861_v23 = vld [vmem:[#allocation10 + $0x40] sm:$0xf]  ;;  %v5846_v43 = vor.u32 %v7357_v22, %v5845_v34  ;;  %v5902_v59 = vor.u32 %v7371_v49, %v5901_v48  ;;  %v5830_v6 = vor.u32 %v7353_v56, %v5829_v55  ;;  %v5927_v34 = vld [vmem:[#allocation10 + $0xc8] sm:$0xf0]  ;;  %v6013_v22 = vld [vmem:[#allocation10 + $0x170] sm:$0xf] }
 0x10e   :  { %1943 = vmatmul.bf16.vlgmr.msra.gmra.mxu2 %v8165_v42  ;;  %1957 = vmatmul.bf16.vlgmr.msra.gmra.mxu3 %v8163_v41  ;;  %v1664_v42 = vpop.f32.mrf.mxu2  ;;  %v5862_v21 = vor.u32 %v7361_v16, %v5861_v23  ;;  %v7375_v41 = vld [vmem:[#allocation10 + $0xb4] sm:$0xf0]  ;;  %v1623_v27 = vadd.f32 %v8195_v47, %v1609_v37  ;;  %v5943_v23 = vld [vmem:[#allocation10 + $0xe8] sm:$0xf0]  ;;  %v1681_v37 = vadd.f32 %v1680_v54, %v408_v52  ;;  %v6005_v49 = vld [vmem:[#allocation10 + $0x160] sm:$0xf] }
 0x10f   :  { %v5918_v35 = vor.u32 %v7375_v41, %v5917_v26  ;;  %v1692_v51 = vpop.f32.mrf.mxu0  ;;  %v1706_v0 = vpop.f32.mrf.mxu1  ;;  %v5935_v26 = vld [vmem:[#allocation10 + $0xd8] sm:$0xf0]  ;;  %v7356_v56 = vld [vmem:[#allocation10 + $0x24] sm:$0xf] }
 0x110   :  { %2366 = vmatpush.bf16.msrb.mxu0 %v5878_v4  ;;  %v1637_v39 = vadd.f32 %v1636_v5, %v1623_v27  ;;  %v5951_v4 = vld [vmem:[#allocation10 + $0xf8] sm:$0xf0]  ;;  %v1679_v5 = vadd.f32 %v1678_v31, %v408_v52  ;;  %v5863_v31 = vld [vmem:[#allocation10 + $0x48] sm:$0xf0] }
 0x111   :  { %2380 = vmatpush.bf16.msrb.mxu1 %v5942_v8  ;;  %v5890_v8 = vor.u32 %v7366_v58, %v5887_v60  ;;  %v5954_v12 = vor.u32 %v7382_v3, %v5951_v4  ;;  %v5847_v58 = vld [vmem:[#allocation10 + $0x28] sm:$0xf0]  ;;  %v7372_v60 = vld [vmem:[#allocation10 + $0xa4] sm:$0xf] }
 0x112   :  { %v1651_v50 = vadd.f32 %v1650_v9, %v1637_v39  ;;  %v5894_v9 = vor.u32 %v7369_v63, %v5893_v61  ;;  %v1693_v16 = vadd.f32 %v1692_v51, %v1679_v5  ;;  %v5919_v51 = vld [vmem:[#allocation10 + $0xb8] sm:$0xf0]  ;;  %v5911_v61 = vld [vmem:[#allocation10 + $0xa8] sm:$0xf0]  ;;  %v5997_v63 = vld [vmem:[#allocation10 + $0x150] sm:$0xf] }
 0x114   :  { %2367 = vmatpush.bf16.msrb.mxu0 %v5870_v15  ;;  %v1665_v1 = vadd.f32 %v1664_v42, %v1651_v50  ;;  %v7380_v15 = vld [vmem:[#allocation10 + $0xe4] sm:$0xf]  ;;  %v7362_v42 = vld [vmem:[#allocation10 + $0x54] sm:$0xf]  ;;  %v1734_v2 = vpop.f32.mrf.mxu3  ;;  %v1707_v41 = vadd.f32 %v1706_v0, %v1693_v16  ;;  %v7397_v50 = vld [vmem:[#allocation10 + $0x164] sm:$0xf0] }
 0x115   :  { %2381 = vmatpush.bf16.msrb.mxu1 %v5934_v17  ;;  %v5946_v24 = vor.u32 %v7380_v15, %v5943_v23  ;;  %v6006_v52 = vor.u32 %v7397_v50, %v6005_v49  ;;  %v7370_v16 = vld [vmem:[#allocation10 + $0x94] sm:$0xf] }
 0x116   :  { %v1666_v47 = vpop.f32.mrf.mxu2  ;;  %v1963_v13 = vmax.f32 %v1665_v1, 0.0  ;;  %v7395_v1 = vld [vmem:[#allocation10 + $0x154] sm:$0xf0] }
 0x117   :  { %v1667_v57 = vadd.f32 %v1666_v47, %v1653_v11  ;;  %v1694_v18 = vpop.f32.mrf.mxu0  ;;  %v1708_v20 = vpop.f32.mrf.mxu1  ;;  %v5855_v47 = vld [vmem:[#allocation10 + $0x38] sm:$0xf0]  ;;  %v7374_v11 = vld [vmem:[#allocation10 + $0xb4] sm:$0xf]  ;;  %v5998_v4 = vor.u32 %v7395_v1, %v5997_v63  ;;  %v6061_v1 = vld [vmem:[#allocation10 + $0x1d0] sm:$0xf] }
 0x118   :  { %2368 = vmatpush.bf16.msrb.mxu0 %v5862_v21  ;;  %v5871_v21 = vld [vmem:[#allocation10 + $0x58] sm:$0xf0]  ;;  %v1695_v28 = vadd.f32 %v1694_v18, %v1681_v37  ;;  %v5858_v54 = vor.u32 %v7358_v44, %v5855_v47  ;;  %v7396_v47 = vld [vmem:[#allocation10 + $0x164] sm:$0xf] }
 0x119   :  { %2382 = vmatpush.bf16.msrb.mxu1 %v5926_v25  ;;  %v1967_v7 = vmax.f32 %v1667_v57, 0.0  ;;  %v7378_v25 = vld [vmem:[#allocation10 + $0xd4] sm:$0xf]  ;;  %v5874_v27 = vor.u32 %v7362_v42, %v5871_v21  ;;  %v5903_v18 = vld [vmem:[#allocation10 + $0x98] sm:$0xf0] }
 0x11a   :  { %v5938_v32 = vor.u32 %v7378_v25, %v5935_v26  ;;  %v1709_v45 = vadd.f32 %v1708_v20, %v1695_v28  ;;  %v7352_v42 = vld [vmem:[#allocation10 + $0x4] sm:$0xf]  ;;  %v5831_v21 = vld [vmem:[#allocation10 + $0x8] sm:$0xf0]  ;;  %v7391_v25 = vld [vmem:[#allocation10 + $0x134] sm:$0xf0] }
 0x11b   :  { %v8207_v17 = vpack.c.bf16 %v1967_v7, %v1963_v13  ;;  %v7354_v7 = vld [vmem:[#allocation10 + $0x14] sm:$0xf]  ;;  %v5989_v13 = vld [vmem:[#allocation10 + $0x140] sm:$0xf]  ;;  %v6015_v44 = vld [vmem:[#allocation10 + $0x178] sm:$0xf0] }
 0x11c   :  { %2369 = vmatpush.bf16.msrb.mxu0 %v5854_v33  ;;  %v7376_v33 = vld [vmem:[#allocation10 + $0xc4] sm:$0xf]  ;;  %v1736_v57 = vpop.f32.mrf.mxu3 }
 0x11d   :  { %2383 = vmatpush.bf16.msrb.mxu1 %v5918_v35  ;;  %v7399_v35 = vld [vmem:[#allocation10 + $0x174] sm:$0xf0]  ;;  %v5930_v48 = vor.u32 %v7376_v33, %v5927_v34 }
 0x11e   :  { %v1720_v14 = vpop.f32.mrf.mxu2  ;;  %v6014_v38 = vor.u32 %v7399_v35, %v6013_v22  ;;  %v5965_v22 = vld [vmem:[#allocation10 + $0x110] sm:$0xf]  ;;  %v7387_v35 = vld [vmem:[#allocation10 + $0x114] sm:$0xf0] }
 0x11f   :  { %v1721_v36 = vadd.f32 %v1720_v14, %v1707_v41  ;;  %v7393_v14 = vld [vmem:[#allocation10 + $0x144] sm:$0xf0]  ;;  %v7368_v41 = vld [vmem:[#allocation10 + $0x84] sm:$0xf] }
 0x120   :  { %2370 = vmatpush.bf16.msrb.mxu0 %v5846_v43  ;;  %v5866_v43 = vor.u32 %v7360_v29, %v5863_v31  ;;  %2393 = vmatpush.bf16.msrb.mxu2 %v6014_v38  ;;  %v5990_v15 = vor.u32 %v7393_v14, %v5989_v13  ;;  %v5834_v29 = vor.u32 %v7352_v42, %v5831_v21  ;;  %v5973_v31 = vld [vmem:[#allocation10 + $0x120] sm:$0xf]  ;;  %v5975_v13 = vld [vmem:[#allocation10 + $0x128] sm:$0xf0] }
 0x121   :  { %2384 = vmatpush.bf16.msrb.mxu1 %v5910_v46  ;;  %v1735_v0 = vadd.f32 %v1734_v2, %v1721_v36  ;;  %v5981_v2 = vld [vmem:[#allocation10 + $0x130] sm:$0xf]  ;;  %v5966_v36 = vor.u32 %v7387_v35, %v5965_v22  ;;  %v5957_v38 = vld [vmem:[#allocation10 + $0x100] sm:$0xf] }
 0x122   :  { %v5982_v28 = vor.u32 %v7391_v25, %v5981_v2  ;;  %v6037_v25 = vld [vmem:[#allocation10 + $0x1a0] sm:$0xf] }
 0x124   :  { %2371 = vmatpush.bf16.msrb.mxu0 %v5838_v53  ;;  %2394 = vmatpush.bf16.msrb.mxu2 %v6006_v52  ;;  %v7394_v52 = vld [vmem:[#allocation10 + $0x154] sm:$0xf] }
 0x125   :  { %2385 = vmatpush.bf16.msrb.mxu1 %v5902_v59  ;;  %v5922_v59 = vor.u32 %v7374_v11, %v5919_v51  ;;  %v6077_v11 = vld [vmem:[#allocation10 + $0x1f0] sm:$0xf]  ;;  %v7415_v51 = vld [vmem:[#allocation10 + $0x1f4] sm:$0xf0] }
 0x126   :  { %v1722_v39 = vpop.f32.mrf.mxu2 }
 0x127   :  { %v1723_v53 = vadd.f32 %v1722_v39, %v1709_v45  ;;  %v7385_v39 = vld [vmem:[#allocation10 + $0x104] sm:$0xf0] }
 0x128   :  { %2372 = vmatpush.bf16.msrb.mxu0 %v5830_v6  ;;  %v5850_v6 = vor.u32 %v7356_v56, %v5847_v58  ;;  %2395 = vmatpush.bf16.msrb.mxu2 %v5998_v4  ;;  %v7390_v4 = vld [vmem:[#allocation10 + $0x134] sm:$0xf] }
 0x129   :  { %2386 = vmatpush.bf16.msrb.mxu1 %v5894_v9  ;;  %v1762_v46 = vpop.f32.mrf.mxu1  ;;  %v1737_v3 = vadd.f32 %v1736_v57, %v1723_v53  ;;  %v5999_v53 = vld [vmem:[#allocation10 + $0x158] sm:$0xf0]  ;;  %v6069_v57 = vld [vmem:[#allocation10 + $0x1e0] sm:$0xf] }
 0x12a   :  { %v1748_v40 = vpop.f32.mrf.mxu0 }
 0x12b   :  { %2373 = vmatmul.bf16.vlgmr.msrb.gmra.mxu0 %v8207_v17  ;;  %v1749_v55 = vadd.f32 %v1748_v40, %v1735_v0  ;;  %v5958_v40 = vor.u32 %v7385_v39, %v5957_v38  ;;  %v6078_v0 = vor.u32 %v7415_v51, %v6077_v11  ;;  %v6029_v38 = vld [vmem:[#allocation10 + $0x190] sm:$0xf]  ;;  %v7403_v39 = vld [vmem:[#allocation10 + $0x194] sm:$0xf0]  ;;  %v7414_v51 = vld [vmem:[#allocation10 + $0x1f4] sm:$0xf] }
 0x12c   :  { %2421 = vmatpush.bf16.msra.mxu0 %v5890_v8  ;;  %2396 = vmatpush.bf16.msrb.mxu2 %v5990_v15 }
 0x12d   :  { %2435 = vmatpush.bf16.msra.mxu1 %v5954_v12  ;;  %v1763_v8 = vadd.f32 %v1762_v46, %v1749_v55  ;;  %v5914_v12 = vor.u32 %v7372_v60, %v5911_v61  ;;  %2407 = vmatpush.bf16.msrb.mxu3 %v6078_v0  ;;  %v7392_v55 = vld [vmem:[#allocation10 + $0x144] sm:$0xf]  ;;  %v409_v60 = vperm.slane %v8193_v30, 2 }
 0x12f   :  { %v1964_v37 = vmax.f32 %v1763_v8, 0.0  ;;  %v6053_v8 = vld [vmem:[#allocation10 + $0x1c0] sm:$0xf] }
 0x130   :  { %2422 = vmatpush.bf16.msra.mxu0 %v5882_v19  ;;  %v5842_v19 = vor.u32 %v7354_v7, %v5839_v62  ;;  %2397 = vmatpush.bf16.msrb.mxu2 %v5982_v28  ;;  %v5983_v7 = vld [vmem:[#allocation10 + $0x138] sm:$0xf0]  ;;  %v5959_v28 = vld [vmem:[#allocation10 + $0x108] sm:$0xf0] }
 0x131   :  { %2436 = vmatpush.bf16.msra.mxu1 %v5946_v24  ;;  %v1764_v10 = vpop.f32.mrf.mxu1  ;;  %v5906_v24 = vor.u32 %v7370_v16, %v5903_v18  ;;  %v1776_v46 = vpop.f32.mrf.mxu2  ;;  %v5986_v62 = vor.u32 %v7390_v4, %v5983_v7  ;;  %v7407_v16 = vld [vmem:[#allocation10 + $0x1b4] sm:$0xf0]  ;;  %v6055_v7 = vld [vmem:[#allocation10 + $0x1c8] sm:$0xf0] }
 0x132   :  { %v1750_v5 = vpop.f32.mrf.mxu0  ;;  %v1790_v50 = vpop.f32.mrf.mxu3 }
 0x133   :  { %v1751_v9 = vadd.f32 %v1750_v5, %v1737_v3  ;;  %v7411_v3 = vld [vmem:[#allocation10 + $0x1d4] sm:$0xf0] }
 0x134   :  { %2423 = vmatpush.bf16.msra.mxu0 %v5874_v27  ;;  %v5895_v27 = vld [vmem:[#allocation10 + $0x88] sm:$0xf0] }
 0x135   :  { %2437 = vmatpush.bf16.msra.mxu1 %v5938_v32  ;;  %v1765_v23 = vadd.f32 %v1764_v10, %v1751_v9  ;;  %v7389_v32 = vld [vmem:[#allocation10 + $0x124] sm:$0xf0]  ;;  %v5898_v34 = vor.u32 %v7368_v41, %v5895_v27  ;;  %v1777_v10 = vadd.f32 %v1776_v46, %v409_v60  ;;  %v7384_v27 = vld [vmem:[#allocation10 + $0x104] sm:$0xf] }
 0x136   :  { %v5974_v33 = vor.u32 %v7389_v32, %v5973_v31  ;;  %v7409_v9 = vld [vmem:[#allocation10 + $0x1c4] sm:$0xf0] }
 0x137   :  { %v1968_v20 = vmax.f32 %v1765_v23, 0.0  ;;  %v6054_v14 = vor.u32 %v7409_v9, %v6053_v8  ;;  %v6045_v23 = vld [vmem:[#allocation10 + $0x1b0] sm:$0xf] }
 0x138   :  { %2424 = vmatpush.bf16.msra.mxu0 %v5866_v43  ;;  %2398 = vmatpush.bf16.msrb.mxu2 %v5974_v33  ;;  %v7398_v43 = vld [vmem:[#allocation10 + $0x174] sm:$0xf] }
 0x139   :  { %2438 = vmatpush.bf16.msra.mxu1 %v5930_v48  ;;  %v1972_v26 = vpack.c.bf16 %v1968_v20, %v1964_v37  ;;  %v6018_v45 = vor.u32 %v7398_v43, %v6015_v44  ;;  %v6007_v48 = vld [vmem:[#allocation10 + $0x168] sm:$0xf0]  ;;  %v1778_v56 = vpop.f32.mrf.mxu2  ;;  %v5967_v37 = vld [vmem:[#allocation10 + $0x118] sm:$0xf0]  ;;  %v1791_v20 = vadd.f32 %v1790_v50, %v1777_v10  ;;  %v6030_v44 = vor.u32 %v7403_v39, %v6029_v38 }
 0x13a   :  { %v6010_v49 = vor.u32 %v7396_v47, %v6007_v48  ;;  %v1792_v5 = vpop.f32.mrf.mxu3  ;;  %v1779_v42 = vadd.f32 %v1778_v56, %v409_v60  ;;  %v6021_v48 = vld [vmem:[#allocation10 + $0x180] sm:$0xf]  ;;  %v6071_v56 = vld [vmem:[#allocation10 + $0x1e8] sm:$0xf0] }
 0x13b   :  { %2387 = vmatmul.bf16.vlgmr.msrb.gmra.mxu1 %v1972_v26 }
 0x13c   :  { %2425 = vmatpush.bf16.msra.mxu0 %v5858_v54  ;;  %2399 = vmatpush.bf16.msrb.mxu2 %v5966_v36  ;;  %v7413_v54 = vld [vmem:[#allocation10 + $0x1e4] sm:$0xf0] }
 0x13d   :  { %2439 = vmatpush.bf16.msra.mxu1 %v5922_v59  ;;  %v6070_v58 = vor.u32 %v7413_v54, %v6069_v57  ;;  %v5991_v59 = vld [vmem:[#allocation10 + $0x148] sm:$0xf0] }
 0x13e   :  { %v5994_v61 = vor.u32 %v7392_v55, %v5991_v59  ;;  %v7412_v55 = vld [vmem:[#allocation10 + $0x1e4] sm:$0xf] }
 0x13f   :  { %2408 = vmatpush.bf16.msrb.mxu3 %v6070_v58  ;;  %v6074_v59 = vor.u32 %v7412_v55, %v6071_v56 }
 0x140   :  { %2426 = vmatpush.bf16.msra.mxu0 %v5850_v6  ;;  %2400 = vmatpush.bf16.msrb.mxu2 %v5958_v40  ;;  %v6062_v6 = vor.u32 %v7411_v3, %v6061_v1  ;;  %v6063_v1 = vld [vmem:[#allocation10 + $0x1d8] sm:$0xf0] }
 0x141   :  { %2440 = vmatpush.bf16.msra.mxu1 %v5914_v12  ;;  %v7388_v12 = vld [vmem:[#allocation10 + $0x124] sm:$0xf] }
 0x142   :  { %v5978_v15 = vor.u32 %v7388_v12, %v5975_v13  ;;  %v6047_v12 = vld [vmem:[#allocation10 + $0x1b8] sm:$0xf0]  ;;  %v410_v13 = vperm.slane %v8193_v30, 3 }
 0x143   :  { %2409 = vmatpush.bf16.msrb.mxu3 %v6062_v6  ;;  %v7408_v6 = vld [vmem:[#allocation10 + $0x1c4] sm:$0xf] }
 0x144   :  { %2427 = vmatpush.bf16.msra.mxu0 %v5842_v19  ;;  %2449 = vmatpush.bf16.msra.mxu2 %v6018_v45  ;;  %v7386_v19 = vld [vmem:[#allocation10 + $0x114] sm:$0xf]  ;;  %v6058_v8 = vor.u32 %v7408_v6, %v6055_v7  ;;  %v7443_v6 = vld [vmem:[#allocation13 + $0xd4] sm:$0xf0] }
 0x145   :  { %2441 = vmatpush.bf16.msra.mxu1 %v5906_v24  ;;  %v6046_v24 = vor.u32 %v7407_v16, %v6045_v23  ;;  %v5970_v2 = vor.u32 %v7386_v19, %v5967_v37  ;;  %v6039_v23 = vld [vmem:[#allocation10 + $0x1a8] sm:$0xf0] }
 0x147   :  { %2410 = vmatpush.bf16.msrb.mxu3 %v6054_v14 }
 0x148   :  { %2428 = vmatpush.bf16.msra.mxu0 %v5834_v29  ;;  %2450 = vmatpush.bf16.msra.mxu2 %v6010_v49  ;;  %v1793_v29 = vadd.f32 %v1792_v5, %v1779_v42  ;;  %v7401_v49 = vld [vmem:[#allocation10 + $0x184] sm:$0xf0]  ;;  %v6031_v42 = vld [vmem:[#allocation10 + $0x198] sm:$0xf0] }
 0x149   :  { %2442 = vmatpush.bf16.msra.mxu1 %v5898_v34  ;;  %v1818_v18 = vpop.f32.mrf.mxu1  ;;  %v5962_v34 = vor.u32 %v7384_v27, %v5959_v28  ;;  %v6022_v11 = vor.u32 %v7401_v49, %v6021_v48  ;;  %v6023_v27 = vld [vmem:[#allocation10 + $0x188] sm:$0xf0] }
 0x14a   :  { %v1804_v63 = vpop.f32.mrf.mxu0 }
 0x14b   :  { %2429 = vmatmul.bf16.vlgmr.msra.gmra.mxu0 %v8207_v17  ;;  %v6002_v17 = vor.u32 %v7394_v52, %v5999_v53  ;;  %v1805_v31 = vadd.f32 %v1804_v63, %v1791_v20  ;;  %2411 = vmatpush.bf16.msrb.mxu3 %v6046_v24  ;;  %v6079_v52 = vld [vmem:[#allocation10 + $0x1f8] sm:$0xf0]  ;;  %v7410_v63 = vld [vmem:[#allocation10 + $0x1d4] sm:$0xf] }
 0x14c   :  { %2443 = vmatmul.bf16.vlgmr.msra.gmra.mxu1 %v1972_v26  ;;  %v7405_v26 = vld [vmem:[#allocation10 + $0x1a4] sm:$0xf0]  ;;  %v6082_v53 = vor.u32 %v7414_v51, %v6079_v52  ;;  %v6066_v4 = vor.u32 %v7410_v63, %v6063_v1  ;;  %v7402_v20 = vld [vmem:[#allocation10 + $0x194] sm:$0xf]  ;;  %v6197_v51 = vld [vmem:[#allocation13 + $0xe0] sm:$0xf] }
 0x14d   :  { %2451 = vmatpush.bf16.msra.mxu2 %v6002_v17  ;;  %v6038_v33 = vor.u32 %v7405_v26, %v6037_v25  ;;  %v1819_v22 = vadd.f32 %v1818_v18, %v1805_v31  ;;  %v7446_v52 = vld [vmem:[#allocation13 + $0xec] sm:$0xf0]  ;;  %v7440_v1 = vld [vmem:[#allocation13 + $0xc4] sm:$0xf] }
 0x14e   :  { %v7442_v63 = vld [vmem:[#allocation13 + $0xcc] sm:$0xf0] }
 0x14f   :  { %2412 = vmatpush.bf16.msrb.mxu3 %v6038_v33 }
 0x151   :  { %2452 = vmatpush.bf16.msra.mxu2 %v5994_v61  ;;  %v1832_v21 = vpop.f32.mrf.mxu2  ;;  %v1846_v32 = vpop.f32.mrf.mxu3 }
 0x152   :  { %v1806_v41 = vpop.f32.mrf.mxu0  ;;  %v1820_v36 = vpop.f32.mrf.mxu1  ;;  %v1833_v45 = vadd.f32 %v1832_v21, %v1819_v22  ;;  %v7400_v21 = vld [vmem:[#allocation10 + $0x184] sm:$0xf] }
 0x153   :  { %v1807_v35 = vadd.f32 %v1806_v41, %v1793_v29  ;;  %2413 = vmatpush.bf16.msrb.mxu3 %v6030_v44  ;;  %v6034_v41 = vor.u32 %v7402_v20, %v6031_v42  ;;  %v6026_v30 = vor.u32 %v7400_v21, %v6023_v27  ;;  %v7439_v20 = vld [vmem:[#allocation13 + $0xb4] sm:$0xf0]  ;;  %v6149_v27 = vld [vmem:[#allocation13 + $0x80] sm:$0xf] }
 0x154   :  { %v1847_v0 = vadd.f32 %v1846_v32, %v1833_v45 }
 0x155   :  { %2453 = vmatpush.bf16.msra.mxu2 %v5986_v62  ;;  %v1821_v46 = vadd.f32 %v1820_v36, %v1807_v35  ;;  %v7406_v62 = vld [vmem:[#allocation10 + $0x1b4] sm:$0xf] }
 0x156   :  { %v6050_v14 = vor.u32 %v7406_v62, %v6047_v12  ;;  %v8213_v62 = vld [vmem:[#allocation11] sm:$0x3] }
 0x157   :  { %2414 = vmatpush.bf16.msrb.mxu3 %v6022_v11 }
 0x159   :  { %2454 = vmatpush.bf16.msra.mxu2 %v5978_v15  ;;  %v1834_v40 = vpop.f32.mrf.mxu2  ;;  %v1848_v50 = vpop.f32.mrf.mxu3  ;;  %v7404_v15 = vld [vmem:[#allocation10 + $0x1a4] sm:$0xf] }
 0x15a   :  { %v1835_v47 = vadd.f32 %v1834_v40, %v1821_v46  ;;  %v6042_v16 = vor.u32 %v7404_v15, %v6039_v23  ;;  %v7436_v15 = vld [vmem:[#allocation13 + $0xa4] sm:$0xf] }
 0x15b   :  { %2463 = vmatpush.bf16.msra.mxu3 %v6082_v53  ;;  %v6198_v53 = vor.u32 %v7446_v52, %v6197_v51  ;;  %v7429_v51 = vld [vmem:[#allocation13 + $0x6c] sm:$0xf]  ;;  %v6143_v52 = vld [vmem:[#allocation13 + $0x78] sm:$0xf0] }
 0x15c   :  { %v1849_v17 = vadd.f32 %v1848_v50, %v1835_v47 }
 0x15d   :  { %2455 = vmatpush.bf16.msra.mxu2 %v5970_v2  ;;  %2692 = vmatpush.bf16.msrb.mxu0 %v6198_v53 }
 0x15f   :  { %2464 = vmatpush.bf16.msra.mxu3 %v6074_v59  ;;  %v6207_v59 = vld [vmem:[#allocation13 + $0xf8] sm:$0xf0] }
 0x161   :  { %2456 = vmatpush.bf16.msra.mxu2 %v5962_v34 }
 0x163   :  { %2465 = vmatpush.bf16.msra.mxu3 %v6066_v4  ;;  %v6183_v4 = vld [vmem:[#allocation13 + $0xd0] sm:$0xf0] }
 0x164   :  { %v6186_v7 = vor.u32 %v7440_v1, %v6183_v4  ;;  %v7427_v4 = vld [vmem:[#allocation13 + $0x54] sm:$0xf0] }
 0x167   :  { %2466 = vmatpush.bf16.msra.mxu3 %v6058_v8 }
 0x169   :  { %v1874_v5 = vpop.f32.mrf.mxu1 }
 0x16a   :  { %v1860_v43 = vpop.f32.mrf.mxu0  ;;  %v1875_v19 = vadd.f32 %v1874_v5, %v410_v13  ;;  %v6189_v5 = vld [vmem:[#allocation13 + $0xc8] sm:$0xf] }
 0x16b   :  { %v1861_v57 = vadd.f32 %v1860_v43, %v1847_v0  ;;  %2467 = vmatpush.bf16.msra.mxu3 %v6050_v14  ;;  %v7444_v0 = vld [vmem:[#allocation13 + $0xe4] sm:$0xf]  ;;  %v6190_v8 = vor.u32 %v7443_v6, %v6189_v5  ;;  %v7438_v14 = vld [vmem:[#allocation13 + $0xac] sm:$0xf0]  ;;  %v7425_v5 = vld [vmem:[#allocation13 + $0x4c] sm:$0xf] }
 0x16c   :  { %v6127_v6 = vld [vmem:[#allocation13 + $0x58] sm:$0xf0] }
 0x16d   :  { %v1965_v60 = vmax.f32 %v1861_v57, 0.0  ;;  %v6205_v57 = vld [vmem:[#allocation13 + $0xe8] sm:$0xf] }
 0x16f   :  { %2468 = vmatpush.bf16.msra.mxu3 %v6042_v16 }
 0x171   :  { %v1888_v9 = vpop.f32.mrf.mxu2  ;;  %v1902_v10 = vpop.f32.mrf.mxu3 }
 0x172   :  { %v1862_v54 = vpop.f32.mrf.mxu0  ;;  %v1876_v18 = vpop.f32.mrf.mxu1  ;;  %v1889_v24 = vadd.f32 %v1888_v9, %v1875_v19  ;;  %v7441_v9 = vld [vmem:[#allocation13 + $0xcc] sm:$0xf]  ;;  %v6167_v19 = vld [vmem:[#allocation13 + $0xb0] sm:$0xf0] }
 0x173   :  { %v1863_v58 = vadd.f32 %v1862_v54, %v1849_v17  ;;  %v1877_v2 = vadd.f32 %v1876_v18, %v410_v13  ;;  %2469 = vmatpush.bf16.msra.mxu3 %v6034_v41  ;;  %v6199_v17 = vld [vmem:[#allocation13 + $0xf0] sm:$0xf0]  ;;  %v7447_v54 = vld [vmem:[#allocation13 + $0xf4] sm:$0xf0]  ;;  %v6165_v13 = vld [vmem:[#allocation13 + $0xa0] sm:$0xf]  ;;  %v6170_v42 = vor.u32 %v7436_v15, %v6167_v19 }
 0x174   :  { %v1903_v29 = vadd.f32 %v1902_v10, %v1889_v24  ;;  %v6202_v55 = vor.u32 %v7444_v0, %v6199_v17  ;;  %v6206_v56 = vor.u32 %v7447_v54, %v6205_v57  ;;  %v6191_v10 = vld [vmem:[#allocation13 + $0xd8] sm:$0xf0]  ;;  %v6166_v18 = vor.u32 %v7438_v14, %v6165_v13  ;;  %v7437_v24 = vld [vmem:[#allocation13 + $0xac] sm:$0xf]  ;;  %v6117_v54 = vld [vmem:[#allocation13 + $0x40] sm:$0xf] }
 0x175   :  { %v1969_v61 = vmax.f32 %v1863_v58, 0.0  ;;  %v7445_v58 = vld [vmem:[#allocation13 + $0xec] sm:$0xf]  ;;  %v6194_v12 = vor.u32 %v7441_v9, %v6191_v10  ;;  %v2041_v41 = vperm.slane %v8213_v62, 0  ;;  %v6146_v17 = vor.u32 %v7429_v51, %v6143_v52  ;;  %v7422_v13 = vld [vmem:[#allocation13 + $0x2c] sm:$0xf0] }
 0x176   :  { %2706 = vmatpush.bf16.msrb.mxu1 %v6202_v55  ;;  %v7426_v55 = vld [vmem:[#allocation13 + $0x4c] sm:$0xf0]  ;;  %v2042_v10 = vperm.slane %v8213_v62, 1  ;;  %v7420_v15 = vld [vmem:[#allocation13 + $0x24] sm:$0xf] }
 0x177   :  { %v1973_v3 = vpack.c.bf16 %v1969_v61, %v1965_v60  ;;  %2470 = vmatpush.bf16.msra.mxu3 %v6026_v30  ;;  %v6210_v60 = vor.u32 %v7445_v58, %v6207_v59  ;;  %v6181_v61 = vld [vmem:[#allocation13 + $0xc0] sm:$0xf]  ;;  %v7434_v30 = vld [vmem:[#allocation13 + $0x8c] sm:$0xf0]  ;;  %v6118_v59 = vor.u32 %v7426_v55, %v6117_v54  ;;  %v6801_v62 = vld [vmem:[#allocation16 + $0x498] sm:$0xf] }
 0x179   :  { %2401 = vmatmul.bf16.vlgmr.msrb.gmra.mxu2 %v1973_v3  ;;  %v1890_v37 = vpop.f32.mrf.mxu2  ;;  %v1904_v25 = vpop.f32.mrf.mxu3 }
 0x17a   :  { %v1891_v31 = vadd.f32 %v1890_v37, %v1877_v2  ;;  %2720 = vmatpush.bf16.msrb.mxu2 %v6206_v56  ;;  %2707 = vmatpush.bf16.msrb.mxu1 %v6186_v7  ;;  %v6173_v37 = vld [vmem:[#allocation13 + $0xa8] sm:$0xf]  ;;  %v6175_v2 = vld [vmem:[#allocation13 + $0xb8] sm:$0xf0] }
 0x17b   :  { %v6174_v21 = vor.u32 %v7439_v20, %v6173_v37  ;;  %v7423_v37 = vld [vmem:[#allocation13 + $0x34] sm:$0xf0]  ;;  %v7421_v20 = vld [vmem:[#allocation13 + $0x2c] sm:$0xf] }
 0x17c   :  { %v1905_v34 = vadd.f32 %v1904_v25, %v1891_v31  ;;  %v6151_v31 = vld [vmem:[#allocation13 + $0x90] sm:$0xf0] }
 0x17e   :  { %2721 = vmatpush.bf16.msrb.mxu2 %v6190_v8  ;;  %2708 = vmatpush.bf16.msrb.mxu1 %v6170_v42  ;;  %v6130_v8 = vor.u32 %v7425_v5, %v6127_v6  ;;  %v6111_v42 = vld [vmem:[#allocation13 + $0x38] sm:$0xf0]  ;;  %v7486_v5 = vld [vmem:[#allocation16 + $0x130] sm:$0xf0] }
 0x17f   :  { %v6577_v6 = vld [vmem:[#allocation16 + $0x2d8] sm:$0xf] }
 0x182   :  { %2722 = vmatpush.bf16.msrb.mxu2 %v6174_v21 }
 0x189   :  { %2457 = vmatmul.bf16.vlgmr.msra.gmra.mxu2 %v1973_v3  ;;  %v1930_v28 = vpop.f32.mrf.mxu1  ;;  %v6182_v3 = vor.u32 %v7442_v63, %v6181_v61  ;;  %v6119_v61 = vld [vmem:[#allocation13 + $0x50] sm:$0xf0]  ;;  %v6125_v63 = vld [vmem:[#allocation13 + $0x48] sm:$0xf] }
 0x18a   :  { %v1916_v26 = vpop.f32.mrf.mxu0  ;;  %v6126_v7 = vor.u32 %v7427_v4, %v6125_v63  ;;  %v6353_v4 = vld [vmem:[#allocation16 + $0x118] sm:$0xf] }
 0x18b   :  { %v1917_v32 = vadd.f32 %v1916_v26, %v1903_v29  ;;  %2693 = vmatpush.bf16.msrb.mxu0 %v6182_v3  ;;  %v6178_v26 = vor.u32 %v7437_v24, %v6175_v2  ;;  %v7432_v29 = vld [vmem:[#allocation13 + $0x84] sm:$0xf]  ;;  %v6114_v2 = vor.u32 %v7421_v20, %v6111_v42  ;;  %v7479_v42 = vld [vmem:[#allocation16 + $0xf8] sm:$0xf0] }
 0x18c   :  { %v6325_v20 = vld [vmem:[#allocation16 + $0xe0] sm:$0xf] }
 0x18d   :  { %v1931_v36 = vadd.f32 %v1930_v28, %v1917_v32  ;;  %v6150_v28 = vor.u32 %v7434_v30, %v6149_v27  ;;  %v6157_v32 = vld [vmem:[#allocation13 + $0x88] sm:$0xf] }
 0x18f   :  { %2694 = vmatpush.bf16.msrb.mxu0 %v6166_v18 }
 0x191   :  { %v1944_v33 = vpop.f32.mrf.mxu2  ;;  %v1958_v22 = vpop.f32.mrf.mxu3 }
 0x192   :  { %v1918_v35 = vpop.f32.mrf.mxu0  ;;  %v1945_v39 = vadd.f32 %v1944_v33, %v1931_v36  ;;  %v1932_v40 = vpop.f32.mrf.mxu1  ;;  %v6154_v33 = vor.u32 %v7432_v29, %v6151_v31  ;;  %v6093_v29 = vld [vmem:[#allocation13 + $0x8] sm:$0xf]  ;;  %v7419_v31 = vld [vmem:[#allocation13 + $0x14] sm:$0xf0] }
 0x193   :  { %v1919_v38 = vadd.f32 %v1918_v35, %v1905_v34  ;;  %v7435_v34 = vld [vmem:[#allocation13 + $0x94] sm:$0xf0]  ;;  %v6159_v35 = vld [vmem:[#allocation13 + $0x98] sm:$0xf0]  ;;  %2695 = vmatpush.bf16.msrb.mxu0 %v6150_v28  ;;  %v6087_v28 = vld [vmem:[#allocation13 + $0x10] sm:$0xf0] }
 0x194   :  { %v1959_v45 = vadd.f32 %v1958_v22, %v1945_v39  ;;  %v7433_v22 = vld [vmem:[#allocation13 + $0x8c] sm:$0xf]  ;;  %v6158_v36 = vor.u32 %v7435_v34, %v6157_v32  ;;  %2709 = vmatpush.bf16.msrb.mxu1 %v6154_v33 }
 0x195   :  { %v1933_v43 = vadd.f32 %v1932_v40, %v1919_v38  ;;  %v6162_v38 = vor.u32 %v7433_v22, %v6159_v35  ;;  %v6133_v40 = vld [vmem:[#allocation13 + $0x60] sm:$0xf]  ;;  %v6094_v22 = vor.u32 %v7419_v31, %v6093_v29  ;;  %v7417_v35 = vld [vmem:[#allocation13 + $0xc] sm:$0xf] }
 0x196   :  { %v1966_v49 = vmax.f32 %v1959_v45, 0.0  ;;  %2723 = vmatpush.bf16.msrb.mxu2 %v6158_v36  ;;  %v6095_v36 = vld [vmem:[#allocation13 + $0x18] sm:$0xf0] }
 0x199   :  { %v1946_v44 = vpop.f32.mrf.mxu2  ;;  %v1960_v47 = vpop.f32.mrf.mxu3 }
 0x19a   :  { %v1947_v46 = vadd.f32 %v1946_v44, %v1933_v43  ;;  %v7430_v43 = vld [vmem:[#allocation13 + $0x6c] sm:$0xf0]  ;;  %v7428_v44 = vld [vmem:[#allocation13 + $0x64] sm:$0xf] }
 0x19b   :  { %v6134_v45 = vor.u32 %v7430_v43, %v6133_v40 }
 0x19c   :  { %v1961_v48 = vadd.f32 %v1960_v47, %v1947_v46  ;;  %v6135_v46 = vld [vmem:[#allocation13 + $0x70] sm:$0xf0]  ;;  %v6141_v47 = vld [vmem:[#allocation13 + $0x68] sm:$0xf] }
 0x19d   :  { %2696 = vmatpush.bf16.msrb.mxu0 %v6134_v45  ;;  %v6409_v45 = vld [vmem:[#allocation16 + $0x188] sm:$0xf] }
 0x19e   :  { %v1970_v50 = vmax.f32 %v1961_v48, 0.0  ;;  %v7431_v48 = vld [vmem:[#allocation13 + $0x74] sm:$0xf0] }
 0x1a0   :  { %v1974_v11 = vpack.c.bf16 %v1970_v50, %v1966_v49  ;;  %v6138_v50 = vor.u32 %v7428_v44, %v6135_v46  ;;  %v7500_v46 = vld [vmem:[#allocation16 + $0x1a0] sm:$0xf0] }
 0x1a1   :  { %2697 = vmatpush.bf16.msrb.mxu0 %v6118_v59  ;;  %v7668_v59 = vld [vmem:[#allocation16 + $0x6e0] sm:$0xf0] }
 0x1a2   :  { %2415 = vmatmul.bf16.vlgmr.msrb.gmra.mxu3 %v1974_v11  ;;  %2710 = vmatpush.bf16.msrb.mxu1 %v6138_v50  ;;  %v6381_v50 = vld [vmem:[#allocation16 + $0x150] sm:$0xf] }
 0x1a3   :  { %2734 = vmatpush.bf16.msrb.mxu3 %v6210_v60  ;;  %v7424_v60 = vld [vmem:[#allocation13 + $0x44] sm:$0xf] }
 0x1a4   :  { %v6122_v3 = vor.u32 %v7424_v60, %v6119_v61 }
 0x1a6   :  { %2711 = vmatpush.bf16.msrb.mxu1 %v6122_v3 }
 0x1a7   :  { %2735 = vmatpush.bf16.msrb.mxu3 %v6194_v12  ;;  %v6101_v12 = vld [vmem:[#allocation13 + $0x20] sm:$0xf] }
 0x1a8   :  { %v2374_v23 = vpop.f32.mrf.mxu0  ;;  %v6102_v14 = vor.u32 %v7422_v13, %v6101_v12  ;;  %v7605_v12 = vld [vmem:[#allocation16 + $0x4e8] sm:$0xf0] }
 0x1a9   :  { %v2375_v39 = vadd.f32 %v2374_v23, %v2041_v41  ;;  %v6103_v23 = vld [vmem:[#allocation13 + $0x30] sm:$0xf0] }
 0x1aa   :  { %v6106_v19 = vor.u32 %v7420_v15, %v6103_v23  ;;  %2698 = vmatpush.bf16.msrb.mxu0 %v6102_v14  ;;  %v7053_v23 = vld [vmem:[#allocation16 + $0x690] sm:$0xf] }
 0x1ab   :  { %2736 = vmatpush.bf16.msrb.mxu3 %v6178_v26  ;;  %v7418_v26 = vld [vmem:[#allocation13 + $0xc] sm:$0xf0] }
 0x1ac   :  { %2712 = vmatpush.bf16.msrb.mxu1 %v6106_v19  ;;  %v6354_v19 = vor.u32 %v7486_v5, %v6353_v4  ;;  %v2483_v5 = vld [vmem:[#allocation5] sm:$0xff] }
 0x1af   :  { %2737 = vmatpush.bf16.msrb.mxu3 %v6162_v38 }
 0x1b0   :  { %v2376_v0 = vpop.f32.mrf.mxu0 }
 0x1b1   :  { %v2377_v9 = vadd.f32 %v2376_v0, %v2041_v41  ;;  %v7416_v41 = vld [vmem:[#allocation13 + $0x4] sm:$0xf]  ;;  %v6605_v0 = vld [vmem:[#allocation16 + $0x310] sm:$0xf] }
 0x1b2   :  { %2471 = vmatmul.bf16.vlgmr.msra.gmra.mxu3 %v1974_v11  ;;  %v6142_v11 = vor.u32 %v7431_v48, %v6141_v47  ;;  %v6090_v34 = vor.u32 %v7416_v41, %v6087_v28  ;;  %v6633_v47 = vld [vmem:[#allocation16 + $0x348] sm:$0xf]  ;;  %v6410_v48 = vor.u32 %v7500_v46, %v6409_v45  ;;  %v7654_v41 = vld [vmem:[#allocation16 + $0x670] sm:$0xf0]  ;;  %v7528_v45 = vld [vmem:[#allocation16 + $0x280] sm:$0xf0] }
 0x1b3   :  { %2738 = vmatpush.bf16.msrb.mxu3 %v6146_v17  ;;  %v6857_v17 = vld [vmem:[#allocation16 + $0x508] sm:$0xf] }
 0x1b4   :  { %2724 = vmatpush.bf16.msrb.mxu2 %v6142_v11  ;;  %2713 = vmatpush.bf16.msrb.mxu1 %v6090_v34  ;;  %v7493_v11 = vld [vmem:[#allocation16 + $0x168] sm:$0xf0]  ;;  %v6773_v34 = vld [vmem:[#allocation16 + $0x460] sm:$0xf] }
 0x1b5   :  { %v6382_v55 = vor.u32 %v7493_v11, %v6381_v50  ;;  %v7584_v11 = vld [vmem:[#allocation16 + $0x440] sm:$0xf0] }
 0x1b7   :  { %2739 = vmatpush.bf16.msrb.mxu3 %v6130_v8  ;;  %v7542_v8 = vld [vmem:[#allocation16 + $0x2f0] sm:$0xf0] }
 0x1b8   :  { %v2388_v16 = vpop.f32.mrf.mxu1  ;;  %2725 = vmatpush.bf16.msrb.mxu2 %v6126_v7 }
 0x1b9   :  { %v2389_v49 = vadd.f32 %v2388_v16, %v2375_v39  ;;  %v6109_v16 = vld [vmem:[#allocation13 + $0x28] sm:$0xf]  ;;  %v6098_v39 = vor.u32 %v7417_v35, %v6095_v36 }
 0x1ba   :  { %v6110_v24 = vor.u32 %v7423_v37, %v6109_v16  ;;  %v7661_v16 = vld [vmem:[#allocation16 + $0x6a8] sm:$0xf0] }
 0x1bb   :  { %2740 = vmatpush.bf16.msrb.mxu3 %v6114_v2  ;;  %v7054_v37 = vor.u32 %v7661_v16, %v7053_v23  ;;  %v6549_v2 = vld [vmem:[#allocation16 + $0x2a0] sm:$0xf]  ;;  %v6689_v23 = vld [vmem:[#allocation16 + $0x3b8] sm:$0xf] }
 0x1bc   :  { %2726 = vmatpush.bf16.msrb.mxu2 %v6110_v24  ;;  %v6578_v24 = vor.u32 %v7542_v8, %v6577_v6  ;;  %v7458_v8 = vld [vmem:[#allocation16 + $0x50] sm:$0xf0] }
 0x1bf   :  { %2741 = vmatpush.bf16.msrb.mxu3 %v6098_v39  ;;  %v7472_v39 = vld [vmem:[#allocation16 + $0xc0] sm:$0xf0] }
 0x1c0   :  { %v2390_v53 = vpop.f32.mrf.mxu1  ;;  %2727 = vmatpush.bf16.msrb.mxu2 %v6094_v22  ;;  %v7591_v22 = vld [vmem:[#allocation16 + $0x478] sm:$0xf0] }
 0x1c1   :  { %v2391_v18 = vadd.f32 %v2390_v53, %v2377_v9  ;;  %v7549_v53 = vld [vmem:[#allocation16 + $0x328] sm:$0xf0]  ;;  %v6829_v9 = vld [vmem:[#allocation16 + $0x4d0] sm:$0xf] }
 0x1c2   :  { %v6606_v61 = vor.u32 %v7549_v53, %v6605_v0  ;;  %v6830_v15 = vor.u32 %v7605_v12, %v6829_v9  ;;  %v6465_v9 = vld [vmem:[#allocation16 + $0x1f8] sm:$0xf]  ;;  %v7514_v12 = vld [vmem:[#allocation16 + $0x210] sm:$0xf0] }
 0x1c8   :  { %v2430_v21 = vpop.f32.mrf.mxu0 }
 0x1c9   :  { %v2444_v32 = vpop.f32.mrf.mxu1  ;;  %v2431_v43 = vadd.f32 %v2430_v21, %v2042_v10 }
 0x1cb   :  { %v2445_v44 = vadd.f32 %v2444_v32, %v2431_v43  ;;  %v6326_v32 = vor.u32 %v7479_v42, %v6325_v20  ;;  %v7647_v43 = vld [vmem:[#allocation16 + $0x638] sm:$0xf0]  ;;  %v7626_v20 = vld [vmem:[#allocation16 + $0x590] sm:$0xf0] }
 0x1d1   :  { %v2446_v7 = vpop.f32.mrf.mxu1 }
 0x1fc   :  { %v2402_v25 = vpop.f32.mrf.mxu2 }
 0x1fd   :  { %v2403_v57 = vadd.f32 %v2402_v25, %v2389_v49  ;;  %v6085_v25 = vld [vmem:[#allocation13] sm:$0xf]  ;;  %v7556_v49 = vld [vmem:[#allocation16 + $0x360] sm:$0xf0] }
 0x1fe   :  { %v6086_v30 = vor.u32 %v7418_v26, %v6085_v25  ;;  %v6634_v52 = vor.u32 %v7556_v49, %v6633_v47  ;;  %v7535_v25 = vld [vmem:[#allocation16 + $0x2b8] sm:$0xf0]  ;;  %v7025_v26 = vld [vmem:[#allocation16 + $0x658] sm:$0xf]  ;;  %v6774_v47 = vor.u32 %v7591_v22, %v6773_v34  ;;  %v6745_v49 = vld [vmem:[#allocation16 + $0x428] sm:$0xf] }
 0x1ff   :  { %v7026_v29 = vor.u32 %v7654_v41, %v7025_v26  ;;  %v6550_v36 = vor.u32 %v7535_v25, %v6549_v2  ;;  %v7451_v25 = vld [vmem:[#allocation16 + $0x18] sm:$0xf0]  ;;  %v7497_v26 = vld [vmem:[#allocation16 + $0x18c] sm:$0xf]  ;;  %v6411_v41 = vld [vmem:[#allocation16 + $0x1a4] sm:$0xf0] }
 0x200   :  { %2699 = vmatpush.bf16.msrb.mxu0 %v6086_v30  ;;  %4198 = vmatpush.bf16.msra.mxu1 %v6634_v52  ;;  %v7640_v52 = vld [vmem:[#allocation16 + $0x600] sm:$0xf0]  ;;  %v7563_v34 = vld [vmem:[#allocation16 + $0x398] sm:$0xf0]  ;;  %v6885_v22 = vld [vmem:[#allocation16 + $0x540] sm:$0xf] }
 0x204   :  { %v2404_v56 = vpop.f32.mrf.mxu2  ;;  %4184 = vmatpush.bf16.msra.mxu0 %v6410_v48  ;;  %4199 = vmatpush.bf16.msra.mxu1 %v6606_v61  ;;  %v7577_v61 = vld [vmem:[#allocation16 + $0x408] sm:$0xf0] }
 0x205   :  { %v2405_v27 = vadd.f32 %v2404_v56, %v2391_v18  ;;  %v7612_v56 = vld [vmem:[#allocation16 + $0x520] sm:$0xf0] }
 0x206   :  { %v6858_v63 = vor.u32 %v7612_v56, %v6857_v17  ;;  %v6269_v17 = vld [vmem:[#allocation16 + $0x70] sm:$0xf]  ;;  %v6746_v56 = vor.u32 %v7584_v11, %v6745_v49  ;;  %v7546_v49 = vld [vmem:[#allocation16 + $0x314] sm:$0xf] }
 0x208   :  { %4212 = vmatpush.bf16.msra.mxu2 %v6858_v63  ;;  %4185 = vmatpush.bf16.msra.mxu0 %v6382_v55  ;;  %v7521_v55 = vld [vmem:[#allocation16 + $0x248] sm:$0xf0]  ;;  %v6941_v63 = vld [vmem:[#allocation16 + $0x5b0] sm:$0xf] }
 0x209   :  { %4200 = vmatpush.bf16.msra.mxu1 %v6578_v24  ;;  %v6213_v24 = vld [vmem:[#allocation16] sm:$0xf] }
 0x20c   :  { %v2458_v40 = vpop.f32.mrf.mxu2  ;;  %4213 = vmatpush.bf16.msra.mxu2 %v6830_v15  ;;  %4186 = vmatpush.bf16.msra.mxu0 %v6354_v19  ;;  %v7570_v19 = vld [vmem:[#allocation16 + $0x3d0] sm:$0xf0] }
 0x20d   :  { %v2459_v51 = vadd.f32 %v2458_v40, %v2445_v44  ;;  %v6997_v40 = vld [vmem:[#allocation16 + $0x620] sm:$0xf]  ;;  %v6521_v44 = vld [vmem:[#allocation16 + $0x268] sm:$0xf]  ;;  %4201 = vmatpush.bf16.msra.mxu1 %v6550_v36  ;;  %v7609_v36 = vld [vmem:[#allocation16 + $0x50c] sm:$0xf] }
 0x20e   :  { %v6998_v48 = vor.u32 %v7647_v43, %v6997_v40  ;;  %v6522_v53 = vor.u32 %v7528_v45, %v6521_v44  ;;  %v6214_v40 = vor.u32 %v7451_v25, %v6213_v24  ;;  %v6859_v44 = vld [vmem:[#allocation16 + $0x524] sm:$0xf0]  ;;  %v7665_v45 = vld [vmem:[#allocation16 + $0x6cc] sm:$0xf]  ;;  %v7588_v25 = vld [vmem:[#allocation16 + $0x464] sm:$0xf] }
 0x20f   :  { %v6523_v24 = vld [vmem:[#allocation16 + $0x284] sm:$0xf0] }
 0x210   :  { %4187 = vmatpush.bf16.msra.mxu0 %v6326_v32  ;;  %v6635_v32 = vld [vmem:[#allocation16 + $0x364] sm:$0xf0] }
 0x211   :  { %4202 = vmatpush.bf16.msra.mxu1 %v6522_v53  ;;  %v7602_v53 = vld [vmem:[#allocation16 + $0x4d4] sm:$0xf] }
 0x214   :  { %v2460_v18 = vpop.f32.mrf.mxu2 }
 0x225   :  { %v2416_v58 = vpop.f32.mrf.mxu3 }
 0x226   :  { %v8216_v1 = vadd.f32 %v2416_v58, %v2403_v57  ;;  %v2432_v57 = vpop.f32.mrf.mxu0  ;;  %v7081_v58 = vld [vmem:[#allocation16 + $0x6c8] sm:$0xf] }
 0x227   :  { %v7082_v3 = vor.u32 %v7668_v59, %v7081_v58  ;;  %v2433_v13 = vadd.f32 %v2432_v57, %v2042_v10  ;;  %v7598_v10 = vld [vmem:[#allocation16 + $0x4b0] sm:$0xf0]  ;;  %v7465_v57 = vld [vmem:[#allocation16 + $0x88] sm:$0xf0]  ;;  %v6717_v59 = vld [vmem:[#allocation16 + $0x3f0] sm:$0xf] }
 0x228   :  { %4858 = vst [vmem:[#allocation18] sm:$0xff] %v8216_v1  ;;  %v6802_v28 = vor.u32 %v7598_v10, %v6801_v62  ;;  %v6437_v62 = vld [vmem:[#allocation16 + $0x1c0] sm:$0xf]  ;;  %v7507_v10 = vld [vmem:[#allocation16 + $0x1d8] sm:$0xf0] }
 0x229   :  { %4226 = vmatpush.bf16.msra.mxu3 %v7082_v3  ;;  %v2447_v21 = vadd.f32 %v2446_v7, %v2433_v13  ;;  %v7633_v3 = vld [vmem:[#allocation16 + $0x5c8] sm:$0xf0]  ;;  %v6241_v7 = vld [vmem:[#allocation16 + $0x38] sm:$0xf]  ;;  %v6438_v43 = vor.u32 %v7507_v10, %v6437_v62  ;;  %v6775_v62 = vld [vmem:[#allocation16 + $0x47c] sm:$0xf0] }
 0x22a   :  { %4214 = vmatpush.bf16.msra.mxu2 %v6802_v28  ;;  %v2484_v13 = vld [vmem:[#allocation5 + $0x8] sm:$0xff]  ;;  %v6942_v15 = vor.u32 %v7633_v3, %v6941_v63  ;;  %v7644_v10 = vld [vmem:[#allocation16 + $0x624] sm:$0xf] }
 0x22d   :  { %v2418_v33 = vpop.f32.mrf.mxu3  ;;  %4227 = vmatpush.bf16.msra.mxu3 %v7054_v37  ;;  %v6913_v37 = vld [vmem:[#allocation16 + $0x578] sm:$0xf] }
 0x22e   :  { %v8220_v38 = vadd.f32 %v2418_v33, %v2405_v27  ;;  %v2461_v27 = vadd.f32 %v2460_v18, %v2447_v21  ;;  %v6297_v33 = vld [vmem:[#allocation16 + $0xa8] sm:$0xf]  ;;  %4215 = vmatpush.bf16.msra.mxu2 %v6774_v47  ;;  %v6242_v18 = vor.u32 %v7458_v8, %v6241_v7  ;;  %v6466_v21 = vor.u32 %v7514_v12, %v6465_v9  ;;  %v6327_v7 = vld [vmem:[#allocation16 + $0xfc] sm:$0xf0]  ;;  %v7532_v8 = vld [vmem:[#allocation16 + $0x2a4] sm:$0xf] }
 0x22f   :  { %v6298_v50 = vor.u32 %v7472_v39, %v6297_v33  ;;  %v6914_v28 = vor.u32 %v7626_v20, %v6913_v37  ;;  %v6661_v33 = vld [vmem:[#allocation16 + $0x380] sm:$0xf]  ;;  %v6414_v47 = vor.u32 %v7497_v26, %v6411_v41  ;;  %v7469_v37 = vld [vmem:[#allocation16 + $0xac] sm:$0xf]  ;;  %v6299_v20 = vld [vmem:[#allocation16 + $0xc4] sm:$0xf0]  ;;  %v6778_v26 = vor.u32 %v7588_v25, %v6775_v62 }
 0x230   :  { %4860 = vst [vmem:[#allocation18 + $0x10] sm:$0xff] %v8220_v38  ;;  %v6662_v11 = vor.u32 %v7563_v34, %v6661_v33  ;;  %v6551_v9 = vld [vmem:[#allocation16 + $0x2bc] sm:$0xf0]  ;;  %v7581_v34 = vld [vmem:[#allocation16 + $0x42c] sm:$0xf] }
 0x231   :  { %4228 = vmatpush.bf16.msra.mxu3 %v7026_v29  ;;  %4188 = vmatpush.bf16.msra.mxu0 %v6298_v50  ;;  %v6607_v50 = vld [vmem:[#allocation16 + $0x32c] sm:$0xf0]  ;;  %v6999_v41 = vld [vmem:[#allocation16 + $0x63c] sm:$0xf0]  ;;  %v7557_v25 = vld [vmem:[#allocation16 + $0x368] sm:$0xf0] }
 0x232   :  { %4216 = vmatpush.bf16.msra.mxu2 %v6746_v56  ;;  %v6610_v56 = vor.u32 %v7546_v49, %v6607_v50  ;;  %v7630_v49 = vld [vmem:[#allocation16 + $0x5b4] sm:$0xf] }
 0x235   :  { %v2472_v54 = vpop.f32.mrf.mxu3  ;;  %4229 = vmatpush.bf16.msra.mxu3 %v6998_v48 }
 0x236   :  { %v2473_v60 = vadd.f32 %v2472_v54, %v2459_v51  ;;  %v6969_v51 = vld [vmem:[#allocation16 + $0x5e8] sm:$0xf]  ;;  %v6493_v54 = vld [vmem:[#allocation16 + $0x230] sm:$0xf] }
 0x237   :  { %v6970_v58 = vor.u32 %v7640_v52, %v6969_v51  ;;  %v6494_v6 = vor.u32 %v7521_v55, %v6493_v54  ;;  %v6862_v52 = vor.u32 %v7609_v36, %v6859_v44  ;;  %v7055_v54 = vld [vmem:[#allocation16 + $0x6ac] sm:$0xf0]  ;;  %v7637_v36 = vld [vmem:[#allocation16 + $0x5ec] sm:$0xf]  ;;  %v6243_v44 = vld [vmem:[#allocation16 + $0x54] sm:$0xf0] }
 0x238   :  { %v2477_v14 = vmul.f32 0.5, %v2473_v60  ;;  %4859 = vst [vmem:[#allocation18 + $0x8] sm:$0xff] %v2473_v60  ;;  %v6270_v60 = vor.u32 %v7465_v57, %v6269_v17  ;;  %v6831_v17 = vld [vmem:[#allocation16 + $0x4ec] sm:$0xf0]  ;;  %v7658_v57 = vld [vmem:[#allocation16 + $0x694] sm:$0xf] }
 0x239   :  { %4230 = vmatpush.bf16.msra.mxu3 %v6970_v58  ;;  %4203 = vmatpush.bf16.msra.mxu1 %v6494_v6  ;;  %v7483_v58 = vld [vmem:[#allocation16 + $0x11c] sm:$0xf]  ;;  %v6834_v63 = vor.u32 %v7602_v53, %v6831_v17  ;;  %v7058_v3 = vor.u32 %v7658_v57, %v7055_v54  ;;  %v7476_v6 = vld [vmem:[#allocation16 + $0xe4] sm:$0xf]  ;;  %v6439_v57 = vld [vmem:[#allocation16 + $0x1dc] sm:$0xf0] }
 0x23a   :  { %v2479_v30 = vmul.f32 1.442695, %v2477_v14  ;;  %v6718_v14 = vor.u32 %v7577_v61, %v6717_v59  ;;  %4189 = vmatpush.bf16.msra.mxu0 %v6270_v60  ;;  %v6355_v59 = vld [vmem:[#allocation16 + $0x134] sm:$0xf0]  ;;  %v7539_v60 = vld [vmem:[#allocation16 + $0x2dc] sm:$0xf]  ;;  %v6330_v12 = vor.u32 %v7476_v6, %v6327_v7 }
 0x23b   :  { %v6579_v61 = vld [vmem:[#allocation16 + $0x2f4] sm:$0xf0]  ;;  %v7504_v53 = vld [vmem:[#allocation16 + $0x1c4] sm:$0xf]  ;;  %v6887_v6 = vld [vmem:[#allocation16 + $0x55c] sm:$0xf0] }
 0x23c   :  { %7689 = vpow2.f32 %v2479_v30  ;;  %4217 = vmatpush.bf16.msra.mxu2 %v6718_v14  ;;  %v6690_v30 = vor.u32 %v7570_v19, %v6689_v23  ;;  %v7595_v14 = vld [vmem:[#allocation16 + $0x49c] sm:$0xf]  ;;  %v6442_v54 = vor.u32 %v7504_v53, %v6439_v57 }
 0x23d   :  { %v2474_v31 = vpop.f32.mrf.mxu3  ;;  %4231 = vmatpush.bf16.msra.mxu3 %v6942_v15  ;;  %4204 = vmatpush.bf16.msra.mxu1 %v6466_v21  ;;  %v6803_v15 = vld [vmem:[#allocation16 + $0x4b4] sm:$0xf0]  ;;  %v7651_v23 = vld [vmem:[#allocation16 + $0x65c] sm:$0xf]  ;;  %v7525_v21 = vld [vmem:[#allocation16 + $0x26c] sm:$0xf] }
 0x23e   :  { %v2475_v35 = vadd.f32 %v2474_v31, %v2461_v27  ;;  %v7553_v27 = vld [vmem:[#allocation16 + $0x34c] sm:$0xf]  ;;  %4190 = vmatpush.bf16.msra.mxu0 %v6242_v18  ;;  %v7027_v18 = vld [vmem:[#allocation16 + $0x674] sm:$0xf0] }
 0x23f   :  { %v6638_v48 = vor.u32 %v7553_v27, %v6635_v32  ;;  %v7030_v19 = vor.u32 %v7651_v23, %v7027_v18  ;;  %v7002_v27 = vor.u32 %v7644_v10, %v6999_v41  ;;  %v6495_v32 = vld [vmem:[#allocation16 + $0x24c] sm:$0xf0] }
 0x240   :  { %v2478_v46 = vmul.f32 0.5, %v2475_v35  ;;  %4861 = vst [vmem:[#allocation18 + $0x18] sm:$0xff] %v2475_v35  ;;  %v7619_v35 = vld [vmem:[#allocation16 + $0x558] sm:$0xf0]  ;;  %4218 = vmatpush.bf16.msra.mxu2 %v6690_v30  ;;  %v7462_v30 = vld [vmem:[#allocation16 + $0x74] sm:$0xf] }
 0x241   :  { %4232 = vmatpush.bf16.msra.mxu3 %v6914_v28  ;;  %v6886_v51 = vor.u32 %v7619_v35, %v6885_v22  ;;  %4205 = vmatpush.bf16.msra.mxu1 %v6438_v43  ;;  %v6271_v28 = vld [vmem:[#allocation16 + $0x8c] sm:$0xf0]  ;;  %v6747_v22 = vld [vmem:[#allocation16 + $0x444] sm:$0xf0]  ;;  %v7455_v43 = vld [vmem:[#allocation16 + $0x3c] sm:$0xf] }
 0x242   :  { %v2481_v0 = vmul.f32 1.442695, %v2478_v46  ;;  %v7690_v4 = vpop.eup %7689  ;;  %v7083_v46 = vld [vmem:[#allocation16 + $0x6e4] sm:$0xf0]  ;;  %4191 = vmatpush.bf16.msra.mxu0 %v6214_v40  ;;  %v6750_v35 = vor.u32 %v7581_v34, %v6747_v22  ;;  %v6613_v22 = vld [vmem:[#allocation16 + $0x318] sm:$0xf] }
 0x243   :  { %v2485_v16 = vmul.f32 %v7690_v4, %v2483_v5  ;;  %v6358_v4 = vor.u32 %v7483_v58, %v6355_v59  ;;  %v6582_v5 = vor.u32 %v7539_v60, %v6579_v61  ;;  %v7623_v58 = vld [vmem:[#allocation16 + $0x57c] sm:$0xf]  ;;  %v6915_v59 = vld [vmem:[#allocation16 + $0x594] sm:$0xf0] }
 0x244   :  { %7691 = vpow2.f32 %v2481_v0  ;;  %v7086_v0 = vor.u32 %v7665_v45, %v7083_v46  ;;  %4219 = vmatpush.bf16.msra.mxu2 %v6662_v11  ;;  %v7511_v45 = vld [vmem:[#allocation16 + $0x1fc] sm:$0xf]  ;;  %v6246_v46 = vor.u32 %v7455_v43, %v6243_v44  ;;  %v6943_v11 = vld [vmem:[#allocation16 + $0x5cc] sm:$0xf0]  ;;  %v6918_v61 = vor.u32 %v7623_v58, %v6915_v59  ;;  %v6837_v58 = vld [vmem:[#allocation16 + $0x4d8] sm:$0xf] }
 0x245   :  { %v2487_v29 = vadd.f32 %v2485_v16, %v8216_v1  ;;  %v7490_v1 = vld [vmem:[#allocation16 + $0x154] sm:$0xf]  ;;  %4233 = vmatpush.bf16.msra.mxu3 %v6886_v51  ;;  %v6806_v16 = vor.u32 %v7595_v14, %v6803_v15  ;;  %v6946_v51 = vor.u32 %v7630_v49, %v6943_v11  ;;  %v7669_v49 = vld [vmem:[#allocation16 + $0x6e8] sm:$0xf0]  ;;  %v7487_v11 = vld [vmem:[#allocation16 + $0x138] sm:$0xf0] }
 0x246   :  { %v7606_v59 = vld [vmem:[#allocation16 + $0x4f0] sm:$0xf0] }
 0x24a   :  { %v7692_v42 = vpop.eup %7691 }
 0x24b   :  { %v2486_v2 = vmul.f32 %v7692_v42, %v2484_v13  ;;  %v6554_v13 = vor.u32 %v7532_v8, %v6551_v9  ;;  %v6302_v42 = vor.u32 %v7469_v37, %v6299_v20  ;;  %v2522_v8 = vld [vmem:[#allocation14] sm:$0xf]  ;;  %v6417_v20 = vld [vmem:[#allocation16 + $0x190] sm:$0xf] }
 0x24c   :  { %v2525_v14 = vperm.slane %v2522_v8, 1  ;;  %v2526_v62 = vperm.slane %v2522_v8, 2  ;;  %v2527_v10 = vperm.slane %v2522_v8, 3 }
 0x24d   :  { %v2488_v31 = vadd.f32 %v2486_v2, %v8220_v38  ;;  %v6383_v38 = vld [vmem:[#allocation16 + $0x16c] sm:$0xf0]  ;;  %v6526_v2 = vor.u32 %v7525_v21, %v6523_v24  ;;  %v7501_v24 = vld [vmem:[#allocation16 + $0x1a8] sm:$0xf0] }
 0x24e   :  { %v6386_v55 = vor.u32 %v7490_v1, %v6383_v38  ;;  %v7574_v1 = vld [vmem:[#allocation16 + $0x3f4] sm:$0xf]  ;;  %v6719_v38 = vld [vmem:[#allocation16 + $0x40c] sm:$0xf0] }
 0x24f   :  { %v2489_v39 = vpack.c.bf16 %v2488_v31, %v2487_v29  ;;  %v7518_v29 = vld [vmem:[#allocation16 + $0x234] sm:$0xf]  ;;  %v6274_v31 = vor.u32 %v7462_v30, %v6271_v28  ;;  %v6722_v50 = vor.u32 %v7574_v1, %v6719_v38  ;;  %v6418_v28 = vor.u32 %v7501_v24, %v6417_v20  ;;  %v6529_v20 = vld [vmem:[#allocation16 + $0x270] sm:$0xf] }
 0x250   :  { %v6498_v33 = vor.u32 %v7518_v29, %v6495_v32  ;;  %v7494_v32 = vld [vmem:[#allocation16 + $0x170] sm:$0xf0] }
 0x251   :  { %2700 = vmatmul.bf16.vlgmr.msrb.gmra.mxu0 %v2489_v39  ;;  %2714 = vmatmul.bf16.vlgmr.msrb.gmra.mxu1 %v2489_v39 }
 0x252   :  { %2728 = vmatmul.bf16.vlgmr.msrb.gmra.mxu2 %v2489_v39  ;;  %2742 = vmatmul.bf16.vlgmr.msrb.gmra.mxu3 %v2489_v39  ;;  %v6971_v39 = vld [vmem:[#allocation16 + $0x604] sm:$0xf0] }
 0x253   :  { %4240 = vmatpush.bf16.msrb.mxu0 %v6414_v47  ;;  %4254 = vmatpush.bf16.msrb.mxu1 %v6638_v48  ;;  %v6974_v40 = vor.u32 %v7637_v36, %v6971_v39  ;;  %v6467_v47 = vld [vmem:[#allocation16 + $0x214] sm:$0xf0] }
 0x254   :  { %4268 = vmatpush.bf16.msrb.mxu2 %v6862_v52  ;;  %4282 = vmatpush.bf16.msrb.mxu3 %v7086_v0  ;;  %v6470_v48 = vor.u32 %v7511_v45, %v6467_v47  ;;  %v7448_v52 = vld [vmem:[#allocation16 + $0x4] sm:$0xf]  ;;  %v6215_v0 = vld [vmem:[#allocation16 + $0x1c] sm:$0xf0]  ;;  %v6865_v45 = vld [vmem:[#allocation16 + $0x510] sm:$0xf] }
 0x255   :  { %v6218_v17 = vor.u32 %v7448_v52, %v6215_v0  ;;  %v7089_v47 = vld [vmem:[#allocation16 + $0x6d0] sm:$0xf]  ;;  %v7543_v52 = vld [vmem:[#allocation16 + $0x2f8] sm:$0xf0] }
 0x257   :  { %4241 = vmatpush.bf16.msrb.mxu0 %v6386_v55  ;;  %4255 = vmatpush.bf16.msrb.mxu1 %v6610_v56  ;;  %v7567_v55 = vld [vmem:[#allocation16 + $0x3bc] sm:$0xf]  ;;  %v6691_v56 = vld [vmem:[#allocation16 + $0x3d4] sm:$0xf0] }
 0x258   :  { %4269 = vmatpush.bf16.msrb.mxu2 %v6834_v63  ;;  %4283 = vmatpush.bf16.msrb.mxu3 %v7058_v3  ;;  %v6694_v60 = vor.u32 %v7567_v55, %v6691_v56  ;;  %v7560_v63 = vld [vmem:[#allocation16 + $0x384] sm:$0xf]  ;;  %v6663_v3 = vld [vmem:[#allocation16 + $0x39c] sm:$0xf0]  ;;  %v7090_v55 = vor.u32 %v7669_v49, %v7089_v47  ;;  %v7515_v47 = vld [vmem:[#allocation16 + $0x218] sm:$0xf0] }
 0x259   :  { %v7578_v49 = vld [vmem:[#allocation16 + $0x410] sm:$0xf0] }
 0x25b   :  { %4242 = vmatpush.bf16.msrb.mxu0 %v6358_v4  ;;  %4256 = vmatpush.bf16.msrb.mxu1 %v6582_v5  ;;  %v6666_v4 = vor.u32 %v7560_v63, %v6663_v3  ;;  %v7616_v5 = vld [vmem:[#allocation16 + $0x544] sm:$0xf]  ;;  %v7061_v3 = vld [vmem:[#allocation16 + $0x698] sm:$0xf] }
 0x25c   :  { %4270 = vmatpush.bf16.msrb.mxu2 %v6806_v16  ;;  %4284 = vmatpush.bf16.msrb.mxu3 %v7030_v19  ;;  %v6890_v7 = vor.u32 %v7616_v5, %v6887_v6  ;;  %v6333_v5 = vld [vmem:[#allocation16 + $0xe8] sm:$0xf]  ;;  %v7480_v6 = vld [vmem:[#allocation16 + $0x100] sm:$0xf0] }
 0x25f   :  { %4243 = vmatpush.bf16.msrb.mxu0 %v6330_v12  ;;  %4257 = vmatpush.bf16.msrb.mxu1 %v6554_v13  ;;  %v2524_v13 = vperm.slane %v2522_v8, 0  ;;  %v7536_v8 = vld [vmem:[#allocation16 + $0x2c0] sm:$0xf0] }
 0x260   :  { %4271 = vmatpush.bf16.msrb.mxu2 %v6778_v26  ;;  %4285 = vmatpush.bf16.msrb.mxu3 %v7002_v27 }
 0x263   :  { %4244 = vmatpush.bf16.msrb.mxu0 %v6302_v42  ;;  %4258 = vmatpush.bf16.msrb.mxu1 %v6526_v2  ;;  %v6641_v2 = vld [vmem:[#allocation16 + $0x350] sm:$0xf] }
 0x264   :  { %4272 = vmatpush.bf16.msrb.mxu2 %v6750_v35  ;;  %4286 = vmatpush.bf16.msrb.mxu3 %v6974_v40  ;;  %v6642_v29 = vor.u32 %v7557_v25, %v6641_v2  ;;  %v7550_v35 = vld [vmem:[#allocation16 + $0x330] sm:$0xf0]  ;;  %v6781_v2 = vld [vmem:[#allocation16 + $0x468] sm:$0xf]  ;;  %v7592_v25 = vld [vmem:[#allocation16 + $0x480] sm:$0xf0] }
 0x265   :  { %v6614_v38 = vor.u32 %v7550_v35, %v6613_v22  ;;  %v6753_v22 = vld [vmem:[#allocation16 + $0x430] sm:$0xf]  ;;  %v7585_v35 = vld [vmem:[#allocation16 + $0x448] sm:$0xf0] }
 0x267   :  { %4245 = vmatpush.bf16.msrb.mxu0 %v6274_v31  ;;  %4259 = vmatpush.bf16.msrb.mxu1 %v6498_v33  ;;  %v6389_v31 = vld [vmem:[#allocation16 + $0x158] sm:$0xf] }
 0x268   :  { %4273 = vmatpush.bf16.msrb.mxu2 %v6722_v50  ;;  %4287 = vmatpush.bf16.msrb.mxu3 %v6946_v51  ;;  %v6390_v44 = vor.u32 %v7494_v32, %v6389_v31  ;;  %v6361_v50 = vld [vmem:[#allocation16 + $0x120] sm:$0xf]  ;;  %v6782_v31 = vor.u32 %v7592_v25, %v6781_v2  ;;  %v7666_v2 = vld [vmem:[#allocation16 + $0x6d4] sm:$0xf]  ;;  %v7091_v25 = vld [vmem:[#allocation16 + $0x6ec] sm:$0xf0] }
 0x269   :  { %v6585_v51 = vld [vmem:[#allocation16 + $0x2e0] sm:$0xf]  ;;  %v6362_v56 = vor.u32 %v7487_v11, %v6361_v50  ;;  %v6949_v50 = vld [vmem:[#allocation16 + $0x5b8] sm:$0xf]  ;;  %v7634_v11 = vld [vmem:[#allocation16 + $0x5d0] sm:$0xf0] }
 0x26a   :  { %v6586_v63 = vor.u32 %v7543_v52, %v6585_v51 }
 0x26b   :  { %4246 = vmatpush.bf16.msrb.mxu0 %v6246_v46  ;;  %4260 = vmatpush.bf16.msrb.mxu1 %v6470_v48  ;;  %v7613_v46 = vld [vmem:[#allocation16 + $0x528] sm:$0xf0] }
 0x26c   :  { %4274 = vmatpush.bf16.msrb.mxu2 %v6694_v60  ;;  %4288 = vmatpush.bf16.msrb.mxu3 %v6918_v61 }
 0x26f   :  { %4247 = vmatpush.bf16.msrb.mxu0 %v6218_v17  ;;  %4261 = vmatpush.bf16.msrb.mxu1 %v6442_v54  ;;  %v6866_v54 = vor.u32 %v7613_v46, %v6865_v45  ;;  %v7459_v45 = vld [vmem:[#allocation16 + $0x58] sm:$0xf0]  ;;  %v6473_v46 = vld [vmem:[#allocation16 + $0x200] sm:$0xf] }
 0x270   :  { %4275 = vmatpush.bf16.msrb.mxu2 %v6666_v4  ;;  %4289 = vmatpush.bf16.msrb.mxu3 %v6890_v7  ;;  %v7662_v4 = vld [vmem:[#allocation16 + $0x6b0] sm:$0xf0]  ;;  %v6557_v7 = vld [vmem:[#allocation16 + $0x2a8] sm:$0xf]  ;;  %v6474_v52 = vor.u32 %v7515_v47, %v6473_v46  ;;  %v7533_v46 = vld [vmem:[#allocation16 + $0x2ac] sm:$0xf] }
 0x271   :  { %v6559_v47 = vld [vmem:[#allocation16 + $0x2c4] sm:$0xf0] }
 0x2ce   :  { %v2701_v9 = vpop.f32.mrf.mxu0  ;;  %v2715_v12 = vpop.f32.mrf.mxu1 }
 0x2cf   :  { %v2702_v15 = vadd.f32 %v2701_v9, %v2524_v13  ;;  %v2716_v23 = vadd.f32 %v2715_v12, %v2525_v14  ;;  %v6838_v9 = vor.u32 %v7606_v59, %v6837_v58  ;;  %v7062_v12 = vor.u32 %v7662_v4, %v7061_v3  ;;  %v7554_v59 = vld [vmem:[#allocation16 + $0x354] sm:$0xf]  ;;  %v6697_v3 = vld [vmem:[#allocation16 + $0x3c0] sm:$0xf]  ;;  %v7571_v4 = vld [vmem:[#allocation16 + $0x3d8] sm:$0xf0] }
 0x2d0   :  { %v6950_v58 = vor.u32 %v7634_v11, %v6949_v50  ;;  %v7652_v50 = vld [vmem:[#allocation16 + $0x664] sm:$0xf]  ;;  %v7035_v11 = vld [vmem:[#allocation16 + $0x67c] sm:$0xf0] }
 0x2d1   :  { %v2748_v26 = vmax.f32 %v2702_v15, 0.0  ;;  %v2749_v41 = vmax.f32 %v2716_v23, 0.0  ;;  %v6558_v15 = vor.u32 %v7536_v8, %v6557_v7  ;;  %v7599_v23 = vld [vmem:[#allocation16 + $0x4b8] sm:$0xf0] }
 0x2d5   :  { %v2729_v16 = vpop.f32.mrf.mxu2  ;;  %v2743_v18 = vpop.f32.mrf.mxu3 }
 0x2d6   :  { %v2703_v19 = vpop.f32.mrf.mxu0  ;;  %v2717_v37 = vpop.f32.mrf.mxu1  ;;  %v2730_v36 = vadd.f32 %v2729_v16, %v2526_v62  ;;  %v2744_v39 = vadd.f32 %v2743_v18, %v2527_v10  ;;  %v7033_v16 = vld [vmem:[#allocation16 + $0x660] sm:$0xf]  ;;  %v7655_v18 = vld [vmem:[#allocation16 + $0x678] sm:$0xf0] }
 0x2d7   :  { %v2704_v42 = vadd.f32 %v2703_v19, %v2524_v13  ;;  %v2718_v21 = vadd.f32 %v2717_v37, %v2525_v14  ;;  %v6809_v13 = vld [vmem:[#allocation16 + $0x4a0] sm:$0xf]  ;;  %v6334_v14 = vor.u32 %v7480_v6, %v6333_v5  ;;  %v6305_v19 = vld [vmem:[#allocation16 + $0xb0] sm:$0xf]  ;;  %v7473_v37 = vld [vmem:[#allocation16 + $0xc8] sm:$0xf0]  ;;  %v7034_v24 = vor.u32 %v7655_v18, %v7033_v16 }
 0x2d8   :  { %v2750_v0 = vmax.f32 %v2730_v36, 0.0  ;;  %v2751_v53 = vmax.f32 %v2744_v39, 0.0  ;;  %v6977_v36 = vld [vmem:[#allocation16 + $0x5f0] sm:$0xf]  ;;  %v7641_v39 = vld [vmem:[#allocation16 + $0x608] sm:$0xf0] }
 0x2d9   :  { %v2752_v27 = vmax.f32 %v2704_v42, 0.0  ;;  %v2753_v30 = vmax.f32 %v2718_v21, 0.0  ;;  %v7529_v42 = vld [vmem:[#allocation16 + $0x288] sm:$0xf0]  ;;  %v6810_v21 = vor.u32 %v7599_v23, %v6809_v13  ;;  %v6921_v5 = vld [vmem:[#allocation16 + $0x580] sm:$0xf]  ;;  %v6698_v23 = vor.u32 %v7571_v4, %v6697_v3 }
 0x2da   :  { %v7627_v6 = vld [vmem:[#allocation16 + $0x598] sm:$0xf0]  ;;  %v6615_v18 = vld [vmem:[#allocation16 + $0x334] sm:$0xf0] }
 0x2db   :  { %v8229_v33 = vpack.c.bf16 %v2752_v27, %v2748_v26  ;;  %v8231_v34 = vpack.c.bf16 %v2753_v30, %v2749_v41  ;;  %v6306_v26 = vor.u32 %v7473_v37, %v6305_v19  ;;  %v6530_v41 = vor.u32 %v7529_v42, %v6529_v20  ;;  %v6277_v27 = vld [vmem:[#allocation16 + $0x78] sm:$0xf]  ;;  %v7466_v30 = vld [vmem:[#allocation16 + $0x90] sm:$0xf0]  ;;  %v7491_v13 = vld [vmem:[#allocation16 + $0x15c] sm:$0xf] }
 0x2dc   :  { %v6922_v16 = vor.u32 %v7627_v6, %v6921_v5  ;;  %v6669_v19 = vld [vmem:[#allocation16 + $0x388] sm:$0xf]  ;;  %v7564_v37 = vld [vmem:[#allocation16 + $0x3a0] sm:$0xf0]  ;;  %v7463_v5 = vld [vmem:[#allocation16 + $0x7c] sm:$0xf] }
 0x2dd   :  { %v2731_v40 = vpop.f32.mrf.mxu2  ;;  %v2745_v43 = vpop.f32.mrf.mxu3  ;;  %4192 = vmatmul.bf16.vlgmr.msra.gmra.mxu0 %v8229_v33  ;;  %4206 = vmatmul.bf16.vlgmr.msra.gmra.mxu1 %v8231_v34  ;;  %v6893_v20 = vld [vmem:[#allocation16 + $0x548] sm:$0xf]  ;;  %v7620_v42 = vld [vmem:[#allocation16 + $0x560] sm:$0xf0]  ;;  %v6279_v6 = vld [vmem:[#allocation16 + $0x94] sm:$0xf0] }
 0x2de   :  { %v2732_v48 = vadd.f32 %v2731_v40, %v2526_v62  ;;  %v2746_v1 = vadd.f32 %v2745_v43, %v2527_v10  ;;  %4296 = vmatpush.bf16.msra.mxu0 %v6418_v28  ;;  %4310 = vmatpush.bf16.msra.mxu1 %v6642_v29  ;;  %v7005_v62 = vld [vmem:[#allocation16 + $0x628] sm:$0xf]  ;;  %v7648_v10 = vld [vmem:[#allocation16 + $0x640] sm:$0xf0]  ;;  %v6501_v28 = vld [vmem:[#allocation16 + $0x238] sm:$0xf]  ;;  %v6278_v40 = vor.u32 %v7466_v30, %v6277_v27 }
 0x2df   :  { %v7522_v29 = vld [vmem:[#allocation16 + $0x250] sm:$0xf0]  ;;  %v7006_v32 = vor.u32 %v7648_v10, %v7005_v62  ;;  %v6894_v27 = vor.u32 %v7620_v42, %v6893_v20  ;;  %v6363_v30 = vld [vmem:[#allocation16 + $0x13c] sm:$0xf0]  ;;  %v7512_v20 = vld [vmem:[#allocation16 + $0x204] sm:$0xf] }
 0x2e0   :  { %v2754_v17 = vmax.f32 %v2732_v48, 0.0  ;;  %v2755_v57 = vmax.f32 %v2746_v1, 0.0  ;;  %v6502_v43 = vor.u32 %v7522_v29, %v6501_v28  ;;  %v6754_v48 = vor.u32 %v7585_v35, %v6753_v22  ;;  %v7540_v28 = vld [vmem:[#allocation16 + $0x2e4] sm:$0xf]  ;;  %v6587_v29 = vld [vmem:[#allocation16 + $0x2fc] sm:$0xf0] }
 0x2e1   :  { %v6978_v1 = vor.u32 %v7641_v39, %v6977_v36  ;;  %v7603_v22 = vld [vmem:[#allocation16 + $0x4dc] sm:$0xf]  ;;  %v6839_v35 = vld [vmem:[#allocation16 + $0x4f4] sm:$0xf0]  ;;  %v6475_v42 = vld [vmem:[#allocation16 + $0x21c] sm:$0xf0] }
 0x2e2   :  { %v8235_v60 = vpack.c.bf16 %v2754_v17, %v2750_v0  ;;  %v8237_v61 = vpack.c.bf16 %v2755_v57, %v2751_v53  ;;  %4297 = vmatpush.bf16.msra.mxu0 %v6390_v44  ;;  %4311 = vmatpush.bf16.msra.mxu1 %v6614_v38  ;;  %v6249_v44 = vld [vmem:[#allocation16 + $0x40] sm:$0xf]  ;;  %v6725_v38 = vld [vmem:[#allocation16 + $0x3f8] sm:$0xf]  ;;  %v6221_v0 = vld [vmem:[#allocation16 + $0x8] sm:$0xf] }
 0x2e3   :  { %v6250_v51 = vor.u32 %v7459_v45, %v6249_v44  ;;  %v7452_v53 = vld [vmem:[#allocation16 + $0x20] sm:$0xf0]  ;;  %v6445_v17 = vld [vmem:[#allocation16 + $0x1c8] sm:$0xf]  ;;  %v7659_v36 = vld [vmem:[#allocation16 + $0x69c] sm:$0xf] }
 0x2e4   :  { %4220 = vmatmul.bf16.vlgmr.msra.gmra.mxu2 %v8235_v60  ;;  %4234 = vmatmul.bf16.vlgmr.msra.gmra.mxu3 %v8237_v61  ;;  %v7508_v57 = vld [vmem:[#allocation16 + $0x1e0] sm:$0xf0]  ;;  %v6222_v7 = vor.u32 %v7452_v53, %v6221_v0  ;;  %v7063_v39 = vld [vmem:[#allocation16 + $0x6b4] sm:$0xf0]  ;;  %v7477_v44 = vld [vmem:[#allocation16 + $0xec] sm:$0xf] }
 0x2e5   :  { %4324 = vmatpush.bf16.msra.mxu2 %v6866_v54  ;;  %4338 = vmatpush.bf16.msra.mxu3 %v7090_v55  ;;  %v7498_v54 = vld [vmem:[#allocation16 + $0x194] sm:$0xf]  ;;  %v6419_v55 = vld [vmem:[#allocation16 + $0x1ac] sm:$0xf0]  ;;  %v6446_v8 = vor.u32 %v7508_v57, %v6445_v17  ;;  %v6335_v45 = vld [vmem:[#allocation16 + $0x104] sm:$0xf0] }
 0x2e6   :  { %4298 = vmatpush.bf16.msra.mxu0 %v6362_v56  ;;  %4312 = vmatpush.bf16.msra.mxu1 %v6586_v63  ;;  %v6726_v56 = vor.u32 %v7578_v49, %v6725_v38  ;;  %v6643_v63 = vld [vmem:[#allocation16 + $0x36c] sm:$0xf0]  ;;  %v7596_v38 = vld [vmem:[#allocation16 + $0x4a4] sm:$0xf]  ;;  %v6811_v49 = vld [vmem:[#allocation16 + $0x4bc] sm:$0xf0] }
 0x2e7   :  { %v7470_v0 = vld [vmem:[#allocation16 + $0xb4] sm:$0xf]  ;;  %v6307_v53 = vld [vmem:[#allocation16 + $0xcc] sm:$0xf0] }
 0x2e8   :  { %v7526_v17 = vld [vmem:[#allocation16 + $0x274] sm:$0xf]  ;;  %v6531_v57 = vld [vmem:[#allocation16 + $0x28c] sm:$0xf0]  ;;  %v6310_v3 = vor.u32 %v7470_v0, %v6307_v53  ;;  %v7561_v0 = vld [vmem:[#allocation16 + $0x38c] sm:$0xf] }
 0x2e9   :  { %4325 = vmatpush.bf16.msra.mxu2 %v6838_v9  ;;  %4339 = vmatpush.bf16.msra.mxu3 %v7062_v12  ;;  %v6422_v9 = vor.u32 %v7498_v54, %v6419_v55  ;;  %v6646_v12 = vor.u32 %v7554_v59, %v6643_v63  ;;  %v6814_v54 = vor.u32 %v7596_v38, %v6811_v49  ;;  %v7645_v59 = vld [vmem:[#allocation16 + $0x62c] sm:$0xf]  ;;  %v7007_v63 = vld [vmem:[#allocation16 + $0x644] sm:$0xf0]  ;;  %v6397_v38 = vld [vmem:[#allocation16 + $0x160] sm:$0xf] }
 0x2ea   :  { %4299 = vmatpush.bf16.msra.mxu0 %v6334_v14  ;;  %4313 = vmatpush.bf16.msra.mxu1 %v6558_v15  ;;  %v6391_v14 = vld [vmem:[#allocation16 + $0x174] sm:$0xf0]  ;;  %v7547_v15 = vld [vmem:[#allocation16 + $0x31c] sm:$0xf]  ;;  %v7038_v55 = vor.u32 %v7652_v50, %v7035_v11  ;;  %v6534_v4 = vor.u32 %v7526_v17, %v6531_v57  ;;  %v6621_v50 = vld [vmem:[#allocation16 + $0x320] sm:$0xf] }
 0x2eb   :  { %v6394_v62 = vor.u32 %v7491_v13, %v6391_v14  ;;  %v6618_v10 = vor.u32 %v7547_v15, %v6615_v18  ;;  %v7582_v13 = vld [vmem:[#allocation16 + $0x434] sm:$0xf]  ;;  %v6755_v14 = vld [vmem:[#allocation16 + $0x44c] sm:$0xf0]  ;;  %v7495_v49 = vld [vmem:[#allocation16 + $0x178] sm:$0xf0] }
 0x2ec   :  { %v7638_v15 = vld [vmem:[#allocation16 + $0x5f4] sm:$0xf]  ;;  %v6671_v53 = vld [vmem:[#allocation16 + $0x3a4] sm:$0xf0]  ;;  %v7617_v17 = vld [vmem:[#allocation16 + $0x54c] sm:$0xf] }
 0x2ed   :  { %4326 = vmatpush.bf16.msra.mxu2 %v6810_v21  ;;  %4340 = vmatpush.bf16.msra.mxu3 %v7034_v24  ;;  %v7610_v21 = vld [vmem:[#allocation16 + $0x514] sm:$0xf]  ;;  %v6867_v24 = vld [vmem:[#allocation16 + $0x52c] sm:$0xf0]  ;;  %v6895_v57 = vld [vmem:[#allocation16 + $0x564] sm:$0xf0] }
 0x2ee   :  { %4248 = vmatmul.bf16.vlgmr.msrb.gmra.mxu0 %v8229_v33  ;;  %4262 = vmatmul.bf16.vlgmr.msrb.gmra.mxu1 %v8231_v34 }
 0x2ef   :  { %4300 = vmatpush.bf16.msra.mxu0 %v6306_v26  ;;  %4314 = vmatpush.bf16.msra.mxu1 %v6530_v41  ;;  %v7484_v26 = vld [vmem:[#allocation16 + $0x124] sm:$0xf]  ;;  %v6670_v41 = vor.u32 %v7564_v37, %v6669_v19  ;;  %v6251_v37 = vld [vmem:[#allocation16 + $0x5c] sm:$0xf0] }
 0x2f0   :  { %v7456_v19 = vld [vmem:[#allocation16 + $0x44] sm:$0xf] }
 0x2f1   :  { %4327 = vmatpush.bf16.msra.mxu2 %v6782_v31  ;;  %4341 = vmatpush.bf16.msra.mxu3 %v7006_v32  ;;  %v6870_v31 = vor.u32 %v7610_v21, %v6867_v24  ;;  %v7094_v32 = vor.u32 %v7666_v2, %v7091_v25  ;;  %v6758_v21 = vor.u32 %v7582_v13, %v6755_v14  ;;  %v7575_v2 = vld [vmem:[#allocation16 + $0x3fc] sm:$0xf]  ;;  %v6727_v25 = vld [vmem:[#allocation16 + $0x414] sm:$0xf0]  ;;  %v6845_v13 = vld [vmem:[#allocation16 + $0x4e0] sm:$0xf] }
 0x2f2   :  { %v7607_v14 = vld [vmem:[#allocation16 + $0x4f8] sm:$0xf0] }
 0x2f3   :  { %4301 = vmatpush.bf16.msra.mxu0 %v6278_v40  ;;  %4315 = vmatpush.bf16.msra.mxu1 %v6502_v43  ;;  %v6366_v40 = vor.u32 %v7484_v26, %v6363_v30  ;;  %v6590_v43 = vor.u32 %v7540_v28, %v6587_v29  ;;  %v6254_v26 = vor.u32 %v7456_v19, %v6251_v37  ;;  %v6223_v30 = vld [vmem:[#allocation16 + $0x24] sm:$0xf0]  ;;  %v7505_v28 = vld [vmem:[#allocation16 + $0x1cc] sm:$0xf]  ;;  %v6341_v19 = vld [vmem:[#allocation16 + $0xf0] sm:$0xf] }
 0x2f4   :  { %4276 = vmatmul.bf16.vlgmr.msrb.gmra.mxu2 %v8235_v60  ;;  %4290 = vmatmul.bf16.vlgmr.msrb.gmra.mxu3 %v8237_v61  ;;  %v6447_v29 = vld [vmem:[#allocation16 + $0x1e4] sm:$0xf0]  ;;  %v7481_v37 = vld [vmem:[#allocation16 + $0x108] sm:$0xf0] }
 0x2f5   :  { %4328 = vmatpush.bf16.msra.mxu2 %v6754_v48  ;;  %4342 = vmatpush.bf16.msra.mxu3 %v6978_v1  ;;  %v6842_v48 = vor.u32 %v7603_v22, %v6839_v35  ;;  %v7066_v1 = vor.u32 %v7659_v36, %v7063_v39  ;;  %v6730_v22 = vor.u32 %v7575_v2, %v6727_v25  ;;  %v6649_v36 = vld [vmem:[#allocation16 + $0x358] sm:$0xf]  ;;  %v7558_v39 = vld [vmem:[#allocation16 + $0x370] sm:$0xf0]  ;;  %v6817_v2 = vld [vmem:[#allocation16 + $0x4a8] sm:$0xf] }
 0x2f6   :  { %v7600_v25 = vld [vmem:[#allocation16 + $0x4c0] sm:$0xf0] }
 0x2f7   :  { %4302 = vmatpush.bf16.msra.mxu0 %v6250_v51  ;;  %4316 = vmatpush.bf16.msra.mxu1 %v6474_v52  ;;  %v6338_v51 = vor.u32 %v7477_v44, %v6335_v45  ;;  %v6562_v52 = vor.u32 %v7533_v46, %v6559_v47  ;;  %v7624_v44 = vld [vmem:[#allocation16 + $0x584] sm:$0xf]  ;;  %v6923_v45 = vld [vmem:[#allocation16 + $0x59c] sm:$0xf0]  ;;  %v6450_v47 = vor.u32 %v7505_v28, %v6447_v29 }
 0x2f8   :  { %v6818_v28 = vor.u32 %v7600_v25, %v6817_v2  ;;  %v7492_v2 = vld [vmem:[#allocation16 + $0x164] sm:$0xf]  ;;  %v6399_v25 = vld [vmem:[#allocation16 + $0x17c] sm:$0xf0] }
 0x2f9   :  { %4329 = vmatpush.bf16.msra.mxu2 %v6726_v56  ;;  %4343 = vmatpush.bf16.msra.mxu3 %v6950_v58  ;;  %v7589_v56 = vld [vmem:[#allocation16 + $0x46c] sm:$0xf]  ;;  %v6783_v58 = vld [vmem:[#allocation16 + $0x484] sm:$0xf0] }
 0x2fb   :  { %4303 = vmatpush.bf16.msra.mxu0 %v6222_v7  ;;  %4317 = vmatpush.bf16.msra.mxu1 %v6446_v8  ;;  %v7519_v7 = vld [vmem:[#allocation16 + $0x23c] sm:$0xf]  ;;  %v6503_v8 = vld [vmem:[#allocation16 + $0x254] sm:$0xf0] }
 0x2fc   :  { %v6506_v18 = vor.u32 %v7519_v7, %v6503_v8 }
 0x2fd   :  { %4330 = vmatpush.bf16.msra.mxu2 %v6698_v23  ;;  %4344 = vmatpush.bf16.msra.mxu3 %v6922_v16  ;;  %v6979_v23 = vld [vmem:[#allocation16 + $0x60c] sm:$0xf0]  ;;  %v6282_v16 = vor.u32 %v7463_v5, %v6279_v6  ;;  %v6369_v5 = vld [vmem:[#allocation16 + $0x128] sm:$0xf]  ;;  %v7488_v6 = vld [vmem:[#allocation16 + $0x140] sm:$0xf0] }
 0x2fe   :  { %4304 = vmatmul.bf16.vlgmr.msra.gmra.mxu0 %v8229_v33  ;;  %4318 = vmatmul.bf16.vlgmr.msra.gmra.mxu1 %v8231_v34  ;;  %v6982_v24 = vor.u32 %v7638_v15, %v6979_v23  ;;  %v7069_v15 = vld [vmem:[#allocation16 + $0x6a0] sm:$0xf]  ;;  %v7663_v23 = vld [vmem:[#allocation16 + $0x6b8] sm:$0xf0] }
 0x2ff   :  { %4352 = vmatpush.bf16.msrb.mxu0 %v6422_v9  ;;  %4366 = vmatpush.bf16.msrb.mxu1 %v6646_v12  ;;  %v6786_v9 = vor.u32 %v7589_v56, %v6783_v58  ;;  %v7010_v12 = vor.u32 %v7645_v59, %v7007_v63  ;;  %v7097_v56 = vld [vmem:[#allocation16 + $0x6d8] sm:$0xf]  ;;  %v7670_v58 = vld [vmem:[#allocation16 + $0x6f0] sm:$0xf0]  ;;  %v6398_v59 = vor.u32 %v7495_v49, %v6397_v38 }
 0x300   :  { %v7098_v8 = vor.u32 %v7670_v58, %v7097_v56  ;;  %v6761_v38 = vld [vmem:[#allocation16 + $0x438] sm:$0xf]  ;;  %v7586_v49 = vld [vmem:[#allocation16 + $0x450] sm:$0xf0]  ;;  %v6733_v56 = vld [vmem:[#allocation16 + $0x400] sm:$0xf] }
 0x301   :  { %4331 = vmatpush.bf16.msra.mxu2 %v6670_v41  ;;  %4345 = vmatpush.bf16.msra.mxu3 %v6894_v27  ;;  %v6478_v41 = vor.u32 %v7512_v20, %v6475_v42  ;;  %v7449_v27 = vld [vmem:[#allocation16 + $0xc] sm:$0xf]  ;;  %v6846_v20 = vor.u32 %v7607_v14, %v6845_v13  ;;  %v7070_v42 = vor.u32 %v7663_v23, %v7069_v15  ;;  %v7579_v58 = vld [vmem:[#allocation16 + $0x418] sm:$0xf0]  ;;  %v6427_v14 = vld [vmem:[#allocation16 + $0x1b4] sm:$0xf0] }
 0x302   :  { %v6226_v46 = vor.u32 %v7449_v27, %v6223_v30  ;;  %v6313_v27 = vld [vmem:[#allocation16 + $0xb8] sm:$0xf]  ;;  %v7474_v30 = vld [vmem:[#allocation16 + $0xd0] sm:$0xf0]  ;;  %v7499_v13 = vld [vmem:[#allocation16 + $0x19c] sm:$0xf] }
 0x303   :  { %4353 = vmatpush.bf16.msrb.mxu0 %v6394_v62  ;;  %4367 = vmatpush.bf16.msrb.mxu1 %v6618_v10  ;;  %v7631_v62 = vld [vmem:[#allocation16 + $0x5bc] sm:$0xf]  ;;  %v6951_v10 = vld [vmem:[#allocation16 + $0x5d4] sm:$0xf0] }
 0x304   :  { %4332 = vmatmul.bf16.vlgmr.msra.gmra.mxu2 %v8235_v60  ;;  %4346 = vmatmul.bf16.vlgmr.msra.gmra.mxu3 %v8237_v61  ;;  %v6954_v35 = vor.u32 %v7631_v62, %v6951_v10  ;;  %v7041_v62 = vld [vmem:[#allocation16 + $0x668] sm:$0xf]  ;;  %v7656_v10 = vld [vmem:[#allocation16 + $0x680] sm:$0xf0]  ;;  %v7555_v15 = vld [vmem:[#allocation16 + $0x35c] sm:$0xf] }
 0x305   :  { %4380 = vmatpush.bf16.msrb.mxu2 %v6870_v31  ;;  %4394 = vmatpush.bf16.msrb.mxu3 %v7094_v32  ;;  %v6425_v31 = vld [vmem:[#allocation16 + $0x198] sm:$0xf]  ;;  %v7502_v32 = vld [vmem:[#allocation16 + $0x1b0] sm:$0xf0]  ;;  %v7042_v29 = vor.u32 %v7656_v10, %v7041_v62  ;;  %v7548_v62 = vld [vmem:[#allocation16 + $0x324] sm:$0xf] }
 0x306   :  { %v6651_v23 = vld [vmem:[#allocation16 + $0x374] sm:$0xf0] }
 0x307   :  { %4354 = vmatpush.bf16.msrb.mxu0 %v6366_v40  ;;  %4368 = vmatpush.bf16.msrb.mxu1 %v6590_v43  ;;  %v7568_v40 = vld [vmem:[#allocation16 + $0x3c4] sm:$0xf]  ;;  %v6699_v43 = vld [vmem:[#allocation16 + $0x3dc] sm:$0xf0] }
 0x308   :  { %v6702_v11 = vor.u32 %v7568_v40, %v6699_v43  ;;  %v6314_v40 = vor.u32 %v7474_v30, %v6313_v27  ;;  %v6677_v27 = vld [vmem:[#allocation16 + $0x390] sm:$0xf]  ;;  %v7565_v30 = vld [vmem:[#allocation16 + $0x3a8] sm:$0xf0] }
 0x309   :  { %4381 = vmatpush.bf16.msrb.mxu2 %v6842_v48  ;;  %4395 = vmatpush.bf16.msrb.mxu3 %v7066_v1  ;;  %v6426_v48 = vor.u32 %v7502_v32, %v6425_v31  ;;  %v6650_v1 = vor.u32 %v7558_v39, %v6649_v36  ;;  %v6537_v31 = vld [vmem:[#allocation16 + $0x278] sm:$0xf]  ;;  %v7530_v32 = vld [vmem:[#allocation16 + $0x290] sm:$0xf0]  ;;  %v7013_v36 = vld [vmem:[#allocation16 + $0x630] sm:$0xf] }
 0x30a   :  { %v7649_v39 = vld [vmem:[#allocation16 + $0x648] sm:$0xf0]  ;;  %v6538_v43 = vor.u32 %v7530_v32, %v6537_v31  ;;  %v7611_v31 = vld [vmem:[#allocation16 + $0x51c] sm:$0xf]  ;;  %v6875_v32 = vld [vmem:[#allocation16 + $0x534] sm:$0xf0] }
 0x30b   :  { %4355 = vmatpush.bf16.msrb.mxu0 %v6338_v51  ;;  %4369 = vmatpush.bf16.msrb.mxu1 %v6562_v52  ;;  %v6926_v51 = vor.u32 %v7624_v44, %v6923_v45  ;;  %v7551_v52 = vld [vmem:[#allocation16 + $0x338] sm:$0xf0]  ;;  %v6285_v44 = vld [vmem:[#allocation16 + $0x80] sm:$0xf] }
 0x30c   :  { %v6622_v63 = vor.u32 %v7551_v52, %v6621_v50  ;;  %v7467_v45 = vld [vmem:[#allocation16 + $0x98] sm:$0xf0]  ;;  %v6985_v50 = vld [vmem:[#allocation16 + $0x5f8] sm:$0xf] }
 0x30d   :  { %4382 = vmatpush.bf16.msrb.mxu2 %v6814_v54  ;;  %4396 = vmatpush.bf16.msrb.mxu3 %v7038_v55  ;;  %v6873_v54 = vld [vmem:[#allocation16 + $0x518] sm:$0xf]  ;;  %v7614_v55 = vld [vmem:[#allocation16 + $0x530] sm:$0xf0] }
 0x30e   :  { %v6874_v7 = vor.u32 %v7614_v55, %v6873_v54  ;;  %v6481_v54 = vld [vmem:[#allocation16 + $0x208] sm:$0xf]  ;;  %v7516_v55 = vld [vmem:[#allocation16 + $0x220] sm:$0xf0] }
 0x30f   :  { %4356 = vmatpush.bf16.msrb.mxu0 %v6310_v3  ;;  %4370 = vmatpush.bf16.msrb.mxu1 %v6534_v4  ;;  %v6674_v3 = vor.u32 %v7561_v0, %v6671_v53  ;;  %v6898_v4 = vor.u32 %v7617_v17, %v6895_v57  ;;  %v6257_v0 = vld [vmem:[#allocation16 + $0x48] sm:$0xf]  ;;  %v7460_v53 = vld [vmem:[#allocation16 + $0x60] sm:$0xf0]  ;;  %v6762_v17 = vor.u32 %v7586_v49, %v6761_v38  ;;  %v6847_v49 = vld [vmem:[#allocation16 + $0x4fc] sm:$0xf0] }
 0x310   :  { %v7604_v38 = vld [vmem:[#allocation16 + $0x4e4] sm:$0xf] }
 0x311   :  { %4383 = vmatpush.bf16.msrb.mxu2 %v6786_v9  ;;  %4397 = vmatpush.bf16.msrb.mxu3 %v7010_v12  ;;  %v6593_v9 = vld [vmem:[#allocation16 + $0x2e8] sm:$0xf]  ;;  %v7544_v12 = vld [vmem:[#allocation16 + $0x300] sm:$0xf0] }
 0x313   :  { %4357 = vmatpush.bf16.msrb.mxu0 %v6282_v16  ;;  %4371 = vmatpush.bf16.msrb.mxu1 %v6506_v18  ;;  %v6370_v16 = vor.u32 %v7488_v6, %v6369_v5  ;;  %v6594_v18 = vor.u32 %v7544_v12, %v6593_v9  ;;  %v6229_v5 = vld [vmem:[#allocation16 + $0x10] sm:$0xf]  ;;  %v7453_v6 = vld [vmem:[#allocation16 + $0x28] sm:$0xf0] }
 0x314   :  { %v7509_v12 = vld [vmem:[#allocation16 + $0x1e8] sm:$0xf0] }
 0x315   :  { %4384 = vmatpush.bf16.msrb.mxu2 %v6758_v21  ;;  %4398 = vmatpush.bf16.msrb.mxu3 %v6982_v24  ;;  %v6565_v21 = vld [vmem:[#allocation16 + $0x2b0] sm:$0xf]  ;;  %v7537_v24 = vld [vmem:[#allocation16 + $0x2c8] sm:$0xf0] }
 0x317   :  { %4358 = vmatpush.bf16.msrb.mxu0 %v6254_v26  ;;  %4372 = vmatpush.bf16.msrb.mxu1 %v6478_v41  ;;  %v6342_v26 = vor.u32 %v7481_v37, %v6341_v19  ;;  %v6566_v41 = vor.u32 %v7537_v24, %v6565_v21  ;;  %v6929_v19 = vld [vmem:[#allocation16 + $0x588] sm:$0xf]  ;;  %v7628_v37 = vld [vmem:[#allocation16 + $0x5a0] sm:$0xf0]  ;;  %v6430_v21 = vor.u32 %v7499_v13, %v6427_v14  ;;  %v7590_v13 = vld [vmem:[#allocation16 + $0x474] sm:$0xf] }
 0x318   :  { %v6654_v24 = vor.u32 %v7555_v15, %v6651_v23  ;;  %v6791_v14 = vld [vmem:[#allocation16 + $0x48c] sm:$0xf0]  ;;  %v7646_v15 = vld [vmem:[#allocation16 + $0x634] sm:$0xf] }
 0x319   :  { %4385 = vmatpush.bf16.msrb.mxu2 %v6730_v22  ;;  %4399 = vmatpush.bf16.msrb.mxu3 %v6954_v35  ;;  %v6789_v22 = vld [vmem:[#allocation16 + $0x470] sm:$0xf]  ;;  %v7593_v35 = vld [vmem:[#allocation16 + $0x488] sm:$0xf0] }
 0x31a   :  { %v7015_v23 = vld [vmem:[#allocation16 + $0x64c] sm:$0xf0] }
 0x31b   :  { %4359 = vmatpush.bf16.msrb.mxu0 %v6226_v46  ;;  %4373 = vmatpush.bf16.msrb.mxu1 %v6450_v47  ;;  %v6790_v46 = vor.u32 %v7593_v35, %v6789_v22  ;;  %v7014_v47 = vor.u32 %v7649_v39, %v7013_v36  ;;  %v7667_v22 = vld [vmem:[#allocation16 + $0x6dc] sm:$0xf]  ;;  %v7099_v35 = vld [vmem:[#allocation16 + $0x6f4] sm:$0xf0]  ;;  %v6402_v36 = vor.u32 %v7492_v2, %v6399_v25 }
 0x31c   :  { %v7583_v2 = vld [vmem:[#allocation16 + $0x43c] sm:$0xf]  ;;  %v6763_v25 = vld [vmem:[#allocation16 + $0x454] sm:$0xf0] }
 0x31d   :  { %4386 = vmatpush.bf16.msrb.mxu2 %v6702_v11  ;;  %4400 = vmatpush.bf16.msrb.mxu3 %v6926_v51  ;;  %v7642_v11 = vld [vmem:[#allocation16 + $0x610] sm:$0xf0]  ;;  %v6286_v51 = vor.u32 %v7467_v45, %v6285_v44  ;;  %v7485_v44 = vld [vmem:[#allocation16 + $0x12c] sm:$0xf]  ;;  %v6371_v45 = vld [vmem:[#allocation16 + $0x144] sm:$0xf0] }
 0x31e   :  { %4360 = vmatmul.bf16.vlgmr.msrb.gmra.mxu0 %v8229_v33  ;;  %4374 = vmatmul.bf16.vlgmr.msrb.gmra.mxu1 %v8231_v34  ;;  %v6986_v57 = vor.u32 %v7642_v11, %v6985_v50  ;;  %v7660_v50 = vld [vmem:[#allocation16 + $0x6a4] sm:$0xf]  ;;  %v7071_v11 = vld [vmem:[#allocation16 + $0x6bc] sm:$0xf0] }
 0x31f   :  { %4408 = vmatpush.bf16.msra.mxu0 %v6426_v48  ;;  %4422 = vmatpush.bf16.msra.mxu1 %v6650_v1  ;;  %v6509_v48 = vld [vmem:[#allocation16 + $0x240] sm:$0xf]  ;;  %v7523_v1 = vld [vmem:[#allocation16 + $0x258] sm:$0xf0] }
 0x320   :  { %v6510_v52 = vor.u32 %v7523_v1, %v6509_v48  ;;  %v7541_v48 = vld [vmem:[#allocation16 + $0x2ec] sm:$0xf]  ;;  %v6595_v1 = vld [vmem:[#allocation16 + $0x304] sm:$0xf0] }
 0x321   :  { %4387 = vmatpush.bf16.msrb.mxu2 %v6674_v3  ;;  %4401 = vmatpush.bf16.msrb.mxu3 %v6898_v4  ;;  %v6258_v3 = vor.u32 %v7460_v53, %v6257_v0  ;;  %v6482_v4 = vor.u32 %v7516_v55, %v6481_v54  ;;  %v7478_v0 = vld [vmem:[#allocation16 + $0xf4] sm:$0xf]  ;;  %v6343_v53 = vld [vmem:[#allocation16 + $0x10c] sm:$0xf0] }
 0x322   :  { %v7534_v54 = vld [vmem:[#allocation16 + $0x2b4] sm:$0xf]  ;;  %v6567_v55 = vld [vmem:[#allocation16 + $0x2cc] sm:$0xf0] }
 0x323   :  { %4409 = vmatpush.bf16.msra.mxu0 %v6398_v59  ;;  %4423 = vmatpush.bf16.msra.mxu1 %v6622_v63  ;;  %v6957_v59 = vld [vmem:[#allocation16 + $0x5c0] sm:$0xf]  ;;  %v7635_v63 = vld [vmem:[#allocation16 + $0x5d8] sm:$0xf0] }
 0x324   :  { %4388 = vmatmul.bf16.vlgmr.msrb.gmra.mxu2 %v8235_v60  ;;  %4402 = vmatmul.bf16.vlgmr.msrb.gmra.mxu3 %v8237_v61  ;;  %v6958_v9 = vor.u32 %v7635_v63, %v6957_v59  ;;  %v7653_v59 = vld [vmem:[#allocation16 + $0x66c] sm:$0xf]  ;;  %v7043_v63 = vld [vmem:[#allocation16 + $0x684] sm:$0xf0] }
 0x325   :  { %4436 = vmatpush.bf16.msra.mxu2 %v6874_v7  ;;  %4450 = vmatpush.bf16.msra.mxu3 %v7098_v8  ;;  %v6453_v7 = vld [vmem:[#allocation16 + $0x1d0] sm:$0xf]  ;;  %v6734_v8 = vor.u32 %v7579_v58, %v6733_v56  ;;  %v7597_v56 = vld [vmem:[#allocation16 + $0x4ac] sm:$0xf]  ;;  %v6819_v58 = vld [vmem:[#allocation16 + $0x4c4] sm:$0xf0] }
 0x327   :  { %4410 = vmatpush.bf16.msra.mxu0 %v6370_v16  ;;  %4424 = vmatpush.bf16.msra.mxu1 %v6594_v18  ;;  %v6705_v16 = vld [vmem:[#allocation16 + $0x3c8] sm:$0xf]  ;;  %v7572_v18 = vld [vmem:[#allocation16 + $0x3e0] sm:$0xf0] }
 0x328   :  { %v6706_v10 = vor.u32 %v7572_v18, %v6705_v16 }
 0x329   :  { %4437 = vmatpush.bf16.msra.mxu2 %v6846_v20  ;;  %4451 = vmatpush.bf16.msra.mxu3 %v7070_v42  ;;  %v6230_v20 = vor.u32 %v7453_v6, %v6229_v5  ;;  %v6454_v42 = vor.u32 %v7509_v12, %v6453_v7  ;;  %v7471_v5 = vld [vmem:[#allocation16 + $0xbc] sm:$0xf]  ;;  %v6315_v6 = vld [vmem:[#allocation16 + $0xd4] sm:$0xf0]  ;;  %v6822_v7 = vor.u32 %v7597_v56, %v6819_v58  ;;  %v6405_v56 = vld [vmem:[#allocation16 + $0x168] sm:$0xf] }
 0x32a   :  { %v6539_v12 = vld [vmem:[#allocation16 + $0x294] sm:$0xf0]  ;;  %v6318_v16 = vor.u32 %v7471_v5, %v6315_v6  ;;  %v7496_v58 = vld [vmem:[#allocation16 + $0x180] sm:$0xf0]  ;;  %v7562_v5 = vld [vmem:[#allocation16 + $0x394] sm:$0xf] }
 0x32b   :  { %4411 = vmatpush.bf16.msra.mxu0 %v6342_v26  ;;  %4425 = vmatpush.bf16.msra.mxu1 %v6566_v41  ;;  %v6930_v26 = vor.u32 %v7628_v37, %v6929_v19  ;;  %v6623_v41 = vld [vmem:[#allocation16 + $0x33c] sm:$0xf0]  ;;  %v7464_v19 = vld [vmem:[#allocation16 + $0x84] sm:$0xf]  ;;  %v6679_v6 = vld [vmem:[#allocation16 + $0x3ac] sm:$0xf0] }
 0x32c   :  { %v6626_v39 = vor.u32 %v7548_v62, %v6623_v41  ;;  %v6287_v37 = vld [vmem:[#allocation16 + $0x9c] sm:$0xf0]  ;;  %v7639_v62 = vld [vmem:[#allocation16 + $0x5fc] sm:$0xf] }
 0x32d   :  { %4438 = vmatpush.bf16.msra.mxu2 %v6818_v28  ;;  %4452 = vmatpush.bf16.msra.mxu3 %v7042_v29  ;;  %v6901_v28 = vld [vmem:[#allocation16 + $0x550] sm:$0xf]  ;;  %v7621_v29 = vld [vmem:[#allocation16 + $0x568] sm:$0xf0] }
 0x32f   :  { %4412 = vmatpush.bf16.msra.mxu0 %v6314_v40  ;;  %4426 = vmatpush.bf16.msra.mxu1 %v6538_v43  ;;  %v6678_v40 = vor.u32 %v7565_v30, %v6677_v27  ;;  %v6902_v43 = vor.u32 %v7621_v29, %v6901_v28  ;;  %v7457_v27 = vld [vmem:[#allocation16 + $0x4c] sm:$0xf]  ;;  %v6259_v30 = vld [vmem:[#allocation16 + $0x64] sm:$0xf0]  ;;  %v6766_v28 = vor.u32 %v7583_v2, %v6763_v25  ;;  %v7608_v25 = vld [vmem:[#allocation16 + $0x500] sm:$0xf0] }
 0x330   :  { %v6853_v2 = vld [vmem:[#allocation16 + $0x4e8] sm:$0xf] }
 0x331   :  { %4439 = vmatpush.bf16.msra.mxu2 %v6790_v46  ;;  %4453 = vmatpush.bf16.msra.mxu3 %v7014_v47  ;;  %v6878_v46 = vor.u32 %v7611_v31, %v6875_v32  ;;  %v7102_v47 = vor.u32 %v7667_v22, %v7099_v35  ;;  %v7513_v31 = vld [vmem:[#allocation16 + $0x20c] sm:$0xf]  ;;  %v6483_v32 = vld [vmem:[#allocation16 + $0x224] sm:$0xf0]  ;;  %v7576_v22 = vld [vmem:[#allocation16 + $0x404] sm:$0xf] }
 0x332   :  { %v6735_v35 = vld [vmem:[#allocation16 + $0x41c] sm:$0xf0] }
 0x333   :  { %4413 = vmatpush.bf16.msra.mxu0 %v6286_v51  ;;  %4427 = vmatpush.bf16.msra.mxu1 %v6510_v52  ;;  %v6374_v51 = vor.u32 %v7485_v44, %v6371_v45  ;;  %v6598_v52 = vor.u32 %v7541_v48, %v6595_v1  ;;  %v7450_v44 = vld [vmem:[#allocation16 + $0x14] sm:$0xf]  ;;  %v6231_v45 = vld [vmem:[#allocation16 + $0x2c] sm:$0xf0] }
 0x334   :  { %v6455_v1 = vld [vmem:[#allocation16 + $0x1ec] sm:$0xf0] }
 0x335   :  { %4440 = vmatpush.bf16.msra.mxu2 %v6762_v17  ;;  %4454 = vmatpush.bf16.msra.mxu3 %v6986_v57  ;;  %v6850_v17 = vor.u32 %v7604_v38, %v6847_v49  ;;  %v7074_v57 = vor.u32 %v7660_v50, %v7071_v11  ;;  %v6433_v38 = vld [vmem:[#allocation16 + $0x1a0] sm:$0xf]  ;;  %v7503_v49 = vld [vmem:[#allocation16 + $0x1b8] sm:$0xf0] }
 0x336   :  { %v6657_v50 = vld [vmem:[#allocation16 + $0x360] sm:$0xf]  ;;  %v7559_v11 = vld [vmem:[#allocation16 + $0x378] sm:$0xf0] }
 0x337   :  { %4414 = vmatpush.bf16.msra.mxu0 %v6258_v3  ;;  %4428 = vmatpush.bf16.msra.mxu1 %v6482_v4  ;;  %v6346_v3 = vor.u32 %v7478_v0, %v6343_v53  ;;  %v6570_v4 = vor.u32 %v7534_v54, %v6567_v55  ;;  %v7625_v0 = vld [vmem:[#allocation16 + $0x58c] sm:$0xf]  ;;  %v6931_v53 = vld [vmem:[#allocation16 + $0x5a4] sm:$0xf0]  ;;  %v6434_v54 = vor.u32 %v7503_v49, %v6433_v38 }
 0x338   :  { %v6658_v55 = vor.u32 %v7559_v11, %v6657_v50  ;;  %v6545_v50 = vld [vmem:[#allocation16 + $0x280] sm:$0xf]  ;;  %v7531_v11 = vld [vmem:[#allocation16 + $0x298] sm:$0xf0] }
 0x339   :  { %4441 = vmatpush.bf16.msra.mxu2 %v6734_v8  ;;  %4455 = vmatpush.bf16.msra.mxu3 %v6958_v9  ;;  %v7046_v8 = vor.u32 %v7653_v59, %v7043_v63  ;;  %v7527_v9 = vld [vmem:[#allocation16 + $0x27c] sm:$0xf]  ;;  %v6629_v59 = vld [vmem:[#allocation16 + $0x328] sm:$0xf] }
 0x33a   :  { %v6542_v18 = vor.u32 %v7527_v9, %v6539_v12  ;;  %v6881_v9 = vld [vmem:[#allocation16 + $0x520] sm:$0xf]  ;;  %v7615_v12 = vld [vmem:[#allocation16 + $0x538] sm:$0xf0] }
 0x33b   :  { %4415 = vmatpush.bf16.msra.mxu0 %v6230_v20  ;;  %4429 = vmatpush.bf16.msra.mxu1 %v6454_v42  ;;  %v6794_v20 = vor.u32 %v7590_v13, %v6791_v14  ;;  %v7018_v42 = vor.u32 %v7646_v15, %v7015_v23  ;;  %v7105_v13 = vld [vmem:[#allocation16 + $0x6e0] sm:$0xf]  ;;  %v7671_v14 = vld [vmem:[#allocation16 + $0x6f8] sm:$0xf0]  ;;  %v6406_v15 = vor.u32 %v7496_v58, %v6405_v56  ;;  %v6293_v56 = vld [vmem:[#allocation16 + $0x88] sm:$0xf] }
 0x33c   :  { %v7468_v58 = vld [vmem:[#allocation16 + $0xa0] sm:$0xf0] }
 0x33d   :  { %4442 = vmatpush.bf16.msra.mxu2 %v6706_v10  ;;  %4456 = vmatpush.bf16.msra.mxu3 %v6930_v26  ;;  %v6987_v10 = vld [vmem:[#allocation16 + $0x614] sm:$0xf0]  ;;  %v6290_v26 = vor.u32 %v7464_v19, %v6287_v37  ;;  %v6377_v19 = vld [vmem:[#allocation16 + $0x130] sm:$0xf]  ;;  %v7489_v37 = vld [vmem:[#allocation16 + $0x148] sm:$0xf0] }
 0x33e   :  { %4416 = vmatmul.bf16.vlgmr.msra.gmra.mxu0 %v8229_v33  ;;  %4430 = vmatmul.bf16.vlgmr.msra.gmra.mxu1 %v8231_v34  ;;  %v6990_v29 = vor.u32 %v7639_v62, %v6987_v10  ;;  %v7077_v62 = vld [vmem:[#allocation16 + $0x6a8] sm:$0xf]  ;;  %v7664_v10 = vld [vmem:[#allocation16 + $0x6c0] sm:$0xf0] }
 0x33f   :  { %4464 = vmatpush.bf16.msrb.mxu0 %v6430_v21  ;;  %4478 = vmatpush.bf16.msrb.mxu1 %v6654_v24  ;;  %v7520_v21 = vld [vmem:[#allocation16 + $0x244] sm:$0xf]  ;;  %v6511_v24 = vld [vmem:[#allocation16 + $0x25c] sm:$0xf0] }
 0x340   :  { %v6514_v41 = vor.u32 %v7520_v21, %v6511_v24  ;;  %v6601_v21 = vld [vmem:[#allocation16 + $0x2f0] sm:$0xf]  ;;  %v7545_v24 = vld [vmem:[#allocation16 + $0x308] sm:$0xf0] }
 0x341   :  { %4443 = vmatpush.bf16.msra.mxu2 %v6678_v40  ;;  %4457 = vmatpush.bf16.msra.mxu3 %v6902_v43  ;;  %v6262_v40 = vor.u32 %v7457_v27, %v6259_v30  ;;  %v6486_v43 = vor.u32 %v7513_v31, %v6483_v32  ;;  %v8262_v27 = vld [vmem:[%s8394_s9] sm:$0xff]  ;;  %v6854_v31 = vor.u32 %v7608_v25, %v6853_v2  ;;  %v6965_v2 = vld [vmem:[#allocation16 + $0x5c8] sm:$0xf]  ;;  %v7636_v25 = vld [vmem:[#allocation16 + $0x5e0] sm:$0xf0]  ;;  %s8042_s9 = smov [#allocation18]  }
 0x342   :  { %v7078_v32 = vor.u32 %v7664_v10, %v7077_v62  ;;  %s4879_s25 = sshll.u32 %s8042_s9, 4  ;;  %s4880_s25 = int_to_ptr.vmem [resolvable:$true] %s4879_s25 }
 0x343   :  { %4465 = vmatpush.bf16.msrb.mxu0 %v6402_v36  ;;  %4479 = vmatpush.bf16.msrb.mxu1 %v6626_v39  ;;  %v7632_v36 = vld [vmem:[#allocation16 + $0x5c4] sm:$0xf]  ;;  %v6959_v39 = vld [vmem:[#allocation16 + $0x5dc] sm:$0xf0]  ;;  %4887 = dma.vmem_to_hbm [thread:$0]  %s4880_s25, 512, %s4882_s23, [#allocation19], %s8037_s0, %s8037_s0, %s8038_s1  }
 0x344   :  { %4444 = vmatmul.bf16.vlgmr.msra.gmra.mxu2 %v8235_v60  ;;  %4458 = vmatmul.bf16.vlgmr.msra.gmra.mxu3 %v8237_v61  ;;  %v6962_v48 = vor.u32 %v7632_v36, %v6959_v39  ;;  %v6825_v36 = vld [vmem:[#allocation16 + $0x4b0] sm:$0xf]  ;;  %v7601_v39 = vld [vmem:[#allocation16 + $0x4c8] sm:$0xf0]  ;;  %s4868_s0 = sshll.u32 %s8395_s10, 4  ;;  %s4869_s0 = int_to_ptr.hbm [resolvable:$true] %s4868_s0 }
 0x345   :  { %4492 = vmatpush.bf16.msrb.mxu2 %v6878_v46  ;;  %4506 = vmatpush.bf16.msrb.mxu3 %v7102_v47  ;;  %v7506_v46 = vld [vmem:[#allocation16 + $0x1d4] sm:$0xf]  ;;  %v6738_v47 = vor.u32 %v7576_v22, %v6735_v35  ;;  %v6573_v22 = vld [vmem:[#allocation16 + $0x2b8] sm:$0xf]  ;;  %v6826_v38 = vor.u32 %v7601_v39, %v6825_v36  ;;  %v6713_v36 = vld [vmem:[#allocation16 + $0x3d0] sm:$0xf] }
 0x346   :  { %v7538_v35 = vld [vmem:[#allocation16 + $0x2d0] sm:$0xf0]  ;;  %v7573_v39 = vld [vmem:[#allocation16 + $0x3e8] sm:$0xf0] }
 0x347   :  { %4466 = vmatpush.bf16.msrb.mxu0 %v6374_v51  ;;  %4480 = vmatpush.bf16.msrb.mxu1 %v6598_v52  ;;  %v7569_v51 = vld [vmem:[#allocation16 + $0x3cc] sm:$0xf]  ;;  %v6707_v52 = vld [vmem:[#allocation16 + $0x3e4] sm:$0xf0] }
 0x348   :  { %v6710_v63 = vor.u32 %v7569_v51, %v6707_v52  ;;  %v6797_v51 = vld [vmem:[#allocation16 + $0x478] sm:$0xf]  ;;  %v7594_v52 = vld [vmem:[#allocation16 + $0x490] sm:$0xf0] }
 0x349   :  { %4493 = vmatpush.bf16.msrb.mxu2 %v6850_v17  ;;  %4507 = vmatpush.bf16.msrb.mxu3 %v7074_v57  ;;  %v6234_v17 = vor.u32 %v7450_v44, %v6231_v45  ;;  %v6458_v57 = vor.u32 %v7506_v46, %v6455_v1  ;;  %v3018_v44 = vperm.slane %v8262_v27, 0  ;;  %v6574_v46 = vor.u32 %v7538_v35, %v6573_v22  ;;  %v7510_v35 = vld [vmem:[#allocation16 + $0x1f0] sm:$0xf0] }
 0x34a   :  { %v6966_v22 = vor.u32 %v7636_v25, %v6965_v2 }
 0x34b   :  { %4467 = vmatpush.bf16.msrb.mxu0 %v6346_v3  ;;  %4481 = vmatpush.bf16.msrb.mxu1 %v6570_v4  ;;  %v6934_v3 = vor.u32 %v7625_v0, %v6931_v53  ;;  %v7552_v4 = vld [vmem:[#allocation16 + $0x340] sm:$0xf0]  ;;  %v7021_v0 = vld [vmem:[#allocation16 + $0x638] sm:$0xf]  ;;  %v7650_v53 = vld [vmem:[#allocation16 + $0x650] sm:$0xf0] }
 0x34c   :  { %v6630_v23 = vor.u32 %v7552_v4, %v6629_v59  ;;  %v6798_v59 = vor.u32 %v7594_v52, %v6797_v51  ;;  %v7524_v4 = vld [vmem:[#allocation16 + $0x260] sm:$0xf0]  ;;  %v6685_v51 = vld [vmem:[#allocation16 + $0x398] sm:$0xf] }
 0x34d   :  { %4494 = vmatpush.bf16.msrb.mxu2 %v6822_v7  ;;  %4508 = vmatpush.bf16.msrb.mxu3 %v7046_v8  ;;  %v7618_v7 = vld [vmem:[#allocation16 + $0x554] sm:$0xf]  ;;  %v6903_v8 = vld [vmem:[#allocation16 + $0x56c] sm:$0xf0] }
 0x34f   :  { %4468 = vmatpush.bf16.msrb.mxu0 %v6318_v16  ;;  %4482 = vmatpush.bf16.msrb.mxu1 %v6542_v18  ;;  %v6682_v16 = vor.u32 %v7562_v5, %v6679_v6  ;;  %v6906_v18 = vor.u32 %v7618_v7, %v6903_v8  ;;  %v6769_v5 = vld [vmem:[#allocation16 + $0x440] sm:$0xf]  ;;  %v7587_v6 = vld [vmem:[#allocation16 + $0x458] sm:$0xf0] }
 0x350   :  { %v6993_v7 = vld [vmem:[#allocation16 + $0x600] sm:$0xf]  ;;  %v7643_v8 = vld [vmem:[#allocation16 + $0x618] sm:$0xf0] }
 0x351   :  { %4495 = vmatpush.bf16.msrb.mxu2 %v6794_v20  ;;  %4509 = vmatpush.bf16.msrb.mxu3 %v7018_v42  ;;  %v6882_v20 = vor.u32 %v7615_v12, %v6881_v9  ;;  %v7106_v42 = vor.u32 %v7671_v14, %v7105_v13  ;;  %v6294_v12 = vor.u32 %v7468_v58, %v6293_v56  ;;  %v6265_v14 = vld [vmem:[#allocation16 + $0x50] sm:$0xf] }
 0x353   :  { %4469 = vmatpush.bf16.msrb.mxu0 %v6290_v26  ;;  %4483 = vmatpush.bf16.msrb.mxu1 %v6514_v41  ;;  %v6378_v26 = vor.u32 %v7489_v37, %v6377_v19  ;;  %v6602_v41 = vor.u32 %v7545_v24, %v6601_v21  ;;  %v6994_v19 = vor.u32 %v7643_v8, %v6993_v7  ;;  %v6489_v37 = vld [vmem:[#allocation16 + $0x210] sm:$0xf]  ;;  %v7580_v24 = vld [vmem:[#allocation16 + $0x420] sm:$0xf0] }
 0x355   :  { %4496 = vmatpush.bf16.msrb.mxu2 %v6766_v28  ;;  %4510 = vmatpush.bf16.msrb.mxu3 %v6990_v29  ;;  %v6349_v28 = vld [vmem:[#allocation16 + $0xf8] sm:$0xf]  ;;  %v7482_v29 = vld [vmem:[#allocation16 + $0x110] sm:$0xf0] }
 0x356   :  { %v6350_v45 = vor.u32 %v7482_v29, %v6349_v28  ;;  %v6237_v28 = vld [vmem:[#allocation16 + $0x18] sm:$0xf]  ;;  %v7454_v29 = vld [vmem:[#allocation16 + $0x30] sm:$0xf0] }
 0x357   :  { %4470 = vmatpush.bf16.msrb.mxu0 %v6262_v40  ;;  %4484 = vmatpush.bf16.msrb.mxu1 %v6486_v43  ;;  %v7049_v40 = vld [vmem:[#allocation16 + $0x670] sm:$0xf]  ;;  %v7657_v43 = vld [vmem:[#allocation16 + $0x688] sm:$0xf0] }
 0x358   :  { %v7050_v49 = vor.u32 %v7657_v43, %v7049_v40 }
 0x359   :  { %4497 = vmatpush.bf16.msrb.mxu2 %v6738_v47  ;;  %4511 = vmatpush.bf16.msrb.mxu3 %v6962_v48  ;;  %v6321_v47 = vld [vmem:[#allocation16 + $0xc0] sm:$0xf]  ;;  %v7475_v48 = vld [vmem:[#allocation16 + $0xd8] sm:$0xf0] }
 0x35a   :  { %v4193_v30 = vpop.f32.mrf.mxu0  ;;  %v4207_v1 = vpop.f32.mrf.mxu1 }
 0x35b   :  { %4471 = vmatpush.bf16.msrb.mxu0 %v6234_v17  ;;  %4485 = vmatpush.bf16.msrb.mxu1 %v6458_v57  ;;  %v4194_v17 = vadd.f32 %v4193_v30, %v3018_v44  ;;  %v6322_v57 = vor.u32 %v7475_v48, %v6321_v47  ;;  %v6238_v48 = vor.u32 %v7454_v29, %v6237_v28 }
 0x35d   :  { %4498 = vmatpush.bf16.msrb.mxu2 %v6710_v63  ;;  %4512 = vmatpush.bf16.msrb.mxu3 %v6934_v3  ;;  %v7022_v63 = vor.u32 %v7650_v53, %v7021_v0  ;;  %v6517_v3 = vld [vmem:[#allocation16 + $0x248] sm:$0xf]  ;;  %v4208_v9 = vadd.f32 %v4207_v1, %v4194_v17  ;;  %v7566_v0 = vld [vmem:[#allocation16 + $0x3b0] sm:$0xf0]  ;;  %v6909_v53 = vld [vmem:[#allocation16 + $0x558] sm:$0xf] }
 0x35e   :  { %4472 = vmatmul.bf16.vlgmr.msrb.gmra.mxu0 %v8229_v33  ;;  %4486 = vmatmul.bf16.vlgmr.msrb.gmra.mxu1 %v8231_v34  ;;  %v6518_v13 = vor.u32 %v7524_v4, %v6517_v3  ;;  %v7622_v17 = vld [vmem:[#allocation16 + $0x570] sm:$0xf0]  ;;  %v6686_v56 = vor.u32 %v7566_v0, %v6685_v51 }
 0x35f   :  { %4520 = vmatpush.bf16.msra.mxu0 %v6434_v54  ;;  %4534 = vmatpush.bf16.msra.mxu1 %v6658_v55  ;;  %v6546_v54 = vor.u32 %v7531_v11, %v6545_v50  ;;  %v6714_v50 = vor.u32 %v7573_v39, %v6713_v36  ;;  %v6910_v58 = vor.u32 %v7622_v17, %v6909_v53 }
 0x361   :  { %4499 = vmatpush.bf16.msrb.mxu2 %v6682_v16  ;;  %4513 = vmatpush.bf16.msrb.mxu3 %v6906_v18  ;;  %v6770_v18 = vor.u32 %v7587_v6, %v6769_v5 }
 0x362   :  { %v4195_v55 = vpop.f32.mrf.mxu0  ;;  %v4209_v62 = vpop.f32.mrf.mxu1 }
 0x363   :  { %4521 = vmatpush.bf16.msra.mxu0 %v6406_v15  ;;  %4535 = vmatpush.bf16.msra.mxu1 %v6630_v23  ;;  %v7461_v15 = vld [vmem:[#allocation16 + $0x68] sm:$0xf0] }
 0x364   :  { %4500 = vmatmul.bf16.vlgmr.msrb.gmra.mxu2 %v8235_v60  ;;  %4514 = vmatmul.bf16.vlgmr.msrb.gmra.mxu3 %v8237_v61  ;;  %v6266_v10 = vor.u32 %v7461_v15, %v6265_v14 }
 0x365   :  { %4548 = vmatpush.bf16.msra.mxu2 %v6882_v20  ;;  %4562 = vmatpush.bf16.msra.mxu3 %v7106_v42  ;;  %v7517_v20 = vld [vmem:[#allocation16 + $0x228] sm:$0xf0]  ;;  %v6741_v42 = vld [vmem:[#allocation16 + $0x408] sm:$0xf] }
 0x366   :  { %v6490_v30 = vor.u32 %v7517_v20, %v6489_v37 }
 0x367   :  { %4522 = vmatpush.bf16.msra.mxu0 %v6378_v26  ;;  %4536 = vmatpush.bf16.msra.mxu1 %v6602_v41  ;;  %v4221_v23 = vpop.f32.mrf.mxu2  ;;  %v4235_v16 = vpop.f32.mrf.mxu3  ;;  %v4196_v26 = vadd.f32 %v4195_v55, %v3018_v44  ;;  %v3019_v44 = vperm.slane %v8262_v27, 1 }
 0x368   :  { %v4222_v21 = vadd.f32 %v4221_v23, %v4208_v9 }
 0x369   :  { %4549 = vmatpush.bf16.msra.mxu2 %v6854_v31  ;;  %4563 = vmatpush.bf16.msra.mxu3 %v7078_v32  ;;  %v6461_v31 = vld [vmem:[#allocation16 + $0x1d8] sm:$0xf]  ;;  %v6742_v32 = vor.u32 %v7580_v24, %v6741_v42  ;;  %v4210_v47 = vadd.f32 %v4209_v62, %v4196_v26  ;;  %v3020_v24 = vperm.slane %v8262_v27, 2 }
 0x36a   :  { %v4236_v41 = vadd.f32 %v4235_v16, %v4222_v21  ;;  %v6462_v1 = vor.u32 %v7510_v35, %v6461_v31 }
 0x36b   :  { %4523 = vmatpush.bf16.msra.mxu0 %v6350_v45  ;;  %4537 = vmatpush.bf16.msra.mxu1 %v6574_v46  ;;  %v4249_v43 = vpop.f32.mrf.mxu0  ;;  %v6937_v45 = vld [vmem:[#allocation16 + $0x590] sm:$0xf]  ;;  %v7629_v46 = vld [vmem:[#allocation16 + $0x5a8] sm:$0xf0]  ;;  %v4263_v55 = vpop.f32.mrf.mxu1 }
 0x36c   :  { %v7107_v40 = vmul.f32 -1.442695, %v4236_v41  ;;  %v6938_v11 = vor.u32 %v7629_v46, %v6937_v45 }
 0x36d   :  { %4550 = vmatpush.bf16.msra.mxu2 %v6826_v38  ;;  %4564 = vmatpush.bf16.msra.mxu3 %v7050_v49 }
 0x36e   :  { %7693 = vpow2.f32 %v7107_v40 }
 0x36f   :  { %4524 = vmatpush.bf16.msra.mxu0 %v6322_v57  ;;  %4538 = vmatpush.bf16.msra.mxu1 %v6546_v54  ;;  %v4223_v38 = vpop.f32.mrf.mxu2  ;;  %v4237_v49 = vpop.f32.mrf.mxu3  ;;  %v4250_v57 = vadd.f32 %v4249_v43, %v3019_v44 }
 0x370   :  { %v4224_v52 = vadd.f32 %v4223_v38, %v4210_v47 }
 0x371   :  { %4551 = vmatpush.bf16.msra.mxu2 %v6798_v59  ;;  %4565 = vmatpush.bf16.msra.mxu3 %v7022_v63  ;;  %v4264_v3 = vadd.f32 %v4263_v55, %v4250_v57 }
 0x372   :  { %v4238_v54 = vadd.f32 %v4237_v49, %v4224_v52 }
 0x373   :  { %4525 = vmatpush.bf16.msra.mxu0 %v6294_v12  ;;  %4539 = vmatpush.bf16.msra.mxu1 %v6518_v13  ;;  %v4251_v4 = vpop.f32.mrf.mxu0  ;;  %v4265_v13 = vpop.f32.mrf.mxu1 }
 0x374   :  { %v7694_v59 = vpop.eup %7693  ;;  %v7114_v63 = vmul.f32 -1.442695, %v4238_v54  ;;  %v4252_v9 = vadd.f32 %v4251_v4, %v3019_v44 }
 0x375   :  { %4552 = vmatpush.bf16.msra.mxu2 %v6770_v18  ;;  %4566 = vmatpush.bf16.msra.mxu3 %v6994_v19  ;;  %v8270_v5 = vadd.f32 1.0, %v7694_v59 }
 0x376   :  { %7695 = vpow2.f32 %v7114_v63  ;;  %v4266_v14 = vadd.f32 %v4265_v13, %v4252_v9 }
 0x377   :  { %4526 = vmatpush.bf16.msra.mxu0 %v6266_v10  ;;  %4540 = vmatpush.bf16.msra.mxu1 %v6490_v30  ;;  %v4277_v6 = vpop.f32.mrf.mxu2  ;;  %v4291_v7 = vpop.f32.mrf.mxu3  ;;  %7697 = vrcp.f32 %v8270_v5  ;;  %vm4637_vm1 = vweird.f32 %v8270_v5  ;;  %v4643_v46 = vand.u32 2147483648, %v8270_v5 }
 0x378   :  { %v4278_v8 = vadd.f32 %v4277_v6, %v4264_v3 }
 0x379   :  { %4553 = vmatpush.bf16.msra.mxu2 %v6742_v32  ;;  %4567 = vmatpush.bf16.msra.mxu3 %v6966_v22  ;;  %v4644_v57 = vor.u32 1.1754944e-38, %v4643_v46 }
 0x37a   :  { %v4292_v12 = vadd.f32 %v4291_v7, %v4278_v8 }
 0x37b   :  { %4527 = vmatpush.bf16.msra.mxu0 %v6238_v48  ;;  %4541 = vmatpush.bf16.msra.mxu1 %v6462_v1  ;;  %v4319_v10 = vpop.f32.mrf.mxu1  ;;  %v4641_v48 = vand.u32 2147483647, %v8270_v5 }
 0x37d   :  { %4554 = vmatpush.bf16.msra.mxu2 %v6714_v50  ;;  %4568 = vmatpush.bf16.msra.mxu3 %v6938_v11  ;;  %vm4642_vm6 = vcmp.eq.f32.partialorder %v4641_v48, 8.507059e+37 }
 0x37e   :  { %4528 = vmatmul.bf16.vlgmr.msra.gmra.mxu0 %v8229_v33  ;;  %4542 = vmatmul.bf16.vlgmr.msra.gmra.mxu1 %v8231_v34  ;;  %v7696_v33 = vpop.eup %7695  ;;  %v7108_v34 = vmul.f32 -1.442695, %v4292_v12 }
 0x37f   :  { %v8275_v15 = vadd.f32 1.0, %v7696_v33  ;;  %v4279_v23 = vpop.f32.mrf.mxu2  ;;  %v7698_v18 = vpop.eup %7697 }
 0x380   :  { %7699 = vpow2.f32 %v7108_v34  ;;  %v4280_v16 = vadd.f32 %v4279_v23, %v4266_v14  ;;  %v4293_v19 = vpop.f32.mrf.mxu3  ;;  %vm4638_vm0 = vweird.f32 %v7698_v18 }
 0x381   :  { %4555 = vmatpush.bf16.msra.mxu2 %v6686_v56  ;;  %4569 = vmatpush.bf16.msra.mxu3 %v6910_v58  ;;  %7701 = vrcp.f32 %v8275_v15  ;;  %vm8290_vm3 = vmor %vm4637_vm1, %vm4638_vm0  ;;  %vm4742_vm9 = vweird.f32 %v8275_v15  ;;  %v4748_v8 = vand.u32 2147483648, %v8275_v15  ;;  %v4746_v33 = vand.u32 2147483647, %v8275_v15 }
 0x382   :  { %v4294_v37 = vadd.f32 %v4293_v19, %v4280_v16  ;;  %v3021_v16 = vperm.slane %v8262_v27, 3 }
 0x383   :  { %v4321_v0 = vpop.f32.mrf.mxu1  ;;  %vm4747_vm14 = vcmp.eq.f32.partialorder %v4746_v33, 8.507059e+37 }
 0x384   :  { %4556 = vmatmul.bf16.vlgmr.msra.gmra.mxu2 %v8235_v60  ;;  %4570 = vmatmul.bf16.vlgmr.msra.gmra.mxu3 %v8237_v61  ;;  %v4633_v60 = vmul.f32 %v7698_v18, %v8270_v5  ;;  %v4305_v61 = vpop.f32.mrf.mxu0  ;;  %v7115_v42 = vmul.f32 -1.442695, %v4294_v37  ;;  %v4749_v37 = vor.u32 1.1754944e-38, %v4748_v8 }
 0x385   :  { %v4306_v62 = vadd.f32 %v4305_v61, %v3020_v24 }
 0x386   :  { %v7700_v20 = vpop.eup %7699  ;;  %7703 = vpow2.f32 %v7115_v42  ;;  %v4634_v2 = vsub.f32 1.0, %v4633_v60 }
 0x387   :  { %v4619_v21 = vadd.f32 1.0, %v7700_v20  ;;  %v8280_v25 = vpop.eup %7701  ;;  %v4333_v26 = vpop.f32.mrf.mxu2  ;;  %v4320_v31 = vadd.f32 %v4319_v10, %v4306_v62 }
 0x388   :  { %v4635_v30 = vmul.f32 %v7698_v18, %v4634_v2  ;;  %v4738_v28 = vmul.f32 %v8280_v25, %v8275_v15  ;;  %v4347_v45 = vpop.f32.mrf.mxu3  ;;  %vm4743_vm8 = vweird.f32 %v8280_v25 }
 0x389   :  { %7705 = vrcp.f32 %v4619_v21  ;;  %v4334_v36 = vadd.f32 %v4333_v26, %v4320_v31  ;;  %v4658_v44 = vand.u32 2147483648, %v4619_v21  ;;  %v4656_v38 = vand.u32 2147483647, %v4619_v21  ;;  %vm4744_vm11 = vmor %vm4742_vm9, %vm4743_vm8 }
 0x38a   :  { %v4636_v39 = vadd.f32 %v7698_v18, %v4635_v30  ;;  %v4739_v40 = vsub.f32 1.0, %v4738_v28  ;;  %vm4652_vm4 = vweird.f32 %v4619_v21 }
 0x38b   :  { %v4348_v50 = vadd.f32 %v4347_v45, %v4334_v36  ;;  %v4659_v54 = vor.u32 1.1754944e-38, %v4658_v44  ;;  %vm4657_vm7 = vcmp.eq.f32.partialorder %v4656_v38, 8.507059e+37 }
 0x38c   :  { %v7704_v41 = vpop.eup %7703  ;;  %v4307_v35 = vpop.f32.mrf.mxu0  ;;  %v4640_v11 = vsel %vm8290_vm3, %v7698_v18, %v4636_v39  ;;  %v4740_v51 = vmul.f32 %v8280_v25, %v4739_v40 }
 0x38d   :  { %v8284_v32 = vadd.f32 1.0, %v7704_v41  ;;  %v4308_v47 = vadd.f32 %v4307_v35, %v3020_v24  ;;  %v4645_v59 = vsel %vm4642_vm6, %v4644_v57, %v4640_v11  ;;  %v7109_v3 = vmul.f32 -1.442695, %v4348_v50 }
 0x38e   :  { %v4741_v5 = vadd.f32 %v8280_v25, %v4740_v51 }
 0x38f   :  { %v7706_v29 = vpop.eup %7705  ;;  %7707 = vrcp.f32 %v8284_v32  ;;  %v4335_v53 = vpop.f32.mrf.mxu2  ;;  %v4322_v55 = vadd.f32 %v4321_v0, %v4308_v47  ;;  %v4763_v9 = vand.u32 2147483648, %v8284_v32  ;;  %v4761_v13 = vand.u32 2147483647, %v8284_v32 }
 0x390   :  { %v4648_v22 = vmul.f32 %v7706_v29, %v4619_v21  ;;  %vm4653_vm2 = vweird.f32 %v7706_v29  ;;  %v4349_v14 = vpop.f32.mrf.mxu3  ;;  %7709 = vpow2.f32 %v7109_v3  ;;  %v4745_v18 = vsel %vm4744_vm11, %v8280_v25, %v4741_v5 }
 0x391   :  { %vm4654_vm5 = vmor %vm4652_vm4, %vm4653_vm2  ;;  %v4336_v4 = vadd.f32 %v4335_v53, %v4322_v55  ;;  %vm4757_vm12 = vweird.f32 %v8284_v32  ;;  %v4764_v20 = vor.u32 1.1754944e-38, %v4763_v9  ;;  %vm4762_vm15 = vcmp.eq.f32.partialorder %v4761_v13, 8.507059e+37 }
 0x392   :  { %v4649_v43 = vsub.f32 1.0, %v4648_v22  ;;  %v4750_v60 = vsel %vm4747_vm14, %v4749_v37, %v4745_v18  ;;  %v3022_v5 = vperm.slane %v8262_v27, 4 }
 0x393   :  { %v4350_v23 = vadd.f32 %v4349_v14, %v4336_v4 }
 0x394   :  { %v4650_v1 = vmul.f32 %v7706_v29, %v4649_v43 }
 0x395   :  { %v7708_v17 = vpop.eup %7707  ;;  %v7116_v42 = vmul.f32 -1.442695, %v4350_v23 }
 0x396   :  { %v4651_v52 = vadd.f32 %v7706_v29, %v4650_v1  ;;  %v4753_v58 = vmul.f32 %v7708_v17, %v8284_v32  ;;  %vm4758_vm10 = vweird.f32 %v7708_v17  ;;  %v7710_v62 = vpop.eup %7709 }
 0x397   :  { %vm4759_vm13 = vmor %vm4757_vm12, %vm4758_vm10  ;;  %7711 = vpow2.f32 %v7116_v42  ;;  %v4620_v26 = vadd.f32 1.0, %v7710_v62 }
 0x398   :  { %v4655_v56 = vsel %vm4654_vm5, %v7706_v29, %v4651_v52  ;;  %v4754_v7 = vsub.f32 1.0, %v4753_v58 }
 0x399   :  { %v4660_v63 = vsel %vm4657_vm7, %v4659_v54, %v4655_v56  ;;  %7713 = vrcp.f32 %v4620_v26  ;;  %vm4667_vm1 = vweird.f32 %v4620_v26  ;;  %v4673_v56 = vand.u32 2147483648, %v4620_v26 }
 0x39a   :  { %v4842_v6 = vpack.c.bf16 %v4660_v63, %v4645_v59  ;;  %v4755_v34 = vmul.f32 %v7708_v17, %v4754_v7  ;;  %v4671_v59 = vand.u32 2147483647, %v4620_v26 }
 0x39b   :  { %v4361_v12 = vpop.f32.mrf.mxu0  ;;  %v4375_v2 = vpop.f32.mrf.mxu1  ;;  %v4674_v33 = vor.u32 1.1754944e-38, %v4673_v56 }
 0x39c   :  { %4850 = vst [vmem:[#allocation17] sm:$0xff] %v4842_v6  ;;  %v4756_v19 = vadd.f32 %v7708_v17, %v4755_v34  ;;  %v4362_v21 = vadd.f32 %v4361_v12, %v3021_v16  ;;  %vm4672_vm6 = vcmp.eq.f32.partialorder %v4671_v59, 8.507059e+37 }
 0x39d   :  { %v7712_v32 = vpop.eup %7711 }
 0x39e   :  { %v4760_v15 = vsel %vm4759_vm13, %v7708_v17, %v4756_v19  ;;  %v4376_v10 = vadd.f32 %v4375_v2, %v4362_v21  ;;  %v8311_v39 = vadd.f32 1.0, %v7712_v32 }
 0x39f   :  { %v4765_v61 = vsel %vm4762_vm15, %v4764_v20, %v4760_v15  ;;  %v7714_v45 = vpop.eup %7713 }
 0x3a0   :  { %v4846_v24 = vpack.c.bf16 %v4765_v61, %v4750_v60  ;;  %v4663_v48 = vmul.f32 %v7714_v45, %v4620_v26  ;;  %vm4668_vm0 = vweird.f32 %v7714_v45  ;;  %vm4772_vm9 = vweird.f32 %v8311_v39 }
 0x3a1   :  { %vm8321_vm3 = vmor %vm4667_vm1, %vm4668_vm0  ;;  %v4778_v15 = vand.u32 2147483648, %v8311_v39  ;;  %v4776_v21 = vand.u32 2147483647, %v8311_v39 }
 0x3a2   :  { %4854 = vst [vmem:[#allocation17 + $0x1c] sm:$0xff] %v4846_v24  ;;  %v4664_v49 = vsub.f32 1.0, %v4663_v48 }
 0x3a3   :  { %v4363_v25 = vpop.f32.mrf.mxu0  ;;  %v4377_v35 = vpop.f32.mrf.mxu1  ;;  %v4779_v26 = vor.u32 1.1754944e-38, %v4778_v15  ;;  %vm4777_vm14 = vcmp.eq.f32.partialorder %v4776_v21, 8.507059e+37 }
 0x3a4   :  { %v4364_v29 = vadd.f32 %v4363_v25, %v3021_v16  ;;  %v4665_v51 = vmul.f32 %v7714_v45, %v4664_v49 }
 0x3a6   :  { %v4378_v36 = vadd.f32 %v4377_v35, %v4364_v29  ;;  %v4666_v57 = vadd.f32 %v7714_v45, %v4665_v51 }
 0x3a7   :  { %v4389_v41 = vpop.f32.mrf.mxu2  ;;  %v4403_v30 = vpop.f32.mrf.mxu3 }
 0x3a8   :  { %v4390_v28 = vadd.f32 %v4389_v41, %v4376_v10  ;;  %v4670_v7 = vsel %vm8321_vm3, %v7714_v45, %v4666_v57 }
 0x3a9   :  { %v4675_v23 = vsel %vm4672_vm6, %v4674_v33, %v4670_v7 }
 0x3aa   :  { %v4404_v31 = vadd.f32 %v4403_v30, %v4390_v28 }
 0x3ac   :  { %v7110_v22 = vmul.f32 -1.442695, %v4404_v31 }
 0x3ae   :  { %7715 = vpow2.f32 %v7110_v22 }
 0x3af   :  { %v4391_v40 = vpop.f32.mrf.mxu2  ;;  %v4405_v46 = vpop.f32.mrf.mxu3  ;;  %7717 = vrcp.f32 %v8311_v39 }
 0x3b0   :  { %v4392_v43 = vadd.f32 %v4391_v40, %v4378_v36 }
 0x3b2   :  { %v4406_v44 = vadd.f32 %v4405_v46, %v4392_v43 }
 0x3b4   :  { %v7716_v47 = vpop.eup %7715  ;;  %v7117_v1 = vmul.f32 -1.442695, %v4406_v44 }
 0x3b5   :  { %v4621_v38 = vadd.f32 1.0, %v7716_v47  ;;  %v8317_v50 = vpop.eup %7717 }
 0x3b6   :  { %7719 = vpow2.f32 %v7117_v1  ;;  %v4768_v52 = vmul.f32 %v8317_v50, %v8311_v39  ;;  %vm4773_vm8 = vweird.f32 %v8317_v50 }
 0x3b7   :  { %7721 = vrcp.f32 %v4621_v38  ;;  %v4688_v58 = vand.u32 2147483648, %v4621_v38  ;;  %v4686_v3 = vand.u32 2147483647, %v4621_v38  ;;  %vm4682_vm4 = vweird.f32 %v4621_v38  ;;  %vm4774_vm11 = vmor %vm4772_vm9, %vm4773_vm8 }
 0x3b8   :  { %v4769_v54 = vsub.f32 1.0, %v4768_v52 }
 0x3b9   :  { %v4689_v34 = vor.u32 1.1754944e-38, %v4688_v58  ;;  %vm4687_vm7 = vcmp.eq.f32.partialorder %v4686_v3, 8.507059e+37 }
 0x3ba   :  { %v4770_v8 = vmul.f32 %v8317_v50, %v4769_v54 }
 0x3bb   :  { %v4417_v6 = vpop.f32.mrf.mxu0  ;;  %v4431_v61 = vpop.f32.mrf.mxu1 }
 0x3bc   :  { %v7720_v11 = vpop.eup %7719  ;;  %v4771_v18 = vadd.f32 %v8317_v50, %v4770_v8  ;;  %v4418_v20 = vadd.f32 %v4417_v6, %v3022_v5 }
 0x3bd   :  { %v7722_v0 = vpop.eup %7721  ;;  %v4628_v53 = vadd.f32 1.0, %v7720_v11 }
 0x3be   :  { %v4678_v17 = vmul.f32 %v7722_v0, %v4621_v38  ;;  %vm4683_vm2 = vweird.f32 %v7722_v0  ;;  %v4775_v62 = vsel %vm4774_vm11, %v8317_v50, %v4771_v18  ;;  %v4432_v25 = vadd.f32 %v4431_v61, %v4418_v20 }
 0x3bf   :  { %7723 = vrcp.f32 %v4628_v53  ;;  %vm4684_vm5 = vmor %vm4682_vm4, %vm4683_vm2  ;;  %v4793_v60 = vand.u32 2147483648, %v4628_v53  ;;  %v4791_v2 = vand.u32 2147483647, %v4628_v53  ;;  %vm4787_vm12 = vweird.f32 %v4628_v53 }
 0x3c0   :  { %v4679_v55 = vsub.f32 1.0, %v4678_v17  ;;  %v4780_v31 = vsel %vm4777_vm14, %v4779_v26, %v4775_v62  ;;  %v3023_v38 = vperm.slane %v8262_v27, 5  ;;  %v3024_v18 = vperm.slane %v8262_v27, 6 }
 0x3c1   :  { %v4794_v41 = vor.u32 1.1754944e-38, %v4793_v60  ;;  %vm4792_vm15 = vcmp.eq.f32.partialorder %v4791_v2, 8.507059e+37 }
 0x3c2   :  { %v4680_v63 = vmul.f32 %v7722_v0, %v4679_v55 }
 0x3c3   :  { %v4419_v30 = vpop.f32.mrf.mxu0  ;;  %v4433_v40 = vpop.f32.mrf.mxu1 }
 0x3c4   :  { %v4681_v9 = vadd.f32 %v7722_v0, %v4680_v63  ;;  %v4420_v36 = vadd.f32 %v4419_v30, %v3022_v5 }
 0x3c5   :  { %v7724_v12 = vpop.eup %7723 }
 0x3c6   :  { %v4685_v13 = vsel %vm4684_vm5, %v7722_v0, %v4681_v9  ;;  %v4783_v14 = vmul.f32 %v7724_v12, %v4628_v53  ;;  %vm4788_vm10 = vweird.f32 %v7724_v12  ;;  %v4434_v45 = vadd.f32 %v4433_v40, %v4420_v36 }
 0x3c7   :  { %v4690_v16 = vsel %vm4687_vm7, %v4689_v34, %v4685_v13  ;;  %v4445_v42 = vpop.f32.mrf.mxu2  ;;  %vm4789_vm13 = vmor %vm4787_vm12, %vm4788_vm10  ;;  %v4459_v22 = vpop.f32.mrf.mxu3 }
 0x3c8   :  { %v4843_v19 = vpack.c.bf16 %v4690_v16, %v4675_v23  ;;  %v4784_v37 = vsub.f32 1.0, %v4783_v14  ;;  %v4446_v29 = vadd.f32 %v4445_v42, %v4432_v25 }
 0x3ca   :  { %4851 = vst [vmem:[#allocation17 + $0x8] sm:$0xff] %v4843_v19  ;;  %v4785_v24 = vmul.f32 %v7724_v12, %v4784_v37  ;;  %v4460_v39 = vadd.f32 %v4459_v22, %v4446_v29 }
 0x3cc   :  { %v4786_v10 = vadd.f32 %v7724_v12, %v4785_v24  ;;  %v7111_v46 = vmul.f32 -1.442695, %v4460_v39 }
 0x3ce   :  { %v4790_v28 = vsel %vm4789_vm13, %v7724_v12, %v4786_v10  ;;  %7725 = vpow2.f32 %v7111_v46 }
 0x3cf   :  { %v4795_v32 = vsel %vm4792_vm15, %v4794_v41, %v4790_v28  ;;  %v4447_v43 = vpop.f32.mrf.mxu2  ;;  %v4461_v48 = vpop.f32.mrf.mxu3 }
 0x3d0   :  { %v4847_v35 = vpack.c.bf16 %v4795_v32, %v4780_v31  ;;  %v4448_v44 = vadd.f32 %v4447_v43, %v4434_v45 }
 0x3d2   :  { %4855 = vst [vmem:[#allocation17 + $0x24] sm:$0xff] %v4847_v35  ;;  %v4462_v1 = vadd.f32 %v4461_v48, %v4448_v44 }
 0x3d4   :  { %v7118_v49 = vmul.f32 -1.442695, %v4462_v1  ;;  %v7726_v51 = vpop.eup %7725 }
 0x3d5   :  { %v8338_v53 = vadd.f32 1.0, %v7726_v51 }
 0x3d6   :  { %7727 = vpow2.f32 %v7118_v49 }
 0x3d7   :  { %7729 = vrcp.f32 %v8338_v53  ;;  %vm4697_vm1 = vweird.f32 %v8338_v53  ;;  %v4703_v27 = vand.u32 2147483648, %v8338_v53  ;;  %v4701_v25 = vand.u32 2147483647, %v8338_v53 }
 0x3d9   :  { %v4704_v40 = vor.u32 1.1754944e-38, %v4703_v27  ;;  %vm4702_vm6 = vcmp.eq.f32.partialorder %v4701_v25, 8.507059e+37 }
 0x3db   :  { %v4473_v47 = vpop.f32.mrf.mxu0  ;;  %v4487_v11 = vpop.f32.mrf.mxu1 }
 0x3dc   :  { %v4474_v50 = vadd.f32 %v4473_v47, %v3023_v38  ;;  %v7728_v58 = vpop.eup %7727 }
 0x3dd   :  { %v8341_v4 = vadd.f32 1.0, %v7728_v58  ;;  %v7730_v7 = vpop.eup %7729 }
 0x3de   :  { %v4488_v52 = vadd.f32 %v4487_v11, %v4474_v50  ;;  %v4693_v33 = vmul.f32 %v7730_v7, %v8338_v53  ;;  %vm4698_vm0 = vweird.f32 %v7730_v7 }
 0x3df   :  { %vm8356_vm3 = vmor %vm4697_vm1, %vm4698_vm0  ;;  %vm4802_vm9 = vweird.f32 %v8341_v4  ;;  %v4808_v51 = vand.u32 2147483648, %v8341_v4  ;;  %v4806_v53 = vand.u32 2147483647, %v8341_v4 }
 0x3e0   :  { %v4694_v14 = vsub.f32 1.0, %v4693_v33 }
 0x3e1   :  { %vm4807_vm14 = vcmp.eq.f32.partialorder %v4806_v53, 8.507059e+37 }
 0x3e2   :  { %v4695_v37 = vmul.f32 %v7730_v7, %v4694_v14 }
 0x3e3   :  { %v4475_v0 = vpop.f32.mrf.mxu0  ;;  %v4489_v63 = vpop.f32.mrf.mxu1 }
 0x3e4   :  { %v4476_v55 = vadd.f32 %v4475_v0, %v3023_v38  ;;  %v4696_v21 = vadd.f32 %v7730_v7, %v4695_v37 }
 0x3e6   :  { %v4490_v3 = vadd.f32 %v4489_v63, %v4476_v55  ;;  %v4700_v31 = vsel %vm8356_vm3, %v7730_v7, %v4696_v21 }
 0x3e7   :  { %v4501_v17 = vpop.f32.mrf.mxu2  ;;  %v4515_v57 = vpop.f32.mrf.mxu3  ;;  %v4705_v47 = vsel %vm4702_vm6, %v4704_v40, %v4700_v31 }
 0x3e8   :  { %v4502_v54 = vadd.f32 %v4501_v17, %v4488_v52 }
 0x3ea   :  { %v4516_v56 = vadd.f32 %v4515_v57, %v4502_v54 }
 0x3ec   :  { %v7112_v59 = vmul.f32 -1.442695, %v4516_v56 }
 0x3ee   :  { %7731 = vpow2.f32 %v7112_v59 }
 0x3ef   :  { %v4503_v5 = vpop.f32.mrf.mxu2  ;;  %v4517_v8 = vpop.f32.mrf.mxu3  ;;  %7733 = vrcp.f32 %v8341_v4 }
 0x3f0   :  { %v4504_v6 = vadd.f32 %v4503_v5, %v4490_v3  ;;  %v4809_v3 = vor.u32 1.1754944e-38, %v4808_v51 }
 0x3f2   :  { %v4518_v9 = vadd.f32 %v4517_v8, %v4504_v6 }
 0x3f4   :  { %v7732_v12 = vpop.eup %7731  ;;  %v7119_v34 = vmul.f32 -1.442695, %v4518_v9 }
 0x3f5   :  { %v4623_v13 = vadd.f32 1.0, %v7732_v12  ;;  %v8345_v23 = vpop.eup %7733 }
 0x3f6   :  { %7735 = vpow2.f32 %v7119_v34  ;;  %v4798_v20 = vmul.f32 %v8345_v23, %v8341_v4  ;;  %vm4803_vm8 = vweird.f32 %v8345_v23 }
 0x3f7   :  { %7737 = vrcp.f32 %v4623_v13  ;;  %v4718_v10 = vand.u32 2147483648, %v4623_v13  ;;  %v4716_v41 = vand.u32 2147483647, %v4623_v13  ;;  %vm4712_vm4 = vweird.f32 %v4623_v13  ;;  %vm8371_vm11 = vmor %vm4802_vm9, %vm4803_vm8 }
 0x3f8   :  { %v4799_v24 = vsub.f32 1.0, %v4798_v20 }
 0x3f9   :  { %v4719_v43 = vor.u32 1.1754944e-38, %v4718_v10  ;;  %vm4717_vm7 = vcmp.eq.f32.partialorder %v4716_v41, 8.507059e+37 }
 0x3fa   :  { %v4800_v32 = vmul.f32 %v8345_v23, %v4799_v24 }
 0x3fb   :  { %v4529_v16 = vpop.f32.mrf.mxu0  ;;  %v4543_v62 = vpop.f32.mrf.mxu1 }
 0x3fc   :  { %v7736_v19 = vpop.eup %7735  ;;  %v4530_v42 = vadd.f32 %v4529_v16, %v3024_v18  ;;  %v4801_v49 = vadd.f32 %v8345_v23, %v4800_v32 }
 0x3fd   :  { %v7738_v15 = vpop.eup %7737  ;;  %v8350_v60 = vadd.f32 1.0, %v7736_v19 }
 0x3fe   :  { %v4708_v61 = vmul.f32 %v7738_v15, %v4623_v13  ;;  %vm4713_vm2 = vweird.f32 %v7738_v15  ;;  %v4544_v28 = vadd.f32 %v4543_v62, %v4530_v42  ;;  %v4805_v58 = vsel %vm8371_vm11, %v8345_v23, %v4801_v49 }
 0x3ff   :  { %7739 = vrcp.f32 %v8350_v60  ;;  %vm4714_vm5 = vmor %vm4712_vm4, %vm4713_vm2  ;;  %v4823_v52 = vand.u32 2147483648, %v8350_v60  ;;  %v4821_v57 = vand.u32 2147483647, %v8350_v60  ;;  %vm4817_vm12 = vweird.f32 %v8350_v60 }
 0x400   :  { %v4709_v2 = vsub.f32 1.0, %v4708_v61  ;;  %v4810_v8 = vsel %vm4807_vm14, %v4809_v3, %v4805_v58 }
 0x401   :  { %v4824_v4 = vor.u32 1.1754944e-38, %v4823_v52  ;;  %vm4822_vm15 = vcmp.eq.f32.partialorder %v4821_v57, 8.507059e+37 }
 0x402   :  { %v4710_v26 = vmul.f32 %v7738_v15, %v4709_v2 }
 0x403   :  { %v4531_v29 = vpop.f32.mrf.mxu0  ;;  %v4545_v54 = vpop.f32.mrf.mxu1 }
 0x404   :  { %v4711_v22 = vadd.f32 %v7738_v15, %v4710_v26  ;;  %v4532_v1 = vadd.f32 %v4531_v29, %v3024_v18 }
 0x405   :  { %v7740_v39 = vpop.eup %7739 }
 0x406   :  { %v4715_v46 = vsel %vm4714_vm5, %v7738_v15, %v4711_v22  ;;  %v4813_v44 = vmul.f32 %v7740_v39, %v8350_v60  ;;  %vm4818_vm10 = vweird.f32 %v7740_v39  ;;  %v4546_v56 = vadd.f32 %v4545_v54, %v4532_v1 }
 0x407   :  { %v4557_v35 = vpop.f32.mrf.mxu2  ;;  %v4571_v36 = vpop.f32.mrf.mxu3  ;;  %v4720_v48 = vsel %vm4717_vm7, %v4719_v43, %v4715_v46  ;;  %vm4819_vm13 = vmor %vm4817_vm12, %vm4818_vm10 }
 0x408   :  { %v4558_v45 = vadd.f32 %v4557_v35, %v4544_v28  ;;  %v4844_v50 = vpack.c.bf16 %v4720_v48, %v4705_v47  ;;  %v4814_v11 = vsub.f32 1.0, %v4813_v44 }
 0x40a   :  { %v4572_v38 = vadd.f32 %v4571_v36, %v4558_v45  ;;  %4852 = vst [vmem:[#allocation17 + $0x10] sm:$0xff] %v4844_v50  ;;  %v4815_v17 = vmul.f32 %v7740_v39, %v4814_v11 }
 0x40c   :  { %v7113_v0 = vmul.f32 -1.442695, %v4572_v38  ;;  %v4816_v59 = vadd.f32 %v7740_v39, %v4815_v17 }
 0x40e   :  { %7741 = vpow2.f32 %v7113_v0  ;;  %v4820_v6 = vsel %vm4819_vm13, %v7740_v39, %v4816_v59 }
 0x40f   :  { %v4559_v63 = vpop.f32.mrf.mxu2  ;;  %v4573_v7 = vpop.f32.mrf.mxu3  ;;  %v4825_v9 = vsel %vm4822_vm15, %v4824_v4, %v4820_v6 }
 0x410   :  { %v4560_v5 = vadd.f32 %v4559_v63, %v4546_v56  ;;  %v4848_v33 = vpack.c.bf16 %v4825_v9, %v4810_v8 }
 0x412   :  { %v4574_v12 = vadd.f32 %v4573_v7, %v4560_v5  ;;  %4856 = vst [vmem:[#allocation17 + $0x2c] sm:$0xff] %v4848_v33 }
 0x414   :  { %v7742_v34 = vpop.eup %7741  ;;  %v7120_v13 = vmul.f32 -1.442695, %v4574_v12 }
 0x415   :  { %v4624_v14 = vadd.f32 1.0, %v7742_v34 }
 0x416   :  { %7743 = vpow2.f32 %v7120_v13 }
 0x417   :  { %7745 = vrcp.f32 %v4624_v14  ;;  %v4733_v20 = vand.u32 2147483648, %v4624_v14  ;;  %v4731_v60 = vand.u32 2147483647, %v4624_v14  ;;  %vm4727_vm1 = vweird.f32 %v4624_v14 }
 0x419   :  { %v4734_v21 = vor.u32 1.1754944e-38, %v4733_v20  ;;  %vm4732_vm3 = vcmp.eq.f32.partialorder %v4731_v60, 8.507059e+37 }
 0x41c   :  { %v7744_v23 = vpop.eup %7743 }
 0x41d   :  { %v7746_v16 = vpop.eup %7745  ;;  %v4631_v18 = vadd.f32 1.0, %v7744_v23 }
 0x41e   :  { %v4723_v19 = vmul.f32 %v7746_v16, %v4624_v14  ;;  %vm4728_vm0 = vweird.f32 %v7746_v16 }
 0x41f   :  { %7747 = vrcp.f32 %v4631_v18  ;;  %vm4729_vm2 = vmor %vm4727_vm1, %vm4728_vm0  ;;  %v4838_v25 = vand.u32 2147483648, %v4631_v18  ;;  %v4836_v41 = vand.u32 2147483647, %v4631_v18  ;;  %vm4832_vm5 = vweird.f32 %v4631_v18 }
 0x420   :  { %v4724_v37 = vsub.f32 1.0, %v4723_v19 }
 0x421   :  { %v4839_v28 = vor.u32 1.1754944e-38, %v4838_v25  ;;  %vm4837_vm7 = vcmp.eq.f32.partialorder %v4836_v41, 8.507059e+37 }
 0x422   :  { %v4725_v15 = vmul.f32 %v7746_v16, %v4724_v37 }
 0x424   :  { %v4726_v61 = vadd.f32 %v7746_v16, %v4725_v15 }
 0x425   :  { %v7748_v42 = vpop.eup %7747 }
 0x426   :  { %v4730_v24 = vsel %vm4729_vm2, %v7746_v16, %v4726_v61  ;;  %v4828_v2 = vmul.f32 %v7748_v42, %v4631_v18  ;;  %vm4833_vm4 = vweird.f32 %v7748_v42 }
 0x427   :  { %v4735_v62 = vsel %vm4732_vm3, %v4734_v21, %v4730_v24  ;;  %vm4834_vm6 = vmor %vm4832_vm5, %vm4833_vm4 }
 0x428   :  { %v4845_v27 = vpack.c.bf16 %v4735_v62, %v4735_v62  ;;  %v4829_v10 = vsub.f32 1.0, %v4828_v2 }
 0x42a   :  { %4853 = vst [vmem:[#allocation17 + $0x18] sm:$0xf] %v4845_v27  ;;  %v4830_v26 = vmul.f32 %v7748_v42, %v4829_v10 }
 0x42c   :  { %v4831_v30 = vadd.f32 %v7748_v42, %v4830_v26 }
 0x42e   :  { %v4835_v29 = vsel %vm4834_vm6, %v7748_v42, %v4831_v30 }
 0x42f   :  { %v4840_v31 = vsel %vm4837_vm7, %v4839_v28, %v4835_v29 }
 0x430   :  { %v4849_v32 = vpack.c.bf16 %v4840_v31, %v4840_v31 }
 0x432   :  { %4857 = vst [vmem:[#allocation17 + $0x34] sm:$0xf] %v4849_v32 }
 0x433   :  { %4874 = dma.vmem_to_hbm [thread:$0]  %s4867_s7, 896, %s4869_s0, [#allocation4], %s8034_s24, %s8034_s24, %s8035_s27  }
 0x434   :  { %8023 = dma.done.wait [#allocation4], 896  }
 0x435   :  { %8024 = vsyncadd [#allocation4], 4294966400 }
 0x436   :  { %8025 = dma.done.wait [#allocation19], 512  }
 0x437   :  { %8026 = vsyncadd [#allocation19], 4294966784 }
 0x438   :  { %4896 = vsyncpa [#allocation3], 1 }
 0x439   :  { %4897 = vsyncpa [#allocation6], 1 }
 0x43a   :  { %4898 = vsyncpa [#allocation9], 1 }
 0x43b   :  { %4899 = vsyncpa [#allocation12], 1 }
 0x43c   :  { %4900 = vsyncpa [#allocation15], 1 }
 0x43d   :  { %4901 = vsyncpa [#allocation4], 1 }
 0x43e   :  { %4902 = vsyncpa [#allocation19], 1 }

</bundles_post_ra>
